<compile_context>
chip_gen: v6e
topology: v6e:2x2x1
jax: 0.10.0
libtpu: 0.0.40
codegen_flags: <defaults>
</compile_context>

<pallas_src>
import functools

import jax
import jax.numpy as jnp
from jax import lax
from jax.experimental import pallas as pl
from jax.experimental.pallas import tpu as pltpu


# --------------------------- fused forward kernel --------------------------- #
def fused_kernel(ids_ref, wfused_ref, whh_ref, bias_ref, wfc_ref, bfc_ref,
                 out_ref, hs_ref, *, batch_pad):
    # ids_ref   : (T*Bp, 1) int32, time-major, batch padded to Bp=8
    # wfused_ref: (vocab, 4H)   = embedding @ W_ih^T, gate order (i, f, o, g)
    # whh_ref   : (H, 4H)       gate order (i, f, o, g)
    # bias_ref  : (1, 4H)       b_ih + b_hh, gate order (i, f, o, g)
    # wfc_ref   : (H, V)        bfc_ref : (1, V)
    # out_ref   : (T*Bp, V)     time-major logits
    # hs_ref    : (T*Bp, H)     VMEM scratch for per-step hidden states
    vocab = wfused_ref.shape[0]
    H = whh_ref.shape[0]
    TB = ids_ref.shape[0]
    Bp = batch_pad
    T = TB // Bp

    # ---- Embedding + input projection in ONE matmul (exact row selection). ----
    ids = ids_ref[...]                                              # (TB, 1) int32
    one_hot = (ids == lax.broadcasted_iota(jnp.int32, (TB, vocab), 1)
               ).astype(jnp.float32)                                # (TB, vocab)
    gates_x = jnp.dot(one_hot, wfused_ref[...],
                      preferred_element_type=jnp.float32) + bias_ref[...]  # (TB, 4H)

    whh = whh_ref[...]
    h = jnp.zeros((Bp, H), jnp.float32)
    c = jnp.zeros((Bp, H), jnp.float32)

    # Fully unrolled recurrence (T small & static).  Only h @ W_hh and the gate
    # nonlinearities sit on the serial critical path.
    for t in range(T):
        g = gates_x[t * Bp:(t + 1) * Bp, :] + jnp.dot(
            h, whh, preferred_element_type=jnp.float32)             # (Bp, 4H)
        sig = jax.nn.sigmoid(g[:, :3 * H])                          # i | f | o
        i_g = sig[:, 0 * H:1 * H]
        f_g = sig[:, 1 * H:2 * H]
        o_g = sig[:, 2 * H:3 * H]
        g_g = jnp.tanh(g[:, 3 * H:4 * H])                           # g
        c = f_g * c + i_g * g_g
        h = o_g * jnp.tanh(c)
        hs_ref[t * Bp:(t + 1) * Bp, :] = h                          # aligned 8-row store

    # ---- Single batched FC over all timesteps: (T*Bp, H) @ (H, V) + bias. ----
    out_ref[...] = (jnp.dot(hs_ref[...], wfc_ref[...],
                            preferred_element_type=jnp.float32) + bfc_ref[...])


def fused_forward(ids_tm, w_fused, w_hh_t, lstm_bias, w_fc_t, b_fc, *, batch_pad):
    TB = ids_tm.shape[0]
    H = w_hh_t.shape[0]
    V = w_fc_t.shape[1]
    vmem_spec = pl.BlockSpec(memory_space=pltpu.MemorySpace.VMEM)
    return pl.pallas_call(
        functools.partial(fused_kernel, batch_pad=batch_pad),
        out_shape=jax.ShapeDtypeStruct((TB, V), jnp.float32),
        in_specs=[vmem_spec] * 6,
        out_specs=vmem_spec,
        scratch_shapes=[pltpu.VMEM((TB, H), jnp.float32)],
        compiler_params=pltpu.CompilerParams(vmem_limit_bytes=32 * 1024 * 1024),
    )(ids_tm, w_fused, w_hh_t, lstm_bias, w_fc_t, b_fc)


# --------------------------- full forward pass ------------------------------ #
@jax.jit
def simple_response_model(input_ids, params):
    B, T = input_ids.shape
    V = params["w_fc_t"].shape[1]
    Bp = 8  # pad batch/sublane dim to a full vreg sublane group

    ids_pad = jnp.zeros((Bp, T), jnp.int32).at[:B].set(input_ids.astype(jnp.int32))
    ids_tm = jnp.transpose(ids_pad).reshape(T * Bp, 1)      # row r = t*Bp + b

    out_tm = fused_forward(
        ids_tm,
        params["w_fused"], params["w_hh_perm_t"], params["lstm_bias_perm"],
        params["w_fc_t"], params["b_fc"],
        batch_pad=Bp,
    )                                                        # (T*Bp, V)
    # Tiny (16 KiB) wrapper transpose + drop padded batch rows.
    return out_tm.reshape(T, Bp, V).transpose(1, 0, 2)[:B]   # (B, T, V)

    # TODO(synk): for production sizes (large vocab / B*T) tile the FC and the
    # fused embedding table over a grid (v7x has only 64 MiB VMEM) and consider
    # bf16 weights; on v7x also shard a leading batch grid axis with
    # dimension_semantics=("parallel", ...) to use both TensorCores.


# --------------------------- pure-JAX reference ----------------------------- #
def reference_model(input_ids, params):
    # PyTorch-faithful LSTM with original (i, f, g, o) gate order.
    H = params["w_hh_t"].shape[0]
    x = params["embedding"][input_ids]                       # (B, T, E)

    def step(carry, x_t):
        h, c = carry
        gates = (jnp.dot(x_t, params["w_ih_t"], precision=lax.Precision.HIGHEST)
                 + jnp.dot(h, params["w_hh_t"], precision=lax.Precision.HIGHEST)
                 + params["lstm_bias"][0])
        i = jax.nn.sigmoid(gates[:, 0 * H:1 * H])
        f = jax.nn.sigmoid(gates[:, 1 * H:2 * H])
        g = jnp.tanh(gates[:, 2 * H:3 * H])
        o = jax.nn.sigmoid(gates[:, 3 * H:4 * H])
        c = f * c + i * g
        h = o * jnp.tanh(c)
        return (h, c), h

    B = x.shape[0]
    init = (jnp.zeros((B, H), jnp.float32), jnp.zeros((B, H), jnp.float32))
    _, hs = lax.scan(step, init, jnp.transpose(x, (1, 0, 2)))
    h_bth = jnp.transpose(hs, (1, 0, 2))
    return (jnp.dot(h_bth, params["w_fc_t"], precision=lax.Precision.HIGHEST)
            + params["b_fc"][0])


# --------------------------------- main -------------------------------------- #
if __name__ == "__main__":
    vocab_size = 128
    embedding_dim = 128
    hidden_dim = 256
    B, T = 2, 8
    H = hidden_dim

    key = jax.random.PRNGKey(0)
    k_emb, k_wih, k_whh, k_bih, k_bhh, k_wfc, k_bfc, k_ids = jax.random.split(key, 8)
    scale = 1.0 / jnp.sqrt(hidden_dim)

    # PyTorch-layout parameters.
    embedding = jax.random.normal(k_emb, (vocab_size, embedding_dim), jnp.float32)
    w_ih = jax.random.uniform(k_wih, (4 * H, embedding_dim), jnp.float32, -scale, scale)
    w_hh = jax.random.uniform(k_whh, (4 * H, hidden_dim), jnp.float32, -scale, scale)
    b_ih = jax.random.uniform(k_bih, (4 * H,), jnp.float32, -scale, scale)
    b_hh = jax.random.uniform(k_bhh, (4 * H,), jnp.float32, -scale, scale)
    w_fc = jax.random.uniform(k_wfc, (vocab_size, hidden_dim), jnp.float32, -scale, scale)
    b_fc = jax.random.uniform(k_bfc, (vocab_size,), jnp.float32, -scale, scale)

    w_ih_t = w_ih.T                      # (E, 4H), gate order (i, f, g, o)
    w_hh_t = w_hh.T                      # (H, 4H)
    lstm_bias = (b_ih + b_hh)[None, :]   # (1, 4H)

    def permute_gates(w4h):
        # Columns (i, f, g, o) -> (i, f, o, g): sigmoid gates contiguous.
        return jnp.concatenate(
            [w4h[..., :2 * H], w4h[..., 3 * H:4 * H], w4h[..., 2 * H:3 * H]], axis=-1)

    params = {
        # Kernel parameters (gate order i, f, o, g; embedding folded into W_ih).
        "w_fused": jnp.dot(embedding, permute_gates(w_ih_t),
                           precision=lax.Precision.HIGHEST),       # (vocab, 4H)
        "w_hh_perm_t": permute_gates(w_hh_t),                       # (H, 4H)
        "lstm_bias_perm": permute_gates(lstm_bias),                 # (1, 4H)
        "w_fc_t": w_fc.T,                                           # (H, V)
        "b_fc": b_fc[None, :],                                      # (1, V)
        # Reference parameters (original PyTorch layout).
        "embedding": embedding,
        "w_ih_t": w_ih_t,
        "w_hh_t": w_hh_t,
        "lstm_bias": lstm_bias,
    }

    input_ids = jax.random.randint(k_ids, (B, T), 0, vocab_size, dtype=jnp.int32)

    out = simple_response_model(input_ids, params)
    out = jax.block_until_ready(out)

    ref = reference_model(input_ids, params)
    assert out.shape == (B, T, vocab_size), out.shape
    max_err = float(jnp.abs(out - ref).max())
    assert jnp.allclose(out, ref, atol=2e-3, rtol=2e-3), max_err

    print("KERNEL_OK")
</pallas_src>

<mosaic_0001>
module attributes {stable_mosaic.version = 11 : i64} {
  func.func @fused_kernel(%arg0: memref<64x1xi32, #tpu.memory_space<vmem>>, %arg1: memref<128x1024xf32, #tpu.memory_space<vmem>>, %arg2: memref<256x1024xf32, #tpu.memory_space<vmem>>, %arg3: memref<1x1024xf32, #tpu.memory_space<vmem>>, %arg4: memref<256x128xf32, #tpu.memory_space<vmem>>, %arg5: memref<1x128xf32, #tpu.memory_space<vmem>>, %arg6: memref<64x128xf32, #tpu.memory_space<vmem>>, %arg7: memref<64x256xf32, #tpu.memory_space<vmem>>) attributes {dimension_semantics = [], scalar_prefetch = 0 : i64, scratch_operands = 1 : i64, tpu.core_type = #tpu.core_type<tc>} {
    %c0 = arith.constant 0 : index
    %c0_0 = arith.constant 0 : index
    %0 = vector.load %arg0[%c0, %c0_0] : memref<64x1xi32, #tpu.memory_space<vmem>>, vector<64x1xi32>
    %1 = tpu.iota {dimensions = array<i32: 1>} : vector<64x128xi32>
    %2 = vector.broadcast %0 : vector<64x1xi32> to vector<64x128xi32>
    %3 = arith.cmpi eq, %2, %1 : vector<64x128xi32>
    %4 = arith.extui %3 : vector<64x128xi1> to vector<64x128xi32>
    %5 = arith.sitofp %4 : vector<64x128xi32> to vector<64x128xf32>
    %c0_1 = arith.constant 0 : index
    %c0_2 = arith.constant 0 : index
    %6 = vector.load %arg1[%c0_1, %c0_2] : memref<128x1024xf32, #tpu.memory_space<vmem>>, vector<128x1024xf32>
    %cst = arith.constant dense<0.000000e+00> : vector<64x1024xf32>
    %7 = tpu.matmul %5, %6, %cst {dimension_numbers = #tpu.dot_dimension_numbers<[1], [0], [0], [1], [0, 0, 1, 1], [], []>} : vector<64x128xf32>, vector<128x1024xf32>, vector<64x1024xf32> -> vector<64x1024xf32>
    %c0_3 = arith.constant 0 : index
    %c0_4 = arith.constant 0 : index
    %8 = vector.load %arg3[%c0_3, %c0_4] : memref<1x1024xf32, #tpu.memory_space<vmem>>, vector<1x1024xf32>
    %9 = vector.broadcast %8 : vector<1x1024xf32> to vector<64x1024xf32>
    %10 = arith.addf %7, %9 : vector<64x1024xf32>
    %c0_5 = arith.constant 0 : index
    %c0_6 = arith.constant 0 : index
    %11 = vector.load %arg2[%c0_5, %c0_6] : memref<256x1024xf32, #tpu.memory_space<vmem>>, vector<256x1024xf32>
    %cst_7 = arith.constant 0.000000e+00 : f32
    %12 = vector.broadcast %cst_7 : f32 to vector<8x256xf32>
    %cst_8 = arith.constant 0.000000e+00 : f32
    %13 = vector.broadcast %cst_8 : f32 to vector<8x256xf32>
    %14 = vector.extract_strided_slice %10 {offsets = [0, 0], sizes = [8, 1024], strides = [1, 1]} : vector<64x1024xf32> to vector<8x1024xf32>
    %cst_9 = arith.constant dense<0.000000e+00> : vector<8x1024xf32>
    %15 = tpu.matmul %12, %11, %cst_9 {dimension_numbers = #tpu.dot_dimension_numbers<[1], [0], [0], [1], [0, 0, 1, 1], [], []>} : vector<8x256xf32>, vector<256x1024xf32>, vector<8x1024xf32> -> vector<8x1024xf32>
    %16 = arith.addf %14, %15 : vector<8x1024xf32>
    %17 = vector.extract_strided_slice %16 {offsets = [0, 0], sizes = [8, 768], strides = [1, 1]} : vector<8x1024xf32> to vector<8x768xf32>
    %18 = arith.negf %17 : vector<8x768xf32>
    %19 = math.exp %18 : vector<8x768xf32>
    %cst_10 = arith.constant 1.000000e+00 : f32
    %20 = vector.broadcast %cst_10 : f32 to vector<8x768xf32>
    %21 = arith.addf %20, %19 : vector<8x768xf32>
    %22 = arith.divf %20, %21 : vector<8x768xf32>
    %23 = vector.extract_strided_slice %22 {offsets = [0, 0], sizes = [8, 256], strides = [1, 1]} : vector<8x768xf32> to vector<8x256xf32>
    %24 = vector.extract_strided_slice %22 {offsets = [0, 256], sizes = [8, 256], strides = [1, 1]} : vector<8x768xf32> to vector<8x256xf32>
    %25 = vector.extract_strided_slice %22 {offsets = [0, 512], sizes = [8, 256], strides = [1, 1]} : vector<8x768xf32> to vector<8x256xf32>
    %26 = vector.extract_strided_slice %16 {offsets = [0, 768], sizes = [8, 256], strides = [1, 1]} : vector<8x1024xf32> to vector<8x256xf32>
    %27 = math.tanh %26 : vector<8x256xf32>
    %28 = arith.mulf %24, %13 : vector<8x256xf32>
    %29 = arith.mulf %23, %27 : vector<8x256xf32>
    %30 = arith.addf %28, %29 : vector<8x256xf32>
    %31 = math.tanh %30 : vector<8x256xf32>
    %32 = arith.mulf %25, %31 : vector<8x256xf32>
    %c0_11 = arith.constant 0 : index
    %c0_12 = arith.constant 0 : index
    %33 = vector.load %arg7[%c0_11, %c0_12] : memref<64x256xf32, #tpu.memory_space<vmem>>, vector<8x256xf32>
    tpu.vector_store %arg7[%c0_11, %c0_12], %32 {strides = array<i32>} : memref<64x256xf32, #tpu.memory_space<vmem>>, vector<8x256xf32>,
    %34 = vector.extract_strided_slice %10 {offsets = [8, 0], sizes = [8, 1024], strides = [1, 1]} : vector<64x1024xf32> to vector<8x1024xf32>
    %cst_13 = arith.constant dense<0.000000e+00> : vector<8x1024xf32>
    %35 = tpu.matmul %32, %11, %cst_13 {dimension_numbers = #tpu.dot_dimension_numbers<[1], [0], [0], [1], [0, 0, 1, 1], [], []>} : vector<8x256xf32>, vector<256x1024xf32>, vector<8x1024xf32> -> vector<8x1024xf32>
    %36 = arith.addf %34, %35 : vector<8x1024xf32>
    %37 = vector.extract_strided_slice %36 {offsets = [0, 0], sizes = [8, 768], strides = [1, 1]} : vector<8x1024xf32> to vector<8x768xf32>
    %38 = arith.negf %37 : vector<8x768xf32>
    %39 = math.exp %38 : vector<8x768xf32>
    %cst_14 = arith.constant 1.000000e+00 : f32
    %40 = vector.broadcast %cst_14 : f32 to vector<8x768xf32>
    %41 = arith.addf %40, %39 : vector<8x768xf32>
    %42 = arith.divf %40, %41 : vector<8x768xf32>
    %43 = vector.extract_strided_slice %42 {offsets = [0, 0], sizes = [8, 256], strides = [1, 1]} : vector<8x768xf32> to vector<8x256xf32>
    %44 = vector.extract_strided_slice %42 {offsets = [0, 256], sizes = [8, 256], strides = [1, 1]} : vector<8x768xf32> to vector<8x256xf32>
    %45 = vector.extract_strided_slice %42 {offsets = [0, 512], sizes = [8, 256], strides = [1, 1]} : vector<8x768xf32> to vector<8x256xf32>
    %46 = vector.extract_strided_slice %36 {offsets = [0, 768], sizes = [8, 256], strides = [1, 1]} : vector<8x1024xf32> to vector<8x256xf32>
    %47 = math.tanh %46 : vector<8x256xf32>
    %48 = arith.mulf %44, %30 : vector<8x256xf32>
    %49 = arith.mulf %43, %47 : vector<8x256xf32>
    %50 = arith.addf %48, %49 : vector<8x256xf32>
    %51 = math.tanh %50 : vector<8x256xf32>
    %52 = arith.mulf %45, %51 : vector<8x256xf32>
    %c8 = arith.constant 8 : index
    %c0_15 = arith.constant 0 : index
    %53 = vector.load %arg7[%c8, %c0_15] : memref<64x256xf32, #tpu.memory_space<vmem>>, vector<8x256xf32>
    tpu.vector_store %arg7[%c8, %c0_15], %52 {strides = array<i32>} : memref<64x256xf32, #tpu.memory_space<vmem>>, vector<8x256xf32>,
    %54 = vector.extract_strided_slice %10 {offsets = [16, 0], sizes = [8, 1024], strides = [1, 1]} : vector<64x1024xf32> to vector<8x1024xf32>
    %cst_16 = arith.constant dense<0.000000e+00> : vector<8x1024xf32>
    %55 = tpu.matmul %52, %11, %cst_16 {dimension_numbers = #tpu.dot_dimension_numbers<[1], [0], [0], [1], [0, 0, 1, 1], [], []>} : vector<8x256xf32>, vector<256x1024xf32>, vector<8x1024xf32> -> vector<8x1024xf32>
    %56 = arith.addf %54, %55 : vector<8x1024xf32>
    %57 = vector.extract_strided_slice %56 {offsets = [0, 0], sizes = [8, 768], strides = [1, 1]} : vector<8x1024xf32> to vector<8x768xf32>
    %58 = arith.negf %57 : vector<8x768xf32>
    %59 = math.exp %58 : vector<8x768xf32>
    %cst_17 = arith.constant 1.000000e+00 : f32
    %60 = vector.broadcast %cst_17 : f32 to vector<8x768xf32>
    %61 = arith.addf %60, %59 : vector<8x768xf32>
    %62 = arith.divf %60, %61 : vector<8x768xf32>
    %63 = vector.extract_strided_slice %62 {offsets = [0, 0], sizes = [8, 256], strides = [1, 1]} : vector<8x768xf32> to vector<8x256xf32>
    %64 = vector.extract_strided_slice %62 {offsets = [0, 256], sizes = [8, 256], strides = [1, 1]} : vector<8x768xf32> to vector<8x256xf32>
    %65 = vector.extract_strided_slice %62 {offsets = [0, 512], sizes = [8, 256], strides = [1, 1]} : vector<8x768xf32> to vector<8x256xf32>
    %66 = vector.extract_strided_slice %56 {offsets = [0, 768], sizes = [8, 256], strides = [1, 1]} : vector<8x1024xf32> to vector<8x256xf32>
    %67 = math.tanh %66 : vector<8x256xf32>
    %68 = arith.mulf %64, %50 : vector<8x256xf32>
    %69 = arith.mulf %63, %67 : vector<8x256xf32>
    %70 = arith.addf %68, %69 : vector<8x256xf32>
    %71 = math.tanh %70 : vector<8x256xf32>
    %72 = arith.mulf %65, %71 : vector<8x256xf32>
    %c16 = arith.constant 16 : index
    %c0_18 = arith.constant 0 : index
    %73 = vector.load %arg7[%c16, %c0_18] : memref<64x256xf32, #tpu.memory_space<vmem>>, vector<8x256xf32>
    tpu.vector_store %arg7[%c16, %c0_18], %72 {strides = array<i32>} : memref<64x256xf32, #tpu.memory_space<vmem>>, vector<8x256xf32>,
    %74 = vector.extract_strided_slice %10 {offsets = [24, 0], sizes = [8, 1024], strides = [1, 1]} : vector<64x1024xf32> to vector<8x1024xf32>
    %cst_19 = arith.constant dense<0.000000e+00> : vector<8x1024xf32>
    %75 = tpu.matmul %72, %11, %cst_19 {dimension_numbers = #tpu.dot_dimension_numbers<[1], [0], [0], [1], [0, 0, 1, 1], [], []>} : vector<8x256xf32>, vector<256x1024xf32>, vector<8x1024xf32> -> vector<8x1024xf32>
    %76 = arith.addf %74, %75 : vector<8x1024xf32>
    %77 = vector.extract_strided_slice %76 {offsets = [0, 0], sizes = [8, 768], strides = [1, 1]} : vector<8x1024xf32> to vector<8x768xf32>
    %78 = arith.negf %77 : vector<8x768xf32>
    %79 = math.exp %78 : vector<8x768xf32>
    %cst_20 = arith.constant 1.000000e+00 : f32
    %80 = vector.broadcast %cst_20 : f32 to vector<8x768xf32>
    %81 = arith.addf %80, %79 : vector<8x768xf32>
    %82 = arith.divf %80, %81 : vector<8x768xf32>
    %83 = vector.extract_strided_slice %82 {offsets = [0, 0], sizes = [8, 256], strides = [1, 1]} : vector<8x768xf32> to vector<8x256xf32>
    %84 = vector.extract_strided_slice %82 {offsets = [0, 256], sizes = [8, 256], strides = [1, 1]} : vector<8x768xf32> to vector<8x256xf32>
    %85 = vector.extract_strided_slice %82 {offsets = [0, 512], sizes = [8, 256], strides = [1, 1]} : vector<8x768xf32> to vector<8x256xf32>
    %86 = vector.extract_strided_slice %76 {offsets = [0, 768], sizes = [8, 256], strides = [1, 1]} : vector<8x1024xf32> to vector<8x256xf32>
    %87 = math.tanh %86 : vector<8x256xf32>
    %88 = arith.mulf %84, %70 : vector<8x256xf32>
    %89 = arith.mulf %83, %87 : vector<8x256xf32>
    %90 = arith.addf %88, %89 : vector<8x256xf32>
    %91 = math.tanh %90 : vector<8x256xf32>
    %92 = arith.mulf %85, %91 : vector<8x256xf32>
    %c24 = arith.constant 24 : index
    %c0_21 = arith.constant 0 : index
    %93 = vector.load %arg7[%c24, %c0_21] : memref<64x256xf32, #tpu.memory_space<vmem>>, vector<8x256xf32>
    tpu.vector_store %arg7[%c24, %c0_21], %92 {strides = array<i32>} : memref<64x256xf32, #tpu.memory_space<vmem>>, vector<8x256xf32>,
    %94 = vector.extract_strided_slice %10 {offsets = [32, 0], sizes = [8, 1024], strides = [1, 1]} : vector<64x1024xf32> to vector<8x1024xf32>
    %cst_22 = arith.constant dense<0.000000e+00> : vector<8x1024xf32>
    %95 = tpu.matmul %92, %11, %cst_22 {dimension_numbers = #tpu.dot_dimension_numbers<[1], [0], [0], [1], [0, 0, 1, 1], [], []>} : vector<8x256xf32>, vector<256x1024xf32>, vector<8x1024xf32> -> vector<8x1024xf32>
    %96 = arith.addf %94, %95 : vector<8x1024xf32>
    %97 = vector.extract_strided_slice %96 {offsets = [0, 0], sizes = [8, 768], strides = [1, 1]} : vector<8x1024xf32> to vector<8x768xf32>
    %98 = arith.negf %97 : vector<8x768xf32>
    %99 = math.exp %98 : vector<8x768xf32>
    %cst_23 = arith.constant 1.000000e+00 : f32
    %100 = vector.broadcast %cst_23 : f32 to vector<8x768xf32>
    %101 = arith.addf %100, %99 : vector<8x768xf32>
    %102 = arith.divf %100, %101 : vector<8x768xf32>
    %103 = vector.extract_strided_slice %102 {offsets = [0, 0], sizes = [8, 256], strides = [1, 1]} : vector<8x768xf32> to vector<8x256xf32>
    %104 = vector.extract_strided_slice %102 {offsets = [0, 256], sizes = [8, 256], strides = [1, 1]} : vector<8x768xf32> to vector<8x256xf32>
    %105 = vector.extract_strided_slice %102 {offsets = [0, 512], sizes = [8, 256], strides = [1, 1]} : vector<8x768xf32> to vector<8x256xf32>
    %106 = vector.extract_strided_slice %96 {offsets = [0, 768], sizes = [8, 256], strides = [1, 1]} : vector<8x1024xf32> to vector<8x256xf32>
    %107 = math.tanh %106 : vector<8x256xf32>
    %108 = arith.mulf %104, %90 : vector<8x256xf32>
    %109 = arith.mulf %103, %107 : vector<8x256xf32>
    %110 = arith.addf %108, %109 : vector<8x256xf32>
    %111 = math.tanh %110 : vector<8x256xf32>
    %112 = arith.mulf %105, %111 : vector<8x256xf32>
    %c32 = arith.constant 32 : index
    %c0_24 = arith.constant 0 : index
    %113 = vector.load %arg7[%c32, %c0_24] : memref<64x256xf32, #tpu.memory_space<vmem>>, vector<8x256xf32>
    tpu.vector_store %arg7[%c32, %c0_24], %112 {strides = array<i32>} : memref<64x256xf32, #tpu.memory_space<vmem>>, vector<8x256xf32>,
    %114 = vector.extract_strided_slice %10 {offsets = [40, 0], sizes = [8, 1024], strides = [1, 1]} : vector<64x1024xf32> to vector<8x1024xf32>
    %cst_25 = arith.constant dense<0.000000e+00> : vector<8x1024xf32>
    %115 = tpu.matmul %112, %11, %cst_25 {dimension_numbers = #tpu.dot_dimension_numbers<[1], [0], [0], [1], [0, 0, 1, 1], [], []>} : vector<8x256xf32>, vector<256x1024xf32>, vector<8x1024xf32> -> vector<8x1024xf32>
    %116 = arith.addf %114, %115 : vector<8x1024xf32>
    %117 = vector.extract_strided_slice %116 {offsets = [0, 0], sizes = [8, 768], strides = [1, 1]} : vector<8x1024xf32> to vector<8x768xf32>
    %118 = arith.negf %117 : vector<8x768xf32>
    %119 = math.exp %118 : vector<8x768xf32>
    %cst_26 = arith.constant 1.000000e+00 : f32
    %120 = vector.broadcast %cst_26 : f32 to vector<8x768xf32>
    %121 = arith.addf %120, %119 : vector<8x768xf32>
    %122 = arith.divf %120, %121 : vector<8x768xf32>
    %123 = vector.extract_strided_slice %122 {offsets = [0, 0], sizes = [8, 256], strides = [1, 1]} : vector<8x768xf32> to vector<8x256xf32>
    %124 = vector.extract_strided_slice %122 {offsets = [0, 256], sizes = [8, 256], strides = [1, 1]} : vector<8x768xf32> to vector<8x256xf32>
    %125 = vector.extract_strided_slice %122 {offsets = [0, 512], sizes = [8, 256], strides = [1, 1]} : vector<8x768xf32> to vector<8x256xf32>
    %126 = vector.extract_strided_slice %116 {offsets = [0, 768], sizes = [8, 256], strides = [1, 1]} : vector<8x1024xf32> to vector<8x256xf32>
    %127 = math.tanh %126 : vector<8x256xf32>
    %128 = arith.mulf %124, %110 : vector<8x256xf32>
    %129 = arith.mulf %123, %127 : vector<8x256xf32>
    %130 = arith.addf %128, %129 : vector<8x256xf32>
    %131 = math.tanh %130 : vector<8x256xf32>
    %132 = arith.mulf %125, %131 : vector<8x256xf32>
    %c40 = arith.constant 40 : index
    %c0_27 = arith.constant 0 : index
    %133 = vector.load %arg7[%c40, %c0_27] : memref<64x256xf32, #tpu.memory_space<vmem>>, vector<8x256xf32>
    tpu.vector_store %arg7[%c40, %c0_27], %132 {strides = array<i32>} : memref<64x256xf32, #tpu.memory_space<vmem>>, vector<8x256xf32>,
    %134 = vector.extract_strided_slice %10 {offsets = [48, 0], sizes = [8, 1024], strides = [1, 1]} : vector<64x1024xf32> to vector<8x1024xf32>
    %cst_28 = arith.constant dense<0.000000e+00> : vector<8x1024xf32>
    %135 = tpu.matmul %132, %11, %cst_28 {dimension_numbers = #tpu.dot_dimension_numbers<[1], [0], [0], [1], [0, 0, 1, 1], [], []>} : vector<8x256xf32>, vector<256x1024xf32>, vector<8x1024xf32> -> vector<8x1024xf32>
    %136 = arith.addf %134, %135 : vector<8x1024xf32>
    %137 = vector.extract_strided_slice %136 {offsets = [0, 0], sizes = [8, 768], strides = [1, 1]} : vector<8x1024xf32> to vector<8x768xf32>
    %138 = arith.negf %137 : vector<8x768xf32>
    %139 = math.exp %138 : vector<8x768xf32>
    %cst_29 = arith.constant 1.000000e+00 : f32
    %140 = vector.broadcast %cst_29 : f32 to vector<8x768xf32>
    %141 = arith.addf %140, %139 : vector<8x768xf32>
    %142 = arith.divf %140, %141 : vector<8x768xf32>
    %143 = vector.extract_strided_slice %142 {offsets = [0, 0], sizes = [8, 256], strides = [1, 1]} : vector<8x768xf32> to vector<8x256xf32>
    %144 = vector.extract_strided_slice %142 {offsets = [0, 256], sizes = [8, 256], strides = [1, 1]} : vector<8x768xf32> to vector<8x256xf32>
    %145 = vector.extract_strided_slice %142 {offsets = [0, 512], sizes = [8, 256], strides = [1, 1]} : vector<8x768xf32> to vector<8x256xf32>
    %146 = vector.extract_strided_slice %136 {offsets = [0, 768], sizes = [8, 256], strides = [1, 1]} : vector<8x1024xf32> to vector<8x256xf32>
    %147 = math.tanh %146 : vector<8x256xf32>
    %148 = arith.mulf %144, %130 : vector<8x256xf32>
    %149 = arith.mulf %143, %147 : vector<8x256xf32>
    %150 = arith.addf %148, %149 : vector<8x256xf32>
    %151 = math.tanh %150 : vector<8x256xf32>
    %152 = arith.mulf %145, %151 : vector<8x256xf32>
    %c48 = arith.constant 48 : index
    %c0_30 = arith.constant 0 : index
    %153 = vector.load %arg7[%c48, %c0_30] : memref<64x256xf32, #tpu.memory_space<vmem>>, vector<8x256xf32>
    tpu.vector_store %arg7[%c48, %c0_30], %152 {strides = array<i32>} : memref<64x256xf32, #tpu.memory_space<vmem>>, vector<8x256xf32>,
    %154 = vector.extract_strided_slice %10 {offsets = [56, 0], sizes = [8, 1024], strides = [1, 1]} : vector<64x1024xf32> to vector<8x1024xf32>
    %cst_31 = arith.constant dense<0.000000e+00> : vector<8x1024xf32>
    %155 = tpu.matmul %152, %11, %cst_31 {dimension_numbers = #tpu.dot_dimension_numbers<[1], [0], [0], [1], [0, 0, 1, 1], [], []>} : vector<8x256xf32>, vector<256x1024xf32>, vector<8x1024xf32> -> vector<8x1024xf32>
    %156 = arith.addf %154, %155 : vector<8x1024xf32>
    %157 = vector.extract_strided_slice %156 {offsets = [0, 0], sizes = [8, 768], strides = [1, 1]} : vector<8x1024xf32> to vector<8x768xf32>
    %158 = arith.negf %157 : vector<8x768xf32>
    %159 = math.exp %158 : vector<8x768xf32>
    %cst_32 = arith.constant 1.000000e+00 : f32
    %160 = vector.broadcast %cst_32 : f32 to vector<8x768xf32>
    %161 = arith.addf %160, %159 : vector<8x768xf32>
    %162 = arith.divf %160, %161 : vector<8x768xf32>
    %163 = vector.extract_strided_slice %162 {offsets = [0, 0], sizes = [8, 256], strides = [1, 1]} : vector<8x768xf32> to vector<8x256xf32>
    %164 = vector.extract_strided_slice %162 {offsets = [0, 256], sizes = [8, 256], strides = [1, 1]} : vector<8x768xf32> to vector<8x256xf32>
    %165 = vector.extract_strided_slice %162 {offsets = [0, 512], sizes = [8, 256], strides = [1, 1]} : vector<8x768xf32> to vector<8x256xf32>
    %166 = vector.extract_strided_slice %156 {offsets = [0, 768], sizes = [8, 256], strides = [1, 1]} : vector<8x1024xf32> to vector<8x256xf32>
    %167 = math.tanh %166 : vector<8x256xf32>
    %168 = arith.mulf %164, %150 : vector<8x256xf32>
    %169 = arith.mulf %163, %167 : vector<8x256xf32>
    %170 = arith.addf %168, %169 : vector<8x256xf32>
    %171 = math.tanh %170 : vector<8x256xf32>
    %172 = arith.mulf %165, %171 : vector<8x256xf32>
    %c56 = arith.constant 56 : index
    %c0_33 = arith.constant 0 : index
    %173 = vector.load %arg7[%c56, %c0_33] : memref<64x256xf32, #tpu.memory_space<vmem>>, vector<8x256xf32>
    tpu.vector_store %arg7[%c56, %c0_33], %172 {strides = array<i32>} : memref<64x256xf32, #tpu.memory_space<vmem>>, vector<8x256xf32>,
    %c0_34 = arith.constant 0 : index
    %c0_35 = arith.constant 0 : index
    %174 = vector.load %arg7[%c0_34, %c0_35] : memref<64x256xf32, #tpu.memory_space<vmem>>, vector<64x256xf32>
    %c0_36 = arith.constant 0 : index
    %c0_37 = arith.constant 0 : index
    %175 = vector.load %arg4[%c0_36, %c0_37] : memref<256x128xf32, #tpu.memory_space<vmem>>, vector<256x128xf32>
    %cst_38 = arith.constant dense<0.000000e+00> : vector<64x128xf32>
    %176 = tpu.matmul %174, %175, %cst_38 {dimension_numbers = #tpu.dot_dimension_numbers<[1], [0], [0], [1], [0, 0, 1, 1], [], []>} : vector<64x256xf32>, vector<256x128xf32>, vector<64x128xf32> -> vector<64x128xf32>
    %c0_39 = arith.constant 0 : index
    %c0_40 = arith.constant 0 : index
    %177 = vector.load %arg5[%c0_39, %c0_40] : memref<1x128xf32, #tpu.memory_space<vmem>>, vector<1x128xf32>
    %178 = vector.broadcast %177 : vector<1x128xf32> to vector<64x128xf32>
    %179 = arith.addf %176, %178 : vector<64x128xf32>
    %c0_41 = arith.constant 0 : index
    %c0_42 = arith.constant 0 : index
    %180 = vector.load %arg6[%c0_41, %c0_42] : memref<64x128xf32, #tpu.memory_space<vmem>>, vector<64x128xf32>
    tpu.vector_store %arg6[%c0_41, %c0_42], %179 {strides = array<i32>} : memref<64x128xf32, #tpu.memory_space<vmem>>, vector<64x128xf32>,
    return
  }
}

</mosaic_0001>

<bundles_post_ra>
// kernel: simple_response_model.1
= control target key start
LH: loop header
LB: loop body
LE: loop exit
PB: predicated region body
PF: predicated region fallthrough
CT: control target
= control target key end

     0   :  { %11 = vsyncpa [#allocation4], 0  ;;  %s9598_s0 = inlined_call_operand.vmem [shape: s32[64,1], index: 0, kind: input, shape index: {}]   ;;  %s9599_s1 = inlined_call_operand.hbm [shape: f32[128,1024], index: 1, kind: input, shape index: {}]   ;;  %s9600_s2 = inlined_call_operand.hbm [shape: f32[256,1024], index: 2, kind: input, shape index: {}]   ;;  %s9601_s3 = inlined_call_operand.vmem [shape: f32[1,1024], index: 3, kind: input, shape index: {}]   ;;  %s9602_s4 = inlined_call_operand.hbm [shape: f32[256,128], index: 4, kind: input, shape index: {}]   ;;  %s9603_s5 = inlined_call_operand.vmem [shape: f32[1,128], index: 5, kind: input, shape index: {}]   ;;  %s9604_s6 = inlined_call_operand.vmem [shape: f32[64,128], index: 6, kind: output, shape index: {}]  }
   0x1   :  { %12 = vsyncpa [#allocation6], 0  ;;  %s5292_s21 = smov [#allocation5]   ;;  %s5293_s23 = smov [#allocation3]  }
   0x2   :  { %s32_s22 = sshll.u32 %s5292_s21, 4  ;;  %s20_s24 = sshll.u32 %s5293_s23, 4  ;;  %s33_s22 = int_to_ptr.vmem [resolvable:$true] %s32_s22  ;;  %s21_s24 = int_to_ptr.vmem [resolvable:$true] %s20_s24 }
   0x3   :  { %s5236_s25 = scalar_lea.vmem %s33_s22, 32768  ;;  %p5241_p1 = scmp.lt.s32.totalorder %s33_s22, %s33_s22 }
   0x4   :  { %p5237_p0 = scmp.ne.s32.totalorder %s33_s22, %s5236_s25  ;;  %p5242_p2 = scmp.lt.s32.totalorder %s5236_s25, %s5236_s25 }
   0x6   :  { %p5243_p3 = por %p5242_p2, %p5241_p1 }
   0x8   :  { %p5244_p4 = pnand %p5243_p3, %p5237_p0 }
   0xa   :  { %5247 = shalt.err (!%p5244_p4)
}
   0xb   :  { %s5294_s26 = smov 1024   ;;  %s5295_s27 = smov 64  }
   0xc   :  { %38 = dma.hbm_to_vmem [thread:$0]  %s9600_s2, 32768, %s33_s22, [#allocation6], %s5294_s26, %s5294_s26, %s5295_s27  }
   0xd   :  { %s5256_s30 = scalar_lea.vmem %s21_s24, 16384  ;;  %p5261_p6 = scmp.lt.s32.totalorder %s21_s24, %s21_s24 }
   0xe   :  { %p5257_p5 = scmp.ne.s32.totalorder %s21_s24, %s5256_s30  ;;  %p5262_p7 = scmp.lt.s32.totalorder %s5256_s30, %s5256_s30 }
  0x10   :  { %p5263_p8 = por %p5262_p7, %p5261_p6 }
  0x12   :  { %p5264_p9 = pnand %p5263_p8, %p5257_p5 }
  0x14   :  { %5267 = shalt.err (!%p5264_p9)
}
  0x15   :  { %26 = dma.hbm_to_vmem [thread:$0]  %s9599_s1, 16384, %s21_s24, [#allocation4], %s5294_s26, %s5294_s26, %s5295_s27  }
  0x16   :  { %s5296_s9 = smov [#allocation7]  }
  0x17   :  { %s46_s10 = sshll.u32 %s5296_s9, 4  ;;  %s47_s10 = int_to_ptr.vmem [resolvable:$true] %s46_s10 }
  0x18   :  { %s5276_s11 = scalar_lea.vmem %s47_s10, 4096  ;;  %p5281_p11 = scmp.lt.s32.totalorder %s47_s10, %s47_s10 }
  0x19   :  { %p5277_p10 = scmp.ne.s32.totalorder %s47_s10, %s5276_s11  ;;  %p5282_p12 = scmp.lt.s32.totalorder %s5276_s11, %s5276_s11 }
  0x1b   :  { %p5283_p13 = por %p5282_p12, %p5281_p11 }
  0x1d   :  { %p5284_p0 = pnand %p5283_p13, %p5277_p10 }
  0x1f   :  { %5287 = shalt.err (!%p5284_p0)
}
  0x20   :  { %s5297_s2 = smov 128   ;;  %s5298_s12 = smov 8  }
  0x21   :  { %52 = dma.hbm_to_vmem [thread:$0]  %s9602_s4, 4096, %s47_s10, [#allocation6], %s5297_s2, %s5297_s2, %s5298_s12  }
  0x22   :  { %5288 = dma.done.wait [#allocation4], 16384  }
  0x23   :  { %5289 = vsyncadd [#allocation4], 4294950912 }
  0x24   :  { %5290 = dma.done.wait [#allocation6], 36864  }
  0x25   :  { %5291 = vsyncadd [#allocation6], 4294930432  ;;  %v5299_v0 = vmov 0   ;;  %v9608_v1 = vmov 0.0   ;;  %v66_v2 = vld [vmem:[%s9598_s0 + $0x10] sm:$0xff]  ;;  %v64_v3 = vld [vmem:[%s9598_s0] sm:$0xff] }
  0x26   :  { %4066 = vset.pattern.permute.xlu1 %v5299_v0  ;;  %4065 = vset.pattern.permute.xlu0 %v5299_v0  ;;  %v67_v4 = vld [vmem:[%s9598_s0 + $0x18] sm:$0xff]  ;;  %v65_v5 = vld [vmem:[%s9598_s0 + $0x8] sm:$0xff]  ;;  %v242_v8 = vld [vmem:[#allocation3 + $0x3c0] sm:$0xff] }
  0x27   :  { %356 = vmatprep.mubr.f32.mxu1 %v9608_v1  ;;  %582 = vmatprep.mubr.f32.mxu0 %v9608_v1  ;;  %v243_v6 = vld [vmem:[#allocation3 + $0x3c8] sm:$0xff]  ;;  %v246_v9 = vld [vmem:[#allocation3 + $0x3e0] sm:$0xff]  ;;  %v71_v23 = vld [vmem:[%s9598_s0 + $0x38] sm:$0xff] }
  0x28   :  { %81 = vperm.xlu1 %4066, %v66_v2   ;;  %75 = vperm.xlu0 %4065, %v64_v3   ;;  %v247_v7 = vld [vmem:[#allocation3 + $0x3e8] sm:$0xff]  ;;  %v234_v12 = vld [vmem:[#allocation3 + $0x380] sm:$0xff]  ;;  %v70_v24 = vld [vmem:[%s9598_s0 + $0x30] sm:$0xff] }
  0x29   :  { %292 = vmatprep.subr.mxu1 %v243_v6  ;;  %518 = vmatprep.subr.mxu0 %v247_v7  ;;  %v235_v10 = vld [vmem:[#allocation3 + $0x388] sm:$0xff]  ;;  %v238_v13 = vld [vmem:[#allocation3 + $0x3a0] sm:$0xff] }
  0x2a   :  { %293 = vmatpush1.msra.mxu1 %v242_v8  ;;  %v239_v11 = vld [vmem:[#allocation3 + $0x3a8] sm:$0xff]  ;;  %v68_v16 = vld [vmem:[%s9598_s0 + $0x20] sm:$0xff]  ;;  %519 = vmatpush1.msra.mxu0 %v246_v9 }
  0x2b   :  { %v227_v14 = vld [vmem:[#allocation3 + $0x348] sm:$0xff]  ;;  %294 = vmatprep.subr.mxu1 %v235_v10  ;;  %520 = vmatprep.subr.mxu0 %v239_v11  ;;  %v226_v18 = vld [vmem:[#allocation3 + $0x340] sm:$0xff]  ;;  %v245_v11 = vld [vmem:[#allocation3 + $0x3d8] sm:$0xff] }
  0x2c   :  { %84 = vperm.xlu1 %4066, %v67_v4   ;;  %78 = vperm.xlu0 %4065, %v65_v5   ;;  %v69_v15 = vld [vmem:[%s9598_s0 + $0x28] sm:$0xff]  ;;  %v230_v19 = vld [vmem:[#allocation3 + $0x360] sm:$0xff] }
  0x2d   :  { %295 = vmatpush1.msra.mxu1 %v234_v12  ;;  %v231_v17 = vld [vmem:[#allocation3 + $0x368] sm:$0xff]  ;;  %521 = vmatpush1.msra.mxu0 %v238_v13  ;;  %v218_v22 = vld [vmem:[#allocation3 + $0x300] sm:$0xff]  ;;  %v9605_v13 = vlaneseq }
  0x2e   :  { %296 = vmatprep.subr.mxu1 %v227_v14  ;;  %v219_v20 = vld [vmem:[#allocation3 + $0x308] sm:$0xff]  ;;  %522 = vmatprep.subr.mxu0 %v231_v17  ;;  %v222_v25 = vld [vmem:[#allocation3 + $0x320] sm:$0xff] }
  0x2f   :  { %v223_v21 = vld [vmem:[#allocation3 + $0x328] sm:$0xff]  ;;  %297 = vmatpush1.msra.mxu1 %v226_v18  ;;  %523 = vmatpush1.msra.mxu0 %v230_v19  ;;  %v210_v28 = vld [vmem:[#allocation3 + $0x2c0] sm:$0xff]  ;;  %v5373_v14 = vand.u32 127, %v9605_v13  ;;  %v237_v18 = vld [vmem:[#allocation3 + $0x398] sm:$0xff] }
  0x30   :  { %90 = vperm.xlu1 %4066, %v69_v15   ;;  %87 = vperm.xlu0 %4065, %v68_v16   ;;  %v211_v26 = vld [vmem:[#allocation3 + $0x2c8] sm:$0xff]  ;;  %v214_v29 = vld [vmem:[#allocation3 + $0x2e0] sm:$0xff]  ;;  %v244_v16 = vld [vmem:[#allocation3 + $0x3d0] sm:$0xff] }
  0x31   :  { %298 = vmatprep.subr.mxu1 %v219_v20  ;;  %524 = vmatprep.subr.mxu0 %v223_v21  ;;  %v215_v27 = vld [vmem:[#allocation3 + $0x2e8] sm:$0xff]  ;;  %v202_v32 = vld [vmem:[#allocation3 + $0x280] sm:$0xff]  ;;  %v5301_v20 = vmov 1.0   ;;  %v236_v21 = vld [vmem:[#allocation3 + $0x390] sm:$0xff] }
  0x32   :  { %299 = vmatpush1.msra.mxu1 %v218_v22  ;;  %v203_v30 = vld [vmem:[#allocation3 + $0x288] sm:$0xff]  ;;  %525 = vmatpush1.msra.mxu0 %v222_v25  ;;  %v206_v33 = vld [vmem:[#allocation3 + $0x2a0] sm:$0xff] }
  0x33   :  { %300 = vmatprep.subr.mxu1 %v211_v26  ;;  %v207_v31 = vld [vmem:[#allocation3 + $0x2a8] sm:$0xff]  ;;  %526 = vmatprep.subr.mxu0 %v215_v27  ;;  %v194_v36 = vld [vmem:[#allocation3 + $0x240] sm:$0xff]  ;;  %v228_v26 = vld [vmem:[#allocation3 + $0x350] sm:$0xff] }
  0x34   :  { %96 = vperm.xlu1 %4066, %v71_v23   ;;  %93 = vperm.xlu0 %4065, %v70_v24   ;;  %v195_v34 = vld [vmem:[#allocation3 + $0x248] sm:$0xff]  ;;  %v198_v37 = vld [vmem:[#allocation3 + $0x260] sm:$0xff]  ;;  %v229_v23 = vld [vmem:[#allocation3 + $0x358] sm:$0xff] }
  0x35   :  { %301 = vmatpush1.msra.mxu1 %v210_v28  ;;  %527 = vmatpush1.msra.mxu0 %v214_v29  ;;  %v199_v35 = vld [vmem:[#allocation3 + $0x268] sm:$0xff]  ;;  %v186_v40 = vld [vmem:[#allocation3 + $0x200] sm:$0xff]  ;;  %v221_v28 = vld [vmem:[#allocation3 + $0x318] sm:$0xff] }
  0x36   :  { %302 = vmatprep.subr.mxu1 %v203_v30  ;;  %528 = vmatprep.subr.mxu0 %v207_v31  ;;  %v187_v38 = vld [vmem:[#allocation3 + $0x208] sm:$0xff]  ;;  %v190_v41 = vld [vmem:[#allocation3 + $0x220] sm:$0xff]  ;;  %v220_v30 = vld [vmem:[#allocation3 + $0x310] sm:$0xff] }
  0x37   :  { %303 = vmatpush1.msra.mxu1 %v202_v32  ;;  %529 = vmatpush1.msra.mxu0 %v206_v33  ;;  %v191_v39 = vld [vmem:[#allocation3 + $0x228] sm:$0xff]  ;;  %v178_v44 = vld [vmem:[#allocation3 + $0x1c0] sm:$0xff]  ;;  %v213_v32 = vld [vmem:[#allocation3 + $0x2d8] sm:$0xff] }
  0x38   :  { %304 = vmatprep.subr.mxu1 %v195_v34  ;;  %530 = vmatprep.subr.mxu0 %v199_v35  ;;  %v179_v42 = vld [vmem:[#allocation3 + $0x1c8] sm:$0xff]  ;;  %v182_v45 = vld [vmem:[#allocation3 + $0x1e0] sm:$0xff]  ;;  %v212_v35 = vld [vmem:[#allocation3 + $0x2d0] sm:$0xff] }
  0x39   :  { %305 = vmatpush1.msra.mxu1 %v194_v36  ;;  %531 = vmatpush1.msra.mxu0 %v198_v37  ;;  %v183_v43 = vld [vmem:[#allocation3 + $0x1e8] sm:$0xff]  ;;  %v170_v48 = vld [vmem:[#allocation3 + $0x180] sm:$0xff]  ;;  %v205_v37 = vld [vmem:[#allocation3 + $0x298] sm:$0xff] }
  0x3a   :  { %306 = vmatprep.subr.mxu1 %v187_v38  ;;  %532 = vmatprep.subr.mxu0 %v191_v39  ;;  %v171_v46 = vld [vmem:[#allocation3 + $0x188] sm:$0xff]  ;;  %v174_v49 = vld [vmem:[#allocation3 + $0x1a0] sm:$0xff]  ;;  %v204_v39 = vld [vmem:[#allocation3 + $0x290] sm:$0xff] }
  0x3b   :  { %307 = vmatpush1.msra.mxu1 %v186_v40  ;;  %533 = vmatpush1.msra.mxu0 %v190_v41  ;;  %v175_v47 = vld [vmem:[#allocation3 + $0x1a8] sm:$0xff]  ;;  %v162_v52 = vld [vmem:[#allocation3 + $0x140] sm:$0xff]  ;;  %v197_v41 = vld [vmem:[#allocation3 + $0x258] sm:$0xff] }
  0x3c   :  { %308 = vmatprep.subr.mxu1 %v179_v42  ;;  %534 = vmatprep.subr.mxu0 %v183_v43  ;;  %v163_v50 = vld [vmem:[#allocation3 + $0x148] sm:$0xff]  ;;  %v166_v53 = vld [vmem:[#allocation3 + $0x160] sm:$0xff] }
  0x3d   :  { %309 = vmatpush1.msra.mxu1 %v178_v44  ;;  %535 = vmatpush1.msra.mxu0 %v182_v45  ;;  %v167_v51 = vld [vmem:[#allocation3 + $0x168] sm:$0xff]  ;;  %v154_v56 = vld [vmem:[#allocation3 + $0x100] sm:$0xff]  ;;  %v196_v44 = vld [vmem:[#allocation3 + $0x250] sm:$0xff] }
  0x3e   :  { %310 = vmatprep.subr.mxu1 %v171_v46  ;;  %536 = vmatprep.subr.mxu0 %v175_v47  ;;  %v155_v54 = vld [vmem:[#allocation3 + $0x108] sm:$0xff]  ;;  %v158_v57 = vld [vmem:[#allocation3 + $0x120] sm:$0xff]  ;;  %v189_v46 = vld [vmem:[#allocation3 + $0x218] sm:$0xff] }
  0x3f   :  { %311 = vmatpush1.msra.mxu1 %v170_v48  ;;  %537 = vmatpush1.msra.mxu0 %v174_v49  ;;  %v159_v55 = vld [vmem:[#allocation3 + $0x128] sm:$0xff]  ;;  %v146_v60 = vld [vmem:[#allocation3 + $0xc0] sm:$0xff]  ;;  %v188_v48 = vld [vmem:[#allocation3 + $0x210] sm:$0xff] }
  0x40   :  { %312 = vmatprep.subr.mxu1 %v163_v50  ;;  %538 = vmatprep.subr.mxu0 %v167_v51  ;;  %v147_v58 = vld [vmem:[#allocation3 + $0xc8] sm:$0xff]  ;;  %v150_v61 = vld [vmem:[#allocation3 + $0xe0] sm:$0xff]  ;;  %v181_v50 = vld [vmem:[#allocation3 + $0x1d8] sm:$0xff] }
  0x41   :  { %313 = vmatpush1.msra.mxu1 %v162_v52  ;;  %539 = vmatpush1.msra.mxu0 %v166_v53  ;;  %v151_v59 = vld [vmem:[#allocation3 + $0xe8] sm:$0xff]  ;;  %v138_v0 = vld [vmem:[#allocation3 + $0x80] sm:$0xff]  ;;  %v180_v53 = vld [vmem:[#allocation3 + $0x1d0] sm:$0xff] }
  0x42   :  { %314 = vmatprep.subr.mxu1 %v155_v54  ;;  %540 = vmatprep.subr.mxu0 %v159_v55  ;;  %v139_v62 = vld [vmem:[#allocation3 + $0x88] sm:$0xff]  ;;  %v142_v2 = vld [vmem:[#allocation3 + $0xa0] sm:$0xff]  ;;  %v173_v55 = vld [vmem:[#allocation3 + $0x198] sm:$0xff] }
  0x43   :  { %315 = vmatpush1.msra.mxu1 %v154_v56  ;;  %541 = vmatpush1.msra.mxu0 %v158_v57  ;;  %v143_v63 = vld [vmem:[#allocation3 + $0xa8] sm:$0xff]  ;;  %v130_v5 = vld [vmem:[#allocation3 + $0x40] sm:$0xff]  ;;  %v172_v57 = vld [vmem:[#allocation3 + $0x190] sm:$0xff] }
  0x44   :  { %316 = vmatprep.subr.mxu1 %v147_v58  ;;  %542 = vmatprep.subr.mxu0 %v151_v59  ;;  %v131_v3 = vld [vmem:[#allocation3 + $0x48] sm:$0xff]  ;;  %v134_v6 = vld [vmem:[#allocation3 + $0x60] sm:$0xff]  ;;  %v165_v59 = vld [vmem:[#allocation3 + $0x158] sm:$0xff] }
  0x45   :  { %317 = vmatpush1.msra.mxu1 %v146_v60  ;;  %543 = vmatpush1.msra.mxu0 %v150_v61  ;;  %v135_v4 = vld [vmem:[#allocation3 + $0x68] sm:$0xff]  ;;  %v122_v9 = vld [vmem:[#allocation3] sm:$0xff] }
  0x46   :  { %318 = vmatprep.subr.mxu1 %v139_v62  ;;  %544 = vmatprep.subr.mxu0 %v143_v63  ;;  %v123_v7 = vld [vmem:[#allocation3 + $0x8] sm:$0xff]  ;;  %v126_v10 = vld [vmem:[#allocation3 + $0x20] sm:$0xff]  ;;  %v164_v62 = vld [vmem:[#allocation3 + $0x150] sm:$0xff] }
  0x47   :  { %319 = vmatpush1.msra.mxu1 %v138_v0  ;;  %545 = vmatpush1.msra.mxu0 %v142_v2  ;;  %v127_v8 = vld [vmem:[#allocation3 + $0x28] sm:$0xff]  ;;  %v864_v17 = vld [vmem:[#allocation5 + $0x3c0] sm:$0xff]  ;;  %v157_v0 = vld [vmem:[#allocation3 + $0x118] sm:$0xff] }
  0x48   :  { %320 = vmatprep.subr.mxu1 %v131_v3  ;;  %546 = vmatprep.subr.mxu0 %v135_v4  ;;  %v865_v12 = vld [vmem:[#allocation5 + $0x3c8] sm:$0xff]  ;;  %v856_v22 = vld [vmem:[#allocation5 + $0x380] sm:$0xff]  ;;  %v156_v3 = vld [vmem:[#allocation3 + $0x110] sm:$0xff] }
  0x49   :  { %321 = vmatpush1.msra.mxu1 %v130_v5  ;;  %547 = vmatpush1.msra.mxu0 %v134_v6  ;;  %v857_v19 = vld [vmem:[#allocation5 + $0x388] sm:$0xff]  ;;  %v848_v27 = vld [vmem:[#allocation5 + $0x340] sm:$0xff]  ;;  %v149_v5 = vld [vmem:[#allocation3 + $0xd8] sm:$0xff] }
  0x4a   :  { %322 = vmatprep.subr.mxu1 %v123_v7  ;;  %548 = vmatprep.subr.mxu0 %v127_v8  ;;  %v849_v25 = vld [vmem:[#allocation5 + $0x348] sm:$0xff]  ;;  %v840_v31 = vld [vmem:[#allocation5 + $0x300] sm:$0xff]  ;;  %v148_v8 = vld [vmem:[#allocation3 + $0xd0] sm:$0xff] }
  0x4b   :  { %323 = vmatpush1.msra.mxu1 %v122_v9  ;;  %549 = vmatpush1.msra.mxu0 %v126_v10  ;;  %v841_v29 = vld [vmem:[#allocation5 + $0x308] sm:$0xff]  ;;  %v832_v36 = vld [vmem:[#allocation5 + $0x2c0] sm:$0xff]  ;;  %v141_v10 = vld [vmem:[#allocation3 + $0x98] sm:$0xff] }
  0x4c   :  { %405 = vmatprep.subr.mxu1 %v245_v11  ;;  %1000 = vmatprep.subr.mxu0 %v865_v12  ;;  %v833_v34 = vld [vmem:[#allocation5 + $0x2c8] sm:$0xff]  ;;  %v824_v40 = vld [vmem:[#allocation5 + $0x280] sm:$0xff]  ;;  %v140_v12 = vld [vmem:[#allocation3 + $0x90] sm:$0xff] }
  0x4d   :  { %v825_v38 = vld [vmem:[#allocation5 + $0x288] sm:$0xff]  ;;  %v816_v45 = vld [vmem:[#allocation5 + $0x240] sm:$0xff] }
  0x4e   :  { %v817_v42 = vld [vmem:[#allocation5 + $0x248] sm:$0xff]  ;;  %v808_v49 = vld [vmem:[#allocation5 + $0x200] sm:$0xff] }
  0x4f   :  { %v809_v47 = vld [vmem:[#allocation5 + $0x208] sm:$0xff]  ;;  %v800_v54 = vld [vmem:[#allocation5 + $0x1c0] sm:$0xff] }
  0x50   :  { %v801_v52 = vld [vmem:[#allocation5 + $0x1c8] sm:$0xff]  ;;  %v792_v58 = vld [vmem:[#allocation5 + $0x180] sm:$0xff] }
  0x51   :  { %v793_v56 = vld [vmem:[#allocation5 + $0x188] sm:$0xff]  ;;  %v784_v63 = vld [vmem:[#allocation5 + $0x140] sm:$0xff] }
  0x52   :  { %v785_v61 = vld [vmem:[#allocation5 + $0x148] sm:$0xff]  ;;  %v776_v4 = vld [vmem:[#allocation5 + $0x100] sm:$0xff] }
  0x53   :  { %v777_v2 = vld [vmem:[#allocation5 + $0x108] sm:$0xff]  ;;  %v768_v9 = vld [vmem:[#allocation5 + $0xc0] sm:$0xff] }
  0x54   :  { %v769_v7 = vld [vmem:[#allocation5 + $0xc8] sm:$0xff]  ;;  %v4324_v13 = vld [vmem:[#allocation5 + $0x3c0] sm:$0xff] }
  0x55   :  { %v761_v11 = vld [vmem:[#allocation5 + $0x88] sm:$0xff] }
  0xa3   :  { %v5375_v15 = vpop.permute.xlu0 %75  ;;  %v5401_v33 = vpop.permute.xlu1 %81 }
  0xa4   :  { %vm98_vm0 = vcmp.eq.s32.totalorder %v5375_v15, %v5373_v14  ;;  %vm100_vm2 = vcmp.eq.s32.totalorder %v5401_v33, %v5373_v14  ;;  %v842_v15 = vld [vmem:[#allocation5 + $0x310] sm:$0xff]  ;;  %v5557_v33 = vld [vmem:[#allocation5 + $0x218] sm:$0xff] }
  0xa5   :  { %3918 = vmatmul.mubr.msk.f32.vlgmr.msra.gmra.mxu1 %vm98_vm0, %v5301_v20  ;;  %3934 = vmatmul.mubr.msk.f32.vlgmr.msra.gmra.mxu0 %vm98_vm0, %v5301_v20 }
  0xa6   :  { %406 = vmatpush1.msra.mxu1 %v244_v16  ;;  %1001 = vmatpush1.msra.mxu0 %v864_v17  ;;  %v760_v16 = vld [vmem:[#allocation5 + $0x80] sm:$0xff]  ;;  %v133_v17 = vld [vmem:[#allocation3 + $0x58] sm:$0xff] }
  0xa7   :  { %407 = vmatprep.subr.mxu1 %v237_v18  ;;  %1002 = vmatprep.subr.mxu0 %v857_v19  ;;  %v5387_v24 = vpop.permute.xlu0 %78  ;;  %v5415_v43 = vpop.permute.xlu1 %84  ;;  %v753_v19 = vld [vmem:[#allocation5 + $0x48] sm:$0xff] }
  0xa8   :  { %408 = vmatpush1.msra.mxu1 %v236_v21  ;;  %1003 = vmatpush1.msra.mxu0 %v856_v22  ;;  %vm99_vm1 = vcmp.eq.s32.totalorder %v5387_v24, %v5373_v14  ;;  %vm101_vm3 = vcmp.eq.s32.totalorder %v5415_v43, %v5373_v14  ;;  %v132_v21 = vld [vmem:[#allocation3 + $0x50] sm:$0xff]  ;;  %v752_v22 = vld [vmem:[#allocation5 + $0x40] sm:$0xff]  ;;  %v829_v24 = vld [vmem:[#allocation5 + $0x2a8] sm:$0xff] }
  0xa9   :  { %362 = vmatprep.mubr.f32.mxu1 %v9608_v1  ;;  %409 = vmatprep.subr.mxu1 %v229_v23  ;;  %v125_v23 = vld [vmem:[#allocation3 + $0x18] sm:$0xff] }
  0xaa   :  { %588 = vmatprep.mubr.f32.mxu0 %v9608_v1  ;;  %1004 = vmatprep.subr.mxu0 %v849_v25  ;;  %v745_v25 = vld [vmem:[#allocation5 + $0x8] sm:$0xff]  ;;  %v5574_v43 = vld [vmem:[#allocation5 + $0x198] sm:$0xff] }
  0xab   :  { %3919 = vmatmul.mubr.msk.f32.gmra.mxu1 %vm99_vm1, %v5301_v20  ;;  %3935 = vmatmul.mubr.msk.f32.gmra.mxu0 %vm99_vm1, %v5301_v20  ;;  %v5429_v51 = vpop.permute.xlu0 %87  ;;  %v5443_v60 = vpop.permute.xlu1 %90 }
  0xac   :  { %410 = vmatpush1.msra.mxu1 %v228_v26  ;;  %1005 = vmatpush1.msra.mxu0 %v848_v27  ;;  %vm102_vm4 = vcmp.eq.s32.totalorder %v5429_v51, %v5373_v14  ;;  %vm103_vm5 = vcmp.eq.s32.totalorder %v5443_v60, %v5373_v14  ;;  %v124_v26 = vld [vmem:[#allocation3 + $0x10] sm:$0xff]  ;;  %v744_v27 = vld [vmem:[#allocation5] sm:$0xff]  ;;  %v5591_v51 = vld [vmem:[#allocation5 + $0x118] sm:$0xff] }
  0xad   :  { %411 = vmatprep.subr.mxu1 %v221_v28  ;;  %1006 = vmatprep.subr.mxu0 %v841_v29  ;;  %v249_v28 = vld [vmem:[#allocation3 + $0x3f8] sm:$0xff]  ;;  %v993_v29 = vld [vmem:[#allocation5 + $0x7c8] sm:$0xff] }
  0xae   :  { %412 = vmatpush1.msra.mxu1 %v220_v30  ;;  %1007 = vmatpush1.msra.mxu0 %v840_v31  ;;  %v248_v30 = vld [vmem:[#allocation3 + $0x3f0] sm:$0xff]  ;;  %v992_v31 = vld [vmem:[#allocation5 + $0x7c0] sm:$0xff]  ;;  %v5608_v60 = vld [vmem:[#allocation5 + $0x98] sm:$0xff] }
  0xaf   :  { %368 = vmatprep.mubr.f32.mxu1 %v9608_v1  ;;  %413 = vmatprep.subr.mxu1 %v213_v32  ;;  %v5457_v6 = vpop.permute.xlu0 %93  ;;  %v5471_v18 = vpop.permute.xlu1 %96  ;;  %v241_v32 = vld [vmem:[#allocation3 + $0x3b8] sm:$0xff] }
  0xb0   :  { %594 = vmatprep.mubr.f32.mxu0 %v9608_v1  ;;  %1008 = vmatprep.subr.mxu0 %v833_v34  ;;  %vm104_vm6 = vcmp.eq.s32.totalorder %v5457_v6, %v5373_v14  ;;  %vm105_vm7 = vcmp.eq.s32.totalorder %v5471_v18, %v5373_v14  ;;  %v985_v34 = vld [vmem:[#allocation5 + $0x788] sm:$0xff]  ;;  %v5625_v6 = vld [vmem:[#allocation5 + $0x18] sm:$0xff]  ;;  %v5643_v18 = vld [vmem:[#allocation5 + $0x790] sm:$0xff] }
  0xb1   :  { %3920 = vmatmul.mubr.msk.f32.gmra.mxu1 %vm100_vm2, %v5301_v20  ;;  %3936 = vmatmul.mubr.msk.f32.gmra.mxu0 %vm100_vm2, %v5301_v20  ;;  %v5640_v14 = vld [vmem:[#allocation5 + $0x798] sm:$0xff] }
  0xb2   :  { %414 = vmatpush1.msra.mxu1 %v212_v35  ;;  %1009 = vmatpush1.msra.mxu0 %v832_v36  ;;  %v240_v35 = vld [vmem:[#allocation3 + $0x3b0] sm:$0xff]  ;;  %v984_v36 = vld [vmem:[#allocation5 + $0x780] sm:$0xff] }
  0xb3   :  { %415 = vmatprep.subr.mxu1 %v205_v37  ;;  %1010 = vmatprep.subr.mxu0 %v825_v38  ;;  %v233_v37 = vld [vmem:[#allocation3 + $0x378] sm:$0xff]  ;;  %v977_v38 = vld [vmem:[#allocation5 + $0x748] sm:$0xff] }
  0xb4   :  { %416 = vmatpush1.msra.mxu1 %v204_v39  ;;  %1011 = vmatpush1.msra.mxu0 %v824_v40  ;;  %v232_v39 = vld [vmem:[#allocation3 + $0x370] sm:$0xff]  ;;  %v976_v40 = vld [vmem:[#allocation5 + $0x740] sm:$0xff] }
  0xb5   :  { %374 = vmatprep.mubr.f32.mxu1 %v9608_v1  ;;  %417 = vmatprep.subr.mxu1 %v197_v41  ;;  %v225_v41 = vld [vmem:[#allocation3 + $0x338] sm:$0xff] }
  0xb6   :  { %600 = vmatprep.mubr.f32.mxu0 %v9608_v1  ;;  %1012 = vmatprep.subr.mxu0 %v817_v42  ;;  %v969_v42 = vld [vmem:[#allocation5 + $0x708] sm:$0xff] }
  0xb7   :  { %3921 = vmatmul.mubr.msk.f32.gmra.mxu1 %vm101_vm3, %v5301_v20  ;;  %3937 = vmatmul.mubr.msk.f32.gmra.mxu0 %vm101_vm3, %v5301_v20 }
  0xb8   :  { %418 = vmatpush1.msra.mxu1 %v196_v44  ;;  %1013 = vmatpush1.msra.mxu0 %v816_v45  ;;  %v224_v44 = vld [vmem:[#allocation3 + $0x330] sm:$0xff]  ;;  %v968_v45 = vld [vmem:[#allocation5 + $0x700] sm:$0xff] }
  0xb9   :  { %419 = vmatprep.subr.mxu1 %v189_v46  ;;  %1014 = vmatprep.subr.mxu0 %v809_v47  ;;  %v217_v46 = vld [vmem:[#allocation3 + $0x2f8] sm:$0xff]  ;;  %v961_v47 = vld [vmem:[#allocation5 + $0x6c8] sm:$0xff] }
  0xba   :  { %420 = vmatpush1.msra.mxu1 %v188_v48  ;;  %1015 = vmatpush1.msra.mxu0 %v808_v49  ;;  %v216_v48 = vld [vmem:[#allocation3 + $0x2f0] sm:$0xff]  ;;  %v960_v49 = vld [vmem:[#allocation5 + $0x6c0] sm:$0xff] }
  0xbb   :  { %380 = vmatprep.mubr.f32.mxu1 %v9608_v1  ;;  %421 = vmatprep.subr.mxu1 %v181_v50  ;;  %v209_v50 = vld [vmem:[#allocation3 + $0x2b8] sm:$0xff] }
  0xbc   :  { %606 = vmatprep.mubr.f32.mxu0 %v9608_v1  ;;  %1016 = vmatprep.subr.mxu0 %v801_v52  ;;  %v953_v52 = vld [vmem:[#allocation5 + $0x688] sm:$0xff] }
  0xbd   :  { %3922 = vmatmul.mubr.msk.f32.gmra.mxu1 %vm102_vm4, %v5301_v20  ;;  %3938 = vmatmul.mubr.msk.f32.gmra.mxu0 %vm102_vm4, %v5301_v20 }
  0xbe   :  { %422 = vmatpush1.msra.mxu1 %v180_v53  ;;  %1017 = vmatpush1.msra.mxu0 %v800_v54  ;;  %v208_v53 = vld [vmem:[#allocation3 + $0x2b0] sm:$0xff]  ;;  %v952_v54 = vld [vmem:[#allocation5 + $0x680] sm:$0xff] }
  0xbf   :  { %423 = vmatprep.subr.mxu1 %v173_v55  ;;  %1018 = vmatprep.subr.mxu0 %v793_v56  ;;  %v201_v55 = vld [vmem:[#allocation3 + $0x278] sm:$0xff]  ;;  %v945_v56 = vld [vmem:[#allocation5 + $0x648] sm:$0xff] }
  0xc0   :  { %424 = vmatpush1.msra.mxu1 %v172_v57  ;;  %1019 = vmatpush1.msra.mxu0 %v792_v58  ;;  %v200_v57 = vld [vmem:[#allocation3 + $0x270] sm:$0xff]  ;;  %v944_v58 = vld [vmem:[#allocation5 + $0x640] sm:$0xff] }
  0xc1   :  { %386 = vmatprep.mubr.f32.mxu1 %v9608_v1  ;;  %425 = vmatprep.subr.mxu1 %v165_v59  ;;  %v193_v59 = vld [vmem:[#allocation3 + $0x238] sm:$0xff] }
  0xc2   :  { %612 = vmatprep.mubr.f32.mxu0 %v9608_v1  ;;  %1020 = vmatprep.subr.mxu0 %v785_v61  ;;  %v937_v61 = vld [vmem:[#allocation5 + $0x608] sm:$0xff] }
  0xc3   :  { %3923 = vmatmul.mubr.msk.f32.gmra.mxu1 %vm103_vm5, %v5301_v20  ;;  %3939 = vmatmul.mubr.msk.f32.gmra.mxu0 %vm103_vm5, %v5301_v20 }
  0xc4   :  { %426 = vmatpush1.msra.mxu1 %v164_v62  ;;  %1021 = vmatpush1.msra.mxu0 %v784_v63  ;;  %v192_v62 = vld [vmem:[#allocation3 + $0x230] sm:$0xff]  ;;  %v936_v63 = vld [vmem:[#allocation5 + $0x600] sm:$0xff] }
  0xc5   :  { %427 = vmatprep.subr.mxu1 %v157_v0  ;;  %1022 = vmatprep.subr.mxu0 %v777_v2  ;;  %v185_v0 = vld [vmem:[#allocation3 + $0x1f8] sm:$0xff]  ;;  %v929_v2 = vld [vmem:[#allocation5 + $0x5c8] sm:$0xff] }
  0xc6   :  { %428 = vmatpush1.msra.mxu1 %v156_v3  ;;  %1023 = vmatpush1.msra.mxu0 %v776_v4  ;;  %v184_v3 = vld [vmem:[#allocation3 + $0x1f0] sm:$0xff]  ;;  %v928_v4 = vld [vmem:[#allocation5 + $0x5c0] sm:$0xff] }
  0xc7   :  { %392 = vmatprep.mubr.f32.mxu1 %v9608_v1  ;;  %429 = vmatprep.subr.mxu1 %v149_v5  ;;  %v177_v5 = vld [vmem:[#allocation3 + $0x1b8] sm:$0xff] }
  0xc8   :  { %618 = vmatprep.mubr.f32.mxu0 %v9608_v1  ;;  %1024 = vmatprep.subr.mxu0 %v769_v7  ;;  %v921_v7 = vld [vmem:[#allocation5 + $0x588] sm:$0xff] }
  0xc9   :  { %3924 = vmatmul.mubr.msk.f32.gmra.mxu1 %vm104_vm6, %v5301_v20  ;;  %3940 = vmatmul.mubr.msk.f32.gmra.mxu0 %vm104_vm6, %v5301_v20 }
  0xca   :  { %430 = vmatpush1.msra.mxu1 %v148_v8  ;;  %1025 = vmatpush1.msra.mxu0 %v768_v9  ;;  %v176_v8 = vld [vmem:[#allocation3 + $0x1b0] sm:$0xff]  ;;  %v920_v9 = vld [vmem:[#allocation5 + $0x580] sm:$0xff] }
  0xcb   :  { %431 = vmatprep.subr.mxu1 %v141_v10  ;;  %1026 = vmatprep.subr.mxu0 %v761_v11  ;;  %v169_v10 = vld [vmem:[#allocation3 + $0x178] sm:$0xff]  ;;  %v913_v11 = vld [vmem:[#allocation5 + $0x548] sm:$0xff] }
  0xcc   :  { %432 = vmatpush1.msra.mxu1 %v140_v12  ;;  %1027 = vmatpush1.msra.mxu0 %v760_v16  ;;  %v168_v12 = vld [vmem:[#allocation3 + $0x170] sm:$0xff]  ;;  %v912_v16 = vld [vmem:[#allocation5 + $0x540] sm:$0xff] }
  0xcd   :  { %398 = vmatprep.mubr.f32.mxu1 %v9608_v1  ;;  %433 = vmatprep.subr.mxu1 %v133_v17  ;;  %v161_v17 = vld [vmem:[#allocation3 + $0x138] sm:$0xff] }
  0xce   :  { %624 = vmatprep.mubr.f32.mxu0 %v9608_v1  ;;  %1028 = vmatprep.subr.mxu0 %v753_v19  ;;  %v905_v19 = vld [vmem:[#allocation5 + $0x508] sm:$0xff] }
  0xcf   :  { %3925 = vmatmul.mubr.msk.f32.gmra.mxu1 %vm105_vm7, %v5301_v20  ;;  %3941 = vmatmul.mubr.msk.f32.gmra.mxu0 %vm105_vm7, %v5301_v20 }
  0xd0   :  { %434 = vmatpush1.msra.mxu1 %v132_v21  ;;  %1029 = vmatpush1.msra.mxu0 %v752_v22  ;;  %v160_v21 = vld [vmem:[#allocation3 + $0x130] sm:$0xff]  ;;  %v904_v22 = vld [vmem:[#allocation5 + $0x500] sm:$0xff] }
  0xd1   :  { %435 = vmatprep.subr.mxu1 %v125_v23  ;;  %1030 = vmatprep.subr.mxu0 %v745_v25  ;;  %v153_v23 = vld [vmem:[#allocation3 + $0xf8] sm:$0xff]  ;;  %v897_v25 = vld [vmem:[#allocation5 + $0x4c8] sm:$0xff] }
  0xd2   :  { %436 = vmatpush1.msra.mxu1 %v124_v26  ;;  %1031 = vmatpush1.msra.mxu0 %v744_v27  ;;  %v152_v26 = vld [vmem:[#allocation3 + $0xf0] sm:$0xff]  ;;  %v896_v27 = vld [vmem:[#allocation5 + $0x4c0] sm:$0xff] }
  0xd3   :  { %469 = vmatprep.mubr.f32.mxu1 %v9608_v1  ;;  %631 = vmatprep.subr.mxu1 %v249_v28  ;;  %v145_v28 = vld [vmem:[#allocation3 + $0xb8] sm:$0xff] }
  0xd4   :  { %1032 = vmatprep.subr.mxu0 %v993_v29  ;;  %3926 = vmatmul.mubr.msk.f32.vlgmr.msra.gmra.mxu1 %vm98_vm0, %v5301_v20  ;;  %v889_v29 = vld [vmem:[#allocation5 + $0x488] sm:$0xff] }
  0xd5   :  { %632 = vmatpush1.msra.mxu1 %v248_v30  ;;  %1033 = vmatpush2.msra.mxu0 %v992_v31  ;;  %v144_v30 = vld [vmem:[#allocation3 + $0xb0] sm:$0xff]  ;;  %v888_v31 = vld [vmem:[#allocation5 + $0x480] sm:$0xff] }
  0xd6   :  { %633 = vmatprep.subr.mxu1 %v241_v32  ;;  %1034 = vmatprep.subr.mxu0 %v985_v34  ;;  %v137_v32 = vld [vmem:[#allocation3 + $0x78] sm:$0xff]  ;;  %v881_v34 = vld [vmem:[#allocation5 + $0x448] sm:$0xff] }
  0xd7   :  { %634 = vmatpush1.msra.mxu1 %v240_v35  ;;  %1035 = vmatpush2.msra.mxu0 %v984_v36  ;;  %v136_v35 = vld [vmem:[#allocation3 + $0x70] sm:$0xff]  ;;  %v880_v36 = vld [vmem:[#allocation5 + $0x440] sm:$0xff] }
  0xd8   :  { %475 = vmatprep.mubr.f32.mxu1 %v9608_v1  ;;  %635 = vmatprep.subr.mxu1 %v233_v37  ;;  %v129_v37 = vld [vmem:[#allocation3 + $0x38] sm:$0xff] }
  0xd9   :  { %1036 = vmatprep.subr.mxu0 %v977_v38  ;;  %3927 = vmatmul.mubr.msk.f32.gmra.mxu1 %vm99_vm1, %v5301_v20  ;;  %v873_v38 = vld [vmem:[#allocation5 + $0x408] sm:$0xff] }
  0xda   :  { %636 = vmatpush1.msra.mxu1 %v232_v39  ;;  %1037 = vmatpush2.msra.mxu0 %v976_v40  ;;  %v128_v39 = vld [vmem:[#allocation3 + $0x30] sm:$0xff]  ;;  %v872_v40 = vld [vmem:[#allocation5 + $0x400] sm:$0xff] }
  0xdb   :  { %637 = vmatprep.subr.mxu1 %v225_v41  ;;  %1038 = vmatprep.subr.mxu0 %v969_v42  ;;  %v867_v41 = vld [vmem:[#allocation5 + $0x3d8] sm:$0xff]  ;;  %v869_v42 = vld [vmem:[#allocation5 + $0x3e8] sm:$0xff] }
  0xdc   :  { %638 = vmatpush1.msra.mxu1 %v224_v44  ;;  %1039 = vmatpush2.msra.mxu0 %v968_v45  ;;  %v866_v44 = vld [vmem:[#allocation5 + $0x3d0] sm:$0xff]  ;;  %v868_v45 = vld [vmem:[#allocation5 + $0x3e0] sm:$0xff] }
  0xdd   :  { %481 = vmatprep.mubr.f32.mxu1 %v9608_v1  ;;  %639 = vmatprep.subr.mxu1 %v217_v46  ;;  %v859_v46 = vld [vmem:[#allocation5 + $0x398] sm:$0xff] }
  0xde   :  { %1040 = vmatprep.subr.mxu0 %v961_v47  ;;  %3928 = vmatmul.mubr.msk.f32.gmra.mxu1 %vm100_vm2, %v5301_v20  ;;  %v861_v47 = vld [vmem:[#allocation5 + $0x3a8] sm:$0xff] }
  0xdf   :  { %640 = vmatpush1.msra.mxu1 %v216_v48  ;;  %1041 = vmatpush2.msra.mxu0 %v960_v49  ;;  %v858_v48 = vld [vmem:[#allocation5 + $0x390] sm:$0xff]  ;;  %v860_v49 = vld [vmem:[#allocation5 + $0x3a0] sm:$0xff] }
  0xe0   :  { %641 = vmatprep.subr.mxu1 %v209_v50  ;;  %1042 = vmatprep.subr.mxu0 %v953_v52  ;;  %v851_v50 = vld [vmem:[#allocation5 + $0x358] sm:$0xff]  ;;  %v853_v52 = vld [vmem:[#allocation5 + $0x368] sm:$0xff] }
  0xe1   :  { %642 = vmatpush1.msra.mxu1 %v208_v53  ;;  %1043 = vmatpush2.msra.mxu0 %v952_v54  ;;  %v850_v53 = vld [vmem:[#allocation5 + $0x350] sm:$0xff]  ;;  %v852_v54 = vld [vmem:[#allocation5 + $0x360] sm:$0xff] }
  0xe2   :  { %487 = vmatprep.mubr.f32.mxu1 %v9608_v1  ;;  %643 = vmatprep.subr.mxu1 %v201_v55  ;;  %v843_v55 = vld [vmem:[#allocation5 + $0x318] sm:$0xff] }
  0xe3   :  { %1044 = vmatprep.subr.mxu0 %v945_v56  ;;  %3929 = vmatmul.mubr.msk.f32.gmra.mxu1 %vm101_vm3, %v5301_v20  ;;  %v845_v56 = vld [vmem:[#allocation5 + $0x328] sm:$0xff] }
  0xe4   :  { %644 = vmatpush1.msra.mxu1 %v200_v57  ;;  %1045 = vmatpush2.msra.mxu0 %v944_v58  ;;  %v844_v57 = vld [vmem:[#allocation5 + $0x320] sm:$0xff]  ;;  %v835_v58 = vld [vmem:[#allocation5 + $0x2d8] sm:$0xff] }
  0xe5   :  { %645 = vmatprep.subr.mxu1 %v193_v59  ;;  %1046 = vmatprep.subr.mxu0 %v937_v61  ;;  %v837_v59 = vld [vmem:[#allocation5 + $0x2e8] sm:$0xff]  ;;  %v5537_v61 = vld [vmem:[#allocation5 + $0x2d0] sm:$0xff] }
  0xe6   :  { %646 = vmatpush1.msra.mxu1 %v192_v62  ;;  %1047 = vmatpush2.msra.mxu0 %v936_v63  ;;  %v836_v62 = vld [vmem:[#allocation5 + $0x2e0] sm:$0xff]  ;;  %v5540_v63 = vld [vmem:[#allocation5 + $0x298] sm:$0xff] }
  0xe7   :  { %493 = vmatprep.mubr.f32.mxu1 %v9608_v1  ;;  %647 = vmatprep.subr.mxu1 %v185_v0  ;;  %v5546_v0 = vld [vmem:[#allocation5 + $0x290] sm:$0xff] }
  0xe8   :  { %1048 = vmatprep.subr.mxu0 %v929_v2  ;;  %3930 = vmatmul.mubr.msk.f32.gmra.mxu1 %vm102_vm4, %v5301_v20  ;;  %v828_v2 = vld [vmem:[#allocation5 + $0x2a0] sm:$0xff] }
  0xe9   :  { %648 = vmatpush1.msra.mxu1 %v184_v3  ;;  %1049 = vmatpush2.msra.mxu0 %v928_v4  ;;  %v5549_v3 = vld [vmem:[#allocation5 + $0x258] sm:$0xff]  ;;  %v821_v4 = vld [vmem:[#allocation5 + $0x268] sm:$0xff] }
  0xea   :  { %649 = vmatprep.subr.mxu1 %v177_v5  ;;  %1050 = vmatprep.subr.mxu0 %v921_v7  ;;  %v5553_v5 = vld [vmem:[#allocation5 + $0x250] sm:$0xff]  ;;  %v820_v7 = vld [vmem:[#allocation5 + $0x260] sm:$0xff] }
  0xeb   :  { %650 = vmatpush1.msra.mxu1 %v176_v8  ;;  %1051 = vmatpush2.msra.mxu0 %v920_v9  ;;  %v813_v8 = vld [vmem:[#allocation5 + $0x228] sm:$0xff]  ;;  %v5563_v9 = vld [vmem:[#allocation5 + $0x210] sm:$0xff] }
  0xec   :  { %499 = vmatprep.mubr.f32.mxu1 %v9608_v1  ;;  %651 = vmatprep.subr.mxu1 %v169_v10  ;;  %v812_v10 = vld [vmem:[#allocation5 + $0x220] sm:$0xff] }
  0xed   :  { %1052 = vmatprep.subr.mxu0 %v913_v11  ;;  %3931 = vmatmul.mubr.msk.f32.gmra.mxu1 %vm103_vm5, %v5301_v20  ;;  %v5566_v11 = vld [vmem:[#allocation5 + $0x1d8] sm:$0xff] }
  0xee   :  { %652 = vmatpush1.msra.mxu1 %v168_v12  ;;  %1053 = vmatpush2.msra.mxu0 %v912_v16  ;;  %v805_v12 = vld [vmem:[#allocation5 + $0x1e8] sm:$0xff]  ;;  %v5570_v16 = vld [vmem:[#allocation5 + $0x1d0] sm:$0xff] }
  0xef   :  { %653 = vmatprep.subr.mxu1 %v161_v17  ;;  %1054 = vmatprep.subr.mxu0 %v905_v19  ;;  %v804_v17 = vld [vmem:[#allocation5 + $0x1e0] sm:$0xff]  ;;  %v797_v19 = vld [vmem:[#allocation5 + $0x1a8] sm:$0xff] }
  0xf0   :  { %654 = vmatpush1.msra.mxu1 %v160_v21  ;;  %1055 = vmatpush2.msra.mxu0 %v904_v22  ;;  %v5580_v21 = vld [vmem:[#allocation5 + $0x190] sm:$0xff]  ;;  %v796_v22 = vld [vmem:[#allocation5 + $0x1a0] sm:$0xff] }
  0xf1   :  { %505 = vmatprep.mubr.f32.mxu1 %v9608_v1  ;;  %655 = vmatprep.subr.mxu1 %v153_v23  ;;  %v5583_v23 = vld [vmem:[#allocation5 + $0x158] sm:$0xff] }
  0xf2   :  { %1056 = vmatprep.subr.mxu0 %v897_v25  ;;  %3932 = vmatmul.mubr.msk.f32.gmra.mxu1 %vm104_vm6, %v5301_v20  ;;  %v789_v25 = vld [vmem:[#allocation5 + $0x168] sm:$0xff] }
  0xf3   :  { %656 = vmatpush1.msra.mxu1 %v152_v26  ;;  %1057 = vmatpush2.msra.mxu0 %v896_v27  ;;  %v5587_v26 = vld [vmem:[#allocation5 + $0x150] sm:$0xff]  ;;  %v788_v27 = vld [vmem:[#allocation5 + $0x160] sm:$0xff] }
  0xf4   :  { %657 = vmatprep.subr.mxu1 %v145_v28  ;;  %1058 = vmatprep.subr.mxu0 %v889_v29  ;;  %v781_v28 = vld [vmem:[#allocation5 + $0x128] sm:$0xff]  ;;  %v5597_v29 = vld [vmem:[#allocation5 + $0x110] sm:$0xff] }
  0xf5   :  { %658 = vmatpush1.msra.mxu1 %v144_v30  ;;  %1059 = vmatpush2.msra.mxu0 %v888_v31  ;;  %v780_v30 = vld [vmem:[#allocation5 + $0x120] sm:$0xff]  ;;  %v5600_v31 = vld [vmem:[#allocation5 + $0xd8] sm:$0xff] }
  0xf6   :  { %511 = vmatprep.mubr.f32.mxu1 %v9608_v1  ;;  %659 = vmatprep.subr.mxu1 %v137_v32  ;;  %v773_v32 = vld [vmem:[#allocation5 + $0xe8] sm:$0xff] }
  0xf7   :  { %1060 = vmatprep.subr.mxu0 %v881_v34  ;;  %3933 = vmatmul.mubr.msk.f32.gmra.mxu1 %vm105_vm7, %v5301_v20  ;;  %v5604_v34 = vld [vmem:[#allocation5 + $0xd0] sm:$0xff] }
  0xf8   :  { %660 = vmatpush1.msra.mxu1 %v136_v35  ;;  %1061 = vmatpush2.msra.mxu0 %v880_v36  ;;  %v772_v35 = vld [vmem:[#allocation5 + $0xe0] sm:$0xff]  ;;  %v765_v36 = vld [vmem:[#allocation5 + $0xa8] sm:$0xff] }
  0xf9   :  { %661 = vmatprep.subr.mxu1 %v129_v37  ;;  %1062 = vmatprep.subr.mxu0 %v873_v38  ;;  %v5614_v37 = vld [vmem:[#allocation5 + $0x90] sm:$0xff]  ;;  %v764_v38 = vld [vmem:[#allocation5 + $0xa0] sm:$0xff] }
  0xfa   :  { %662 = vmatpush1.msra.mxu1 %v128_v39  ;;  %1063 = vmatpush2.msra.mxu0 %v872_v40  ;;  %v5617_v39 = vld [vmem:[#allocation5 + $0x58] sm:$0xff]  ;;  %v757_v40 = vld [vmem:[#allocation5 + $0x68] sm:$0xff] }
  0xfb   :  { %1064 = vmatprep.mubr.f32.mxu0 %v9608_v1  ;;  %695 = vmatprep.mubr.f32.mxu1 %v9608_v1 }
  0xfc   :  { %1065 = vmatmul.mubr.f32.vlgmr.msra.gmra.mxu0 %v9608_v1  ;;  %1071 = vmatprep.subr.mxu1 %v867_v41  ;;  %v5621_v41 = vld [vmem:[#allocation5 + $0x50] sm:$0xff] }
  0xfd   :  { %1142 = vmatprep.subr.mxu0 %v869_v42  ;;  %3942 = vmatmul.mubr.msk.f32.vlgmr.msra.gmra.mxu1 %vm98_vm0, %v5301_v20  ;;  %v756_v42 = vld [vmem:[#allocation5 + $0x60] sm:$0xff] }
  0xfe   :  { %1072 = vmatpush1.msra.mxu1 %v866_v44  ;;  %1143 = vmatpush1.msra.mxu0 %v868_v45  ;;  %v749_v44 = vld [vmem:[#allocation5 + $0x28] sm:$0xff]  ;;  %v5631_v45 = vld [vmem:[#allocation5 + $0x10] sm:$0xff] }
  0xff   :  { %1073 = vmatprep.subr.mxu1 %v859_v46  ;;  %1144 = vmatprep.subr.mxu0 %v861_v47  ;;  %v748_v46 = vld [vmem:[#allocation5 + $0x20] sm:$0xff]  ;;  %v5634_v47 = vld [vmem:[#allocation5 + $0x7d8] sm:$0xff] }
 0x100   :  { %1074 = vmatpush1.msra.mxu1 %v858_v48  ;;  %1145 = vmatpush1.msra.mxu0 %v860_v49  ;;  %v997_v48 = vld [vmem:[#allocation5 + $0x7e8] sm:$0xff]  ;;  %v5637_v49 = vld [vmem:[#allocation5 + $0x7d0] sm:$0xff] }
 0x101   :  { %701 = vmatprep.mubr.f32.mxu1 %v9608_v1  ;;  %1075 = vmatprep.subr.mxu1 %v851_v50  ;;  %v996_v50 = vld [vmem:[#allocation5 + $0x7e0] sm:$0xff] }
 0x102   :  { %1146 = vmatprep.subr.mxu0 %v853_v52  ;;  %3943 = vmatmul.mubr.msk.f32.gmra.mxu1 %vm99_vm1, %v5301_v20  ;;  %v988_v52 = vld [vmem:[#allocation5 + $0x7a0] sm:$0xff] }
 0x103   :  { %1076 = vmatpush1.msra.mxu1 %v850_v53  ;;  %1147 = vmatpush1.msra.mxu0 %v852_v54  ;;  %v5646_v53 = vld [vmem:[#allocation5 + $0x758] sm:$0xff]  ;;  %v981_v54 = vld [vmem:[#allocation5 + $0x768] sm:$0xff] }
 0x104   :  { %1077 = vmatprep.subr.mxu1 %v843_v55  ;;  %1148 = vmatprep.subr.mxu0 %v845_v56  ;;  %v5649_v55 = vld [vmem:[#allocation5 + $0x750] sm:$0xff]  ;;  %v980_v56 = vld [vmem:[#allocation5 + $0x760] sm:$0xff] }
 0x105   :  { %1078 = vmatpush1.msra.mxu1 %v842_v15  ;;  %1149 = vmatpush1.msra.mxu0 %v844_v57  ;;  %v5652_v15 = vld [vmem:[#allocation5 + $0x718] sm:$0xff]  ;;  %v973_v57 = vld [vmem:[#allocation5 + $0x728] sm:$0xff] }
 0x106   :  { %707 = vmatprep.mubr.f32.mxu1 %v9608_v1  ;;  %1079 = vmatprep.subr.mxu1 %v835_v58  ;;  %v5655_v58 = vld [vmem:[#allocation5 + $0x710] sm:$0xff] }
 0x107   :  { %1150 = vmatprep.subr.mxu0 %v837_v59  ;;  %3944 = vmatmul.mubr.msk.f32.gmra.mxu1 %vm100_vm2, %v5301_v20  ;;  %v972_v59 = vld [vmem:[#allocation5 + $0x720] sm:$0xff] }
 0x108   :  { %1080 = vmatpush1.msra.mxu1 %v5537_v61  ;;  %1151 = vmatpush1.msra.mxu0 %v836_v62  ;;  %v5658_v62 = vld [vmem:[#allocation5 + $0x6d8] sm:$0xff] }
 0x109   :  { %1081 = vmatprep.subr.mxu1 %v5540_v63  ;;  %1152 = vmatprep.subr.mxu0 %v829_v24  ;;  %v965_v24 = vld [vmem:[#allocation5 + $0x6e8] sm:$0xff] }
 0x10a   :  { %1082 = vmatpush1.msra.mxu1 %v5546_v0  ;;  %1153 = vmatpush1.msra.mxu0 %v828_v2  ;;  %v5661_v2 = vld [vmem:[#allocation5 + $0x6d0] sm:$0xff] }
 0x10b   :  { %713 = vmatprep.mubr.f32.mxu1 %v9608_v1  ;;  %1083 = vmatprep.subr.mxu1 %v5549_v3 }
 0x10c   :  { %1154 = vmatprep.subr.mxu0 %v821_v4  ;;  %3945 = vmatmul.mubr.msk.f32.gmra.mxu1 %vm101_vm3, %v5301_v20  ;;  %v964_v4 = vld [vmem:[#allocation5 + $0x6e0] sm:$0xff] }
 0x10d   :  { %1084 = vmatpush1.msra.mxu1 %v5553_v5  ;;  %1155 = vmatpush1.msra.mxu0 %v820_v7  ;;  %v5664_v7 = vld [vmem:[#allocation5 + $0x698] sm:$0xff] }
 0x10e   :  { %1085 = vmatprep.subr.mxu1 %v5557_v33  ;;  %1156 = vmatprep.subr.mxu0 %v813_v8  ;;  %v957_v8 = vld [vmem:[#allocation5 + $0x6a8] sm:$0xff] }
 0x10f   :  { %1086 = vmatpush1.msra.mxu1 %v5563_v9  ;;  %1157 = vmatpush1.msra.mxu0 %v812_v10  ;;  %v5667_v10 = vld [vmem:[#allocation5 + $0x690] sm:$0xff] }
 0x110   :  { %719 = vmatprep.mubr.f32.mxu1 %v9608_v1  ;;  %1087 = vmatprep.subr.mxu1 %v5566_v11 }
 0x111   :  { %1158 = vmatprep.subr.mxu0 %v805_v12  ;;  %3946 = vmatmul.mubr.msk.f32.gmra.mxu1 %vm102_vm4, %v5301_v20  ;;  %v956_v12 = vld [vmem:[#allocation5 + $0x6a0] sm:$0xff] }
 0x112   :  { %1088 = vmatpush1.msra.mxu1 %v5570_v16  ;;  %1159 = vmatpush1.msra.mxu0 %v804_v17  ;;  %v5670_v17 = vld [vmem:[#allocation5 + $0x658] sm:$0xff] }
 0x113   :  { %1089 = vmatprep.subr.mxu1 %v5574_v43  ;;  %1160 = vmatprep.subr.mxu0 %v797_v19  ;;  %v949_v19 = vld [vmem:[#allocation5 + $0x668] sm:$0xff] }
 0x114   :  { %1090 = vmatpush1.msra.mxu1 %v5580_v21  ;;  %1161 = vmatpush1.msra.mxu0 %v796_v22  ;;  %v5673_v22 = vld [vmem:[#allocation5 + $0x650] sm:$0xff] }
 0x115   :  { %725 = vmatprep.mubr.f32.mxu1 %v9608_v1  ;;  %1091 = vmatprep.subr.mxu1 %v5583_v23 }
 0x116   :  { %1162 = vmatprep.subr.mxu0 %v789_v25  ;;  %3947 = vmatmul.mubr.msk.f32.gmra.mxu1 %vm103_vm5, %v5301_v20  ;;  %v948_v25 = vld [vmem:[#allocation5 + $0x660] sm:$0xff] }
 0x117   :  { %1092 = vmatpush1.msra.mxu1 %v5587_v26  ;;  %1163 = vmatpush1.msra.mxu0 %v788_v27  ;;  %v5676_v27 = vld [vmem:[#allocation5 + $0x618] sm:$0xff] }
 0x118   :  { %1093 = vmatprep.subr.mxu1 %v5591_v51  ;;  %1164 = vmatprep.subr.mxu0 %v781_v28  ;;  %v941_v28 = vld [vmem:[#allocation5 + $0x628] sm:$0xff] }
 0x119   :  { %1094 = vmatpush1.msra.mxu1 %v5597_v29  ;;  %1165 = vmatpush1.msra.mxu0 %v780_v30  ;;  %v5679_v30 = vld [vmem:[#allocation5 + $0x610] sm:$0xff] }
 0x11a   :  { %731 = vmatprep.mubr.f32.mxu1 %v9608_v1  ;;  %1095 = vmatprep.subr.mxu1 %v5600_v31 }
 0x11b   :  { %1166 = vmatprep.subr.mxu0 %v773_v32  ;;  %3948 = vmatmul.mubr.msk.f32.gmra.mxu1 %vm104_vm6, %v5301_v20  ;;  %v940_v32 = vld [vmem:[#allocation5 + $0x620] sm:$0xff] }
 0x11c   :  { %1096 = vmatpush1.msra.mxu1 %v5604_v34  ;;  %1167 = vmatpush1.msra.mxu0 %v772_v35  ;;  %v5682_v35 = vld [vmem:[#allocation5 + $0x5d8] sm:$0xff] }
 0x11d   :  { %1097 = vmatprep.subr.mxu1 %v5608_v60  ;;  %1168 = vmatprep.subr.mxu0 %v765_v36  ;;  %v933_v36 = vld [vmem:[#allocation5 + $0x5e8] sm:$0xff] }
 0x11e   :  { %1098 = vmatpush1.msra.mxu1 %v5614_v37  ;;  %1169 = vmatpush1.msra.mxu0 %v764_v38  ;;  %v5685_v38 = vld [vmem:[#allocation5 + $0x5d0] sm:$0xff] }
 0x11f   :  { %737 = vmatprep.mubr.f32.mxu1 %v9608_v1  ;;  %1099 = vmatprep.subr.mxu1 %v5617_v39 }
 0x120   :  { %1170 = vmatprep.subr.mxu0 %v757_v40  ;;  %3949 = vmatmul.mubr.msk.f32.gmra.mxu1 %vm105_vm7, %v5301_v20  ;;  %v989_v20 = vld [vmem:[#allocation5 + $0x7a8] sm:$0xff]  ;;  %v932_v40 = vld [vmem:[#allocation5 + $0x5e0] sm:$0xff] }
 0x121   :  { %1100 = vmatpush1.msra.mxu1 %v5621_v41  ;;  %1171 = vmatpush1.msra.mxu0 %v756_v42  ;;  %v5688_v42 = vld [vmem:[#allocation5 + $0x598] sm:$0xff] }
 0x122   :  { %1101 = vmatprep.subr.mxu1 %v5625_v6  ;;  %1172 = vmatprep.subr.mxu0 %v749_v44  ;;  %v925_v44 = vld [vmem:[#allocation5 + $0x5a8] sm:$0xff] }
 0x123   :  { %1102 = vmatpush1.msra.mxu1 %v5631_v45  ;;  %1173 = vmatpush1.msra.mxu0 %v748_v46  ;;  %v5691_v46 = vld [vmem:[#allocation5 + $0x590] sm:$0xff] }
 0x124   :  { %1103 = vmatprep.subr.mxu1 %v5634_v47  ;;  %1174 = vmatprep.subr.mxu0 %v997_v48  ;;  %v924_v48 = vld [vmem:[#allocation5 + $0x5a0] sm:$0xff] }
 0x125   :  { %1104 = vmatpush2.msra.mxu1 %v5637_v49  ;;  %1175 = vmatpush2.msra.mxu0 %v996_v50  ;;  %v5694_v50 = vld [vmem:[#allocation5 + $0x558] sm:$0xff] }
 0x126   :  { %1105 = vmatprep.subr.mxu1 %v5640_v14  ;;  %1176 = vmatprep.subr.mxu0 %v989_v20  ;;  %v917_v20 = vld [vmem:[#allocation5 + $0x568] sm:$0xff] }
 0x127   :  { %1106 = vmatpush2.msra.mxu1 %v5643_v18  ;;  %1177 = vmatpush2.msra.mxu0 %v988_v52  ;;  %v5697_v52 = vld [vmem:[#allocation5 + $0x550] sm:$0xff] }
 0x128   :  { %1107 = vmatprep.subr.mxu1 %v5646_v53  ;;  %1178 = vmatprep.subr.mxu0 %v981_v54  ;;  %10207 = vst [vmem:[#allocation10_spill] sm:$0xff] %v5697_v52  ;;  %v916_v54 = vld [vmem:[#allocation5 + $0x560] sm:$0xff] }
 0x129   :  { %1108 = vmatpush2.msra.mxu1 %v5649_v55  ;;  %1179 = vmatpush2.msra.mxu0 %v980_v56  ;;  %v5700_v56 = vld [vmem:[#allocation5 + $0x518] sm:$0xff] }
 0x12a   :  { %1109 = vmatprep.subr.mxu1 %v5652_v15  ;;  %1180 = vmatprep.subr.mxu0 %v973_v57  ;;  %10208 = vst [vmem:[#allocation11_spill] sm:$0xff] %v5700_v56  ;;  %v909_v57 = vld [vmem:[#allocation5 + $0x528] sm:$0xff] }
 0x12b   :  { %1110 = vmatpush2.msra.mxu1 %v5655_v58  ;;  %1181 = vmatpush2.msra.mxu0 %v972_v59  ;;  %v5703_v59 = vld [vmem:[#allocation5 + $0x510] sm:$0xff] }
 0x12c   :  { %1111 = vmatprep.subr.mxu1 %v5658_v62  ;;  %1182 = vmatprep.subr.mxu0 %v965_v24  ;;  %10209 = vst [vmem:[#allocation12_spill] sm:$0xff] %v5703_v59  ;;  %v908_v24 = vld [vmem:[#allocation5 + $0x520] sm:$0xff] }
 0x12d   :  { %1112 = vmatpush2.msra.mxu1 %v5661_v2  ;;  %1183 = vmatpush2.msra.mxu0 %v964_v4  ;;  %v5706_v4 = vld [vmem:[#allocation5 + $0x4d8] sm:$0xff] }
 0x12e   :  { %1113 = vmatprep.subr.mxu1 %v5664_v7  ;;  %1184 = vmatprep.subr.mxu0 %v957_v8  ;;  %10210 = vst [vmem:[#allocation13_spill] sm:$0xff] %v5706_v4  ;;  %v901_v8 = vld [vmem:[#allocation5 + $0x4e8] sm:$0xff] }
 0x12f   :  { %1114 = vmatpush2.msra.mxu1 %v5667_v10  ;;  %1185 = vmatpush2.msra.mxu0 %v956_v12  ;;  %v5709_v12 = vld [vmem:[#allocation5 + $0x4d0] sm:$0xff] }
 0x130   :  { %1115 = vmatprep.subr.mxu1 %v5670_v17  ;;  %1186 = vmatprep.subr.mxu0 %v949_v19  ;;  %10211 = vst [vmem:[#allocation14_spill] sm:$0xff] %v5709_v12  ;;  %v900_v19 = vld [vmem:[#allocation5 + $0x4e0] sm:$0xff] }
 0x131   :  { %1116 = vmatpush2.msra.mxu1 %v5673_v22  ;;  %1187 = vmatpush2.msra.mxu0 %v948_v25  ;;  %v5712_v25 = vld [vmem:[#allocation5 + $0x498] sm:$0xff] }
 0x132   :  { %1117 = vmatprep.subr.mxu1 %v5676_v27  ;;  %1188 = vmatprep.subr.mxu0 %v941_v28  ;;  %10212 = vst [vmem:[#allocation15_spill] sm:$0xff] %v5712_v25  ;;  %v893_v28 = vld [vmem:[#allocation5 + $0x4a8] sm:$0xff] }
 0x133   :  { %1118 = vmatpush2.msra.mxu1 %v5679_v30  ;;  %1189 = vmatpush2.msra.mxu0 %v940_v32  ;;  %v5715_v32 = vld [vmem:[#allocation5 + $0x490] sm:$0xff] }
 0x134   :  { %1119 = vmatprep.subr.mxu1 %v5682_v35  ;;  %1190 = vmatprep.subr.mxu0 %v933_v36  ;;  %10213 = vst [vmem:[#allocation16_spill] sm:$0xff] %v5715_v32  ;;  %v892_v36 = vld [vmem:[#allocation5 + $0x4a0] sm:$0xff] }
 0x135   :  { %1120 = vmatpush2.msra.mxu1 %v5685_v38  ;;  %1191 = vmatpush2.msra.mxu0 %v932_v40  ;;  %v5718_v40 = vld [vmem:[#allocation5 + $0x458] sm:$0xff] }
 0x136   :  { %1121 = vmatprep.subr.mxu1 %v5688_v42  ;;  %1192 = vmatprep.subr.mxu0 %v925_v44  ;;  %10214 = vst [vmem:[#allocation17_spill] sm:$0xff] %v5718_v40  ;;  %v885_v44 = vld [vmem:[#allocation5 + $0x468] sm:$0xff] }
 0x137   :  { %1122 = vmatpush2.msra.mxu1 %v5691_v46  ;;  %1193 = vmatpush2.msra.mxu0 %v924_v48  ;;  %v5721_v48 = vld [vmem:[#allocation5 + $0x450] sm:$0xff] }
 0x138   :  { %1123 = vmatprep.subr.mxu1 %v5694_v50  ;;  %1194 = vmatprep.subr.mxu0 %v917_v20  ;;  %10215 = vst [vmem:[#allocation18_spill] sm:$0xff] %v5721_v48  ;;  %v884_v20 = vld [vmem:[#allocation5 + $0x460] sm:$0xff] }
 0x139   :  { %1124 = vmatpush2.msra.mxu1 %v5697_v52  ;;  %1195 = vmatpush2.msra.mxu0 %v916_v54  ;;  %v5724_v54 = vld [vmem:[#allocation5 + $0x418] sm:$0xff]  ;;  %v4367_v52 = vld [vmem:[#allocation5 + $0x648] sm:$0xff] }
 0x13a   :  { %1125 = vmatprep.subr.mxu1 %v5700_v56  ;;  %1196 = vmatprep.subr.mxu0 %v909_v57  ;;  %10216 = vst [vmem:[#allocation19_spill] sm:$0xff] %v5724_v54  ;;  %v877_v57 = vld [vmem:[#allocation5 + $0x428] sm:$0xff] }
 0x13b   :  { %1126 = vmatpush2.msra.mxu1 %v5703_v59  ;;  %1197 = vmatpush2.msra.mxu0 %v908_v24  ;;  %v5727_v24 = vld [vmem:[#allocation5 + $0x410] sm:$0xff]  ;;  %v5901_v59 = vld [vmem:[#allocation5 + $0x6b8] sm:$0xff] }
 0x13c   :  { %1127 = vmatprep.subr.mxu1 %v5706_v4  ;;  %1198 = vmatprep.subr.mxu0 %v901_v8  ;;  %10217 = vst [vmem:[#allocation20_spill] sm:$0xff] %v5727_v24  ;;  %v876_v8 = vld [vmem:[#allocation5 + $0x420] sm:$0xff]  ;;  %10267 = vst [vmem:[#allocation69_spill] sm:$0xff] %v5901_v59 }
 0x13d   :  { %1128 = vmatpush2.msra.mxu1 %v5709_v12  ;;  %1199 = vmatpush2.msra.mxu0 %v900_v19  ;;  %v5733_v19 = vld [vmem:[#allocation5 + $0x3f8] sm:$0xff]  ;;  %v4354_v12 = vld [vmem:[#allocation5] sm:$0xff] }
 0x13e   :  { %1129 = vmatprep.subr.mxu1 %v5712_v25  ;;  %1200 = vmatprep.subr.mxu0 %v893_v28  ;;  %10218 = vst [vmem:[#allocation21_spill] sm:$0xff] %v5733_v19  ;;  %v5736_v28 = vld [vmem:[#allocation5 + $0x3f0] sm:$0xff] }
 0x13f   :  { %1130 = vmatpush2.msra.mxu1 %v5715_v32  ;;  %1201 = vmatpush2.msra.mxu0 %v892_v36  ;;  %10219 = vst [vmem:[#allocation22_spill] sm:$0xff] %v5736_v28  ;;  %v5740_v36 = vld [vmem:[#allocation5 + $0x3b8] sm:$0xff] }
 0x140   :  { %1131 = vmatprep.subr.mxu1 %v5718_v40  ;;  %1202 = vmatprep.subr.mxu0 %v885_v44  ;;  %10220 = vst [vmem:[#allocation23_spill] sm:$0xff] %v5740_v36  ;;  %v5743_v44 = vld [vmem:[#allocation5 + $0x3b0] sm:$0xff]  ;;  %v5844_v32 = vld [vmem:[#allocation5 + $0x7f8] sm:$0xff] }
 0x141   :  { %1132 = vmatpush2.msra.mxu1 %v5721_v48  ;;  %1203 = vmatpush2.msra.mxu0 %v884_v20  ;;  %10221 = vst [vmem:[#allocation24_spill] sm:$0xff] %v5743_v44  ;;  %v5747_v20 = vld [vmem:[#allocation5 + $0x378] sm:$0xff]  ;;  %v4346_v48 = vld [vmem:[#allocation5 + $0x100] sm:$0xff]  ;;  %v5838_v40 = vld [vmem:[#allocation5 + $0x30] sm:$0xff] }
 0x142   :  { %1133 = vmatprep.subr.mxu1 %v5724_v54  ;;  %1204 = vmatprep.subr.mxu0 %v877_v57  ;;  %10222 = vst [vmem:[#allocation25_spill] sm:$0xff] %v5747_v20  ;;  %v4323_v57 = vld [vmem:[#allocation5 + $0x3c8] sm:$0xff]  ;;  %v10241_v54 = vlaneseq  ;;  %10250 = vst [vmem:[#allocation52_spill] sm:$0xff] %v5838_v40 }
 0x143   :  { %1134 = vmatpush2.msra.mxu1 %v5727_v24  ;;  %1135 = vmatprep.mubr.f32.mxu1 %v9608_v1  ;;  %v5753_v24 = vld [vmem:[#allocation5 + $0x338] sm:$0xff]  ;;  %10251 = vst [vmem:[#allocation53_spill] sm:$0xff] %v5844_v32 }
 0x144   :  { %1205 = vmatpush2.msra.mxu0 %v876_v8  ;;  %1206 = vmatprep.mubr.f32.mxu0 %v9608_v1  ;;  %v5750_v8 = vld [vmem:[#allocation5 + $0x370] sm:$0xff]  ;;  %10224 = vst [vmem:[#allocation27_spill] sm:$0xff] %v5753_v24 }
 0x145   :  { %1136 = vmatmul.mubr.f32.vlgmr.msra.gmra.mxu1 %v9608_v1  ;;  %1207 = vmatmul.mubr.f32.vlgmr.msra.gmra.mxu0 %v9608_v1  ;;  %10223 = vst [vmem:[#allocation26_spill] sm:$0xff] %v5750_v8 }
 0x146   :  { %1213 = vmatprep.subr.mxu1 %v5733_v19  ;;  %1277 = vmatprep.mubr.f32.mxu1 %v9608_v1  ;;  %v4325_v19 = vld [vmem:[#allocation5 + $0x388] sm:$0xff]  ;;  %v5756_v1 = vld [vmem:[#allocation5 + $0x330] sm:$0xff] }
 0x147   :  { %1214 = vmatpush1.msra.mxu1 %v5736_v28  ;;  %1342 = vmatprep.subr.mxu0 %v4323_v57  ;;  %10225 = vst [vmem:[#allocation28_spill] sm:$0xff] %v5756_v1  ;;  %v4326_v28 = vld [vmem:[#allocation5 + $0x380] sm:$0xff]  ;;  %v5759_v57 = vld [vmem:[#allocation5 + $0x2f8] sm:$0xff] }
 0x148   :  { %1215 = vmatprep.subr.mxu1 %v5740_v36  ;;  %1343 = vmatpush1.msra.mxu0 %v4324_v13  ;;  %10226 = vst [vmem:[#allocation29_spill] sm:$0xff] %v5759_v57  ;;  %v4327_v36 = vld [vmem:[#allocation5 + $0x348] sm:$0xff]  ;;  %v5762_v13 = vld [vmem:[#allocation5 + $0x2f0] sm:$0xff] }
 0x149   :  { %1216 = vmatpush1.msra.mxu1 %v5743_v44  ;;  %1344 = vmatprep.subr.mxu0 %v4325_v19  ;;  %10227 = vst [vmem:[#allocation30_spill] sm:$0xff] %v5762_v13  ;;  %v4328_v44 = vld [vmem:[#allocation5 + $0x340] sm:$0xff]  ;;  %v5765_v19 = vld [vmem:[#allocation5 + $0x2b8] sm:$0xff] }
 0x14a   :  { %1217 = vmatprep.subr.mxu1 %v5747_v20  ;;  %1345 = vmatpush1.msra.mxu0 %v4326_v28  ;;  %10228 = vst [vmem:[#allocation31_spill] sm:$0xff] %v5765_v19  ;;  %v4329_v20 = vld [vmem:[#allocation5 + $0x308] sm:$0xff]  ;;  %v5768_v28 = vld [vmem:[#allocation5 + $0x2b0] sm:$0xff] }
 0x14b   :  { %1218 = vmatpush1.msra.mxu1 %v5750_v8  ;;  %1346 = vmatprep.subr.mxu0 %v4327_v36  ;;  %10229 = vst [vmem:[#allocation32_spill] sm:$0xff] %v5768_v28  ;;  %v4330_v8 = vld [vmem:[#allocation5 + $0x300] sm:$0xff]  ;;  %v5771_v36 = vld [vmem:[#allocation5 + $0x278] sm:$0xff] }
 0x14c   :  { %1219 = vmatprep.subr.mxu1 %v5753_v24  ;;  %1347 = vmatpush1.msra.mxu0 %v4328_v44  ;;  %10230 = vst [vmem:[#allocation33_spill] sm:$0xff] %v5771_v36  ;;  %v4331_v24 = vld [vmem:[#allocation5 + $0x2c8] sm:$0xff]  ;;  %v5774_v44 = vld [vmem:[#allocation5 + $0x270] sm:$0xff] }
 0x14d   :  { %1220 = vmatpush1.msra.mxu1 %v5756_v1  ;;  %1348 = vmatprep.subr.mxu0 %v4329_v20  ;;  %10231 = vst [vmem:[#allocation34_spill] sm:$0xff] %v5774_v44  ;;  %v4332_v1 = vld [vmem:[#allocation5 + $0x2c0] sm:$0xff]  ;;  %v5777_v20 = vld [vmem:[#allocation5 + $0x238] sm:$0xff] }
 0x14e   :  { %1221 = vmatprep.subr.mxu1 %v5759_v57  ;;  %1349 = vmatpush1.msra.mxu0 %v4330_v8  ;;  %10232 = vst [vmem:[#allocation35_spill] sm:$0xff] %v5777_v20  ;;  %v4333_v57 = vld [vmem:[#allocation5 + $0x288] sm:$0xff]  ;;  %v5780_v8 = vld [vmem:[#allocation5 + $0x230] sm:$0xff] }
 0x14f   :  { %1222 = vmatpush1.msra.mxu1 %v5762_v13  ;;  %1350 = vmatprep.subr.mxu0 %v4331_v24  ;;  %10233 = vst [vmem:[#allocation36_spill] sm:$0xff] %v5780_v8  ;;  %v4334_v13 = vld [vmem:[#allocation5 + $0x280] sm:$0xff]  ;;  %v5783_v24 = vld [vmem:[#allocation5 + $0x1f8] sm:$0xff] }
 0x150   :  { %1223 = vmatprep.subr.mxu1 %v5765_v19  ;;  %1351 = vmatpush1.msra.mxu0 %v4332_v1  ;;  %10234 = vst [vmem:[#allocation37_spill] sm:$0xff] %v5783_v24  ;;  %v4335_v19 = vld [vmem:[#allocation5 + $0x248] sm:$0xff]  ;;  %v5786_v1 = vld [vmem:[#allocation5 + $0x1f0] sm:$0xff] }
 0x151   :  { %1224 = vmatpush1.msra.mxu1 %v5768_v28  ;;  %1352 = vmatprep.subr.mxu0 %v4333_v57  ;;  %10235 = vst [vmem:[#allocation38_spill] sm:$0xff] %v5786_v1  ;;  %v4336_v28 = vld [vmem:[#allocation5 + $0x240] sm:$0xff]  ;;  %v5789_v57 = vld [vmem:[#allocation5 + $0x1b8] sm:$0xff] }
 0x152   :  { %1225 = vmatprep.subr.mxu1 %v5771_v36  ;;  %1353 = vmatpush1.msra.mxu0 %v4334_v13  ;;  %10236 = vst [vmem:[#allocation39_spill] sm:$0xff] %v5789_v57  ;;  %v4337_v36 = vld [vmem:[#allocation5 + $0x208] sm:$0xff]  ;;  %v5792_v13 = vld [vmem:[#allocation5 + $0x1b0] sm:$0xff] }
 0x153   :  { %1226 = vmatpush1.msra.mxu1 %v5774_v44  ;;  %1354 = vmatprep.subr.mxu0 %v4335_v19  ;;  %10237 = vst [vmem:[#allocation40_spill] sm:$0xff] %v5792_v13  ;;  %v4338_v44 = vld [vmem:[#allocation5 + $0x200] sm:$0xff]  ;;  %v5795_v19 = vld [vmem:[#allocation5 + $0x178] sm:$0xff] }
 0x154   :  { %1227 = vmatprep.subr.mxu1 %v5777_v20  ;;  %1355 = vmatpush1.msra.mxu0 %v4336_v28  ;;  %10238 = vst [vmem:[#allocation41_spill] sm:$0xff] %v5795_v19  ;;  %v4339_v20 = vld [vmem:[#allocation5 + $0x1c8] sm:$0xff]  ;;  %v5798_v28 = vld [vmem:[#allocation5 + $0x170] sm:$0xff] }
 0x155   :  { %1228 = vmatpush1.msra.mxu1 %v5780_v8  ;;  %1356 = vmatprep.subr.mxu0 %v4337_v36  ;;  %10239 = vst [vmem:[#allocation42_spill] sm:$0xff] %v5798_v28  ;;  %v4340_v8 = vld [vmem:[#allocation5 + $0x1c0] sm:$0xff]  ;;  %v5801_v36 = vld [vmem:[#allocation5 + $0x138] sm:$0xff] }
 0x156   :  { %1229 = vmatprep.subr.mxu1 %v5783_v24  ;;  %1357 = vmatpush1.msra.mxu0 %v4338_v44  ;;  %10240 = vst [vmem:[#allocation43_spill] sm:$0xff] %v5801_v36  ;;  %v4341_v24 = vld [vmem:[#allocation5 + $0x188] sm:$0xff]  ;;  %v5804_v44 = vshrl.u32 %v10241_v54, 7  ;;  %v5816_v54 = vld [vmem:[#allocation5 + $0xb8] sm:$0xff] }
 0x157   :  { %1230 = vmatpush1.msra.mxu1 %v5786_v1  ;;  %1358 = vmatprep.subr.mxu0 %v4339_v20  ;;  %v5807_v1 = vld [vmem:[#allocation5 + $0x130] sm:$0xff]  ;;  %v4342_v20 = vld [vmem:[#allocation5 + $0x180] sm:$0xff]  ;;  %10245 = vst [vmem:[#allocation47_spill] sm:$0xff] %v5816_v54 }
 0x158   :  { %1231 = vmatprep.subr.mxu1 %v5789_v57  ;;  %1359 = vmatpush1.msra.mxu0 %v4340_v8  ;;  %10242 = vst [vmem:[#allocation44_spill] sm:$0xff] %v5807_v1  ;;  %v5810_v57 = vld [vmem:[#allocation5 + $0xf8] sm:$0xff]  ;;  %v4343_v8 = vld [vmem:[#allocation5 + $0x148] sm:$0xff] }
 0x159   :  { %1232 = vmatpush1.msra.mxu1 %v5792_v13  ;;  %1360 = vmatprep.subr.mxu0 %v4341_v24  ;;  %10243 = vst [vmem:[#allocation45_spill] sm:$0xff] %v5810_v57  ;;  %v5813_v13 = vld [vmem:[#allocation5 + $0xf0] sm:$0xff]  ;;  %v4344_v24 = vld [vmem:[#allocation5 + $0x140] sm:$0xff] }
 0x15a   :  { %1233 = vmatprep.subr.mxu1 %v5795_v19  ;;  %1361 = vmatpush1.msra.mxu0 %v4342_v20  ;;  %10244 = vst [vmem:[#allocation46_spill] sm:$0xff] %v5813_v13  ;;  %v4345_v19 = vld [vmem:[#allocation5 + $0x108] sm:$0xff]  ;;  %v5819_v20 = vld [vmem:[#allocation5 + $0xb0] sm:$0xff] }
 0x15b   :  { %1234 = vmatpush1.msra.mxu1 %v5798_v28  ;;  %1362 = vmatprep.subr.mxu0 %v4343_v8  ;;  %10246 = vst [vmem:[#allocation48_spill] sm:$0xff] %v5819_v20  ;;  %v254_v28 = vsub.s32 0, %v5804_v44  ;;  %v5823_v8 = vld [vmem:[#allocation5 + $0x78] sm:$0xff] }
 0x15c   :  { %1235 = vmatprep.subr.mxu1 %v5801_v36  ;;  %1363 = vmatpush1.msra.mxu0 %v4344_v24  ;;  %10247 = vst [vmem:[#allocation49_spill] sm:$0xff] %v5823_v8  ;;  %v5828_v24 = vld [vmem:[%s9601_s3] sm:$0xff] }
 0x15d   :  { %1236 = vmatpush1.msra.mxu1 %v5807_v1  ;;  %1364 = vmatprep.subr.mxu0 %v4345_v19  ;;  %v4347_v1 = vld [vmem:[#allocation5 + $0xc8] sm:$0xff]  ;;  %v5831_v19 = vld [vmem:[#allocation5 + $0x70] sm:$0xff]  ;;  %v4348_v36 = vld [vmem:[#allocation5 + $0xc0] sm:$0xff] }
 0x15e   :  { %1237 = vmatprep.subr.mxu1 %v5810_v57  ;;  %1365 = vmatpush1.msra.mxu0 %v4346_v48  ;;  %10248 = vst [vmem:[#allocation50_spill] sm:$0xff] %v5831_v19  ;;  %v258_v57 = vsub.s32 1, %v5804_v44  ;;  %v5835_v48 = vld [vmem:[#allocation5 + $0x38] sm:$0xff] }
 0x15f   :  { %1238 = vmatpush1.msra.mxu1 %v5813_v13  ;;  %1366 = vmatprep.subr.mxu0 %v4347_v1  ;;  %10249 = vst [vmem:[#allocation51_spill] sm:$0xff] %v5835_v48  ;;  %v4349_v13 = vld [vmem:[#allocation5 + $0x88] sm:$0xff]  ;;  %v5841_v1 = vrot.slane %v5828_v24, %v254_v28  ;;  %v5853_v28 = vld [vmem:[#allocation5 + $0x7b8] sm:$0xff] }
 0x160   :  { %1239 = vmatprep.subr.mxu1 %v5816_v54  ;;  %1367 = vmatpush1.msra.mxu0 %v4348_v36  ;;  %v4350_v54 = vld [vmem:[#allocation5 + $0x80] sm:$0xff]  ;;  %v4351_v36 = vld [vmem:[#allocation5 + $0x48] sm:$0xff]  ;;  %10253 = vst [vmem:[#allocation55_spill] sm:$0xff] %v5853_v28 }
 0x161   :  { %1240 = vmatpush1.msra.mxu1 %v5819_v20  ;;  %1368 = vmatprep.subr.mxu0 %v4349_v13  ;;  %v5847_v20 = vld [vmem:[#allocation5 + $0x7f0] sm:$0xff]  ;;  %v5850_v13 = vrot.slane %v5828_v24, %v258_v57  ;;  %v270_v57 = vsub.s32 4, %v5804_v44 }
 0x162   :  { %1241 = vmatprep.subr.mxu1 %v5823_v8  ;;  %1369 = vmatpush1.msra.mxu0 %v4350_v54  ;;  %10252 = vst [vmem:[#allocation54_spill] sm:$0xff] %v5847_v20  ;;  %v4352_v8 = vld [vmem:[#allocation5 + $0x40] sm:$0xff] }
 0x163   :  { %1242 = vmatpush1.msra.mxu1 %v5831_v19  ;;  %1370 = vmatprep.subr.mxu0 %v4351_v36  ;;  %v4353_v19 = vld [vmem:[#allocation5 + $0x8] sm:$0xff]  ;;  %v5858_v36 = vld [vmem:[#allocation5 + $0x7b0] sm:$0xff] }
 0x164   :  { %1243 = vmatprep.subr.mxu1 %v5835_v48  ;;  %1371 = vmatpush1.msra.mxu0 %v4352_v8  ;;  %10255 = vst [vmem:[#allocation57_spill] sm:$0xff] %v5858_v36  ;;  %v5865_v8 = vld [vmem:[#allocation5 + $0x778] sm:$0xff] }
 0x165   :  { %1244 = vmatpush1.msra.mxu1 %v5838_v40  ;;  %v358_v54 = vpop.f32.mrf.mxu1  ;;  %v5855_v25 = vpop.f32.mrf.mxu0  ;;  %1372 = vmatprep.subr.mxu0 %v4353_v19  ;;  %10257 = vst [vmem:[#allocation59_spill] sm:$0xff] %v5865_v8  ;;  %v5870_v19 = vld [vmem:[#allocation5 + $0x770] sm:$0xff] }
 0x166   :  { %10254 = vst [vmem:[#allocation56_spill] sm:$0xff] %v5855_v25  ;;  %1245 = vmatprep.subr.mxu1 %v5844_v32  ;;  %v5861_v48 = vadd.f32 %v358_v54, %v5841_v1  ;;  %1373 = vmatpush1.msra.mxu0 %v4354_v12  ;;  %v4355_v25 = vld [vmem:[#allocation5 + $0x7c8] sm:$0xff]  ;;  %10259 = vst [vmem:[#allocation61_spill] sm:$0xff] %v5870_v19  ;;  %v274_v32 = vsub.s32 5, %v5804_v44  ;;  %v5877_v12 = vld [vmem:[#allocation5 + $0x738] sm:$0xff] }
 0x167   :  { %1246 = vmatpush2.msra.mxu1 %v5847_v20  ;;  %v360_v40 = vpop.f32.mrf.mxu1  ;;  %v5867_v4 = vpop.f32.mrf.mxu0  ;;  %1374 = vmatprep.subr.mxu0 %v4355_v25  ;;  %10261 = vst [vmem:[#allocation63_spill] sm:$0xff] %v5877_v12  ;;  %v4357_v20 = vld [vmem:[#allocation5 + $0x788] sm:$0xff]  ;;  %v5880_v25 = vld [vmem:[#allocation5 + $0x730] sm:$0xff] }
 0x168   :  { %10256 = vst [vmem:[#allocation58_spill] sm:$0xff] %v5861_v48  ;;  %10258 = vst [vmem:[#allocation60_spill] sm:$0xff] %v5867_v4  ;;  %1247 = vmatprep.subr.mxu1 %v5853_v28  ;;  %v5873_v54 = vadd.f32 %v360_v40, %v5850_v13  ;;  %v4356_v48 = vld [vmem:[#allocation5 + $0x7c0] sm:$0xff]  ;;  %v5883_v28 = vrot.slane %v5828_v24, %v270_v57  ;;  %v5886_v40 = vld [vmem:[#allocation5 + $0x6f8] sm:$0xff] }
 0x169   :  { %1375 = vmatpush2.msra.mxu0 %v4356_v48  ;;  %1248 = vmatpush2.msra.mxu1 %v5858_v36  ;;  %10262 = vst [vmem:[#allocation64_spill] sm:$0xff] %v5880_v25  ;;  %v4358_v4 = vld [vmem:[#allocation5 + $0x780] sm:$0xff]  ;;  %10263 = vst [vmem:[#allocation65_spill] sm:$0xff] %v5886_v40  ;;  %v4359_v36 = vld [vmem:[#allocation5 + $0x748] sm:$0xff] }
 0x16a   :  { %10260 = vst [vmem:[#allocation62_spill] sm:$0xff] %v5873_v54  ;;  %1376 = vmatprep.subr.mxu0 %v4357_v20  ;;  %1249 = vmatprep.subr.mxu1 %v5865_v8  ;;  %v5889_v20 = vld [vmem:[#allocation5 + $0x6f0] sm:$0xff]  ;;  %v5892_v8 = vrot.slane %v5828_v24, %v274_v32 }
 0x16b   :  { %1377 = vmatpush2.msra.mxu0 %v4358_v4  ;;  %1250 = vmatpush2.msra.mxu1 %v5870_v19  ;;  %v364_v48 = vpop.f32.mrf.mxu1  ;;  %v590_v54 = vpop.f32.mrf.mxu0  ;;  %10264 = vst [vmem:[#allocation66_spill] sm:$0xff] %v5889_v20  ;;  %v4360_v19 = vld [vmem:[#allocation5 + $0x740] sm:$0xff]  ;;  %v5904_v32 = vld [vmem:[#allocation5 + $0x6b0] sm:$0xff] }
 0x16c   :  { %1378 = vmatprep.subr.mxu0 %v4359_v36  ;;  %1251 = vmatprep.subr.mxu1 %v5877_v12  ;;  %v5895_v57 = vadd.f32 %v364_v48, %v5841_v1  ;;  %v5898_v4 = vadd.f32 %v590_v54, %v5883_v28  ;;  %v4361_v12 = vld [vmem:[#allocation5 + $0x708] sm:$0xff]  ;;  %10268 = vst [vmem:[#allocation70_spill] sm:$0xff] %v5904_v32 }
 0x16d   :  { %1379 = vmatpush2.msra.mxu0 %v4360_v19  ;;  %1252 = vmatpush2.msra.mxu1 %v5880_v25  ;;  %v366_v36 = vpop.f32.mrf.mxu1  ;;  %v592_v56 = vpop.f32.mrf.mxu0  ;;  %v5913_v19 = vld [vmem:[#allocation5 + $0x678] sm:$0xff] }
 0x16e   :  { %10265 = vst [vmem:[#allocation67_spill] sm:$0xff] %v5895_v57  ;;  %10266 = vst [vmem:[#allocation68_spill] sm:$0xff] %v5898_v4  ;;  %1380 = vmatprep.subr.mxu0 %v4361_v12  ;;  %1253 = vmatprep.subr.mxu1 %v5886_v40  ;;  %v5907_v48 = vadd.f32 %v366_v36, %v5850_v13  ;;  %v5910_v54 = vadd.f32 %v592_v56, %v5892_v8  ;;  %v4362_v4 = vld [vmem:[#allocation5 + $0x700] sm:$0xff]  ;;  %v4363_v57 = vld [vmem:[#allocation5 + $0x6c8] sm:$0xff] }
 0x16f   :  { %1381 = vmatpush2.msra.mxu0 %v4362_v4  ;;  %1254 = vmatpush2.msra.mxu1 %v5889_v20  ;;  %10271 = vst [vmem:[#allocation73_spill] sm:$0xff] %v5913_v19  ;;  %v5916_v12 = vld [vmem:[#allocation5 + $0x670] sm:$0xff]  ;;  %v4364_v40 = vld [vmem:[#allocation5 + $0x6c0] sm:$0xff]  ;;  %v5919_v36 = vld [vmem:[#allocation5 + $0x638] sm:$0xff] }
 0x170   :  { %10269 = vst [vmem:[#allocation71_spill] sm:$0xff] %v5907_v48  ;;  %10270 = vst [vmem:[#allocation72_spill] sm:$0xff] %v5910_v54  ;;  %1382 = vmatprep.subr.mxu0 %v4363_v57  ;;  %1255 = vmatprep.subr.mxu1 %v5901_v59  ;;  %v4365_v48 = vld [vmem:[#allocation5 + $0x688] sm:$0xff]  ;;  %v5922_v4 = vld [vmem:[#allocation5 + $0x630] sm:$0xff] }
 0x171   :  { %10272 = vst [vmem:[#allocation74_spill] sm:$0xff] %v5916_v12  ;;  %1383 = vmatpush2.msra.mxu0 %v4364_v40  ;;  %1256 = vmatpush2.msra.mxu1 %v5904_v32  ;;  %10273 = vst [vmem:[#allocation75_spill] sm:$0xff] %v5919_v36  ;;  %v370_v56 = vpop.f32.mrf.mxu1  ;;  %v596_v54 = vpop.f32.mrf.mxu0  ;;  %v4366_v20 = vld [vmem:[#allocation5 + $0x680] sm:$0xff]  ;;  %v5931_v40 = vld [vmem:[#allocation5 + $0x5f8] sm:$0xff] }
 0x172   :  { %1384 = vmatprep.subr.mxu0 %v4365_v48  ;;  %1257 = vmatprep.subr.mxu1 %v5913_v19  ;;  %10274 = vst [vmem:[#allocation76_spill] sm:$0xff] %v5922_v4  ;;  %v5925_v57 = vadd.f32 %v370_v56, %v5841_v1  ;;  %v5928_v59 = vadd.f32 %v596_v54, %v5883_v28  ;;  %10277 = vst [vmem:[#allocation79_spill] sm:$0xff] %v5931_v40  ;;  %v5934_v48 = vld [vmem:[#allocation5 + $0x5f0] sm:$0xff]  ;;  %v4373_v19 = vld [vmem:[#allocation5 + $0x588] sm:$0xff] }
 0x173   :  { %1385 = vmatpush2.msra.mxu0 %v4366_v20  ;;  %1258 = vmatpush2.msra.mxu1 %v5916_v12  ;;  %v372_v32 = vpop.f32.mrf.mxu1  ;;  %v598_v25 = vpop.f32.mrf.mxu0  ;;  %10278 = vst [vmem:[#allocation80_spill] sm:$0xff] %v5934_v48  ;;  %v5943_v20 = vld [vmem:[#allocation5 + $0x5b8] sm:$0xff] }
 0x174   :  { %10275 = vst [vmem:[#allocation77_spill] sm:$0xff] %v5925_v57  ;;  %10276 = vst [vmem:[#allocation78_spill] sm:$0xff] %v5928_v59  ;;  %1386 = vmatprep.subr.mxu0 %v4367_v52  ;;  %1259 = vmatprep.subr.mxu1 %v5919_v36  ;;  %v5937_v56 = vadd.f32 %v372_v32, %v5850_v13  ;;  %v5940_v54 = vadd.f32 %v598_v25, %v5892_v8  ;;  %v4368_v59 = vld [vmem:[#allocation5 + $0x640] sm:$0xff]  ;;  %v4369_v57 = vld [vmem:[#allocation5 + $0x608] sm:$0xff] }
 0x175   :  { %1387 = vmatpush2.msra.mxu0 %v4368_v59  ;;  %1260 = vmatpush2.msra.mxu1 %v5922_v4  ;;  %v5946_v52 = vld [vmem:[#allocation5 + $0x5b0] sm:$0xff]  ;;  %v4370_v36 = vld [vmem:[#allocation5 + $0x600] sm:$0xff]  ;;  %v5949_v32 = vld [vmem:[#allocation5 + $0x578] sm:$0xff] }
 0x176   :  { %10279 = vst [vmem:[#allocation81_spill] sm:$0xff] %v5937_v56  ;;  %10280 = vst [vmem:[#allocation82_spill] sm:$0xff] %v5940_v54  ;;  %1388 = vmatprep.subr.mxu0 %v4369_v57  ;;  %1261 = vmatprep.subr.mxu1 %v5931_v40  ;;  %v4371_v56 = vld [vmem:[#allocation5 + $0x5c8] sm:$0xff]  ;;  %v5952_v59 = vld [vmem:[#allocation5 + $0x570] sm:$0xff] }
 0x177   :  { %10281 = vst [vmem:[#allocation83_spill] sm:$0xff] %v5946_v52  ;;  %1389 = vmatpush2.msra.mxu0 %v4370_v36  ;;  %1262 = vmatpush2.msra.mxu1 %v5934_v48  ;;  %10282 = vst [vmem:[#allocation84_spill] sm:$0xff] %v5949_v32  ;;  %v376_v25 = vpop.f32.mrf.mxu1  ;;  %v602_v54 = vpop.f32.mrf.mxu0  ;;  %v4372_v4 = vld [vmem:[#allocation5 + $0x5c0] sm:$0xff]  ;;  %v5961_v36 = vld [vmem:[#allocation5 + $0x538] sm:$0xff] }
 0x178   :  { %1390 = vmatprep.subr.mxu0 %v4371_v56  ;;  %1263 = vmatprep.subr.mxu1 %v5943_v20  ;;  %10283 = vst [vmem:[#allocation85_spill] sm:$0xff] %v5952_v59  ;;  %v5955_v57 = vadd.f32 %v376_v25, %v5841_v1  ;;  %v5958_v40 = vadd.f32 %v602_v54, %v5883_v28  ;;  %10286 = vst [vmem:[#allocation88_spill] sm:$0xff] %v5961_v36  ;;  %v5964_v56 = vld [vmem:[#allocation5 + $0x530] sm:$0xff] }
 0x179   :  { %1391 = vmatpush2.msra.mxu0 %v4372_v4  ;;  %1264 = vmatpush2.msra.mxu1 %v5946_v52  ;;  %v378_v48 = vpop.f32.mrf.mxu1  ;;  %v604_v12 = vpop.f32.mrf.mxu0  ;;  %10287 = vst [vmem:[#allocation89_spill] sm:$0xff] %v5964_v56  ;;  %v5976_v4 = vld [vmem:[#allocation5 + $0x4f8] sm:$0xff]  ;;  %v6008_v52 = vld [vmem:[#allocation5 + $0x4c8] sm:$0xff] }
 0x17a   :  { %10284 = vst [vmem:[#allocation86_spill] sm:$0xff] %v5955_v57  ;;  %10285 = vst [vmem:[#allocation87_spill] sm:$0xff] %v5958_v40  ;;  %1392 = vmatprep.subr.mxu0 %v4373_v19  ;;  %1265 = vmatprep.subr.mxu1 %v5949_v32  ;;  %v5967_v25 = vadd.f32 %v378_v48, %v5850_v13  ;;  %v5970_v54 = vadd.f32 %v604_v12, %v5892_v8  ;;  %v5972_v40 = vld [vmem:[#allocation5 + $0x580] sm:$0xff]  ;;  %v5978_v57 = vld [vmem:[#allocation5 + $0x548] sm:$0xff] }
 0x17b   :  { %10290 = vst [vmem:[#allocation92_spill] sm:$0xff] %v5972_v40  ;;  %1393 = vmatpush2.msra.mxu0 %v5972_v40  ;;  %1266 = vmatpush2.msra.mxu1 %v5952_v59  ;;  %10291 = vst [vmem:[#allocation93_spill] sm:$0xff] %v5978_v57  ;;  %v5982_v19 = vld [vmem:[#allocation5 + $0x4f0] sm:$0xff]  ;;  %v5984_v48 = vld [vmem:[#allocation5 + $0x540] sm:$0xff] }
 0x17c   :  { %10288 = vst [vmem:[#allocation90_spill] sm:$0xff] %v5967_v25  ;;  %10289 = vst [vmem:[#allocation91_spill] sm:$0xff] %v5970_v54  ;;  %1394 = vmatprep.subr.mxu0 %v5978_v57  ;;  %1267 = vmatprep.subr.mxu1 %v5961_v36  ;;  %v5988_v12 = vld [vmem:[#allocation5 + $0x4b8] sm:$0xff]  ;;  %v5990_v40 = vld [vmem:[#allocation5 + $0x508] sm:$0xff] }
 0x17d   :  { %10292 = vst [vmem:[#allocation94_spill] sm:$0xff] %v5982_v19  ;;  %10293 = vst [vmem:[#allocation95_spill] sm:$0xff] %v5984_v48  ;;  %1395 = vmatpush2.msra.mxu0 %v5984_v48  ;;  %1268 = vmatpush2.msra.mxu1 %v5964_v56  ;;  %v382_v54 = vpop.f32.mrf.mxu1  ;;  %v608_v25 = vpop.f32.mrf.mxu0  ;;  %v5994_v57 = vld [vmem:[#allocation5 + $0x4b0] sm:$0xff]  ;;  %v6002_v48 = vld [vmem:[#allocation5 + $0x500] sm:$0xff] }
 0x17e   :  { %10294 = vst [vmem:[#allocation96_spill] sm:$0xff] %v5990_v40  ;;  %1396 = vmatprep.subr.mxu0 %v5990_v40  ;;  %1269 = vmatprep.subr.mxu1 %v5976_v4  ;;  %10295 = vst [vmem:[#allocation97_spill] sm:$0xff] %v5994_v57  ;;  %v5997_v36 = vadd.f32 %v382_v54, %v5841_v1  ;;  %v6000_v59 = vadd.f32 %v608_v25, %v5883_v28  ;;  %v6006_v56 = vld [vmem:[#allocation5 + $0x478] sm:$0xff]  ;;  %v6012_v54 = vld [vmem:[#allocation5 + $0x470] sm:$0xff] }
 0x17f   :  { %10298 = vst [vmem:[#allocation100_spill] sm:$0xff] %v6002_v48  ;;  %1397 = vmatpush2.msra.mxu0 %v6002_v48  ;;  %1270 = vmatpush2.msra.mxu1 %v5982_v19  ;;  %10299 = vst [vmem:[#allocation101_spill] sm:$0xff] %v6006_v56  ;;  %v384_v32 = vpop.f32.mrf.mxu1  ;;  %v610_v40 = vpop.f32.mrf.mxu0  ;;  %v6024_v48 = vld [vmem:[#allocation5 + $0x438] sm:$0xff]  ;;  %v6026_v19 = vld [vmem:[#allocation5 + $0x488] sm:$0xff] }
 0x180   :  { %10296 = vst [vmem:[#allocation98_spill] sm:$0xff] %v5997_v36  ;;  %10297 = vst [vmem:[#allocation99_spill] sm:$0xff] %v6000_v59  ;;  %1398 = vmatprep.subr.mxu0 %v6008_v52  ;;  %1271 = vmatprep.subr.mxu1 %v5988_v12  ;;  %v6015_v25 = vadd.f32 %v384_v32, %v5850_v13  ;;  %v6018_v59 = vadd.f32 %v610_v40, %v5892_v8  ;;  %v6020_v36 = vld [vmem:[#allocation5 + $0x4c0] sm:$0xff] }
 0x181   :  { %10300 = vst [vmem:[#allocation102_spill] sm:$0xff] %v6008_v52  ;;  %10301 = vst [vmem:[#allocation103_spill] sm:$0xff] %v6012_v54  ;;  %1399 = vmatpush2.msra.mxu0 %v6020_v36  ;;  %1272 = vmatpush2.msra.mxu1 %v5994_v57  ;;  %v6030_v52 = vld [vmem:[#allocation5 + $0x430] sm:$0xff]  ;;  %v6032_v32 = vld [vmem:[#allocation5 + $0x480] sm:$0xff] }
 0x182   :  { %10302 = vst [vmem:[#allocation104_spill] sm:$0xff] %v6015_v25  ;;  %10303 = vst [vmem:[#allocation105_spill] sm:$0xff] %v6018_v59  ;;  %1400 = vmatprep.subr.mxu0 %v6026_v19  ;;  %1273 = vmatprep.subr.mxu1 %v6006_v56  ;;  %v6036_v25 = vld [vmem:[#allocation5 + $0x448] sm:$0xff]  ;;  %v6046_v56 = vld [vmem:[#allocation5 + $0x440] sm:$0xff] }
 0x183   :  { %10304 = vst [vmem:[#allocation106_spill] sm:$0xff] %v6020_v36  ;;  %10305 = vst [vmem:[#allocation107_spill] sm:$0xff] %v6026_v19  ;;  %1401 = vmatpush2.msra.mxu0 %v6032_v32  ;;  %1274 = vmatpush2.msra.mxu1 %v6012_v54  ;;  %v388_v40 = vpop.f32.mrf.mxu1  ;;  %v614_v59 = vpop.f32.mrf.mxu0  ;;  %v6050_v57 = vld [vmem:[#allocation5 + $0x408] sm:$0xff] }
 0x184   :  { %10306 = vst [vmem:[#allocation108_spill] sm:$0xff] %v6030_v52  ;;  %10307 = vst [vmem:[#allocation109_spill] sm:$0xff] %v6032_v32  ;;  %1402 = vmatprep.subr.mxu0 %v6036_v25  ;;  %1275 = vmatprep.subr.mxu1 %v6024_v48  ;;  %v6041_v19 = vadd.f32 %v388_v40, %v5841_v1  ;;  %v6044_v36 = vadd.f32 %v614_v59, %v5883_v28 }
 0x185   :  { %10308 = vst [vmem:[#allocation110_spill] sm:$0xff] %v6036_v25  ;;  %10311 = vst [vmem:[#allocation113_spill] sm:$0xff] %v6046_v56  ;;  %1403 = vmatpush2.msra.mxu0 %v6046_v56  ;;  %1276 = vmatpush2.msra.mxu1 %v6030_v52  ;;  %v390_v32 = vpop.f32.mrf.mxu1  ;;  %v616_v54 = vpop.f32.mrf.mxu0  ;;  %v10313_v25 = vmov 0.0   ;;  %v6066_v56 = vld [vmem:[#allocation5 + $0x400] sm:$0xff]  ;;  %v6087_v52 = vld [vmem:[#allocation5 + $0x350] sm:$0xff] }
 0x186   :  { %10309 = vst [vmem:[#allocation111_spill] sm:$0xff] %v6041_v19  ;;  %10310 = vst [vmem:[#allocation112_spill] sm:$0xff] %v6044_v36  ;;  %1404 = vmatprep.subr.mxu0 %v6050_v57  ;;  %1278 = vmatmul.mubr.f32.vlgmr.msra.gmra.mxu1 %v10313_v25  ;;  %v6055_v40 = vadd.f32 %v390_v32, %v5850_v13  ;;  %v6058_v59 = vadd.f32 %v616_v54, %v5892_v8  ;;  %v6060_v36 = vld [vmem:[#allocation5 + $0x3d8] sm:$0xff]  ;;  %v6063_v19 = vld [vmem:[#allocation5 + $0x3d0] sm:$0xff] }
 0x187   :  { %10312 = vst [vmem:[#allocation114_spill] sm:$0xff] %v6050_v57  ;;  %10316 = vst [vmem:[#allocation117_spill] sm:$0xff] %v6060_v36  ;;  %1413 = vmatprep.subr.mxu1 %v6060_v36  ;;  %1405 = vmatpush2.msra.mxu0 %v6066_v56  ;;  %v6069_v57 = vld [vmem:[#allocation5 + $0x398] sm:$0xff]  ;;  %v6072_v25 = vld [vmem:[#allocation5 + $0x3e8] sm:$0xff] }
 0x188   :  { %10314 = vst [vmem:[#allocation115_spill] sm:$0xff] %v6055_v40  ;;  %10315 = vst [vmem:[#allocation116_spill] sm:$0xff] %v6058_v59  ;;  %1414 = vmatpush1.msra.mxu1 %v6063_v19  ;;  %1484 = vmatprep.subr.mxu0 %v6072_v25  ;;  %v6075_v59 = vld [vmem:[#allocation5 + $0x390] sm:$0xff] }
 0x189   :  { %10317 = vst [vmem:[#allocation118_spill] sm:$0xff] %v6063_v19  ;;  %10318 = vst [vmem:[#allocation119_spill] sm:$0xff] %v6066_v56  ;;  %1415 = vmatprep.subr.mxu1 %v6069_v57  ;;  %v394_v54 = vpop.f32.mrf.mxu1  ;;  %v620_v32 = vpop.f32.mrf.mxu0  ;;  %v6084_v56 = vld [vmem:[#allocation5 + $0x358] sm:$0xff] }
 0x18a   :  { %10319 = vst [vmem:[#allocation120_spill] sm:$0xff] %v6069_v57  ;;  %10320 = vst [vmem:[#allocation121_spill] sm:$0xff] %v6072_v25  ;;  %1416 = vmatpush1.msra.mxu1 %v6075_v59  ;;  %v6079_v40 = vadd.f32 %v394_v54, %v5841_v1  ;;  %v6082_v19 = vadd.f32 %v620_v32, %v5883_v28  ;;  %v6096_v54 = vld [vmem:[#allocation5 + $0x318] sm:$0xff]  ;;  %v262_v32 = vsub.s32 2, %v5804_v44 }
 0x18b   :  { %10321 = vst [vmem:[#allocation122_spill] sm:$0xff] %v6075_v59  ;;  %1417 = vmatprep.subr.mxu1 %v6084_v56  ;;  %v396_v57 = vpop.f32.mrf.mxu1  ;;  %v622_v36 = vpop.f32.mrf.mxu0  ;;  %10324 = vst [vmem:[#allocation125_spill] sm:$0xff] %v6087_v52 }
 0x18c   :  { %10322 = vst [vmem:[#allocation123_spill] sm:$0xff] %v6079_v40  ;;  %10323 = vst [vmem:[#allocation124_spill] sm:$0xff] %v6082_v19  ;;  %1418 = vmatpush1.msra.mxu1 %v6087_v52  ;;  %v6091_v25 = vadd.f32 %v396_v57, %v5850_v13  ;;  %v6094_v59 = vadd.f32 %v622_v36, %v5892_v8  ;;  %v6100_v19 = vld [vmem:[#allocation5 + $0x310] sm:$0xff]  ;;  %v6103_v40 = vld [vmem:[#allocation5 + $0x2d8] sm:$0xff] }
 0x18d   :  { %10327 = vst [vmem:[#allocation128_spill] sm:$0xff] %v6096_v54  ;;  %1419 = vmatprep.subr.mxu1 %v6096_v54  ;;  %10328 = vst [vmem:[#allocation129_spill] sm:$0xff] %v6100_v19 }
 0x18e   :  { %10325 = vst [vmem:[#allocation126_spill] sm:$0xff] %v6091_v25  ;;  %10326 = vst [vmem:[#allocation127_spill] sm:$0xff] %v6094_v59  ;;  %1420 = vmatpush1.msra.mxu1 %v6100_v19  ;;  %v6115_v19 = vrot.slane %v5828_v24, %v262_v32 }
 0x18f   :  { %10329 = vst [vmem:[#allocation130_spill] sm:$0xff] %v6103_v40  ;;  %1421 = vmatprep.subr.mxu1 %v6103_v40  ;;  %v400_v52 = vpop.f32.mrf.mxu1  ;;  %v626_v57 = vpop.f32.mrf.mxu0 }
 0x190   :  { %1422 = vmatpush1.msra.mxu1 %v5537_v61  ;;  %v6108_v36 = vadd.f32 %v400_v52, %v5841_v1  ;;  %v6111_v59 = vadd.f32 %v626_v57, %v5883_v28  ;;  %v10355_v57 = vld [vmem:[#allocation19_spill] sm:$0xff] }
 0x191   :  { %1423 = vmatprep.subr.mxu1 %v5540_v63  ;;  %v402_v25 = vpop.f32.mrf.mxu1  ;;  %v628_v54 = vpop.f32.mrf.mxu0 }
 0x192   :  { %10330 = vst [vmem:[#allocation131_spill] sm:$0xff] %v6108_v36  ;;  %10331 = vst [vmem:[#allocation132_spill] sm:$0xff] %v6111_v59  ;;  %1424 = vmatpush1.msra.mxu1 %v5546_v0  ;;  %v6119_v40 = vadd.f32 %v402_v25, %v5850_v13  ;;  %v6122_v61 = vadd.f32 %v628_v54, %v5892_v8  ;;  %v266_v0 = vsub.s32 3, %v5804_v44  ;;  %v6399_v59 = vld [vmem:[#allocation5 + $0x120] sm:$0xff] }
 0x193   :  { %1425 = vmatprep.subr.mxu1 %v5549_v3  ;;  %v6415_v36 = vld [vmem:[#allocation5 + $0xa0] sm:$0xff] }
 0x194   :  { %10332 = vst [vmem:[#allocation133_spill] sm:$0xff] %v6119_v40  ;;  %10333 = vst [vmem:[#allocation134_spill] sm:$0xff] %v6122_v61  ;;  %1426 = vmatpush1.msra.mxu1 %v5553_v5  ;;  %v471_v1 = vpop.f32.mrf.mxu1  ;;  %v6139_v5 = vrot.slane %v5828_v24, %v266_v0  ;;  %v10356_v0 = vld [vmem:[#allocation20_spill] sm:$0xff]  ;;  %v6391_v61 = vld [vmem:[#allocation5 + $0x160] sm:$0xff] }
 0x195   :  { %1427 = vmatprep.subr.mxu1 %v5557_v33  ;;  %v6128_v63 = vadd.f32 %v471_v1, %v6115_v19  ;;  %v6407_v40 = vld [vmem:[#allocation5 + $0xe0] sm:$0xff] }
 0x196   :  { %1428 = vmatpush1.msra.mxu1 %v5563_v9  ;;  %v6132_v52 = vpop.f32.mrf.mxu1 }
 0x197   :  { %1429 = vmatprep.subr.mxu1 %v5566_v11 }
 0x198   :  { %1430 = vmatpush1.msra.mxu1 %v5570_v16 }
 0x199   :  { %1431 = vmatprep.subr.mxu1 %v5574_v43  ;;  %v477_v3 = vpop.f32.mrf.mxu1 }
 0x19a   :  { %1432 = vmatpush1.msra.mxu1 %v5580_v21  ;;  %v6142_v33 = vadd.f32 %v477_v3, %v6115_v19  ;;  %v10357_v3 = vld [vmem:[#allocation21_spill] sm:$0xff] }
 0x19b   :  { %1433 = vmatprep.subr.mxu1 %v5583_v23  ;;  %v479_v9 = vpop.f32.mrf.mxu1 }
 0x19c   :  { %1434 = vmatpush1.msra.mxu1 %v5587_v26  ;;  %v6147_v11 = vadd.f32 %v479_v9, %v6139_v5 }
 0x19d   :  { %1435 = vmatprep.subr.mxu1 %v5591_v51 }
 0x19e   :  { %1436 = vmatpush1.msra.mxu1 %v5597_v29  ;;  %v483_v16 = vpop.f32.mrf.mxu1 }
 0x19f   :  { %1437 = vmatprep.subr.mxu1 %v5600_v31  ;;  %v6153_v43 = vadd.f32 %v483_v16, %v6115_v19 }
 0x1a0   :  { %1438 = vmatpush1.msra.mxu1 %v5604_v34  ;;  %v485_v21 = vpop.f32.mrf.mxu1 }
 0x1a1   :  { %10334 = vst [vmem:[#allocation135_spill] sm:$0xff] %v6153_v43  ;;  %1439 = vmatprep.subr.mxu1 %v5608_v60  ;;  %v6158_v23 = vadd.f32 %v485_v21, %v6139_v5  ;;  %v6499_v43 = vld [vmem:[#allocation5 + $0x5e8] sm:$0xff] }
 0x1a2   :  { %1440 = vmatpush1.msra.mxu1 %v5614_v37 }
 0x1a3   :  { %10335 = vst [vmem:[#allocation136_spill] sm:$0xff] %v6158_v23  ;;  %1441 = vmatprep.subr.mxu1 %v5617_v39  ;;  %v489_v26 = vpop.f32.mrf.mxu1  ;;  %v6495_v23 = vld [vmem:[#allocation5 + $0x620] sm:$0xff] }
 0x1a4   :  { %1442 = vmatpush1.msra.mxu1 %v5621_v41  ;;  %v6164_v51 = vadd.f32 %v489_v26, %v6115_v19 }
 0x1a5   :  { %1443 = vmatprep.subr.mxu1 %v5625_v6  ;;  %v491_v29 = vpop.f32.mrf.mxu1 }
 0x1a6   :  { %10336 = vst [vmem:[#allocation137_spill] sm:$0xff] %v6164_v51  ;;  %1444 = vmatpush1.msra.mxu1 %v5631_v45  ;;  %v6169_v31 = vadd.f32 %v491_v29, %v6139_v5  ;;  %v6483_v51 = vld [vmem:[#allocation5 + $0x668] sm:$0xff] }
 0x1a7   :  { %1445 = vmatprep.subr.mxu1 %v5634_v47 }
 0x1a8   :  { %10337 = vst [vmem:[#allocation138_spill] sm:$0xff] %v6169_v31  ;;  %1446 = vmatpush2.msra.mxu1 %v5637_v49  ;;  %v495_v34 = vpop.f32.mrf.mxu1  ;;  %v6479_v31 = vld [vmem:[#allocation5 + $0x6a0] sm:$0xff] }
 0x1a9   :  { %1447 = vmatprep.subr.mxu1 %v5640_v14  ;;  %v6175_v60 = vadd.f32 %v495_v34, %v6115_v19 }
 0x1aa   :  { %1448 = vmatpush2.msra.mxu1 %v5643_v18  ;;  %v497_v37 = vpop.f32.mrf.mxu1 }
 0x1ab   :  { %10338 = vst [vmem:[#allocation139_spill] sm:$0xff] %v6175_v60  ;;  %1449 = vmatprep.subr.mxu1 %v5646_v53  ;;  %v6180_v39 = vadd.f32 %v497_v37, %v6139_v5  ;;  %v6467_v60 = vld [vmem:[#allocation5 + $0x6e8] sm:$0xff] }
 0x1ac   :  { %1450 = vmatpush2.msra.mxu1 %v5649_v55 }
 0x1ad   :  { %10339 = vst [vmem:[#allocation140_spill] sm:$0xff] %v6180_v39  ;;  %1451 = vmatprep.subr.mxu1 %v5652_v15  ;;  %v501_v41 = vpop.f32.mrf.mxu1  ;;  %v6463_v39 = vld [vmem:[#allocation5 + $0x720] sm:$0xff] }
 0x1ae   :  { %1452 = vmatpush2.msra.mxu1 %v5655_v58  ;;  %v6186_v6 = vadd.f32 %v501_v41, %v6115_v19 }
 0x1af   :  { %1453 = vmatprep.subr.mxu1 %v5658_v62  ;;  %v503_v45 = vpop.f32.mrf.mxu1 }
 0x1b0   :  { %10340 = vst [vmem:[#allocation141_spill] sm:$0xff] %v6186_v6  ;;  %1454 = vmatpush2.msra.mxu1 %v5661_v2  ;;  %v6191_v47 = vadd.f32 %v503_v45, %v6139_v5  ;;  %v10346_v2 = vld [vmem:[#allocation10_spill] sm:$0xff]  ;;  %v6451_v6 = vld [vmem:[#allocation5 + $0x768] sm:$0xff] }
 0x1b1   :  { %1455 = vmatprep.subr.mxu1 %v5664_v7  ;;  %v10347_v7 = vld [vmem:[#allocation11_spill] sm:$0xff] }
 0x1b2   :  { %10341 = vst [vmem:[#allocation142_spill] sm:$0xff] %v6191_v47  ;;  %1456 = vmatpush2.msra.mxu1 %v5667_v10  ;;  %v507_v49 = vpop.f32.mrf.mxu1  ;;  %v278_v10 = vsub.s32 6, %v5804_v44  ;;  %v6447_v47 = vld [vmem:[#allocation5 + $0x7a0] sm:$0xff] }
 0x1b3   :  { %1457 = vmatprep.subr.mxu1 %v5670_v17  ;;  %v6197_v14 = vadd.f32 %v507_v49, %v6115_v19 }
 0x1b4   :  { %1458 = vmatpush2.msra.mxu1 %v5673_v22  ;;  %v509_v18 = vpop.f32.mrf.mxu1  ;;  %v10348_v22 = vld [vmem:[#allocation12_spill] sm:$0xff] }
 0x1b5   :  { %10342 = vst [vmem:[#allocation143_spill] sm:$0xff] %v6197_v14  ;;  %1459 = vmatprep.subr.mxu1 %v5676_v27  ;;  %v6202_v53 = vadd.f32 %v509_v18, %v6139_v5  ;;  %v10349_v27 = vld [vmem:[#allocation13_spill] sm:$0xff]  ;;  %v6435_v14 = vld [vmem:[#allocation5 + $0x7e8] sm:$0xff] }
 0x1b6   :  { %1460 = vmatpush2.msra.mxu1 %v5679_v30  ;;  %v282_v30 = vsub.s32 7, %v5804_v44  ;;  %v10354_v44 = vld [vmem:[#allocation18_spill] sm:$0xff] }
 0x1b7   :  { %10343 = vst [vmem:[#allocation144_spill] sm:$0xff] %v6202_v53  ;;  %1461 = vmatprep.subr.mxu1 %v5682_v35  ;;  %v513_v55 = vpop.f32.mrf.mxu1  ;;  %v6431_v53 = vld [vmem:[#allocation5 + $0x20] sm:$0xff] }
 0x1b8   :  { %1462 = vmatpush2.msra.mxu1 %v5685_v38  ;;  %v6208_v15 = vadd.f32 %v513_v55, %v6115_v19  ;;  %v10350_v38 = vld [vmem:[#allocation14_spill] sm:$0xff]  ;;  %v10353_v19 = vld [vmem:[#allocation17_spill] sm:$0xff]  ;;  %v6234_v25 = vrot.slane %v5828_v24, %v282_v30 }
 0x1b9   :  { %1463 = vmatprep.subr.mxu1 %v5688_v42  ;;  %v515_v58 = vpop.f32.mrf.mxu1  ;;  %v10351_v42 = vld [vmem:[#allocation15_spill] sm:$0xff] }
 0x1ba   :  { %10344 = vst [vmem:[#allocation145_spill] sm:$0xff] %v6208_v15  ;;  %1464 = vmatpush2.msra.mxu1 %v5691_v46  ;;  %v6213_v62 = vadd.f32 %v515_v58, %v6139_v5  ;;  %v6229_v46 = vrot.slane %v5828_v24, %v278_v10  ;;  %v6411_v15 = vld [vmem:[#allocation5 + $0xa8] sm:$0xff] }
 0x1bb   :  { %1465 = vmatprep.subr.mxu1 %v5694_v50  ;;  %v10352_v50 = vld [vmem:[#allocation16_spill] sm:$0xff] }
 0x1bc   :  { %10345 = vst [vmem:[#allocation146_spill] sm:$0xff] %v6213_v62  ;;  %1466 = vmatpush2.msra.mxu1 %v10346_v2  ;;  %v6403_v62 = vld [vmem:[#allocation5 + $0xe8] sm:$0xff] }
 0x1bd   :  { %1467 = vmatprep.subr.mxu1 %v10347_v7  ;;  %v6219_v17 = vpop.f32.mrf.mxu1 }
 0x1be   :  { %1468 = vmatpush2.msra.mxu1 %v10348_v22 }
 0x1bf   :  { %1469 = vmatprep.subr.mxu1 %v10349_v27  ;;  %v6224_v35 = vpop.f32.mrf.mxu1 }
 0x1c0   :  { %1470 = vmatpush2.msra.mxu1 %v10350_v38 }
 0x1c1   :  { %1471 = vmatprep.subr.mxu1 %v10351_v42 }
 0x1c2   :  { %1472 = vmatpush2.msra.mxu1 %v10352_v50  ;;  %v703_v13 = vpop.f32.mrf.mxu1 }
 0x1c3   :  { %1473 = vmatprep.subr.mxu1 %v10353_v19  ;;  %v6237_v54 = vadd.f32 %v703_v13, %v6229_v46  ;;  %v1066_v19 = vpop.f32.mrf.mxu0 }
 0x1c4   :  { %1474 = vmatpush2.msra.mxu1 %v10354_v44  ;;  %v705_v32 = vpop.f32.mrf.mxu1 }
 0x1c5   :  { %1475 = vmatprep.subr.mxu1 %v10355_v57  ;;  %v6242_v1 = vadd.f32 %v705_v32, %v6234_v25  ;;  %v1068_v32 = vpop.f32.mrf.mxu0  ;;  %v10370_v57 = vld [vmem:[#allocation58_spill] sm:$0xff] }
 0x1c6   :  { %1476 = vmatpush2.msra.mxu1 %v10356_v0  ;;  %v1284_v0 = vadd.f32 %v1066_v19, %v10370_v57 }
 0x1c7   :  { %1555 = vmatprep.subr.mxu1 %v10357_v3  ;;  %v709_v9 = vpop.f32.mrf.mxu1  ;;  %v10371_v3 = vld [vmem:[#allocation62_spill] sm:$0xff] }
 0x1c8   :  { %v6247_v16 = vadd.f32 %v709_v9, %v6229_v46  ;;  %v1285_v9 = vadd.f32 %v1068_v32, %v10371_v3 }
 0x1c9   :  { %v711_v24 = vpop.f32.mrf.mxu1 }
 0x1ca   :  { %10358 = vst [vmem:[#allocation10_spill] sm:$0xff] %v6247_v16  ;;  %v6250_v21 = vadd.f32 %v711_v24, %v6234_v25  ;;  %v6491_v16 = vld [vmem:[#allocation5 + $0x628] sm:$0xff] }
 0x1cc   :  { %10359 = vst [vmem:[#allocation11_spill] sm:$0xff] %v6250_v21  ;;  %v715_v26 = vpop.f32.mrf.mxu1  ;;  %v6487_v21 = vld [vmem:[#allocation5 + $0x660] sm:$0xff] }
 0x1cd   :  { %v6253_v29 = vadd.f32 %v715_v26, %v6229_v46  ;;  %v474_v26 = vadd.f32 %v6132_v52, %v6139_v5 }
 0x1ce   :  { %v717_v34 = vpop.f32.mrf.mxu1 }
 0x1cf   :  { %10360 = vst [vmem:[#allocation12_spill] sm:$0xff] %v6253_v29  ;;  %v6256_v37 = vadd.f32 %v717_v34, %v6234_v25  ;;  %v6475_v29 = vld [vmem:[#allocation5 + $0x6a8] sm:$0xff] }
 0x1d1   :  { %10361 = vst [vmem:[#allocation13_spill] sm:$0xff] %v6256_v37  ;;  %v721_v41 = vpop.f32.mrf.mxu1  ;;  %v6471_v37 = vld [vmem:[#allocation5 + $0x6e0] sm:$0xff] }
 0x1d2   :  { %v6259_v45 = vadd.f32 %v721_v41, %v6229_v46  ;;  %v3950_v41 = vmul.f32 -1.442695, %v1284_v0 }
 0x1d3   :  { %v723_v49 = vpop.f32.mrf.mxu1 }
 0x1d4   :  { %10362 = vst [vmem:[#allocation14_spill] sm:$0xff] %v6259_v45  ;;  %v6262_v18 = vadd.f32 %v723_v49, %v6234_v25  ;;  %4067 = vpow2.f32 %v3950_v41  ;;  %v6459_v45 = vld [vmem:[#allocation5 + $0x728] sm:$0xff] }
 0x1d6   :  { %10363 = vst [vmem:[#allocation15_spill] sm:$0xff] %v6262_v18  ;;  %v727_v55 = vpop.f32.mrf.mxu1  ;;  %v6455_v18 = vld [vmem:[#allocation5 + $0x760] sm:$0xff] }
 0x1d7   :  { %v6265_v58 = vadd.f32 %v727_v55, %v6229_v46  ;;  %v3951_v55 = vmul.f32 -1.442695, %v1285_v9 }
 0x1d8   :  { %v729_v2 = vpop.f32.mrf.mxu1 }
 0x1d9   :  { %10364 = vst [vmem:[#allocation16_spill] sm:$0xff] %v6265_v58  ;;  %v6268_v7 = vadd.f32 %v729_v2, %v6234_v25  ;;  %4069 = vpow2.f32 %v3951_v55  ;;  %v6443_v58 = vld [vmem:[#allocation5 + $0x7a8] sm:$0xff] }
 0x1db   :  { %10365 = vst [vmem:[#allocation17_spill] sm:$0xff] %v6268_v7  ;;  %v733_v10 = vpop.f32.mrf.mxu1  ;;  %v6439_v7 = vld [vmem:[#allocation5 + $0x7e0] sm:$0xff] }
 0x1dc   :  { %v6271_v22 = vadd.f32 %v733_v10, %v6229_v46 }
 0x1dd   :  { %v735_v27 = vpop.f32.mrf.mxu1 }
 0x1de   :  { %10366 = vst [vmem:[#allocation18_spill] sm:$0xff] %v6271_v22  ;;  %v6274_v30 = vadd.f32 %v735_v27, %v6234_v25  ;;  %v6427_v22 = vld [vmem:[#allocation5 + $0x28] sm:$0xff] }
 0x1e0   :  { %10367 = vst [vmem:[#allocation19_spill] sm:$0xff] %v6274_v30  ;;  %v739_v38 = vpop.f32.mrf.mxu1  ;;  %v6423_v30 = vld [vmem:[#allocation5 + $0x60] sm:$0xff] }
 0x1e1   :  { %v6277_v42 = vadd.f32 %v739_v38, %v6229_v46  ;;  %v4068_v32 = vpop.eup %4067 }
 0x1e2   :  { %v741_v50 = vpop.f32.mrf.mxu1 }
 0x1e3   :  { %10368 = vst [vmem:[#allocation20_spill] sm:$0xff] %v6277_v42  ;;  %v6280_v13 = vadd.f32 %v741_v50, %v6234_v25  ;;  %v10372_v50 = vld [vmem:[#allocation60_spill] sm:$0xff]  ;;  %v6395_v42 = vld [vmem:[#allocation5 + $0x128] sm:$0xff] }
 0x1e4   :  { %v587_v19 = vadd.f32 %v10372_v50, %v5892_v8  ;;  %10416 = vst [vmem:[#allocation60_spill] sm:$0xff] %v6471_v37 }
 0x1e5   :  { %10369 = vst [vmem:[#allocation21_spill] sm:$0xff] %v6280_v13  ;;  %v6387_v13 = vld [vmem:[#allocation5 + $0x168] sm:$0xff] }
 0x1e6   :  { %v4070_v57 = vpop.eup %4069 }
 0x1e7   :  { %v1311_v9 = vadd.f32 1.0, %v4070_v57 }
 0x205   :  { %v1137_v44 = vpop.f32.mrf.mxu1  ;;  %v1208_v27 = vpop.f32.mrf.mxu0 }
 0x206   :  { %v1286_v34 = vadd.f32 %v1137_v44, %v6128_v63  ;;  %v10373_v63 = vld [vmem:[#allocation56_spill] sm:$0xff]  ;;  %v1310_v44 = vadd.f32 1.0, %v4068_v32 }
 0x207   :  { %v1139_v24 = vpop.f32.mrf.mxu1  ;;  %v1210_v38 = vpop.f32.mrf.mxu0  ;;  %v585_v5 = vadd.f32 %v10373_v63, %v5883_v28  ;;  %10418 = vst [vmem:[#allocation56_spill] sm:$0xff] %v6475_v29 }
 0x208   :  { %v1287_v49 = vadd.f32 %v1139_v24, %v474_v26  ;;  %v3952_v2 = vmul.f32 -1.442695, %v1286_v34  ;;  %v1289_v3 = vadd.f32 %v1210_v38, %v587_v19 }
 0x209   :  { %v1288_v24 = vadd.f32 %v1208_v27, %v585_v5 }
 0x20a   :  { %v3953_v10 = vmul.f32 -1.442695, %v1287_v49  ;;  %4071 = vpow2.f32 %v3952_v2  ;;  %v3955_v26 = vmul.f32 -1.442695, %v1289_v3  ;;  %v698_v49 = vadd.f32 %v6219_v17, %v6229_v46 }
 0x20b   :  { %v3954_v8 = vmul.f32 -1.442695, %v1288_v24  ;;  %v700_v2 = vadd.f32 %v6224_v35, %v6234_v25 }
 0x20c   :  { %4073 = vpow2.f32 %v3953_v10 }
 0x20d   :  { %4075 = vrcp.f32 %v1310_v44 }
 0x20e   :  { %4077 = vrcp.f32 %v1311_v9 }
 0x20f   :  { %4079 = vpow2.f32 %v3955_v26 }
 0x217   :  { %v4072_v52 = vpop.eup %4071 }
 0x218   :  { %v1312_v34 = vadd.f32 1.0, %v4072_v52 }
 0x219   :  { %v4074_v0 = vpop.eup %4073 }
 0x21a   :  { %v1313_v41 = vadd.f32 1.0, %v4074_v0  ;;  %4081 = vrcp.f32 %v1312_v34  ;;  %v4076_v38 = vpop.eup %4075 }
 0x21b   :  { %v4078_v50 = vpop.eup %4077 }
 0x21c   :  { %4083 = vrcp.f32 %v1313_v41  ;;  %v4080_v19 = vpop.eup %4079 }
 0x21d   :  { %v1315_v52 = vadd.f32 1.0, %v4080_v19  ;;  %v10379_v19 = vld [vmem:[#allocation25_spill] sm:$0xff] }
 0x21e   :  { %10426 = vst [vmem:[#allocation25_spill] sm:$0xff] %v6491_v16 }
 0x227   :  { %v4082_v32 = vpop.eup %4081 }
 0x228   :  { %v1330_v3 = vmul.f32 0.0, %v4082_v32  ;;  %v6327_v32 = vld [vmem:[#allocation5 + $0x360] sm:$0xff] }
 0x229   :  { %v4084_v17 = vpop.eup %4083 }
 0x22a   :  { %v1331_v35 = vmul.f32 0.0, %v4084_v17  ;;  %v10380_v17 = vld [vmem:[#allocation26_spill] sm:$0xff] }
 0x22b   :  { %10428 = vst [vmem:[#allocation26_spill] sm:$0xff] %v6495_v23 }
 0x246   :  { %v1279_v55 = vpop.f32.mrf.mxu1 }
 0x247   :  { %v1290_v28 = vadd.f32 %v1279_v55, %v698_v49  ;;  %v6309_v55 = vld [vmem:[#allocation5 + $0x3e0] sm:$0xff] }
 0x248   :  { %v1281_v10 = vpop.f32.mrf.mxu1 }
 0x249   :  { %4085 = vtanh.f32 %v1290_v28  ;;  %v1291_v27 = vadd.f32 %v1281_v10, %v700_v2  ;;  %v10376_v2 = vld [vmem:[#allocation22_spill] sm:$0xff]  ;;  %v6313_v28 = vld [vmem:[#allocation5 + $0x3a8] sm:$0xff] }
 0x24a   :  { %4087 = vpow2.f32 %v3954_v8  ;;  %v10377_v10 = vld [vmem:[#allocation23_spill] sm:$0xff]  ;;  %10420 = vst [vmem:[#allocation22_spill] sm:$0xff] %v6479_v31 }
 0x24b   :  { %4089 = vtanh.f32 %v1291_v27  ;;  %v6319_v27 = vld [vmem:[#allocation5 + $0x3a0] sm:$0xff]  ;;  %10422 = vst [vmem:[#allocation23_spill] sm:$0xff] %v6483_v51 }
 0x24c   :  { %4091 = vrcp.f32 %v1315_v52  ;;  %v10382_v52 = vld [vmem:[#allocation28_spill] sm:$0xff] }
 0x256   :  { %v4086_v46 = vpop.eup %4085 }
 0x257   :  { %v4088_v57 = vpop.eup %4087  ;;  %v1332_v63 = vmul.f32 %v4086_v46, %v4076_v38  ;;  %v10378_v38 = vld [vmem:[#allocation24_spill] sm:$0xff]  ;;  %v6331_v46 = vld [vmem:[#allocation5 + $0x328] sm:$0xff] }
 0x258   :  { %v4090_v5 = vpop.eup %4089  ;;  %v1314_v0 = vadd.f32 1.0, %v4088_v57  ;;  %v10381_v57 = vld [vmem:[#allocation27_spill] sm:$0xff]  ;;  %10424 = vst [vmem:[#allocation24_spill] sm:$0xff] %v6487_v21 }
 0x259   :  { %v6295_v25 = vadd.f32 %v1332_v63, %v1330_v3  ;;  %v1333_v44 = vmul.f32 %v4090_v5, %v4078_v50  ;;  %v4092_v24 = vpop.eup %4091  ;;  %v6323_v50 = vld [vmem:[#allocation5 + $0x368] sm:$0xff]  ;;  %v6335_v3 = vld [vmem:[#allocation5 + $0x320] sm:$0xff]  ;;  %v10383_v5 = vld [vmem:[#allocation29_spill] sm:$0xff]  ;;  %10430 = vst [vmem:[#allocation27_spill] sm:$0xff] %v6499_v43 }
 0x25a   :  { %v6339_v63 = vld [vmem:[#allocation5 + $0x2e8] sm:$0xff] }
 0x25b   :  { %v6297_v9 = vadd.f32 %v1333_v44, %v1331_v35  ;;  %4093 = vtanh.f32 %v6295_v25  ;;  %v6343_v35 = vld [vmem:[#allocation5 + $0x2e0] sm:$0xff] }
 0x25c   :  { %v10384_v44 = vld [vmem:[#allocation30_spill] sm:$0xff] }
 0x25d   :  { %4095 = vtanh.f32 %v6297_v9 }
 0x25e   :  { %4097 = vrcp.f32 %v1314_v0  ;;  %v6347_v0 = vld [vmem:[#allocation5 + $0x2a8] sm:$0xff] }
 0x268   :  { %v4094_v26 = vpop.eup %4093 }
 0x26a   :  { %v4096_v34 = vpop.eup %4095 }
 0x26b   :  { %v4098_v41 = vpop.eup %4097  ;;  %v6301_v49 = vmul.f32 %v4096_v34, %v4092_v24  ;;  %v10385_v24 = vld [vmem:[#allocation31_spill] sm:$0xff]  ;;  %v10386_v34 = vld [vmem:[#allocation32_spill] sm:$0xff] }
 0x26c   :  { %v6303_v8 = vmul.f32 %v4098_v41, %v4094_v26  ;;  %v6351_v26 = vld [vmem:[#allocation5 + $0x2a0] sm:$0xff]  ;;  %v6355_v41 = vld [vmem:[#allocation5 + $0x268] sm:$0xff] }
 0x26d   :  { %10374 = vst [vmem:[#allocation58_spill] sm:$0xff] %v6301_v49  ;;  %1406 = vmatprep.mubr.f32.mxu0 %v6301_v49  ;;  %1477 = vmatprep.mubr.f32.mxu1 %v6301_v49 }
 0x26e   :  { %10375 = vst [vmem:[#allocation62_spill] sm:$0xff] %v6303_v8  ;;  %1407 = vmatmul.mubr.f32.vlgmr.msra.gmra.mxu0 %v6303_v8  ;;  %1478 = vmatmul.mubr.f32.vlgmr.msra.gmra.mxu1 %v6303_v8 }
 0x26f   :  { %1485 = vmatpush1.msra.mxu0 %v6309_v55  ;;  %1556 = vmatpush1.msra.mxu1 %v10376_v2  ;;  %v10387_v2 = vld [vmem:[#allocation33_spill] sm:$0xff] }
 0x270   :  { %1486 = vmatprep.subr.mxu0 %v6313_v28  ;;  %1548 = vmatprep.mubr.f32.mxu0 %v6301_v49 }
 0x271   :  { %1557 = vmatprep.subr.mxu1 %v10377_v10  ;;  %1619 = vmatprep.mubr.f32.mxu1 %v6301_v49  ;;  %v6359_v10 = vld [vmem:[#allocation5 + $0x260] sm:$0xff]  ;;  %v6419_v49 = vld [vmem:[#allocation5 + $0x68] sm:$0xff] }
 0x272   :  { %1487 = vmatpush1.msra.mxu0 %v6319_v27  ;;  %1558 = vmatpush1.msra.mxu1 %v10378_v38  ;;  %v10388_v38 = vld [vmem:[#allocation34_spill] sm:$0xff] }
 0x273   :  { %1488 = vmatprep.subr.mxu0 %v6323_v50  ;;  %1559 = vmatprep.subr.mxu1 %v10379_v19  ;;  %v6363_v19 = vld [vmem:[#allocation5 + $0x228] sm:$0xff] }
 0x274   :  { %1489 = vmatpush1.msra.mxu0 %v6327_v32  ;;  %1560 = vmatpush1.msra.mxu1 %v10380_v17  ;;  %v10389_v17 = vld [vmem:[#allocation35_spill] sm:$0xff] }
 0x275   :  { %1490 = vmatprep.subr.mxu0 %v6331_v46  ;;  %1561 = vmatprep.subr.mxu1 %v10381_v57  ;;  %v6367_v57 = vld [vmem:[#allocation5 + $0x220] sm:$0xff] }
 0x276   :  { %1491 = vmatpush1.msra.mxu0 %v6335_v3  ;;  %1562 = vmatpush1.msra.mxu1 %v10382_v52  ;;  %v10390_v52 = vld [vmem:[#allocation36_spill] sm:$0xff] }
 0x277   :  { %1492 = vmatprep.subr.mxu0 %v6339_v63  ;;  %1563 = vmatprep.subr.mxu1 %v10383_v5  ;;  %v6371_v5 = vld [vmem:[#allocation5 + $0x1e8] sm:$0xff] }
 0x278   :  { %1493 = vmatpush1.msra.mxu0 %v6343_v35  ;;  %1564 = vmatpush1.msra.mxu1 %v10384_v44  ;;  %v10391_v44 = vld [vmem:[#allocation37_spill] sm:$0xff] }
 0x279   :  { %1494 = vmatprep.subr.mxu0 %v6347_v0  ;;  %1565 = vmatprep.subr.mxu1 %v10385_v24  ;;  %v6375_v24 = vld [vmem:[#allocation5 + $0x1e0] sm:$0xff] }
 0x27a   :  { %1495 = vmatpush1.msra.mxu0 %v6351_v26  ;;  %1566 = vmatpush1.msra.mxu1 %v10386_v34  ;;  %v10392_v34 = vld [vmem:[#allocation38_spill] sm:$0xff] }
 0x27b   :  { %1496 = vmatprep.subr.mxu0 %v6355_v41  ;;  %1567 = vmatprep.subr.mxu1 %v10387_v2  ;;  %v6379_v2 = vld [vmem:[#allocation5 + $0x1a8] sm:$0xff] }
 0x27c   :  { %1497 = vmatpush1.msra.mxu0 %v6359_v10  ;;  %1568 = vmatpush1.msra.mxu1 %v10388_v38  ;;  %v10393_v38 = vld [vmem:[#allocation39_spill] sm:$0xff] }
 0x27d   :  { %1498 = vmatprep.subr.mxu0 %v6363_v19  ;;  %1569 = vmatprep.subr.mxu1 %v10389_v17  ;;  %v6383_v17 = vld [vmem:[#allocation5 + $0x1a0] sm:$0xff] }
 0x27e   :  { %1499 = vmatpush1.msra.mxu0 %v6367_v57  ;;  %1570 = vmatpush1.msra.mxu1 %v10390_v52  ;;  %v10394_v52 = vld [vmem:[#allocation40_spill] sm:$0xff] }
 0x27f   :  { %1500 = vmatprep.subr.mxu0 %v6371_v5  ;;  %1571 = vmatprep.subr.mxu1 %v10391_v44  ;;  %v10395_v44 = vld [vmem:[#allocation41_spill] sm:$0xff] }
 0x280   :  { %1501 = vmatpush1.msra.mxu0 %v6375_v24  ;;  %1572 = vmatpush1.msra.mxu1 %v10392_v34  ;;  %v10396_v34 = vld [vmem:[#allocation42_spill] sm:$0xff] }
 0x281   :  { %1502 = vmatprep.subr.mxu0 %v6379_v2  ;;  %1573 = vmatprep.subr.mxu1 %v10393_v38  ;;  %v10397_v38 = vld [vmem:[#allocation43_spill] sm:$0xff] }
 0x282   :  { %1503 = vmatpush1.msra.mxu0 %v6383_v17  ;;  %1574 = vmatpush1.msra.mxu1 %v10394_v52  ;;  %v10398_v52 = vld [vmem:[#allocation44_spill] sm:$0xff] }
 0x283   :  { %1504 = vmatprep.subr.mxu0 %v6387_v13  ;;  %1575 = vmatprep.subr.mxu1 %v10395_v44  ;;  %v10399_v44 = vld [vmem:[#allocation45_spill] sm:$0xff] }
 0x284   :  { %1505 = vmatpush1.msra.mxu0 %v6391_v61  ;;  %1576 = vmatpush1.msra.mxu1 %v10396_v34  ;;  %v10400_v34 = vld [vmem:[#allocation46_spill] sm:$0xff] }
 0x285   :  { %1506 = vmatprep.subr.mxu0 %v6395_v42  ;;  %1577 = vmatprep.subr.mxu1 %v10397_v38  ;;  %v10401_v38 = vld [vmem:[#allocation47_spill] sm:$0xff] }
 0x286   :  { %1507 = vmatpush1.msra.mxu0 %v6399_v59  ;;  %1578 = vmatpush1.msra.mxu1 %v10398_v52  ;;  %v10402_v52 = vld [vmem:[#allocation48_spill] sm:$0xff] }
 0x287   :  { %1508 = vmatprep.subr.mxu0 %v6403_v62  ;;  %1579 = vmatprep.subr.mxu1 %v10399_v44  ;;  %v10403_v44 = vld [vmem:[#allocation49_spill] sm:$0xff] }
 0x288   :  { %1509 = vmatpush1.msra.mxu0 %v6407_v40  ;;  %1580 = vmatpush1.msra.mxu1 %v10400_v34  ;;  %v10404_v34 = vld [vmem:[#allocation50_spill] sm:$0xff] }
 0x289   :  { %1510 = vmatprep.subr.mxu0 %v6411_v15  ;;  %1581 = vmatprep.subr.mxu1 %v10401_v38  ;;  %v10405_v38 = vld [vmem:[#allocation51_spill] sm:$0xff] }
 0x28a   :  { %1511 = vmatpush1.msra.mxu0 %v6415_v36  ;;  %1582 = vmatpush1.msra.mxu1 %v10402_v52  ;;  %v10406_v52 = vld [vmem:[#allocation52_spill] sm:$0xff] }
 0x28b   :  { %1512 = vmatprep.subr.mxu0 %v6419_v49  ;;  %1583 = vmatprep.subr.mxu1 %v10403_v44  ;;  %v10407_v44 = vld [vmem:[#allocation53_spill] sm:$0xff] }
 0x28c   :  { %1513 = vmatpush1.msra.mxu0 %v6423_v30  ;;  %1584 = vmatpush1.msra.mxu1 %v10404_v34  ;;  %v10408_v34 = vld [vmem:[#allocation54_spill] sm:$0xff] }
 0x28d   :  { %1514 = vmatprep.subr.mxu0 %v6427_v22  ;;  %1585 = vmatprep.subr.mxu1 %v10405_v38  ;;  %v10409_v38 = vld [vmem:[#allocation55_spill] sm:$0xff] }
 0x28e   :  { %1515 = vmatpush1.msra.mxu0 %v6431_v53  ;;  %1586 = vmatpush1.msra.mxu1 %v10406_v52  ;;  %v10410_v52 = vld [vmem:[#allocation57_spill] sm:$0xff] }
 0x28f   :  { %1516 = vmatprep.subr.mxu0 %v6435_v14  ;;  %1587 = vmatprep.subr.mxu1 %v10407_v44  ;;  %v10411_v44 = vld [vmem:[#allocation59_spill] sm:$0xff] }
 0x290   :  { %1517 = vmatpush2.msra.mxu0 %v6439_v7  ;;  %1588 = vmatpush2.msra.mxu1 %v10408_v34  ;;  %v10412_v34 = vld [vmem:[#allocation61_spill] sm:$0xff] }
 0x291   :  { %1518 = vmatprep.subr.mxu0 %v6443_v58  ;;  %1589 = vmatprep.subr.mxu1 %v10409_v38  ;;  %v10413_v38 = vld [vmem:[#allocation63_spill] sm:$0xff] }
 0x292   :  { %1519 = vmatpush2.msra.mxu0 %v6447_v47  ;;  %1590 = vmatpush2.msra.mxu1 %v10410_v52  ;;  %v10414_v52 = vld [vmem:[#allocation64_spill] sm:$0xff] }
 0x293   :  { %1520 = vmatprep.subr.mxu0 %v6451_v6  ;;  %1591 = vmatprep.subr.mxu1 %v10411_v44  ;;  %v10415_v44 = vld [vmem:[#allocation65_spill] sm:$0xff] }
 0x294   :  { %1521 = vmatpush2.msra.mxu0 %v6455_v18  ;;  %1592 = vmatpush2.msra.mxu1 %v10412_v34  ;;  %v10417_v34 = vld [vmem:[#allocation66_spill] sm:$0xff] }
 0x295   :  { %1522 = vmatprep.subr.mxu0 %v6459_v45  ;;  %1593 = vmatprep.subr.mxu1 %v10413_v38  ;;  %v10419_v38 = vld [vmem:[#allocation69_spill] sm:$0xff] }
 0x296   :  { %1523 = vmatpush2.msra.mxu0 %v6463_v39  ;;  %1594 = vmatpush2.msra.mxu1 %v10414_v52  ;;  %v10421_v52 = vld [vmem:[#allocation70_spill] sm:$0xff] }
 0x297   :  { %1524 = vmatprep.subr.mxu0 %v6467_v60  ;;  %1595 = vmatprep.subr.mxu1 %v10415_v44  ;;  %v10423_v44 = vld [vmem:[#allocation73_spill] sm:$0xff] }
 0x298   :  { %1525 = vmatpush2.msra.mxu0 %v6471_v37  ;;  %1596 = vmatpush2.msra.mxu1 %v10417_v34  ;;  %v10425_v34 = vld [vmem:[#allocation74_spill] sm:$0xff] }
 0x299   :  { %1526 = vmatprep.subr.mxu0 %v6475_v29  ;;  %1597 = vmatprep.subr.mxu1 %v10419_v38  ;;  %v10427_v38 = vld [vmem:[#allocation75_spill] sm:$0xff] }
 0x29a   :  { %1527 = vmatpush2.msra.mxu0 %v6479_v31  ;;  %1598 = vmatpush2.msra.mxu1 %v10421_v52  ;;  %v10429_v52 = vld [vmem:[#allocation76_spill] sm:$0xff] }
 0x29b   :  { %1528 = vmatprep.subr.mxu0 %v6483_v51  ;;  %1599 = vmatprep.subr.mxu1 %v10423_v44  ;;  %v10431_v44 = vld [vmem:[#allocation79_spill] sm:$0xff] }
 0x29c   :  { %1529 = vmatpush2.msra.mxu0 %v6487_v21  ;;  %1600 = vmatpush2.msra.mxu1 %v10425_v34  ;;  %v6503_v21 = vld [vmem:[#allocation5 + $0x5e0] sm:$0xff]  ;;  %v10433_v34 = vld [vmem:[#allocation80_spill] sm:$0xff] }
 0x29d   :  { %1530 = vmatprep.subr.mxu0 %v6491_v16  ;;  %1601 = vmatprep.subr.mxu1 %v10427_v38  ;;  %10432 = vst [vmem:[#allocation28_spill] sm:$0xff] %v6503_v21  ;;  %v6507_v16 = vld [vmem:[#allocation5 + $0x5a8] sm:$0xff]  ;;  %v6511_v38 = vld [vmem:[#allocation5 + $0x5a0] sm:$0xff] }
 0x29e   :  { %1531 = vmatpush2.msra.mxu0 %v6495_v23  ;;  %1602 = vmatpush2.msra.mxu1 %v10429_v52  ;;  %10434 = vst [vmem:[#allocation29_spill] sm:$0xff] %v6507_v16  ;;  %10435 = vst [vmem:[#allocation30_spill] sm:$0xff] %v6511_v38  ;;  %v10436_v52 = vld [vmem:[#allocation83_spill] sm:$0xff] }
 0x29f   :  { %1532 = vmatprep.subr.mxu0 %v6499_v43  ;;  %1603 = vmatprep.subr.mxu1 %v10431_v44  ;;  %v6515_v43 = vld [vmem:[#allocation5 + $0x568] sm:$0xff]  ;;  %v10438_v44 = vld [vmem:[#allocation84_spill] sm:$0xff] }
 0x2a0   :  { %1533 = vmatpush2.msra.mxu0 %v6503_v21  ;;  %1604 = vmatpush2.msra.mxu1 %v10433_v34  ;;  %10437 = vst [vmem:[#allocation31_spill] sm:$0xff] %v6515_v43  ;;  %v6519_v21 = vld [vmem:[#allocation5 + $0x560] sm:$0xff]  ;;  %v10440_v34 = vld [vmem:[#allocation85_spill] sm:$0xff] }
 0x2a1   :  { %1534 = vmatprep.subr.mxu0 %v6507_v16  ;;  %1605 = vmatprep.subr.mxu1 %v5943_v20  ;;  %10439 = vst [vmem:[#allocation32_spill] sm:$0xff] %v6519_v21  ;;  %v6523_v16 = vld [vmem:[#allocation5 + $0x528] sm:$0xff]  ;;  %v10442_v20 = vld [vmem:[#allocation88_spill] sm:$0xff] }
 0x2a2   :  { %1535 = vmatpush2.msra.mxu0 %v6511_v38  ;;  %1606 = vmatpush2.msra.mxu1 %v10436_v52  ;;  %10441 = vst [vmem:[#allocation33_spill] sm:$0xff] %v6523_v16  ;;  %v6527_v38 = vld [vmem:[#allocation5 + $0x520] sm:$0xff]  ;;  %v10444_v52 = vld [vmem:[#allocation89_spill] sm:$0xff] }
 0x2a3   :  { %1536 = vmatprep.subr.mxu0 %v6515_v43  ;;  %1607 = vmatprep.subr.mxu1 %v10438_v44  ;;  %10443 = vst [vmem:[#allocation34_spill] sm:$0xff] %v6527_v38  ;;  %v6531_v43 = vld [vmem:[#allocation5 + $0x4e8] sm:$0xff]  ;;  %v6535_v44 = vld [vmem:[#allocation5 + $0x4e0] sm:$0xff] }
 0x2a4   :  { %1537 = vmatpush2.msra.mxu0 %v6519_v21  ;;  %1608 = vmatpush2.msra.mxu1 %v10440_v34  ;;  %10445 = vst [vmem:[#allocation35_spill] sm:$0xff] %v6531_v43  ;;  %10446 = vst [vmem:[#allocation36_spill] sm:$0xff] %v6535_v44  ;;  %v10447_v34 = vld [vmem:[#allocation94_spill] sm:$0xff] }
 0x2a5   :  { %1538 = vmatprep.subr.mxu0 %v6523_v16  ;;  %1609 = vmatprep.subr.mxu1 %v10442_v20  ;;  %v6539_v16 = vld [vmem:[#allocation5 + $0x4a8] sm:$0xff]  ;;  %v6543_v20 = vld [vmem:[#allocation5 + $0x4a0] sm:$0xff] }
 0x2a6   :  { %1539 = vmatpush2.msra.mxu0 %v6527_v38  ;;  %1610 = vmatpush2.msra.mxu1 %v10444_v52  ;;  %10448 = vst [vmem:[#allocation37_spill] sm:$0xff] %v6539_v16  ;;  %10449 = vst [vmem:[#allocation38_spill] sm:$0xff] %v6543_v20  ;;  %v10450_v52 = vld [vmem:[#allocation97_spill] sm:$0xff]  ;;  %v10588_v38 = vld [vmem:[#allocation71_spill] sm:$0xff] }
 0x2a7   :  { %1540 = vmatprep.subr.mxu0 %v6531_v43  ;;  %1611 = vmatprep.subr.mxu1 %v5976_v4  ;;  %v6547_v43 = vld [vmem:[#allocation5 + $0x468] sm:$0xff]  ;;  %v10452_v4 = vld [vmem:[#allocation101_spill] sm:$0xff] }
 0x2a8   :  { %1541 = vmatpush2.msra.mxu0 %v6535_v44  ;;  %1612 = vmatpush2.msra.mxu1 %v10447_v34  ;;  %10451 = vst [vmem:[#allocation39_spill] sm:$0xff] %v6547_v43  ;;  %v6551_v44 = vld [vmem:[#allocation5 + $0x460] sm:$0xff]  ;;  %v10454_v34 = vld [vmem:[#allocation103_spill] sm:$0xff] }
 0x2a9   :  { %1542 = vmatprep.subr.mxu0 %v6539_v16  ;;  %1613 = vmatprep.subr.mxu1 %v5988_v12  ;;  %10453 = vst [vmem:[#allocation40_spill] sm:$0xff] %v6551_v44  ;;  %v6555_v16 = vld [vmem:[#allocation5 + $0x428] sm:$0xff]  ;;  %v6559_v12 = vld [vmem:[#allocation5 + $0x420] sm:$0xff] }
 0x2aa   :  { %1543 = vmatpush2.msra.mxu0 %v6543_v20  ;;  %1614 = vmatpush2.msra.mxu1 %v10450_v52  ;;  %10455 = vst [vmem:[#allocation41_spill] sm:$0xff] %v6555_v16  ;;  %10456 = vst [vmem:[#allocation42_spill] sm:$0xff] %v6559_v12  ;;  %v10457_v52 = vld [vmem:[#allocation108_spill] sm:$0xff] }
 0x2ab   :  { %1544 = vmatprep.subr.mxu0 %v6547_v43  ;;  %1615 = vmatprep.subr.mxu1 %v10452_v4  ;;  %v6565_v4 = vld [vmem:[#allocation5 + $0x3c8] sm:$0xff] }
 0x2ac   :  { %1545 = vmatpush2.msra.mxu0 %v6551_v44  ;;  %1616 = vmatpush2.msra.mxu1 %v10454_v34  ;;  %10458 = vst [vmem:[#allocation43_spill] sm:$0xff] %v6565_v4  ;;  %v10459_v34 = vld [vmem:[#allocation117_spill] sm:$0xff]  ;;  %v6569_v44 = vld [vmem:[#allocation5 + $0x3c0] sm:$0xff] }
 0x2ad   :  { %1546 = vmatprep.subr.mxu0 %v6555_v16  ;;  %1617 = vmatprep.subr.mxu1 %v6024_v48  ;;  %10460 = vst [vmem:[#allocation44_spill] sm:$0xff] %v6569_v44  ;;  %v10461_v48 = vld [vmem:[#allocation118_spill] sm:$0xff]  ;;  %v6573_v16 = vld [vmem:[#allocation5 + $0x388] sm:$0xff] }
 0x2ae   :  { %1547 = vmatpush2.msra.mxu0 %v6559_v12  ;;  %1618 = vmatpush2.msra.mxu1 %v10457_v52  ;;  %10462 = vst [vmem:[#allocation45_spill] sm:$0xff] %v6573_v16  ;;  %v10463_v52 = vld [vmem:[#allocation120_spill] sm:$0xff]  ;;  %v6577_v12 = vld [vmem:[#allocation5 + $0x380] sm:$0xff] }
 0x2af   :  { %1549 = vmatmul.mubr.f32.vlgmr.msra.gmra.mxu0 %v6303_v8  ;;  %1620 = vmatmul.mubr.f32.vlgmr.msra.gmra.mxu1 %v6303_v8  ;;  %10464 = vst [vmem:[#allocation46_spill] sm:$0xff] %v6577_v12  ;;  %v10465_v8 = vld [vmem:[#allocation122_spill] sm:$0xff] }
 0x2b0   :  { %1684 = vmatprep.subr.mxu0 %v6565_v4  ;;  %1755 = vmatprep.subr.mxu1 %v10459_v34  ;;  %v6581_v4 = vld [vmem:[#allocation5 + $0x348] sm:$0xff]  ;;  %v6585_v34 = vld [vmem:[#allocation5 + $0x340] sm:$0xff] }
 0x2b1   :  { %1685 = vmatpush1.msra.mxu0 %v6569_v44  ;;  %1756 = vmatpush1.msra.mxu1 %v10461_v48  ;;  %10466 = vst [vmem:[#allocation47_spill] sm:$0xff] %v6581_v4  ;;  %10467 = vst [vmem:[#allocation48_spill] sm:$0xff] %v6585_v34  ;;  %v10468_v48 = vld [vmem:[#allocation125_spill] sm:$0xff] }
 0x2b2   :  { %1686 = vmatprep.subr.mxu0 %v6573_v16  ;;  %1757 = vmatprep.subr.mxu1 %v10463_v52  ;;  %v6589_v16 = vld [vmem:[#allocation5 + $0x308] sm:$0xff]  ;;  %v10470_v52 = vld [vmem:[#allocation128_spill] sm:$0xff] }
 0x2b3   :  { %1687 = vmatpush1.msra.mxu0 %v6577_v12  ;;  %1758 = vmatpush1.msra.mxu1 %v10465_v8  ;;  %10469 = vst [vmem:[#allocation49_spill] sm:$0xff] %v6589_v16  ;;  %v6593_v12 = vld [vmem:[#allocation5 + $0x300] sm:$0xff]  ;;  %v10472_v8 = vld [vmem:[#allocation129_spill] sm:$0xff] }
 0x2b4   :  { %1688 = vmatprep.subr.mxu0 %v6581_v4  ;;  %1759 = vmatprep.subr.mxu1 %v6084_v56  ;;  %10471 = vst [vmem:[#allocation50_spill] sm:$0xff] %v6593_v12  ;;  %v6597_v4 = vld [vmem:[#allocation5 + $0x2c8] sm:$0xff]  ;;  %v10474_v56 = vld [vmem:[#allocation130_spill] sm:$0xff] }
 0x2b5   :  { %1689 = vmatpush1.msra.mxu0 %v6585_v34  ;;  %1760 = vmatpush1.msra.mxu1 %v10468_v48  ;;  %10473 = vst [vmem:[#allocation51_spill] sm:$0xff] %v6597_v4  ;;  %v6601_v34 = vld [vmem:[#allocation5 + $0x2c0] sm:$0xff]  ;;  %v6604_v48 = vld [vmem:[#allocation5 + $0x2d0] sm:$0xff] }
 0x2b6   :  { %1690 = vmatprep.subr.mxu0 %v6589_v16  ;;  %1761 = vmatprep.subr.mxu1 %v10470_v52  ;;  %10475 = vst [vmem:[#allocation52_spill] sm:$0xff] %v6601_v34  ;;  %10476 = vst [vmem:[#allocation53_spill] sm:$0xff] %v6604_v48  ;;  %v6607_v52 = vld [vmem:[#allocation5 + $0x288] sm:$0xff]  ;;  %v6862_v16 = vld [vmem:[#allocation5 + $0x550] sm:$0xff] }
 0x2b7   :  { %1691 = vmatpush1.msra.mxu0 %v6593_v12  ;;  %1762 = vmatpush1.msra.mxu1 %v10472_v8  ;;  %10477 = vst [vmem:[#allocation54_spill] sm:$0xff] %v6607_v52  ;;  %v6610_v12 = vld [vmem:[#allocation5 + $0x298] sm:$0xff]  ;;  %v6613_v8 = vld [vmem:[#allocation5 + $0x280] sm:$0xff] }
 0x2b8   :  { %1692 = vmatprep.subr.mxu0 %v6597_v4  ;;  %1763 = vmatprep.subr.mxu1 %v10474_v56  ;;  %10478 = vst [vmem:[#allocation55_spill] sm:$0xff] %v6610_v12  ;;  %10479 = vst [vmem:[#allocation57_spill] sm:$0xff] %v6613_v8  ;;  %v6616_v56 = vld [vmem:[#allocation5 + $0x290] sm:$0xff] }
 0x2b9   :  { %1693 = vmatpush1.msra.mxu0 %v6601_v34  ;;  %1764 = vmatpush1.msra.mxu1 %v6604_v48  ;;  %10480 = vst [vmem:[#allocation59_spill] sm:$0xff] %v6616_v56  ;;  %v6619_v34 = vld [vmem:[#allocation5 + $0x248] sm:$0xff]  ;;  %v6622_v48 = vld [vmem:[#allocation5 + $0x258] sm:$0xff]  ;;  %v6854_v4 = vld [vmem:[#allocation5 + $0x590] sm:$0xff] }
 0x2ba   :  { %1694 = vmatprep.subr.mxu0 %v6607_v52  ;;  %1765 = vmatprep.subr.mxu1 %v6610_v12  ;;  %10481 = vst [vmem:[#allocation61_spill] sm:$0xff] %v6619_v34  ;;  %10482 = vst [vmem:[#allocation63_spill] sm:$0xff] %v6622_v48  ;;  %v6625_v52 = vld [vmem:[#allocation5 + $0x240] sm:$0xff]  ;;  %v6628_v12 = vld [vmem:[#allocation5 + $0x250] sm:$0xff] }
 0x2bb   :  { %1695 = vmatpush1.msra.mxu0 %v6613_v8  ;;  %1766 = vmatpush1.msra.mxu1 %v6616_v56  ;;  %10483 = vst [vmem:[#allocation64_spill] sm:$0xff] %v6625_v52  ;;  %10484 = vst [vmem:[#allocation65_spill] sm:$0xff] %v6628_v12  ;;  %v6631_v8 = vld [vmem:[#allocation5 + $0x208] sm:$0xff]  ;;  %v6634_v56 = vld [vmem:[#allocation5 + $0x218] sm:$0xff] }
 0x2bc   :  { %1696 = vmatprep.subr.mxu0 %v6619_v34  ;;  %1767 = vmatprep.subr.mxu1 %v6622_v48  ;;  %10485 = vst [vmem:[#allocation66_spill] sm:$0xff] %v6631_v8  ;;  %10486 = vst [vmem:[#allocation69_spill] sm:$0xff] %v6634_v56  ;;  %v6637_v34 = vld [vmem:[#allocation5 + $0x200] sm:$0xff]  ;;  %v6640_v48 = vld [vmem:[#allocation5 + $0x210] sm:$0xff] }
 0x2bd   :  { %1697 = vmatpush1.msra.mxu0 %v6625_v52  ;;  %1768 = vmatpush1.msra.mxu1 %v6628_v12  ;;  %10487 = vst [vmem:[#allocation70_spill] sm:$0xff] %v6637_v34  ;;  %10488 = vst [vmem:[#allocation73_spill] sm:$0xff] %v6640_v48  ;;  %v6643_v52 = vld [vmem:[#allocation5 + $0x1c8] sm:$0xff]  ;;  %v6646_v12 = vld [vmem:[#allocation5 + $0x1d8] sm:$0xff] }
 0x2be   :  { %1698 = vmatprep.subr.mxu0 %v6631_v8  ;;  %1769 = vmatprep.subr.mxu1 %v6634_v56  ;;  %10489 = vst [vmem:[#allocation74_spill] sm:$0xff] %v6643_v52  ;;  %10490 = vst [vmem:[#allocation75_spill] sm:$0xff] %v6646_v12  ;;  %v6649_v8 = vld [vmem:[#allocation5 + $0x1c0] sm:$0xff]  ;;  %v6652_v56 = vld [vmem:[#allocation5 + $0x1d0] sm:$0xff] }
 0x2bf   :  { %1699 = vmatpush1.msra.mxu0 %v6637_v34  ;;  %1770 = vmatpush1.msra.mxu1 %v6640_v48  ;;  %10491 = vst [vmem:[#allocation76_spill] sm:$0xff] %v6649_v8  ;;  %10492 = vst [vmem:[#allocation79_spill] sm:$0xff] %v6652_v56  ;;  %v6655_v34 = vld [vmem:[#allocation5 + $0x188] sm:$0xff]  ;;  %v6658_v48 = vld [vmem:[#allocation5 + $0x198] sm:$0xff] }
 0x2c0   :  { %1700 = vmatprep.subr.mxu0 %v6643_v52  ;;  %1771 = vmatprep.subr.mxu1 %v6646_v12  ;;  %10493 = vst [vmem:[#allocation80_spill] sm:$0xff] %v6655_v34  ;;  %10494 = vst [vmem:[#allocation83_spill] sm:$0xff] %v6658_v48  ;;  %v6661_v52 = vld [vmem:[#allocation5 + $0x180] sm:$0xff]  ;;  %v6664_v12 = vld [vmem:[#allocation5 + $0x190] sm:$0xff] }
 0x2c1   :  { %1701 = vmatpush1.msra.mxu0 %v6649_v8  ;;  %1772 = vmatpush1.msra.mxu1 %v6652_v56  ;;  %10495 = vst [vmem:[#allocation84_spill] sm:$0xff] %v6661_v52  ;;  %10496 = vst [vmem:[#allocation85_spill] sm:$0xff] %v6664_v12  ;;  %v6667_v8 = vld [vmem:[#allocation5 + $0x148] sm:$0xff]  ;;  %v6670_v56 = vld [vmem:[#allocation5 + $0x158] sm:$0xff] }
 0x2c2   :  { %1702 = vmatprep.subr.mxu0 %v6655_v34  ;;  %1773 = vmatprep.subr.mxu1 %v6658_v48  ;;  %10497 = vst [vmem:[#allocation88_spill] sm:$0xff] %v6667_v8  ;;  %10498 = vst [vmem:[#allocation89_spill] sm:$0xff] %v6670_v56  ;;  %v6673_v34 = vld [vmem:[#allocation5 + $0x140] sm:$0xff]  ;;  %v6676_v48 = vld [vmem:[#allocation5 + $0x150] sm:$0xff] }
 0x2c3   :  { %1703 = vmatpush1.msra.mxu0 %v6661_v52  ;;  %1774 = vmatpush1.msra.mxu1 %v6664_v12  ;;  %10499 = vst [vmem:[#allocation94_spill] sm:$0xff] %v6673_v34  ;;  %10500 = vst [vmem:[#allocation97_spill] sm:$0xff] %v6676_v48  ;;  %v6679_v52 = vld [vmem:[#allocation5 + $0x108] sm:$0xff]  ;;  %v6682_v12 = vld [vmem:[#allocation5 + $0x118] sm:$0xff] }
 0x2c4   :  { %1704 = vmatprep.subr.mxu0 %v6667_v8  ;;  %1775 = vmatprep.subr.mxu1 %v6670_v56  ;;  %10501 = vst [vmem:[#allocation101_spill] sm:$0xff] %v6679_v52  ;;  %10502 = vst [vmem:[#allocation103_spill] sm:$0xff] %v6682_v12  ;;  %v6685_v8 = vld [vmem:[#allocation5 + $0x100] sm:$0xff]  ;;  %v6688_v56 = vld [vmem:[#allocation5 + $0x110] sm:$0xff] }
 0x2c5   :  { %1705 = vmatpush1.msra.mxu0 %v6673_v34  ;;  %1776 = vmatpush1.msra.mxu1 %v6676_v48  ;;  %10503 = vst [vmem:[#allocation108_spill] sm:$0xff] %v6685_v8  ;;  %10504 = vst [vmem:[#allocation117_spill] sm:$0xff] %v6688_v56  ;;  %v6691_v34 = vld [vmem:[#allocation5 + $0xc8] sm:$0xff]  ;;  %v6694_v48 = vld [vmem:[#allocation5 + $0xd8] sm:$0xff] }
 0x2c6   :  { %1706 = vmatprep.subr.mxu0 %v6679_v52  ;;  %1777 = vmatprep.subr.mxu1 %v6682_v12  ;;  %10505 = vst [vmem:[#allocation118_spill] sm:$0xff] %v6691_v34  ;;  %10506 = vst [vmem:[#allocation120_spill] sm:$0xff] %v6694_v48  ;;  %v6697_v52 = vld [vmem:[#allocation5 + $0xc0] sm:$0xff]  ;;  %v6700_v12 = vld [vmem:[#allocation5 + $0xd0] sm:$0xff] }
 0x2c7   :  { %1707 = vmatpush1.msra.mxu0 %v6685_v8  ;;  %1778 = vmatpush1.msra.mxu1 %v6688_v56  ;;  %10507 = vst [vmem:[#allocation122_spill] sm:$0xff] %v6697_v52  ;;  %10508 = vst [vmem:[#allocation125_spill] sm:$0xff] %v6700_v12  ;;  %v6703_v8 = vld [vmem:[#allocation5 + $0x88] sm:$0xff]  ;;  %v6706_v56 = vld [vmem:[#allocation5 + $0x98] sm:$0xff] }
 0x2c8   :  { %1708 = vmatprep.subr.mxu0 %v6691_v34  ;;  %1779 = vmatprep.subr.mxu1 %v6694_v48  ;;  %10509 = vst [vmem:[#allocation128_spill] sm:$0xff] %v6703_v8  ;;  %10510 = vst [vmem:[#allocation129_spill] sm:$0xff] %v6706_v56  ;;  %v6709_v34 = vld [vmem:[#allocation5 + $0x80] sm:$0xff]  ;;  %v6712_v48 = vld [vmem:[#allocation5 + $0x90] sm:$0xff] }
 0x2c9   :  { %1709 = vmatpush1.msra.mxu0 %v6697_v52  ;;  %1780 = vmatpush1.msra.mxu1 %v6700_v12  ;;  %10511 = vst [vmem:[#allocation130_spill] sm:$0xff] %v6709_v34  ;;  %10512 = vst [vmem:[#allocation147_spill] sm:$0xff] %v6712_v48  ;;  %v6715_v52 = vld [vmem:[#allocation5 + $0x48] sm:$0xff]  ;;  %v6718_v12 = vld [vmem:[#allocation5 + $0x58] sm:$0xff] }
 0x2ca   :  { %1710 = vmatprep.subr.mxu0 %v6703_v8  ;;  %1781 = vmatprep.subr.mxu1 %v6706_v56  ;;  %10513 = vst [vmem:[#allocation148_spill] sm:$0xff] %v6715_v52  ;;  %10514 = vst [vmem:[#allocation149_spill] sm:$0xff] %v6718_v12  ;;  %v6721_v8 = vld [vmem:[#allocation5 + $0x40] sm:$0xff]  ;;  %v6724_v56 = vld [vmem:[#allocation5 + $0x50] sm:$0xff] }
 0x2cb   :  { %1711 = vmatpush1.msra.mxu0 %v6709_v34  ;;  %1782 = vmatpush1.msra.mxu1 %v6712_v48  ;;  %10515 = vst [vmem:[#allocation150_spill] sm:$0xff] %v6721_v8  ;;  %10516 = vst [vmem:[#allocation151_spill] sm:$0xff] %v6724_v56  ;;  %v6727_v34 = vld [vmem:[#allocation5 + $0x8] sm:$0xff]  ;;  %v6730_v48 = vld [vmem:[#allocation5 + $0x18] sm:$0xff] }
 0x2cc   :  { %1712 = vmatprep.subr.mxu0 %v6715_v52  ;;  %1783 = vmatprep.subr.mxu1 %v6718_v12  ;;  %10517 = vst [vmem:[#allocation152_spill] sm:$0xff] %v6727_v34  ;;  %10518 = vst [vmem:[#allocation153_spill] sm:$0xff] %v6730_v48  ;;  %v6733_v52 = vld [vmem:[#allocation5] sm:$0xff]  ;;  %v6736_v12 = vld [vmem:[#allocation5 + $0x10] sm:$0xff] }
 0x2cd   :  { %1713 = vmatpush1.msra.mxu0 %v6721_v8  ;;  %1784 = vmatpush1.msra.mxu1 %v6724_v56  ;;  %10519 = vst [vmem:[#allocation154_spill] sm:$0xff] %v6733_v52  ;;  %10520 = vst [vmem:[#allocation155_spill] sm:$0xff] %v6736_v12  ;;  %v6739_v8 = vld [vmem:[#allocation5 + $0x7c8] sm:$0xff]  ;;  %v6742_v56 = vld [vmem:[#allocation5 + $0x7d8] sm:$0xff] }
 0x2ce   :  { %1714 = vmatprep.subr.mxu0 %v6727_v34  ;;  %1785 = vmatprep.subr.mxu1 %v6730_v48  ;;  %10521 = vst [vmem:[#allocation156_spill] sm:$0xff] %v6739_v8  ;;  %10522 = vst [vmem:[#allocation157_spill] sm:$0xff] %v6742_v56  ;;  %v6745_v34 = vld [vmem:[#allocation5 + $0x7c0] sm:$0xff]  ;;  %v6748_v48 = vld [vmem:[#allocation5 + $0x7d0] sm:$0xff] }
 0x2cf   :  { %1715 = vmatpush1.msra.mxu0 %v6733_v52  ;;  %1786 = vmatpush1.msra.mxu1 %v6736_v12  ;;  %10523 = vst [vmem:[#allocation158_spill] sm:$0xff] %v6745_v34  ;;  %10524 = vst [vmem:[#allocation159_spill] sm:$0xff] %v6748_v48  ;;  %v6751_v52 = vld [vmem:[#allocation5 + $0x788] sm:$0xff]  ;;  %v6754_v12 = vld [vmem:[#allocation5 + $0x798] sm:$0xff] }
 0x2d0   :  { %1716 = vmatprep.subr.mxu0 %v6739_v8  ;;  %1787 = vmatprep.subr.mxu1 %v6742_v56  ;;  %10525 = vst [vmem:[#allocation160_spill] sm:$0xff] %v6751_v52  ;;  %10526 = vst [vmem:[#allocation161_spill] sm:$0xff] %v6754_v12  ;;  %v6757_v8 = vld [vmem:[#allocation5 + $0x780] sm:$0xff]  ;;  %v6760_v56 = vld [vmem:[#allocation5 + $0x790] sm:$0xff] }
 0x2d1   :  { %1717 = vmatpush2.msra.mxu0 %v6745_v34  ;;  %1788 = vmatpush2.msra.mxu1 %v6748_v48  ;;  %10527 = vst [vmem:[#allocation162_spill] sm:$0xff] %v6757_v8  ;;  %10528 = vst [vmem:[#allocation163_spill] sm:$0xff] %v6760_v56  ;;  %v6763_v34 = vld [vmem:[#allocation5 + $0x748] sm:$0xff]  ;;  %v6766_v48 = vld [vmem:[#allocation5 + $0x758] sm:$0xff] }
 0x2d2   :  { %1718 = vmatprep.subr.mxu0 %v6751_v52  ;;  %1789 = vmatprep.subr.mxu1 %v6754_v12  ;;  %10529 = vst [vmem:[#allocation164_spill] sm:$0xff] %v6763_v34  ;;  %10530 = vst [vmem:[#allocation165_spill] sm:$0xff] %v6766_v48  ;;  %v6769_v52 = vld [vmem:[#allocation5 + $0x740] sm:$0xff]  ;;  %v6772_v12 = vld [vmem:[#allocation5 + $0x750] sm:$0xff] }
 0x2d3   :  { %1719 = vmatpush2.msra.mxu0 %v6757_v8  ;;  %1790 = vmatpush2.msra.mxu1 %v6760_v56  ;;  %10531 = vst [vmem:[#allocation166_spill] sm:$0xff] %v6769_v52  ;;  %10532 = vst [vmem:[#allocation167_spill] sm:$0xff] %v6772_v12  ;;  %v6775_v8 = vld [vmem:[#allocation5 + $0x708] sm:$0xff]  ;;  %v6778_v56 = vld [vmem:[#allocation5 + $0x718] sm:$0xff] }
 0x2d4   :  { %1720 = vmatprep.subr.mxu0 %v6763_v34  ;;  %1791 = vmatprep.subr.mxu1 %v6766_v48  ;;  %10533 = vst [vmem:[#allocation168_spill] sm:$0xff] %v6775_v8  ;;  %10534 = vst [vmem:[#allocation169_spill] sm:$0xff] %v6778_v56  ;;  %v6781_v34 = vld [vmem:[#allocation5 + $0x700] sm:$0xff]  ;;  %v6784_v48 = vld [vmem:[#allocation5 + $0x710] sm:$0xff] }
 0x2d5   :  { %1721 = vmatpush2.msra.mxu0 %v6769_v52  ;;  %1792 = vmatpush2.msra.mxu1 %v6772_v12  ;;  %10535 = vst [vmem:[#allocation170_spill] sm:$0xff] %v6781_v34  ;;  %10536 = vst [vmem:[#allocation171_spill] sm:$0xff] %v6784_v48  ;;  %v6787_v52 = vld [vmem:[#allocation5 + $0x6c8] sm:$0xff]  ;;  %v6790_v12 = vld [vmem:[#allocation5 + $0x6d8] sm:$0xff] }
 0x2d6   :  { %1722 = vmatprep.subr.mxu0 %v6775_v8  ;;  %1793 = vmatprep.subr.mxu1 %v6778_v56  ;;  %10537 = vst [vmem:[#allocation172_spill] sm:$0xff] %v6787_v52  ;;  %10538 = vst [vmem:[#allocation173_spill] sm:$0xff] %v6790_v12  ;;  %v6793_v8 = vld [vmem:[#allocation5 + $0x6c0] sm:$0xff]  ;;  %v6796_v56 = vld [vmem:[#allocation5 + $0x6d0] sm:$0xff] }
 0x2d7   :  { %1723 = vmatpush2.msra.mxu0 %v6781_v34  ;;  %1794 = vmatpush2.msra.mxu1 %v6784_v48  ;;  %10539 = vst [vmem:[#allocation174_spill] sm:$0xff] %v6793_v8  ;;  %10540 = vst [vmem:[#allocation175_spill] sm:$0xff] %v6796_v56  ;;  %v6799_v34 = vld [vmem:[#allocation5 + $0x688] sm:$0xff]  ;;  %v6802_v48 = vld [vmem:[#allocation5 + $0x698] sm:$0xff] }
 0x2d8   :  { %1724 = vmatprep.subr.mxu0 %v6787_v52  ;;  %1795 = vmatprep.subr.mxu1 %v6790_v12  ;;  %10541 = vst [vmem:[#allocation176_spill] sm:$0xff] %v6799_v34  ;;  %10542 = vst [vmem:[#allocation177_spill] sm:$0xff] %v6802_v48  ;;  %v6805_v52 = vld [vmem:[#allocation5 + $0x680] sm:$0xff]  ;;  %v6808_v12 = vld [vmem:[#allocation5 + $0x690] sm:$0xff] }
 0x2d9   :  { %1725 = vmatpush2.msra.mxu0 %v6793_v8  ;;  %1796 = vmatpush2.msra.mxu1 %v6796_v56  ;;  %10543 = vst [vmem:[#allocation178_spill] sm:$0xff] %v6805_v52  ;;  %10544 = vst [vmem:[#allocation179_spill] sm:$0xff] %v6808_v12  ;;  %v6811_v8 = vld [vmem:[#allocation5 + $0x648] sm:$0xff]  ;;  %v6814_v56 = vld [vmem:[#allocation5 + $0x658] sm:$0xff] }
 0x2da   :  { %1726 = vmatprep.subr.mxu0 %v6799_v34  ;;  %1797 = vmatprep.subr.mxu1 %v6802_v48  ;;  %10545 = vst [vmem:[#allocation180_spill] sm:$0xff] %v6811_v8  ;;  %10546 = vst [vmem:[#allocation181_spill] sm:$0xff] %v6814_v56  ;;  %v6817_v34 = vld [vmem:[#allocation5 + $0x640] sm:$0xff]  ;;  %v6820_v48 = vld [vmem:[#allocation5 + $0x650] sm:$0xff] }
 0x2db   :  { %1727 = vmatpush2.msra.mxu0 %v6805_v52  ;;  %1798 = vmatpush2.msra.mxu1 %v6808_v12  ;;  %10547 = vst [vmem:[#allocation182_spill] sm:$0xff] %v6817_v34  ;;  %10548 = vst [vmem:[#allocation183_spill] sm:$0xff] %v6820_v48  ;;  %v6823_v52 = vld [vmem:[#allocation5 + $0x608] sm:$0xff]  ;;  %v6826_v12 = vld [vmem:[#allocation5 + $0x618] sm:$0xff] }
 0x2dc   :  { %1728 = vmatprep.subr.mxu0 %v6811_v8  ;;  %1799 = vmatprep.subr.mxu1 %v6814_v56  ;;  %10549 = vst [vmem:[#allocation184_spill] sm:$0xff] %v6823_v52  ;;  %10550 = vst [vmem:[#allocation185_spill] sm:$0xff] %v6826_v12  ;;  %v6829_v8 = vld [vmem:[#allocation5 + $0x600] sm:$0xff]  ;;  %v6832_v56 = vld [vmem:[#allocation5 + $0x610] sm:$0xff] }
 0x2dd   :  { %1729 = vmatpush2.msra.mxu0 %v6817_v34  ;;  %1800 = vmatpush2.msra.mxu1 %v6820_v48  ;;  %10551 = vst [vmem:[#allocation186_spill] sm:$0xff] %v6829_v8  ;;  %10552 = vst [vmem:[#allocation187_spill] sm:$0xff] %v6832_v56  ;;  %v6835_v34 = vld [vmem:[#allocation5 + $0x5c8] sm:$0xff]  ;;  %v6838_v48 = vld [vmem:[#allocation5 + $0x5d8] sm:$0xff] }
 0x2de   :  { %1730 = vmatprep.subr.mxu0 %v6823_v52  ;;  %1801 = vmatprep.subr.mxu1 %v6826_v12  ;;  %10553 = vst [vmem:[#allocation188_spill] sm:$0xff] %v6835_v34  ;;  %10554 = vst [vmem:[#allocation189_spill] sm:$0xff] %v6838_v48  ;;  %v6841_v52 = vld [vmem:[#allocation5 + $0x5c0] sm:$0xff]  ;;  %v6844_v12 = vld [vmem:[#allocation5 + $0x5d0] sm:$0xff] }
 0x2df   :  { %1731 = vmatpush2.msra.mxu0 %v6829_v8  ;;  %1802 = vmatpush2.msra.mxu1 %v6832_v56  ;;  %10555 = vst [vmem:[#allocation190_spill] sm:$0xff] %v6841_v52  ;;  %10556 = vst [vmem:[#allocation191_spill] sm:$0xff] %v6844_v12  ;;  %v6847_v8 = vld [vmem:[#allocation5 + $0x588] sm:$0xff]  ;;  %v6850_v56 = vld [vmem:[#allocation5 + $0x598] sm:$0xff] }
 0x2e0   :  { %1732 = vmatprep.subr.mxu0 %v6835_v34  ;;  %1803 = vmatprep.subr.mxu1 %v6838_v48  ;;  %10557 = vst [vmem:[#allocation192_spill] sm:$0xff] %v6847_v8  ;;  %10558 = vst [vmem:[#allocation193_spill] sm:$0xff] %v6850_v56  ;;  %v10559_v34 = vld [vmem:[#allocation92_spill] sm:$0xff]  ;;  %v10561_v48 = vld [vmem:[#allocation93_spill] sm:$0xff] }
 0x2e1   :  { %1733 = vmatpush2.msra.mxu0 %v6841_v52  ;;  %1804 = vmatpush2.msra.mxu1 %v6844_v12  ;;  %10560 = vst [vmem:[#allocation92_spill] sm:$0xff] %v6854_v4  ;;  %v6858_v52 = vld [vmem:[#allocation5 + $0x558] sm:$0xff]  ;;  %v10563_v12 = vld [vmem:[#allocation95_spill] sm:$0xff] }
 0x2e2   :  { %1734 = vmatprep.subr.mxu0 %v6847_v8  ;;  %1805 = vmatprep.subr.mxu1 %v6850_v56  ;;  %10562 = vst [vmem:[#allocation93_spill] sm:$0xff] %v6858_v52  ;;  %10564 = vst [vmem:[#allocation95_spill] sm:$0xff] %v6862_v16  ;;  %v10565_v8 = vld [vmem:[#allocation96_spill] sm:$0xff]  ;;  %v6866_v56 = vld [vmem:[#allocation5 + $0x518] sm:$0xff] }
 0x2e3   :  { %1735 = vmatpush2.msra.mxu0 %v10559_v34  ;;  %1806 = vmatpush2.msra.mxu1 %v6854_v4  ;;  %10566 = vst [vmem:[#allocation96_spill] sm:$0xff] %v6866_v56  ;;  %v10567_v34 = vld [vmem:[#allocation100_spill] sm:$0xff] }
 0x2e4   :  { %1736 = vmatprep.subr.mxu0 %v10561_v48  ;;  %1807 = vmatprep.subr.mxu1 %v6858_v52  ;;  %v6870_v4 = vld [vmem:[#allocation5 + $0x510] sm:$0xff]  ;;  %v10569_v48 = vld [vmem:[#allocation102_spill] sm:$0xff]  ;;  %v6874_v52 = vld [vmem:[#allocation5 + $0x4d8] sm:$0xff] }
 0x2e5   :  { %1737 = vmatpush2.msra.mxu0 %v10563_v12  ;;  %1808 = vmatpush2.msra.mxu1 %v6862_v16  ;;  %10568 = vst [vmem:[#allocation100_spill] sm:$0xff] %v6870_v4  ;;  %10570 = vst [vmem:[#allocation102_spill] sm:$0xff] %v6874_v52  ;;  %v10571_v12 = vld [vmem:[#allocation106_spill] sm:$0xff]  ;;  %v6878_v16 = vld [vmem:[#allocation5 + $0x4d0] sm:$0xff] }
 0x2e6   :  { %1738 = vmatprep.subr.mxu0 %v10565_v8  ;;  %1809 = vmatprep.subr.mxu1 %v6866_v56  ;;  %10572 = vst [vmem:[#allocation106_spill] sm:$0xff] %v6878_v16  ;;  %v10573_v8 = vld [vmem:[#allocation107_spill] sm:$0xff]  ;;  %v6882_v56 = vld [vmem:[#allocation5 + $0x498] sm:$0xff] }
 0x2e7   :  { %1739 = vmatpush2.msra.mxu0 %v10567_v34  ;;  %1810 = vmatpush2.msra.mxu1 %v6870_v4  ;;  %10574 = vst [vmem:[#allocation107_spill] sm:$0xff] %v6882_v56  ;;  %v10575_v34 = vld [vmem:[#allocation109_spill] sm:$0xff]  ;;  %v6886_v4 = vld [vmem:[#allocation5 + $0x490] sm:$0xff] }
 0x2e8   :  { %1740 = vmatprep.subr.mxu0 %v10569_v48  ;;  %1811 = vmatprep.subr.mxu1 %v6874_v52  ;;  %10576 = vst [vmem:[#allocation109_spill] sm:$0xff] %v6886_v4  ;;  %v10577_v48 = vld [vmem:[#allocation110_spill] sm:$0xff]  ;;  %v6890_v52 = vld [vmem:[#allocation5 + $0x458] sm:$0xff] }
 0x2e9   :  { %1741 = vmatpush2.msra.mxu0 %v10571_v12  ;;  %1812 = vmatpush2.msra.mxu1 %v6878_v16  ;;  %10578 = vst [vmem:[#allocation110_spill] sm:$0xff] %v6890_v52  ;;  %v10579_v12 = vld [vmem:[#allocation113_spill] sm:$0xff]  ;;  %v6894_v16 = vld [vmem:[#allocation5 + $0x450] sm:$0xff] }
 0x2ea   :  { %1742 = vmatprep.subr.mxu0 %v10573_v8  ;;  %1813 = vmatprep.subr.mxu1 %v6882_v56  ;;  %10580 = vst [vmem:[#allocation113_spill] sm:$0xff] %v6894_v16  ;;  %v10581_v8 = vld [vmem:[#allocation114_spill] sm:$0xff]  ;;  %v6898_v56 = vld [vmem:[#allocation5 + $0x418] sm:$0xff] }
 0x2eb   :  { %1743 = vmatpush2.msra.mxu0 %v10575_v34  ;;  %1814 = vmatpush2.msra.mxu1 %v6886_v4  ;;  %10582 = vst [vmem:[#allocation114_spill] sm:$0xff] %v6898_v56  ;;  %v10583_v34 = vld [vmem:[#allocation119_spill] sm:$0xff]  ;;  %v6902_v4 = vld [vmem:[#allocation5 + $0x410] sm:$0xff] }
 0x2ec   :  { %1744 = vmatprep.subr.mxu0 %v10577_v48  ;;  %1815 = vmatprep.subr.mxu1 %v6890_v52  ;;  %10584 = vst [vmem:[#allocation119_spill] sm:$0xff] %v6902_v4  ;;  %v10585_v48 = vld [vmem:[#allocation121_spill] sm:$0xff] }
 0x2ed   :  { %1745 = vmatpush2.msra.mxu0 %v10579_v12  ;;  %1816 = vmatpush2.msra.mxu1 %v6894_v16  ;;  %v6906_v52 = vld [vmem:[#allocation5 + $0x3f8] sm:$0xff] }
 0x2ee   :  { %1746 = vmatprep.subr.mxu0 %v10581_v8  ;;  %1817 = vmatprep.subr.mxu1 %v6898_v56  ;;  %10586 = vst [vmem:[#allocation121_spill] sm:$0xff] %v6906_v52  ;;  %v10587_v8 = vld [vmem:[#allocation67_spill] sm:$0xff] }
 0x2ef   :  { %1747 = vmatpush2.msra.mxu0 %v10583_v34  ;;  %1818 = vmatpush2.msra.mxu1 %v6902_v4 }
 0x2f0   :  { %1826 = vmatprep.subr.mxu0 %v10585_v48  ;;  %1897 = vmatprep.subr.mxu1 %v6906_v52 }
 0x32e   :  { %v1408_v12 = vpop.f32.mrf.mxu0  ;;  %v1479_v16 = vpop.f32.mrf.mxu1 }
 0x32f   :  { %v1626_v43 = vadd.f32 %v1408_v12, %v10587_v8  ;;  %v1628_v20 = vadd.f32 %v1479_v16, %v6142_v33 }
 0x330   :  { %v1410_v44 = vpop.f32.mrf.mxu0  ;;  %v1481_v56 = vpop.f32.mrf.mxu1 }
 0x331   :  { %v1627_v34 = vadd.f32 %v1410_v44, %v10588_v38  ;;  %v3956_v21 = vmul.f32 -1.442695, %v1626_v43  ;;  %v1629_v23 = vadd.f32 %v1481_v56, %v6147_v11  ;;  %v3958_v4 = vmul.f32 -1.442695, %v1628_v20  ;;  %v10589_v11 = vld [vmem:[#allocation68_spill] sm:$0xff] }
 0x333   :  { %v3957_v51 = vmul.f32 -1.442695, %v1627_v34  ;;  %4099 = vpow2.f32 %v3956_v21  ;;  %v3959_v48 = vmul.f32 -1.442695, %v1629_v23 }
 0x334   :  { %4101 = vpow2.f32 %v3958_v4  ;;  %v10590_v4 = vld [vmem:[#allocation72_spill] sm:$0xff] }
 0x335   :  { %4103 = vpow2.f32 %v3957_v51 }
 0x336   :  { %4105 = vpow2.f32 %v3959_v48 }
 0x340   :  { %v4100_v52 = vpop.eup %4099 }
 0x341   :  { %v4102_v31 = vpop.eup %4101  ;;  %v1652_v37 = vadd.f32 1.0, %v4100_v52 }
 0x342   :  { %v4104_v29 = vpop.eup %4103  ;;  %v1654_v8 = vadd.f32 1.0, %v4102_v31 }
 0x343   :  { %v4106_v12 = vpop.eup %4105  ;;  %v1653_v33 = vadd.f32 1.0, %v4104_v29  ;;  %4107 = vrcp.f32 %v1652_v37 }
 0x344   :  { %v1655_v16 = vadd.f32 1.0, %v4106_v12  ;;  %4109 = vrcp.f32 %v1654_v8 }
 0x345   :  { %4111 = vrcp.f32 %v1653_v33 }
 0x350   :  { %v4108_v29 = vpop.eup %4107 }
 0x351   :  { %v4110_v37 = vpop.eup %4109 }
 0x352   :  { %v4112_v34 = vpop.eup %4111 }
 0x36f   :  { %v1550_v38 = vpop.f32.mrf.mxu0  ;;  %v1621_v43 = vpop.f32.mrf.mxu1 }
 0x370   :  { %v1630_v44 = vadd.f32 %v1550_v38, %v10589_v11  ;;  %v1632_v21 = vadd.f32 %v1621_v43, %v6237_v54  ;;  %v1672_v54 = vmul.f32 %v4110_v37, %v6295_v25  ;;  %v6956_v37 = vld [vmem:[#allocation5 + $0x338] sm:$0xff] }
 0x371   :  { %v1552_v23 = vpop.f32.mrf.mxu0  ;;  %v1623_v51 = vpop.f32.mrf.mxu1 }
 0x372   :  { %v3960_v20 = vmul.f32 -1.442695, %v1630_v44  ;;  %4113 = vtanh.f32 %v1632_v21  ;;  %v1631_v56 = vadd.f32 %v1552_v23, %v10590_v4  ;;  %v1633_v52 = vadd.f32 %v1623_v51, %v6242_v1 }
 0x373   :  { %4115 = vrcp.f32 %v1655_v16 }
 0x374   :  { %4117 = vpow2.f32 %v3960_v20  ;;  %v3961_v31 = vmul.f32 -1.442695, %v1631_v56 }
 0x375   :  { %4119 = vtanh.f32 %v1633_v52 }
 0x376   :  { %4121 = vpow2.f32 %v3961_v31  ;;  %v6939_v31 = vld [vmem:[#allocation5 + $0x3b8] sm:$0xff] }
 0x37f   :  { %v4114_v48 = vpop.eup %4113 }
 0x380   :  { %v4116_v12 = vpop.eup %4115  ;;  %v1674_v8 = vmul.f32 %v4114_v48, %v4108_v29  ;;  %v6944_v29 = vld [vmem:[#allocation5 + $0x3b0] sm:$0xff]  ;;  %v7100_v48 = vld [vmem:[#allocation5 + $0x6b8] sm:$0xff] }
 0x381   :  { %v4118_v33 = vpop.eup %4117  ;;  %v1673_v1 = vmul.f32 %v4116_v12, %v6297_v9  ;;  %v6934_v9 = vld [vmem:[#allocation5 + $0x3f0] sm:$0xff] }
 0x382   :  { %v4120_v38 = vpop.eup %4119  ;;  %v1656_v43 = vadd.f32 1.0, %v4118_v33  ;;  %v6918_v11 = vadd.f32 %v1674_v8, %v1672_v54  ;;  %v7104_v12 = vld [vmem:[#allocation5 + $0x6b0] sm:$0xff]  ;;  %v7108_v54 = vld [vmem:[#allocation5 + $0x678] sm:$0xff] }
 0x383   :  { %v4122_v44 = vpop.eup %4121  ;;  %v1675_v16 = vmul.f32 %v4120_v38, %v4112_v34  ;;  %v7096_v34 = vld [vmem:[#allocation5 + $0x6f0] sm:$0xff]  ;;  %10596 = vst [vmem:[#allocation68_spill] sm:$0xff] %v7104_v12  ;;  %10598 = vst [vmem:[#allocation72_spill] sm:$0xff] %v7108_v54  ;;  %v10601_v38 = vld [vmem:[#allocation25_spill] sm:$0xff] }
 0x384   :  { %4123 = vrcp.f32 %v1656_v43  ;;  %v1657_v21 = vadd.f32 1.0, %v4122_v44  ;;  %v10599_v8 = vld [vmem:[#allocation24_spill] sm:$0xff]  ;;  %v7116_v43 = vld [vmem:[#allocation5 + $0x638] sm:$0xff]  ;;  %v10603_v44 = vld [vmem:[#allocation26_spill] sm:$0xff] }
 0x385   :  { %4125 = vtanh.f32 %v6918_v11  ;;  %v6922_v23 = vadd.f32 %v1675_v16, %v1673_v1  ;;  %v7112_v33 = vld [vmem:[#allocation5 + $0x670] sm:$0xff]  ;;  %v10605_v16 = vld [vmem:[#allocation27_spill] sm:$0xff] }
 0x386   :  { %4127 = vrcp.f32 %v1657_v21  ;;  %v7120_v1 = vld [vmem:[#allocation5 + $0x630] sm:$0xff]  ;;  %v7124_v21 = vld [vmem:[#allocation5 + $0x5f8] sm:$0xff] }
 0x387   :  { %4129 = vtanh.f32 %v6922_v23 }
 0x391   :  { %v4124_v25 = vpop.eup %4123 }
 0x392   :  { %v4126_v51 = vpop.eup %4125 }
 0x393   :  { %v4128_v20 = vpop.eup %4127  ;;  %v6927_v52 = vmul.f32 %v4126_v51, %v4124_v25  ;;  %v10607_v25 = vld [vmem:[#allocation28_spill] sm:$0xff] }
 0x394   :  { %v4130_v4 = vpop.eup %4129  ;;  %v7128_v51 = vld [vmem:[#allocation5 + $0x5f0] sm:$0xff] }
 0x395   :  { %v6925_v56 = vmul.f32 %v4130_v4, %v4128_v20  ;;  %10592 = vst [vmem:[#allocation71_spill] sm:$0xff] %v6927_v52  ;;  %10608 = vst [vmem:[#allocation24_spill] sm:$0xff] %v7128_v51  ;;  %v10609_v20 = vld [vmem:[#allocation29_spill] sm:$0xff] }
 0x396   :  { %v7132_v4 = vld [vmem:[#allocation5 + $0x5b8] sm:$0xff] }
 0x397   :  { %10591 = vst [vmem:[#allocation67_spill] sm:$0xff] %v6925_v56  ;;  %1748 = vmatprep.mubr.f32.mxu0 %v6925_v56  ;;  %1819 = vmatprep.mubr.f32.mxu1 %v6925_v56  ;;  %10610 = vst [vmem:[#allocation25_spill] sm:$0xff] %v7132_v4 }
 0x398   :  { %1749 = vmatmul.mubr.f32.vlgmr.msra.gmra.mxu0 %v6927_v52  ;;  %1820 = vmatmul.mubr.f32.vlgmr.msra.gmra.mxu1 %v6927_v52 }
 0x399   :  { %1827 = vmatpush1.msra.mxu0 %v6309_v55  ;;  %1898 = vmatpush1.msra.mxu1 %v6934_v9  ;;  %v6948_v55 = vld [vmem:[#allocation5 + $0x378] sm:$0xff] }
 0x39a   :  { %1828 = vmatprep.subr.mxu0 %v6313_v28  ;;  %1890 = vmatprep.mubr.f32.mxu0 %v6925_v56  ;;  %v6952_v28 = vld [vmem:[#allocation5 + $0x370] sm:$0xff] }
 0x39b   :  { %1899 = vmatprep.subr.mxu1 %v6939_v31  ;;  %1961 = vmatprep.mubr.f32.mxu1 %v6925_v56  ;;  %v7160_v56 = vld [vmem:[#allocation5 + $0x4f0] sm:$0xff] }
 0x39c   :  { %1829 = vmatpush1.msra.mxu0 %v6319_v27  ;;  %1900 = vmatpush1.msra.mxu1 %v6944_v29  ;;  %v6960_v27 = vld [vmem:[#allocation5 + $0x330] sm:$0xff] }
 0x39d   :  { %1830 = vmatprep.subr.mxu0 %v6323_v50  ;;  %1901 = vmatprep.subr.mxu1 %v6948_v55  ;;  %v6964_v50 = vld [vmem:[#allocation5 + $0x2f8] sm:$0xff] }
 0x39e   :  { %1831 = vmatpush1.msra.mxu0 %v6327_v32  ;;  %1902 = vmatpush1.msra.mxu1 %v6952_v28  ;;  %v6968_v32 = vld [vmem:[#allocation5 + $0x2f0] sm:$0xff] }
 0x39f   :  { %1832 = vmatprep.subr.mxu0 %v6331_v46  ;;  %1903 = vmatprep.subr.mxu1 %v6956_v37  ;;  %v6972_v46 = vld [vmem:[#allocation5 + $0x2b8] sm:$0xff] }
 0x3a0   :  { %1833 = vmatpush1.msra.mxu0 %v6335_v3  ;;  %1904 = vmatpush1.msra.mxu1 %v6960_v27  ;;  %v6976_v3 = vld [vmem:[#allocation5 + $0x2b0] sm:$0xff] }
 0x3a1   :  { %1834 = vmatprep.subr.mxu0 %v6339_v63  ;;  %1905 = vmatprep.subr.mxu1 %v6964_v50  ;;  %v6980_v63 = vld [vmem:[#allocation5 + $0x278] sm:$0xff] }
 0x3a2   :  { %1835 = vmatpush1.msra.mxu0 %v6343_v35  ;;  %1906 = vmatpush1.msra.mxu1 %v6968_v32  ;;  %v6984_v35 = vld [vmem:[#allocation5 + $0x270] sm:$0xff] }
 0x3a3   :  { %1836 = vmatprep.subr.mxu0 %v6347_v0  ;;  %1907 = vmatprep.subr.mxu1 %v6972_v46  ;;  %v6988_v0 = vld [vmem:[#allocation5 + $0x238] sm:$0xff] }
 0x3a4   :  { %1837 = vmatpush1.msra.mxu0 %v6351_v26  ;;  %1908 = vmatpush1.msra.mxu1 %v6976_v3  ;;  %v6992_v26 = vld [vmem:[#allocation5 + $0x230] sm:$0xff] }
 0x3a5   :  { %1838 = vmatprep.subr.mxu0 %v6355_v41  ;;  %1909 = vmatprep.subr.mxu1 %v6980_v63  ;;  %v6996_v41 = vld [vmem:[#allocation5 + $0x1f8] sm:$0xff] }
 0x3a6   :  { %1839 = vmatpush1.msra.mxu0 %v6359_v10  ;;  %1910 = vmatpush1.msra.mxu1 %v6984_v35  ;;  %v7000_v10 = vld [vmem:[#allocation5 + $0x1f0] sm:$0xff] }
 0x3a7   :  { %1840 = vmatprep.subr.mxu0 %v6363_v19  ;;  %1911 = vmatprep.subr.mxu1 %v6988_v0  ;;  %v7004_v19 = vld [vmem:[#allocation5 + $0x1b8] sm:$0xff] }
 0x3a8   :  { %1841 = vmatpush1.msra.mxu0 %v6367_v57  ;;  %1912 = vmatpush1.msra.mxu1 %v6992_v26  ;;  %v7008_v57 = vld [vmem:[#allocation5 + $0x1b0] sm:$0xff] }
 0x3a9   :  { %1842 = vmatprep.subr.mxu0 %v6371_v5  ;;  %1913 = vmatprep.subr.mxu1 %v6996_v41  ;;  %v7012_v5 = vld [vmem:[#allocation5 + $0x178] sm:$0xff] }
 0x3aa   :  { %1843 = vmatpush1.msra.mxu0 %v6375_v24  ;;  %1914 = vmatpush1.msra.mxu1 %v7000_v10  ;;  %v7016_v24 = vld [vmem:[#allocation5 + $0x170] sm:$0xff] }
 0x3ab   :  { %1844 = vmatprep.subr.mxu0 %v6379_v2  ;;  %1915 = vmatprep.subr.mxu1 %v7004_v19  ;;  %v7020_v2 = vld [vmem:[#allocation5 + $0x138] sm:$0xff] }
 0x3ac   :  { %1845 = vmatpush1.msra.mxu0 %v6383_v17  ;;  %1916 = vmatpush1.msra.mxu1 %v7008_v57  ;;  %v7024_v17 = vld [vmem:[#allocation5 + $0x130] sm:$0xff] }
 0x3ad   :  { %1846 = vmatprep.subr.mxu0 %v6387_v13  ;;  %1917 = vmatprep.subr.mxu1 %v7012_v5  ;;  %v7028_v13 = vld [vmem:[#allocation5 + $0xf8] sm:$0xff] }
 0x3ae   :  { %1847 = vmatpush1.msra.mxu0 %v6391_v61  ;;  %1918 = vmatpush1.msra.mxu1 %v7016_v24  ;;  %v7032_v61 = vld [vmem:[#allocation5 + $0xf0] sm:$0xff] }
 0x3af   :  { %1848 = vmatprep.subr.mxu0 %v6395_v42  ;;  %1919 = vmatprep.subr.mxu1 %v7020_v2  ;;  %v7036_v42 = vld [vmem:[#allocation5 + $0xb8] sm:$0xff] }
 0x3b0   :  { %1849 = vmatpush1.msra.mxu0 %v6399_v59  ;;  %1920 = vmatpush1.msra.mxu1 %v7024_v17  ;;  %v7040_v59 = vld [vmem:[#allocation5 + $0xb0] sm:$0xff] }
 0x3b1   :  { %1850 = vmatprep.subr.mxu0 %v6403_v62  ;;  %1921 = vmatprep.subr.mxu1 %v7028_v13  ;;  %v7044_v62 = vld [vmem:[#allocation5 + $0x78] sm:$0xff] }
 0x3b2   :  { %1851 = vmatpush1.msra.mxu0 %v6407_v40  ;;  %1922 = vmatpush1.msra.mxu1 %v7032_v61  ;;  %v7048_v40 = vld [vmem:[#allocation5 + $0x70] sm:$0xff] }
 0x3b3   :  { %1852 = vmatprep.subr.mxu0 %v6411_v15  ;;  %1923 = vmatprep.subr.mxu1 %v7036_v42  ;;  %v7052_v15 = vld [vmem:[#allocation5 + $0x38] sm:$0xff] }
 0x3b4   :  { %1853 = vmatpush1.msra.mxu0 %v6415_v36  ;;  %1924 = vmatpush1.msra.mxu1 %v7040_v59  ;;  %v7056_v36 = vld [vmem:[#allocation5 + $0x30] sm:$0xff] }
 0x3b5   :  { %1854 = vmatprep.subr.mxu0 %v6419_v49  ;;  %1925 = vmatprep.subr.mxu1 %v7044_v62  ;;  %v7060_v49 = vld [vmem:[#allocation5 + $0x7f8] sm:$0xff] }
 0x3b6   :  { %1855 = vmatpush1.msra.mxu0 %v6423_v30  ;;  %1926 = vmatpush1.msra.mxu1 %v7048_v40  ;;  %v7064_v30 = vld [vmem:[#allocation5 + $0x7f0] sm:$0xff] }
 0x3b7   :  { %1856 = vmatprep.subr.mxu0 %v6427_v22  ;;  %1927 = vmatprep.subr.mxu1 %v7052_v15  ;;  %v7068_v22 = vld [vmem:[#allocation5 + $0x7b8] sm:$0xff] }
 0x3b8   :  { %1857 = vmatpush1.msra.mxu0 %v6431_v53  ;;  %1928 = vmatpush1.msra.mxu1 %v7056_v36  ;;  %v7072_v53 = vld [vmem:[#allocation5 + $0x7b0] sm:$0xff] }
 0x3b9   :  { %1858 = vmatprep.subr.mxu0 %v6435_v14  ;;  %1929 = vmatprep.subr.mxu1 %v7060_v49  ;;  %v7076_v14 = vld [vmem:[#allocation5 + $0x778] sm:$0xff] }
 0x3ba   :  { %1859 = vmatpush2.msra.mxu0 %v6439_v7  ;;  %1930 = vmatpush2.msra.mxu1 %v7064_v30  ;;  %v7080_v7 = vld [vmem:[#allocation5 + $0x770] sm:$0xff] }
 0x3bb   :  { %1860 = vmatprep.subr.mxu0 %v6443_v58  ;;  %1931 = vmatprep.subr.mxu1 %v7068_v22  ;;  %v7084_v58 = vld [vmem:[#allocation5 + $0x738] sm:$0xff] }
 0x3bc   :  { %1861 = vmatpush2.msra.mxu0 %v6447_v47  ;;  %1932 = vmatpush2.msra.mxu1 %v7072_v53  ;;  %v7088_v47 = vld [vmem:[#allocation5 + $0x730] sm:$0xff] }
 0x3bd   :  { %1862 = vmatprep.subr.mxu0 %v6451_v6  ;;  %1933 = vmatprep.subr.mxu1 %v7076_v14  ;;  %v7092_v6 = vld [vmem:[#allocation5 + $0x6f8] sm:$0xff] }
 0x3be   :  { %1863 = vmatpush2.msra.mxu0 %v6455_v18  ;;  %1934 = vmatpush2.msra.mxu1 %v7080_v7  ;;  %v10593_v18 = vld [vmem:[#allocation60_spill] sm:$0xff] }
 0x3bf   :  { %1864 = vmatprep.subr.mxu0 %v6459_v45  ;;  %1935 = vmatprep.subr.mxu1 %v7084_v58  ;;  %v10594_v45 = vld [vmem:[#allocation56_spill] sm:$0xff]  ;;  %10600 = vst [vmem:[#allocation60_spill] sm:$0xff] %v7112_v33 }
 0x3c0   :  { %1865 = vmatpush2.msra.mxu0 %v6463_v39  ;;  %1936 = vmatpush2.msra.mxu1 %v7088_v47  ;;  %v10595_v39 = vld [vmem:[#allocation22_spill] sm:$0xff]  ;;  %10602 = vst [vmem:[#allocation56_spill] sm:$0xff] %v7116_v43 }
 0x3c1   :  { %1866 = vmatprep.subr.mxu0 %v6467_v60  ;;  %1937 = vmatprep.subr.mxu1 %v7092_v6  ;;  %v10597_v60 = vld [vmem:[#allocation23_spill] sm:$0xff]  ;;  %10604 = vst [vmem:[#allocation22_spill] sm:$0xff] %v7120_v1 }
 0x3c2   :  { %1867 = vmatpush2.msra.mxu0 %v10593_v18  ;;  %1938 = vmatpush2.msra.mxu1 %v7096_v34  ;;  %10606 = vst [vmem:[#allocation23_spill] sm:$0xff] %v7124_v21  ;;  %v10611_v18 = vld [vmem:[#allocation30_spill] sm:$0xff] }
 0x3c3   :  { %1868 = vmatprep.subr.mxu0 %v10594_v45  ;;  %1939 = vmatprep.subr.mxu1 %v7100_v48  ;;  %v7136_v45 = vld [vmem:[#allocation5 + $0x5b0] sm:$0xff] }
 0x3c4   :  { %1869 = vmatpush2.msra.mxu0 %v10595_v39  ;;  %1940 = vmatpush2.msra.mxu1 %v7104_v12  ;;  %10612 = vst [vmem:[#allocation26_spill] sm:$0xff] %v7136_v45  ;;  %v10613_v39 = vld [vmem:[#allocation31_spill] sm:$0xff] }
 0x3c5   :  { %1870 = vmatprep.subr.mxu0 %v10597_v60  ;;  %1941 = vmatprep.subr.mxu1 %v7108_v54  ;;  %v7140_v60 = vld [vmem:[#allocation5 + $0x578] sm:$0xff] }
 0x3c6   :  { %1871 = vmatpush2.msra.mxu0 %v10599_v8  ;;  %1942 = vmatpush2.msra.mxu1 %v7112_v33  ;;  %10614 = vst [vmem:[#allocation27_spill] sm:$0xff] %v7140_v60  ;;  %v10615_v8 = vld [vmem:[#allocation32_spill] sm:$0xff] }
 0x3c7   :  { %1872 = vmatprep.subr.mxu0 %v10601_v38  ;;  %1943 = vmatprep.subr.mxu1 %v7116_v43  ;;  %v7144_v38 = vld [vmem:[#allocation5 + $0x570] sm:$0xff]  ;;  %10624 = vst [vmem:[#allocation32_spill] sm:$0xff] %v7160_v56 }
 0x3c8   :  { %1873 = vmatpush2.msra.mxu0 %v10603_v44  ;;  %1944 = vmatpush2.msra.mxu1 %v7120_v1  ;;  %10616 = vst [vmem:[#allocation28_spill] sm:$0xff] %v7144_v38  ;;  %v10617_v44 = vld [vmem:[#allocation33_spill] sm:$0xff] }
 0x3c9   :  { %1874 = vmatprep.subr.mxu0 %v10605_v16  ;;  %1945 = vmatprep.subr.mxu1 %v7124_v21  ;;  %v7148_v16 = vld [vmem:[#allocation5 + $0x538] sm:$0xff] }
 0x3ca   :  { %1875 = vmatpush2.msra.mxu0 %v10607_v25  ;;  %1946 = vmatpush2.msra.mxu1 %v7128_v51  ;;  %10618 = vst [vmem:[#allocation29_spill] sm:$0xff] %v7148_v16  ;;  %v10619_v25 = vld [vmem:[#allocation34_spill] sm:$0xff] }
 0x3cb   :  { %1876 = vmatprep.subr.mxu0 %v10609_v20  ;;  %1947 = vmatprep.subr.mxu1 %v7132_v4  ;;  %v7152_v20 = vld [vmem:[#allocation5 + $0x530] sm:$0xff]  ;;  %v10769_v4 = vld [vmem:[#allocation81_spill] sm:$0xff] }
 0x3cc   :  { %1877 = vmatpush2.msra.mxu0 %v10611_v18  ;;  %1948 = vmatpush2.msra.mxu1 %v7136_v45  ;;  %10620 = vst [vmem:[#allocation30_spill] sm:$0xff] %v7152_v20  ;;  %v10621_v18 = vld [vmem:[#allocation35_spill] sm:$0xff] }
 0x3cd   :  { %1878 = vmatprep.subr.mxu0 %v10613_v39  ;;  %1949 = vmatprep.subr.mxu1 %v7140_v60  ;;  %v7156_v39 = vld [vmem:[#allocation5 + $0x4f8] sm:$0xff] }
 0x3ce   :  { %1879 = vmatpush2.msra.mxu0 %v10615_v8  ;;  %1950 = vmatpush2.msra.mxu1 %v7144_v38  ;;  %10622 = vst [vmem:[#allocation31_spill] sm:$0xff] %v7156_v39  ;;  %v10623_v8 = vld [vmem:[#allocation36_spill] sm:$0xff]  ;;  %v10661_v38 = vld [vmem:[#allocation61_spill] sm:$0xff] }
 0x3cf   :  { %1880 = vmatprep.subr.mxu0 %v10617_v44  ;;  %1951 = vmatprep.subr.mxu1 %v7148_v16  ;;  %v10625_v44 = vld [vmem:[#allocation37_spill] sm:$0xff] }
 0x3d0   :  { %1881 = vmatpush2.msra.mxu0 %v10619_v25  ;;  %1952 = vmatpush2.msra.mxu1 %v7152_v20  ;;  %v7164_v16 = vld [vmem:[#allocation5 + $0x4b8] sm:$0xff]  ;;  %v10627_v25 = vld [vmem:[#allocation38_spill] sm:$0xff]  ;;  %v7168_v20 = vld [vmem:[#allocation5 + $0x4b0] sm:$0xff] }
 0x3d1   :  { %1882 = vmatprep.subr.mxu0 %v10621_v18  ;;  %1953 = vmatprep.subr.mxu1 %v7156_v39  ;;  %10626 = vst [vmem:[#allocation33_spill] sm:$0xff] %v7164_v16  ;;  %10628 = vst [vmem:[#allocation34_spill] sm:$0xff] %v7168_v20  ;;  %v10629_v18 = vld [vmem:[#allocation39_spill] sm:$0xff]  ;;  %v7172_v39 = vld [vmem:[#allocation5 + $0x478] sm:$0xff] }
 0x3d2   :  { %1883 = vmatpush2.msra.mxu0 %v10623_v8  ;;  %1954 = vmatpush2.msra.mxu1 %v7160_v56  ;;  %10630 = vst [vmem:[#allocation35_spill] sm:$0xff] %v7172_v39  ;;  %v10631_v8 = vld [vmem:[#allocation40_spill] sm:$0xff]  ;;  %v10664_v60 = vld [vmem:[#allocation65_spill] sm:$0xff] }
 0x3d3   :  { %1884 = vmatprep.subr.mxu0 %v10625_v44  ;;  %1955 = vmatprep.subr.mxu1 %v7164_v16  ;;  %v7176_v56 = vld [vmem:[#allocation5 + $0x470] sm:$0xff]  ;;  %v10633_v44 = vld [vmem:[#allocation41_spill] sm:$0xff] }
 0x3d4   :  { %1885 = vmatpush2.msra.mxu0 %v10627_v25  ;;  %1956 = vmatpush2.msra.mxu1 %v7168_v20  ;;  %10632 = vst [vmem:[#allocation36_spill] sm:$0xff] %v7176_v56  ;;  %v7180_v16 = vld [vmem:[#allocation5 + $0x438] sm:$0xff]  ;;  %v10635_v25 = vld [vmem:[#allocation42_spill] sm:$0xff]  ;;  %v7184_v20 = vld [vmem:[#allocation5 + $0x430] sm:$0xff] }
 0x3d5   :  { %1886 = vmatprep.subr.mxu0 %v10629_v18  ;;  %1957 = vmatprep.subr.mxu1 %v7172_v39  ;;  %10634 = vst [vmem:[#allocation37_spill] sm:$0xff] %v7180_v16  ;;  %10636 = vst [vmem:[#allocation38_spill] sm:$0xff] %v7184_v20  ;;  %v10637_v18 = vld [vmem:[#allocation43_spill] sm:$0xff] }
 0x3d6   :  { %1887 = vmatpush2.msra.mxu0 %v10631_v8  ;;  %1958 = vmatpush2.msra.mxu1 %v7176_v56  ;;  %v7190_v8 = vld [vmem:[#allocation5 + $0x3d8] sm:$0xff]  ;;  %v7194_v56 = vld [vmem:[#allocation5 + $0x3d0] sm:$0xff]  ;;  %v10658_v39 = vld [vmem:[#allocation55_spill] sm:$0xff] }
 0x3d7   :  { %1888 = vmatprep.subr.mxu0 %v10633_v44  ;;  %1959 = vmatprep.subr.mxu1 %v7180_v16  ;;  %10638 = vst [vmem:[#allocation39_spill] sm:$0xff] %v7190_v8  ;;  %v10639_v44 = vld [vmem:[#allocation44_spill] sm:$0xff]  ;;  %10640 = vst [vmem:[#allocation40_spill] sm:$0xff] %v7194_v56  ;;  %v7198_v16 = vld [vmem:[#allocation5 + $0x398] sm:$0xff] }
 0x3d8   :  { %1889 = vmatpush2.msra.mxu0 %v10635_v25  ;;  %1960 = vmatpush2.msra.mxu1 %v7184_v20  ;;  %v10641_v25 = vld [vmem:[#allocation45_spill] sm:$0xff]  ;;  %10642 = vst [vmem:[#allocation41_spill] sm:$0xff] %v7198_v16  ;;  %v10643_v20 = vld [vmem:[#allocation46_spill] sm:$0xff] }
 0x3d9   :  { %1891 = vmatmul.mubr.f32.vlgmr.msra.gmra.mxu0 %v6927_v52  ;;  %1962 = vmatmul.mubr.f32.vlgmr.msra.gmra.mxu1 %v6927_v52  ;;  %v7202_v52 = vld [vmem:[#allocation5 + $0x390] sm:$0xff] }
 0x3da   :  { %2026 = vmatprep.subr.mxu0 %v10637_v18  ;;  %2097 = vmatprep.subr.mxu1 %v7190_v8  ;;  %10644 = vst [vmem:[#allocation42_spill] sm:$0xff] %v7202_v52  ;;  %v10645_v18 = vld [vmem:[#allocation47_spill] sm:$0xff]  ;;  %v7206_v8 = vld [vmem:[#allocation5 + $0x358] sm:$0xff] }
 0x3db   :  { %2027 = vmatpush1.msra.mxu0 %v10639_v44  ;;  %2098 = vmatpush1.msra.mxu1 %v7194_v56  ;;  %10646 = vst [vmem:[#allocation43_spill] sm:$0xff] %v7206_v8  ;;  %v10647_v44 = vld [vmem:[#allocation48_spill] sm:$0xff] }
 0x3dc   :  { %2028 = vmatprep.subr.mxu0 %v10641_v25  ;;  %2099 = vmatprep.subr.mxu1 %v7198_v16  ;;  %v7210_v56 = vld [vmem:[#allocation5 + $0x350] sm:$0xff]  ;;  %v10649_v25 = vld [vmem:[#allocation49_spill] sm:$0xff] }
 0x3dd   :  { %2029 = vmatpush1.msra.mxu0 %v10643_v20  ;;  %2100 = vmatpush1.msra.mxu1 %v7202_v52  ;;  %10648 = vst [vmem:[#allocation44_spill] sm:$0xff] %v7210_v56  ;;  %v7214_v16 = vld [vmem:[#allocation5 + $0x318] sm:$0xff]  ;;  %v10651_v20 = vld [vmem:[#allocation50_spill] sm:$0xff]  ;;  %v7218_v52 = vld [vmem:[#allocation5 + $0x310] sm:$0xff] }
 0x3de   :  { %2030 = vmatprep.subr.mxu0 %v10645_v18  ;;  %2101 = vmatprep.subr.mxu1 %v7206_v8  ;;  %10650 = vst [vmem:[#allocation45_spill] sm:$0xff] %v7214_v16  ;;  %10652 = vst [vmem:[#allocation46_spill] sm:$0xff] %v7218_v52  ;;  %v10653_v18 = vld [vmem:[#allocation51_spill] sm:$0xff]  ;;  %v7222_v8 = vld [vmem:[#allocation5 + $0x2d8] sm:$0xff] }
 0x3df   :  { %2031 = vmatpush1.msra.mxu0 %v10647_v44  ;;  %2102 = vmatpush1.msra.mxu1 %v7210_v56  ;;  %10654 = vst [vmem:[#allocation47_spill] sm:$0xff] %v7222_v8  ;;  %v10655_v44 = vld [vmem:[#allocation52_spill] sm:$0xff]  ;;  %v10656_v56 = vld [vmem:[#allocation53_spill] sm:$0xff] }
 0x3e0   :  { %2032 = vmatprep.subr.mxu0 %v10649_v25  ;;  %2103 = vmatprep.subr.mxu1 %v7214_v16  ;;  %v10657_v25 = vld [vmem:[#allocation54_spill] sm:$0xff]  ;;  %v10659_v16 = vld [vmem:[#allocation57_spill] sm:$0xff] }
 0x3e1   :  { %2033 = vmatpush1.msra.mxu0 %v10651_v20  ;;  %2104 = vmatpush1.msra.mxu1 %v7218_v52  ;;  %v10660_v20 = vld [vmem:[#allocation59_spill] sm:$0xff] }
 0x3e2   :  { %2034 = vmatprep.subr.mxu0 %v10653_v18  ;;  %2105 = vmatprep.subr.mxu1 %v7222_v8  ;;  %v10662_v52 = vld [vmem:[#allocation63_spill] sm:$0xff]  ;;  %v10663_v18 = vld [vmem:[#allocation64_spill] sm:$0xff]  ;;  %v10665_v8 = vld [vmem:[#allocation66_spill] sm:$0xff] }
 0x3e3   :  { %2035 = vmatpush1.msra.mxu0 %v10655_v44  ;;  %2106 = vmatpush1.msra.mxu1 %v10656_v56  ;;  %v10666_v44 = vld [vmem:[#allocation69_spill] sm:$0xff]  ;;  %v10667_v56 = vld [vmem:[#allocation70_spill] sm:$0xff] }
 0x3e4   :  { %2036 = vmatprep.subr.mxu0 %v10657_v25  ;;  %2107 = vmatprep.subr.mxu1 %v10658_v39  ;;  %v10668_v25 = vld [vmem:[#allocation73_spill] sm:$0xff]  ;;  %v10669_v39 = vld [vmem:[#allocation74_spill] sm:$0xff] }
 0x3e5   :  { %2037 = vmatpush1.msra.mxu0 %v10659_v16  ;;  %2108 = vmatpush1.msra.mxu1 %v10660_v20  ;;  %v10670_v16 = vld [vmem:[#allocation75_spill] sm:$0xff]  ;;  %v10671_v20 = vld [vmem:[#allocation76_spill] sm:$0xff] }
 0x3e6   :  { %2038 = vmatprep.subr.mxu0 %v10661_v38  ;;  %2109 = vmatprep.subr.mxu1 %v10662_v52  ;;  %v10672_v38 = vld [vmem:[#allocation79_spill] sm:$0xff]  ;;  %v10673_v52 = vld [vmem:[#allocation80_spill] sm:$0xff] }
 0x3e7   :  { %2039 = vmatpush1.msra.mxu0 %v10663_v18  ;;  %2110 = vmatpush1.msra.mxu1 %v10664_v60  ;;  %v10674_v18 = vld [vmem:[#allocation83_spill] sm:$0xff]  ;;  %v10675_v60 = vld [vmem:[#allocation84_spill] sm:$0xff] }
 0x3e8   :  { %2040 = vmatprep.subr.mxu0 %v10665_v8  ;;  %2111 = vmatprep.subr.mxu1 %v10666_v44  ;;  %v10676_v8 = vld [vmem:[#allocation85_spill] sm:$0xff]  ;;  %v10677_v44 = vld [vmem:[#allocation88_spill] sm:$0xff] }
 0x3e9   :  { %2041 = vmatpush1.msra.mxu0 %v10667_v56  ;;  %2112 = vmatpush1.msra.mxu1 %v10668_v25  ;;  %v10678_v56 = vld [vmem:[#allocation89_spill] sm:$0xff]  ;;  %v10679_v25 = vld [vmem:[#allocation94_spill] sm:$0xff] }
 0x3ea   :  { %2042 = vmatprep.subr.mxu0 %v10669_v39  ;;  %2113 = vmatprep.subr.mxu1 %v10670_v16  ;;  %v10680_v39 = vld [vmem:[#allocation97_spill] sm:$0xff] }
 0x3eb   :  { %2043 = vmatpush1.msra.mxu0 %v10671_v20  ;;  %2114 = vmatpush1.msra.mxu1 %v10672_v38  ;;  %v10681_v16 = vld [vmem:[#allocation101_spill] sm:$0xff]  ;;  %v10682_v20 = vld [vmem:[#allocation103_spill] sm:$0xff]  ;;  %v10683_v38 = vld [vmem:[#allocation108_spill] sm:$0xff] }
 0x3ec   :  { %2044 = vmatprep.subr.mxu0 %v10673_v52  ;;  %2115 = vmatprep.subr.mxu1 %v10674_v18  ;;  %v10684_v52 = vld [vmem:[#allocation117_spill] sm:$0xff]  ;;  %v10685_v18 = vld [vmem:[#allocation118_spill] sm:$0xff] }
 0x3ed   :  { %2045 = vmatpush1.msra.mxu0 %v10675_v60  ;;  %2116 = vmatpush1.msra.mxu1 %v10676_v8  ;;  %v10686_v60 = vld [vmem:[#allocation120_spill] sm:$0xff]  ;;  %v10687_v8 = vld [vmem:[#allocation122_spill] sm:$0xff] }
 0x3ee   :  { %2046 = vmatprep.subr.mxu0 %v10677_v44  ;;  %2117 = vmatprep.subr.mxu1 %v10678_v56  ;;  %v10688_v44 = vld [vmem:[#allocation125_spill] sm:$0xff]  ;;  %v10689_v56 = vld [vmem:[#allocation128_spill] sm:$0xff] }
 0x3ef   :  { %2047 = vmatpush1.msra.mxu0 %v10679_v25  ;;  %2118 = vmatpush1.msra.mxu1 %v10680_v39  ;;  %v10690_v25 = vld [vmem:[#allocation129_spill] sm:$0xff]  ;;  %v10691_v39 = vld [vmem:[#allocation130_spill] sm:$0xff] }
 0x3f0   :  { %2048 = vmatprep.subr.mxu0 %v10681_v16  ;;  %2119 = vmatprep.subr.mxu1 %v10682_v20  ;;  %v10692_v16 = vld [vmem:[#allocation147_spill] sm:$0xff]  ;;  %v10693_v20 = vld [vmem:[#allocation148_spill] sm:$0xff] }
 0x3f1   :  { %2049 = vmatpush1.msra.mxu0 %v10683_v38  ;;  %2120 = vmatpush1.msra.mxu1 %v10684_v52  ;;  %v10694_v38 = vld [vmem:[#allocation149_spill] sm:$0xff]  ;;  %v10695_v52 = vld [vmem:[#allocation150_spill] sm:$0xff] }
 0x3f2   :  { %2050 = vmatprep.subr.mxu0 %v10685_v18  ;;  %2121 = vmatprep.subr.mxu1 %v10686_v60  ;;  %v10696_v18 = vld [vmem:[#allocation151_spill] sm:$0xff]  ;;  %v10697_v60 = vld [vmem:[#allocation152_spill] sm:$0xff] }
 0x3f3   :  { %2051 = vmatpush1.msra.mxu0 %v10687_v8  ;;  %2122 = vmatpush1.msra.mxu1 %v10688_v44  ;;  %v10698_v8 = vld [vmem:[#allocation153_spill] sm:$0xff]  ;;  %v10699_v44 = vld [vmem:[#allocation154_spill] sm:$0xff] }
 0x3f4   :  { %2052 = vmatprep.subr.mxu0 %v10689_v56  ;;  %2123 = vmatprep.subr.mxu1 %v10690_v25  ;;  %v10700_v56 = vld [vmem:[#allocation155_spill] sm:$0xff]  ;;  %v10701_v25 = vld [vmem:[#allocation156_spill] sm:$0xff] }
 0x3f5   :  { %2053 = vmatpush1.msra.mxu0 %v10691_v39  ;;  %2124 = vmatpush1.msra.mxu1 %v10692_v16  ;;  %v10702_v39 = vld [vmem:[#allocation157_spill] sm:$0xff]  ;;  %v10703_v16 = vld [vmem:[#allocation158_spill] sm:$0xff] }
 0x3f6   :  { %2054 = vmatprep.subr.mxu0 %v10693_v20  ;;  %2125 = vmatprep.subr.mxu1 %v10694_v38  ;;  %v10704_v20 = vld [vmem:[#allocation159_spill] sm:$0xff]  ;;  %v10705_v38 = vld [vmem:[#allocation160_spill] sm:$0xff] }
 0x3f7   :  { %2055 = vmatpush1.msra.mxu0 %v10695_v52  ;;  %2126 = vmatpush1.msra.mxu1 %v10696_v18  ;;  %v10706_v52 = vld [vmem:[#allocation161_spill] sm:$0xff]  ;;  %v10707_v18 = vld [vmem:[#allocation162_spill] sm:$0xff] }
 0x3f8   :  { %2056 = vmatprep.subr.mxu0 %v10697_v60  ;;  %2127 = vmatprep.subr.mxu1 %v10698_v8  ;;  %v10708_v60 = vld [vmem:[#allocation163_spill] sm:$0xff]  ;;  %v10709_v8 = vld [vmem:[#allocation164_spill] sm:$0xff] }
 0x3f9   :  { %2057 = vmatpush1.msra.mxu0 %v10699_v44  ;;  %2128 = vmatpush1.msra.mxu1 %v10700_v56  ;;  %v10710_v44 = vld [vmem:[#allocation165_spill] sm:$0xff]  ;;  %v10711_v56 = vld [vmem:[#allocation166_spill] sm:$0xff] }
 0x3fa   :  { %2058 = vmatprep.subr.mxu0 %v10701_v25  ;;  %2129 = vmatprep.subr.mxu1 %v10702_v39  ;;  %v10712_v25 = vld [vmem:[#allocation167_spill] sm:$0xff]  ;;  %v10713_v39 = vld [vmem:[#allocation168_spill] sm:$0xff] }
 0x3fb   :  { %2059 = vmatpush2.msra.mxu0 %v10703_v16  ;;  %2130 = vmatpush2.msra.mxu1 %v10704_v20  ;;  %v10714_v16 = vld [vmem:[#allocation169_spill] sm:$0xff]  ;;  %v10715_v20 = vld [vmem:[#allocation170_spill] sm:$0xff] }
 0x3fc   :  { %2060 = vmatprep.subr.mxu0 %v10705_v38  ;;  %2131 = vmatprep.subr.mxu1 %v10706_v52  ;;  %v10716_v38 = vld [vmem:[#allocation171_spill] sm:$0xff]  ;;  %v10717_v52 = vld [vmem:[#allocation172_spill] sm:$0xff] }
 0x3fd   :  { %2061 = vmatpush2.msra.mxu0 %v10707_v18  ;;  %2132 = vmatpush2.msra.mxu1 %v10708_v60  ;;  %v10718_v18 = vld [vmem:[#allocation173_spill] sm:$0xff]  ;;  %v10719_v60 = vld [vmem:[#allocation174_spill] sm:$0xff] }
 0x3fe   :  { %2062 = vmatprep.subr.mxu0 %v10709_v8  ;;  %2133 = vmatprep.subr.mxu1 %v10710_v44  ;;  %v10720_v8 = vld [vmem:[#allocation175_spill] sm:$0xff]  ;;  %v10721_v44 = vld [vmem:[#allocation176_spill] sm:$0xff] }
 0x3ff   :  { %2063 = vmatpush2.msra.mxu0 %v10711_v56  ;;  %2134 = vmatpush2.msra.mxu1 %v10712_v25  ;;  %v10722_v56 = vld [vmem:[#allocation177_spill] sm:$0xff]  ;;  %v10723_v25 = vld [vmem:[#allocation178_spill] sm:$0xff] }
 0x400   :  { %2064 = vmatprep.subr.mxu0 %v10713_v39  ;;  %2135 = vmatprep.subr.mxu1 %v10714_v16  ;;  %v10724_v39 = vld [vmem:[#allocation179_spill] sm:$0xff]  ;;  %v10725_v16 = vld [vmem:[#allocation180_spill] sm:$0xff] }
 0x401   :  { %2065 = vmatpush2.msra.mxu0 %v10715_v20  ;;  %2136 = vmatpush2.msra.mxu1 %v10716_v38  ;;  %v10726_v20 = vld [vmem:[#allocation181_spill] sm:$0xff]  ;;  %v10727_v38 = vld [vmem:[#allocation182_spill] sm:$0xff] }
 0x402   :  { %2066 = vmatprep.subr.mxu0 %v10717_v52  ;;  %2137 = vmatprep.subr.mxu1 %v10718_v18  ;;  %v10728_v52 = vld [vmem:[#allocation183_spill] sm:$0xff]  ;;  %v10729_v18 = vld [vmem:[#allocation184_spill] sm:$0xff] }
 0x403   :  { %2067 = vmatpush2.msra.mxu0 %v10719_v60  ;;  %2138 = vmatpush2.msra.mxu1 %v10720_v8  ;;  %v10730_v60 = vld [vmem:[#allocation185_spill] sm:$0xff]  ;;  %v10731_v8 = vld [vmem:[#allocation186_spill] sm:$0xff] }
 0x404   :  { %2068 = vmatprep.subr.mxu0 %v10721_v44  ;;  %2139 = vmatprep.subr.mxu1 %v10722_v56  ;;  %v10732_v44 = vld [vmem:[#allocation187_spill] sm:$0xff]  ;;  %v10733_v56 = vld [vmem:[#allocation188_spill] sm:$0xff] }
 0x405   :  { %2069 = vmatpush2.msra.mxu0 %v10723_v25  ;;  %2140 = vmatpush2.msra.mxu1 %v10724_v39  ;;  %v10734_v25 = vld [vmem:[#allocation189_spill] sm:$0xff]  ;;  %v10735_v39 = vld [vmem:[#allocation190_spill] sm:$0xff] }
 0x406   :  { %2070 = vmatprep.subr.mxu0 %v10725_v16  ;;  %2141 = vmatprep.subr.mxu1 %v10726_v20  ;;  %v10736_v16 = vld [vmem:[#allocation191_spill] sm:$0xff]  ;;  %v10737_v20 = vld [vmem:[#allocation192_spill] sm:$0xff] }
 0x407   :  { %2071 = vmatpush2.msra.mxu0 %v10727_v38  ;;  %2142 = vmatpush2.msra.mxu1 %v10728_v52  ;;  %v10738_v38 = vld [vmem:[#allocation193_spill] sm:$0xff]  ;;  %v7309_v52 = vld [vmem:[#allocation5 + $0x580] sm:$0xff] }
 0x408   :  { %2072 = vmatprep.subr.mxu0 %v10729_v18  ;;  %2143 = vmatprep.subr.mxu1 %v10730_v60  ;;  %10739 = vst [vmem:[#allocation48_spill] sm:$0xff] %v7309_v52  ;;  %v10740_v18 = vld [vmem:[#allocation92_spill] sm:$0xff]  ;;  %v7313_v60 = vld [vmem:[#allocation5 + $0x548] sm:$0xff] }
 0x409   :  { %2073 = vmatpush2.msra.mxu0 %v10731_v8  ;;  %2144 = vmatpush2.msra.mxu1 %v10732_v44  ;;  %10741 = vst [vmem:[#allocation49_spill] sm:$0xff] %v7313_v60  ;;  %v10742_v8 = vld [vmem:[#allocation93_spill] sm:$0xff]  ;;  %v7317_v44 = vld [vmem:[#allocation5 + $0x540] sm:$0xff] }
 0x40a   :  { %2074 = vmatprep.subr.mxu0 %v10733_v56  ;;  %2145 = vmatprep.subr.mxu1 %v10734_v25  ;;  %10743 = vst [vmem:[#allocation50_spill] sm:$0xff] %v7317_v44  ;;  %v10744_v56 = vld [vmem:[#allocation95_spill] sm:$0xff] }
 0x40b   :  { %2075 = vmatpush2.msra.mxu0 %v10735_v39  ;;  %2146 = vmatpush2.msra.mxu1 %v10736_v16  ;;  %v7321_v25 = vld [vmem:[#allocation5 + $0x508] sm:$0xff]  ;;  %v10746_v39 = vld [vmem:[#allocation96_spill] sm:$0xff]  ;;  %v7325_v16 = vld [vmem:[#allocation5 + $0x500] sm:$0xff] }
 0x40c   :  { %2076 = vmatprep.subr.mxu0 %v10737_v20  ;;  %2147 = vmatprep.subr.mxu1 %v10738_v38  ;;  %10745 = vst [vmem:[#allocation51_spill] sm:$0xff] %v7321_v25  ;;  %10747 = vst [vmem:[#allocation52_spill] sm:$0xff] %v7325_v16  ;;  %v10748_v20 = vld [vmem:[#allocation100_spill] sm:$0xff]  ;;  %v7329_v38 = vld [vmem:[#allocation5 + $0x4c8] sm:$0xff] }
 0x40d   :  { %2077 = vmatpush2.msra.mxu0 %v7309_v52  ;;  %2148 = vmatpush2.msra.mxu1 %v10740_v18  ;;  %10749 = vst [vmem:[#allocation53_spill] sm:$0xff] %v7329_v38  ;;  %v10750_v18 = vld [vmem:[#allocation102_spill] sm:$0xff] }
 0x40e   :  { %2078 = vmatprep.subr.mxu0 %v7313_v60  ;;  %2149 = vmatprep.subr.mxu1 %v10742_v8  ;;  %v7333_v8 = vld [vmem:[#allocation5 + $0x4c0] sm:$0xff]  ;;  %v10767_v60 = vld [vmem:[#allocation77_spill] sm:$0xff] }
 0x40f   :  { %2079 = vmatpush2.msra.mxu0 %v7317_v44  ;;  %2150 = vmatpush2.msra.mxu1 %v10744_v56  ;;  %10751 = vst [vmem:[#allocation54_spill] sm:$0xff] %v7333_v8  ;;  %v10752_v56 = vld [vmem:[#allocation106_spill] sm:$0xff] }
 0x410   :  { %2080 = vmatprep.subr.mxu0 %v7321_v25  ;;  %2151 = vmatprep.subr.mxu1 %v10746_v39  ;;  %v7337_v25 = vld [vmem:[#allocation5 + $0x488] sm:$0xff] }
 0x411   :  { %2081 = vmatpush2.msra.mxu0 %v7325_v16  ;;  %2152 = vmatpush2.msra.mxu1 %v10748_v20  ;;  %10753 = vst [vmem:[#allocation55_spill] sm:$0xff] %v7337_v25  ;;  %v10754_v39 = vld [vmem:[#allocation107_spill] sm:$0xff]  ;;  %v7341_v16 = vld [vmem:[#allocation5 + $0x480] sm:$0xff]  ;;  %v10756_v20 = vld [vmem:[#allocation109_spill] sm:$0xff] }
 0x412   :  { %2082 = vmatprep.subr.mxu0 %v7329_v38  ;;  %2153 = vmatprep.subr.mxu1 %v10750_v18  ;;  %10755 = vst [vmem:[#allocation57_spill] sm:$0xff] %v7341_v16  ;;  %v7345_v38 = vld [vmem:[#allocation5 + $0x448] sm:$0xff]  ;;  %v10758_v18 = vld [vmem:[#allocation110_spill] sm:$0xff] }
 0x413   :  { %2083 = vmatpush2.msra.mxu0 %v7333_v8  ;;  %2154 = vmatpush2.msra.mxu1 %v10752_v56  ;;  %10757 = vst [vmem:[#allocation59_spill] sm:$0xff] %v7345_v38  ;;  %v7349_v8 = vld [vmem:[#allocation5 + $0x440] sm:$0xff]  ;;  %v10760_v56 = vld [vmem:[#allocation113_spill] sm:$0xff] }
 0x414   :  { %2084 = vmatprep.subr.mxu0 %v7337_v25  ;;  %2155 = vmatprep.subr.mxu1 %v10754_v39  ;;  %10759 = vst [vmem:[#allocation61_spill] sm:$0xff] %v7349_v8  ;;  %v7353_v25 = vld [vmem:[#allocation5 + $0x408] sm:$0xff]  ;;  %v10762_v39 = vld [vmem:[#allocation114_spill] sm:$0xff] }
 0x415   :  { %2085 = vmatpush2.msra.mxu0 %v7341_v16  ;;  %2156 = vmatpush2.msra.mxu1 %v10756_v20  ;;  %10761 = vst [vmem:[#allocation63_spill] sm:$0xff] %v7353_v25  ;;  %v7357_v16 = vld [vmem:[#allocation5 + $0x400] sm:$0xff]  ;;  %v10764_v20 = vld [vmem:[#allocation119_spill] sm:$0xff] }
 0x416   :  { %2086 = vmatprep.subr.mxu0 %v7345_v38  ;;  %2157 = vmatprep.subr.mxu1 %v10758_v18  ;;  %10763 = vst [vmem:[#allocation64_spill] sm:$0xff] %v7357_v16  ;;  %v7361_v38 = vld [vmem:[#allocation5 + $0x3e8] sm:$0xff]  ;;  %v10766_v18 = vld [vmem:[#allocation121_spill] sm:$0xff] }
 0x417   :  { %2087 = vmatpush2.msra.mxu0 %v7349_v8  ;;  %2158 = vmatpush2.msra.mxu1 %v10760_v56  ;;  %10765 = vst [vmem:[#allocation65_spill] sm:$0xff] %v7361_v38 }
 0x418   :  { %2088 = vmatprep.subr.mxu0 %v7353_v25  ;;  %2159 = vmatprep.subr.mxu1 %v10762_v39  ;;  %v10768_v25 = vld [vmem:[#allocation135_spill] sm:$0xff] }
 0x419   :  { %2089 = vmatpush2.msra.mxu0 %v7357_v16  ;;  %2160 = vmatpush2.msra.mxu1 %v10764_v20  ;;  %v10770_v16 = vld [vmem:[#allocation136_spill] sm:$0xff] }
 0x41a   :  { %2168 = vmatprep.subr.mxu0 %v7361_v38  ;;  %2239 = vmatprep.subr.mxu1 %v10766_v18 }
 0x458   :  { %v1750_v8 = vpop.f32.mrf.mxu0  ;;  %v1821_v56 = vpop.f32.mrf.mxu1 }
 0x459   :  { %v1968_v52 = vadd.f32 %v1750_v8, %v10767_v60  ;;  %v1970_v45 = vadd.f32 %v1821_v56, %v10768_v25 }
 0x45a   :  { %v1752_v44 = vpop.f32.mrf.mxu0  ;;  %v1823_v39 = vpop.f32.mrf.mxu1 }
 0x45b   :  { %v1969_v51 = vadd.f32 %v1752_v44, %v10769_v4  ;;  %v3962_v21 = vmul.f32 -1.442695, %v1968_v52  ;;  %v1971_v1 = vadd.f32 %v1823_v39, %v10770_v16  ;;  %v3964_v20 = vmul.f32 -1.442695, %v1970_v45  ;;  %v10771_v44 = vld [vmem:[#allocation78_spill] sm:$0xff] }
 0x45c   :  { %v10773_v16 = vld [vmem:[#allocation82_spill] sm:$0xff] }
 0x45d   :  { %v3963_v43 = vmul.f32 -1.442695, %v1969_v51  ;;  %4131 = vpow2.f32 %v3962_v21  ;;  %v3965_v33 = vmul.f32 -1.442695, %v1971_v1  ;;  %v10772_v51 = vld [vmem:[#allocation10_spill] sm:$0xff] }
 0x45e   :  { %4133 = vpow2.f32 %v3964_v20  ;;  %v10774_v20 = vld [vmem:[#allocation11_spill] sm:$0xff] }
 0x45f   :  { %4135 = vpow2.f32 %v3963_v43 }
 0x460   :  { %4137 = vpow2.f32 %v3965_v33 }
 0x46a   :  { %v4132_v18 = vpop.eup %4131 }
 0x46b   :  { %v4134_v38 = vpop.eup %4133  ;;  %v1994_v12 = vadd.f32 1.0, %v4132_v18 }
 0x46c   :  { %v4136_v54 = vpop.eup %4135  ;;  %v1996_v8 = vadd.f32 1.0, %v4134_v38 }
 0x46d   :  { %v4138_v60 = vpop.eup %4137  ;;  %v1995_v25 = vadd.f32 1.0, %v4136_v54  ;;  %4139 = vrcp.f32 %v1994_v12 }
 0x46e   :  { %v1997_v56 = vadd.f32 1.0, %v4138_v60  ;;  %4141 = vrcp.f32 %v1996_v8 }
 0x46f   :  { %4143 = vrcp.f32 %v1995_v25 }
 0x47a   :  { %v4140_v54 = vpop.eup %4139 }
 0x47b   :  { %v4142_v38 = vpop.eup %4141 }
 0x47c   :  { %v4144_v60 = vpop.eup %4143  ;;  %v2014_v25 = vmul.f32 %v4142_v38, %v6918_v11  ;;  %v7393_v38 = vld [vmem:[#allocation5 + $0x3a8] sm:$0xff] }
 0x499   :  { %v1892_v4 = vpop.f32.mrf.mxu0  ;;  %v1963_v52 = vpop.f32.mrf.mxu1 }
 0x49a   :  { %v1972_v45 = vadd.f32 %v1892_v4, %v10771_v44  ;;  %v1974_v21 = vadd.f32 %v1963_v52, %v10772_v51 }
 0x49b   :  { %v1894_v1 = vpop.f32.mrf.mxu0  ;;  %v1965_v43 = vpop.f32.mrf.mxu1 }
 0x49c   :  { %v3966_v33 = vmul.f32 -1.442695, %v1972_v45  ;;  %4145 = vtanh.f32 %v1974_v21  ;;  %v1973_v39 = vadd.f32 %v1894_v1, %v10773_v16  ;;  %v1975_v18 = vadd.f32 %v1965_v43, %v10774_v20 }
 0x49d   :  { %4147 = vrcp.f32 %v1997_v56 }
 0x49e   :  { %4149 = vpow2.f32 %v3966_v33  ;;  %v3967_v12 = vmul.f32 -1.442695, %v1973_v39 }
 0x49f   :  { %4151 = vtanh.f32 %v1975_v18 }
 0x4a0   :  { %4153 = vpow2.f32 %v3967_v12 }
 0x4a9   :  { %v4146_v8 = vpop.eup %4145 }
 0x4aa   :  { %v4148_v4 = vpop.eup %4147  ;;  %v2016_v52 = vmul.f32 %v4146_v8, %v4140_v54  ;;  %v7403_v8 = vld [vmem:[#allocation5 + $0x368] sm:$0xff] }
 0x4ab   :  { %v4150_v44 = vpop.eup %4149  ;;  %v2015_v56 = vmul.f32 %v4148_v4, %v6922_v23  ;;  %v7389_v23 = vld [vmem:[#allocation5 + $0x3e0] sm:$0xff] }
 0x4ac   :  { %v4152_v45 = vpop.eup %4151  ;;  %v1998_v51 = vadd.f32 1.0, %v4150_v44  ;;  %v7374_v21 = vadd.f32 %v2016_v52, %v2014_v25  ;;  %v7415_v4 = vld [vmem:[#allocation5 + $0x320] sm:$0xff]  ;;  %v7563_v25 = vld [vmem:[#allocation5 + $0x668] sm:$0xff] }
 0x4ad   :  { %v4154_v1 = vpop.eup %4153  ;;  %v2017_v43 = vmul.f32 %v4152_v45, %v4144_v60  ;;  %v7399_v60 = vld [vmem:[#allocation5 + $0x3a0] sm:$0xff]  ;;  %10779 = vst [vmem:[#allocation73_spill] sm:$0xff] %v7563_v25  ;;  %v7571_v44 = vld [vmem:[#allocation5 + $0x628] sm:$0xff] }
 0x4ae   :  { %4155 = vrcp.f32 %v1998_v51  ;;  %v1999_v33 = vadd.f32 1.0, %v4154_v1  ;;  %v7567_v52 = vld [vmem:[#allocation5 + $0x660] sm:$0xff]  ;;  %10783 = vst [vmem:[#allocation75_spill] sm:$0xff] %v7571_v44  ;;  %v7579_v1 = vld [vmem:[#allocation5 + $0x5e8] sm:$0xff] }
 0x4af   :  { %4157 = vtanh.f32 %v7374_v21  ;;  %v7378_v16 = vadd.f32 %v2017_v43, %v2015_v56  ;;  %10781 = vst [vmem:[#allocation74_spill] sm:$0xff] %v7567_v52  ;;  %v7575_v45 = vld [vmem:[#allocation5 + $0x620] sm:$0xff]  ;;  %10787 = vst [vmem:[#allocation79_spill] sm:$0xff] %v7579_v1  ;;  %v10788_v56 = vld [vmem:[#allocation23_spill] sm:$0xff] }
 0x4b0   :  { %4159 = vrcp.f32 %v1999_v33  ;;  %10785 = vst [vmem:[#allocation76_spill] sm:$0xff] %v7575_v45  ;;  %v10786_v51 = vld [vmem:[#allocation22_spill] sm:$0xff]  ;;  %v10790_v33 = vld [vmem:[#allocation24_spill] sm:$0xff] }
 0x4b1   :  { %4161 = vtanh.f32 %v7378_v16  ;;  %v7583_v43 = vld [vmem:[#allocation5 + $0x5e0] sm:$0xff] }
 0x4b2   :  { %10789 = vst [vmem:[#allocation80_spill] sm:$0xff] %v7583_v43 }
 0x4bb   :  { %v4156_v11 = vpop.eup %4155 }
 0x4bc   :  { %v4158_v39 = vpop.eup %4157 }
 0x4bd   :  { %v4160_v20 = vpop.eup %4159  ;;  %v7383_v54 = vmul.f32 %v4158_v39, %v4156_v11  ;;  %v7587_v11 = vld [vmem:[#allocation5 + $0x5a8] sm:$0xff]  ;;  %v10792_v39 = vld [vmem:[#allocation25_spill] sm:$0xff] }
 0x4be   :  { %v4162_v18 = vpop.eup %4161  ;;  %10791 = vst [vmem:[#allocation83_spill] sm:$0xff] %v7587_v11 }
 0x4bf   :  { %v7381_v12 = vmul.f32 %v4162_v18, %v4160_v20  ;;  %10776 = vst [vmem:[#allocation69_spill] sm:$0xff] %v7383_v54  ;;  %v7591_v20 = vld [vmem:[#allocation5 + $0x5a0] sm:$0xff] }
 0x4c0   :  { %10793 = vst [vmem:[#allocation84_spill] sm:$0xff] %v7591_v20  ;;  %v10794_v18 = vld [vmem:[#allocation26_spill] sm:$0xff] }
 0x4c1   :  { %10775 = vst [vmem:[#allocation66_spill] sm:$0xff] %v7381_v12  ;;  %2090 = vmatprep.mubr.f32.mxu0 %v7381_v12  ;;  %2161 = vmatprep.mubr.f32.mxu1 %v7381_v12 }
 0x4c2   :  { %2091 = vmatmul.mubr.f32.vlgmr.msra.gmra.mxu0 %v7383_v54  ;;  %2162 = vmatmul.mubr.f32.vlgmr.msra.gmra.mxu1 %v7383_v54 }
 0x4c3   :  { %2169 = vmatpush1.msra.mxu0 %v7389_v23  ;;  %2240 = vmatpush1.msra.mxu1 %v6934_v9  ;;  %v7407_v9 = vld [vmem:[#allocation5 + $0x360] sm:$0xff] }
 0x4c4   :  { %2170 = vmatprep.subr.mxu0 %v7393_v38  ;;  %2232 = vmatprep.mubr.f32.mxu0 %v7381_v12 }
 0x4c5   :  { %2241 = vmatprep.subr.mxu1 %v6939_v31  ;;  %2303 = vmatprep.mubr.f32.mxu1 %v7381_v12  ;;  %v7411_v31 = vld [vmem:[#allocation5 + $0x328] sm:$0xff]  ;;  %v7615_v12 = vld [vmem:[#allocation5 + $0x4e0] sm:$0xff] }
 0x4c6   :  { %2171 = vmatpush1.msra.mxu0 %v7399_v60  ;;  %2242 = vmatpush1.msra.mxu1 %v6944_v29  ;;  %v7419_v29 = vld [vmem:[#allocation5 + $0x2e8] sm:$0xff]  ;;  %10805 = vst [vmem:[#allocation101_spill] sm:$0xff] %v7615_v12 }
 0x4c7   :  { %2172 = vmatprep.subr.mxu0 %v7403_v8  ;;  %2243 = vmatprep.subr.mxu1 %v6948_v55  ;;  %v7423_v55 = vld [vmem:[#allocation5 + $0x2e0] sm:$0xff] }
 0x4c8   :  { %2173 = vmatpush1.msra.mxu0 %v7407_v9  ;;  %2244 = vmatpush1.msra.mxu1 %v6952_v28  ;;  %v7427_v28 = vld [vmem:[#allocation5 + $0x2a8] sm:$0xff] }
 0x4c9   :  { %2174 = vmatprep.subr.mxu0 %v7411_v31  ;;  %2245 = vmatprep.subr.mxu1 %v6956_v37  ;;  %v7431_v37 = vld [vmem:[#allocation5 + $0x2a0] sm:$0xff] }
 0x4ca   :  { %2175 = vmatpush1.msra.mxu0 %v7415_v4  ;;  %2246 = vmatpush1.msra.mxu1 %v6960_v27  ;;  %v7435_v27 = vld [vmem:[#allocation5 + $0x268] sm:$0xff] }
 0x4cb   :  { %2176 = vmatprep.subr.mxu0 %v7419_v29  ;;  %2247 = vmatprep.subr.mxu1 %v6964_v50  ;;  %v7439_v50 = vld [vmem:[#allocation5 + $0x260] sm:$0xff] }
 0x4cc   :  { %2177 = vmatpush1.msra.mxu0 %v7423_v55  ;;  %2248 = vmatpush1.msra.mxu1 %v6968_v32  ;;  %v7443_v32 = vld [vmem:[#allocation5 + $0x228] sm:$0xff] }
 0x4cd   :  { %2178 = vmatprep.subr.mxu0 %v7427_v28  ;;  %2249 = vmatprep.subr.mxu1 %v6972_v46  ;;  %v7447_v46 = vld [vmem:[#allocation5 + $0x220] sm:$0xff] }
 0x4ce   :  { %2179 = vmatpush1.msra.mxu0 %v7431_v37  ;;  %2250 = vmatpush1.msra.mxu1 %v6976_v3  ;;  %v7451_v3 = vld [vmem:[#allocation5 + $0x1e8] sm:$0xff] }
 0x4cf   :  { %2180 = vmatprep.subr.mxu0 %v7435_v27  ;;  %2251 = vmatprep.subr.mxu1 %v6980_v63  ;;  %v7455_v63 = vld [vmem:[#allocation5 + $0x1e0] sm:$0xff] }
 0x4d0   :  { %2181 = vmatpush1.msra.mxu0 %v7439_v50  ;;  %2252 = vmatpush1.msra.mxu1 %v6984_v35  ;;  %v7459_v35 = vld [vmem:[#allocation5 + $0x1a8] sm:$0xff] }
 0x4d1   :  { %2182 = vmatprep.subr.mxu0 %v7443_v32  ;;  %2253 = vmatprep.subr.mxu1 %v6988_v0  ;;  %v7463_v0 = vld [vmem:[#allocation5 + $0x1a0] sm:$0xff] }
 0x4d2   :  { %2183 = vmatpush1.msra.mxu0 %v7447_v46  ;;  %2254 = vmatpush1.msra.mxu1 %v6992_v26  ;;  %v7467_v26 = vld [vmem:[#allocation5 + $0x168] sm:$0xff] }
 0x4d3   :  { %2184 = vmatprep.subr.mxu0 %v7451_v3  ;;  %2255 = vmatprep.subr.mxu1 %v6996_v41  ;;  %v7471_v41 = vld [vmem:[#allocation5 + $0x160] sm:$0xff] }
 0x4d4   :  { %2185 = vmatpush1.msra.mxu0 %v7455_v63  ;;  %2256 = vmatpush1.msra.mxu1 %v7000_v10  ;;  %v7475_v10 = vld [vmem:[#allocation5 + $0x128] sm:$0xff] }
 0x4d5   :  { %2186 = vmatprep.subr.mxu0 %v7459_v35  ;;  %2257 = vmatprep.subr.mxu1 %v7004_v19  ;;  %v7479_v19 = vld [vmem:[#allocation5 + $0x120] sm:$0xff] }
 0x4d6   :  { %2187 = vmatpush1.msra.mxu0 %v7463_v0  ;;  %2258 = vmatpush1.msra.mxu1 %v7008_v57  ;;  %v7483_v57 = vld [vmem:[#allocation5 + $0xe8] sm:$0xff] }
 0x4d7   :  { %2188 = vmatprep.subr.mxu0 %v7467_v26  ;;  %2259 = vmatprep.subr.mxu1 %v7012_v5  ;;  %v7487_v5 = vld [vmem:[#allocation5 + $0xe0] sm:$0xff] }
 0x4d8   :  { %2189 = vmatpush1.msra.mxu0 %v7471_v41  ;;  %2260 = vmatpush1.msra.mxu1 %v7016_v24  ;;  %v7491_v24 = vld [vmem:[#allocation5 + $0xa8] sm:$0xff] }
 0x4d9   :  { %2190 = vmatprep.subr.mxu0 %v7475_v10  ;;  %2261 = vmatprep.subr.mxu1 %v7020_v2  ;;  %v7495_v2 = vld [vmem:[#allocation5 + $0xa0] sm:$0xff] }
 0x4da   :  { %2191 = vmatpush1.msra.mxu0 %v7479_v19  ;;  %2262 = vmatpush1.msra.mxu1 %v7024_v17  ;;  %v7499_v17 = vld [vmem:[#allocation5 + $0x68] sm:$0xff] }
 0x4db   :  { %2192 = vmatprep.subr.mxu0 %v7483_v57  ;;  %2263 = vmatprep.subr.mxu1 %v7028_v13  ;;  %v7503_v13 = vld [vmem:[#allocation5 + $0x60] sm:$0xff] }
 0x4dc   :  { %2193 = vmatpush1.msra.mxu0 %v7487_v5  ;;  %2264 = vmatpush1.msra.mxu1 %v7032_v61  ;;  %v7507_v61 = vld [vmem:[#allocation5 + $0x28] sm:$0xff] }
 0x4dd   :  { %2194 = vmatprep.subr.mxu0 %v7491_v24  ;;  %2265 = vmatprep.subr.mxu1 %v7036_v42  ;;  %v7511_v42 = vld [vmem:[#allocation5 + $0x20] sm:$0xff] }
 0x4de   :  { %2195 = vmatpush1.msra.mxu0 %v7495_v2  ;;  %2266 = vmatpush1.msra.mxu1 %v7040_v59  ;;  %v7515_v59 = vld [vmem:[#allocation5 + $0x7e8] sm:$0xff] }
 0x4df   :  { %2196 = vmatprep.subr.mxu0 %v7499_v17  ;;  %2267 = vmatprep.subr.mxu1 %v7044_v62  ;;  %v7519_v62 = vld [vmem:[#allocation5 + $0x7e0] sm:$0xff] }
 0x4e0   :  { %2197 = vmatpush1.msra.mxu0 %v7503_v13  ;;  %2268 = vmatpush1.msra.mxu1 %v7048_v40  ;;  %v7523_v40 = vld [vmem:[#allocation5 + $0x7a8] sm:$0xff] }
 0x4e1   :  { %2198 = vmatprep.subr.mxu0 %v7507_v61  ;;  %2269 = vmatprep.subr.mxu1 %v7052_v15  ;;  %v7527_v15 = vld [vmem:[#allocation5 + $0x7a0] sm:$0xff] }
 0x4e2   :  { %2199 = vmatpush1.msra.mxu0 %v7511_v42  ;;  %2270 = vmatpush1.msra.mxu1 %v7056_v36  ;;  %v7531_v36 = vld [vmem:[#allocation5 + $0x768] sm:$0xff] }
 0x4e3   :  { %2200 = vmatprep.subr.mxu0 %v7515_v59  ;;  %2271 = vmatprep.subr.mxu1 %v7060_v49  ;;  %v7535_v49 = vld [vmem:[#allocation5 + $0x760] sm:$0xff] }
 0x4e4   :  { %2201 = vmatpush2.msra.mxu0 %v7519_v62  ;;  %2272 = vmatpush2.msra.mxu1 %v7064_v30  ;;  %v7539_v30 = vld [vmem:[#allocation5 + $0x728] sm:$0xff] }
 0x4e5   :  { %2202 = vmatprep.subr.mxu0 %v7523_v40  ;;  %2273 = vmatprep.subr.mxu1 %v7068_v22  ;;  %v7543_v22 = vld [vmem:[#allocation5 + $0x720] sm:$0xff] }
 0x4e6   :  { %2203 = vmatpush2.msra.mxu0 %v7527_v15  ;;  %2274 = vmatpush2.msra.mxu1 %v7072_v53  ;;  %v7547_v53 = vld [vmem:[#allocation5 + $0x6e8] sm:$0xff] }
 0x4e7   :  { %2204 = vmatprep.subr.mxu0 %v7531_v36  ;;  %2275 = vmatprep.subr.mxu1 %v7076_v14  ;;  %v7551_v14 = vld [vmem:[#allocation5 + $0x6e0] sm:$0xff] }
 0x4e8   :  { %2205 = vmatpush2.msra.mxu0 %v7535_v49  ;;  %2276 = vmatpush2.msra.mxu1 %v7080_v7  ;;  %v7555_v7 = vld [vmem:[#allocation5 + $0x6a8] sm:$0xff] }
 0x4e9   :  { %2206 = vmatprep.subr.mxu0 %v7539_v30  ;;  %2277 = vmatprep.subr.mxu1 %v7084_v58  ;;  %v7559_v58 = vld [vmem:[#allocation5 + $0x6a0] sm:$0xff] }
 0x4ea   :  { %2207 = vmatpush2.msra.mxu0 %v7543_v22  ;;  %2278 = vmatpush2.msra.mxu1 %v7088_v47  ;;  %10777 = vst [vmem:[#allocation70_spill] sm:$0xff] %v7559_v58  ;;  %v10778_v47 = vld [vmem:[#allocation68_spill] sm:$0xff] }
 0x4eb   :  { %2208 = vmatprep.subr.mxu0 %v7547_v53  ;;  %2279 = vmatprep.subr.mxu1 %v7092_v6  ;;  %v10780_v6 = vld [vmem:[#allocation72_spill] sm:$0xff] }
 0x4ec   :  { %2209 = vmatpush2.msra.mxu0 %v7551_v14  ;;  %2280 = vmatpush2.msra.mxu1 %v7096_v34  ;;  %v10782_v34 = vld [vmem:[#allocation60_spill] sm:$0xff] }
 0x4ed   :  { %2210 = vmatprep.subr.mxu0 %v7555_v7  ;;  %2281 = vmatprep.subr.mxu1 %v7100_v48  ;;  %v10784_v48 = vld [vmem:[#allocation56_spill] sm:$0xff] }
 0x4ee   :  { %2211 = vmatpush2.msra.mxu0 %v7559_v58  ;;  %2282 = vmatpush2.msra.mxu1 %v10778_v47  ;;  %v7595_v47 = vld [vmem:[#allocation5 + $0x568] sm:$0xff] }
 0x4ef   :  { %2212 = vmatprep.subr.mxu0 %v7563_v25  ;;  %2283 = vmatprep.subr.mxu1 %v10780_v6  ;;  %10795 = vst [vmem:[#allocation85_spill] sm:$0xff] %v7595_v47  ;;  %v10796_v6 = vld [vmem:[#allocation27_spill] sm:$0xff] }
 0x4f0   :  { %2213 = vmatpush2.msra.mxu0 %v7567_v52  ;;  %2284 = vmatpush2.msra.mxu1 %v10782_v34  ;;  %v7599_v34 = vld [vmem:[#allocation5 + $0x560] sm:$0xff] }
 0x4f1   :  { %2214 = vmatprep.subr.mxu0 %v7571_v44  ;;  %2285 = vmatprep.subr.mxu1 %v10784_v48  ;;  %10797 = vst [vmem:[#allocation88_spill] sm:$0xff] %v7599_v34  ;;  %v10798_v48 = vld [vmem:[#allocation28_spill] sm:$0xff] }
 0x4f2   :  { %2215 = vmatpush2.msra.mxu0 %v7575_v45  ;;  %2286 = vmatpush2.msra.mxu1 %v10786_v51  ;;  %v7603_v51 = vld [vmem:[#allocation5 + $0x528] sm:$0xff] }
 0x4f3   :  { %2216 = vmatprep.subr.mxu0 %v7579_v1  ;;  %2287 = vmatprep.subr.mxu1 %v10788_v56  ;;  %10799 = vst [vmem:[#allocation89_spill] sm:$0xff] %v7603_v51  ;;  %v10800_v56 = vld [vmem:[#allocation29_spill] sm:$0xff]  ;;  %v10952_v1 = vld [vmem:[#allocation138_spill] sm:$0xff] }
 0x4f4   :  { %2217 = vmatpush2.msra.mxu0 %v7583_v43  ;;  %2288 = vmatpush2.msra.mxu1 %v10790_v33  ;;  %v7607_v33 = vld [vmem:[#allocation5 + $0x520] sm:$0xff] }
 0x4f5   :  { %2218 = vmatprep.subr.mxu0 %v7587_v11  ;;  %2289 = vmatprep.subr.mxu1 %v10792_v39  ;;  %10801 = vst [vmem:[#allocation94_spill] sm:$0xff] %v7607_v33  ;;  %v10802_v39 = vld [vmem:[#allocation30_spill] sm:$0xff] }
 0x4f6   :  { %2219 = vmatpush2.msra.mxu0 %v7591_v20  ;;  %2290 = vmatpush2.msra.mxu1 %v10794_v18  ;;  %v7611_v18 = vld [vmem:[#allocation5 + $0x4e8] sm:$0xff]  ;;  %v10951_v11 = vld [vmem:[#allocation90_spill] sm:$0xff] }
 0x4f7   :  { %2220 = vmatprep.subr.mxu0 %v7595_v47  ;;  %2291 = vmatprep.subr.mxu1 %v10796_v6  ;;  %10803 = vst [vmem:[#allocation97_spill] sm:$0xff] %v7611_v18  ;;  %v10804_v6 = vld [vmem:[#allocation31_spill] sm:$0xff]  ;;  %v10950_v47 = vld [vmem:[#allocation137_spill] sm:$0xff] }
 0x4f8   :  { %2221 = vmatpush2.msra.mxu0 %v7599_v34  ;;  %2292 = vmatpush2.msra.mxu1 %v10798_v48  ;;  %v10806_v48 = vld [vmem:[#allocation32_spill] sm:$0xff] }
 0x4f9   :  { %2222 = vmatprep.subr.mxu0 %v7603_v51  ;;  %2293 = vmatprep.subr.mxu1 %v10800_v56  ;;  %v7619_v51 = vld [vmem:[#allocation5 + $0x4a8] sm:$0xff]  ;;  %v10808_v56 = vld [vmem:[#allocation33_spill] sm:$0xff] }
 0x4fa   :  { %2223 = vmatpush2.msra.mxu0 %v7607_v33  ;;  %2294 = vmatpush2.msra.mxu1 %v10802_v39  ;;  %10807 = vst [vmem:[#allocation103_spill] sm:$0xff] %v7619_v51  ;;  %v7623_v33 = vld [vmem:[#allocation5 + $0x4a0] sm:$0xff] }
 0x4fb   :  { %2224 = vmatprep.subr.mxu0 %v7611_v18  ;;  %2295 = vmatprep.subr.mxu1 %v10804_v6  ;;  %10809 = vst [vmem:[#allocation108_spill] sm:$0xff] %v7623_v33  ;;  %v10810_v39 = vld [vmem:[#allocation34_spill] sm:$0xff]  ;;  %v7627_v18 = vld [vmem:[#allocation5 + $0x468] sm:$0xff] }
 0x4fc   :  { %2225 = vmatpush2.msra.mxu0 %v7615_v12  ;;  %2296 = vmatpush2.msra.mxu1 %v10806_v48  ;;  %10811 = vst [vmem:[#allocation117_spill] sm:$0xff] %v7627_v18  ;;  %v10812_v6 = vld [vmem:[#allocation35_spill] sm:$0xff]  ;;  %v7631_v12 = vld [vmem:[#allocation5 + $0x460] sm:$0xff]  ;;  %v10814_v48 = vld [vmem:[#allocation36_spill] sm:$0xff] }
 0x4fd   :  { %2226 = vmatprep.subr.mxu0 %v7619_v51  ;;  %2297 = vmatprep.subr.mxu1 %v10808_v56  ;;  %10813 = vst [vmem:[#allocation118_spill] sm:$0xff] %v7631_v12  ;;  %v7635_v51 = vld [vmem:[#allocation5 + $0x428] sm:$0xff]  ;;  %v10816_v56 = vld [vmem:[#allocation37_spill] sm:$0xff] }
 0x4fe   :  { %2227 = vmatpush2.msra.mxu0 %v7623_v33  ;;  %2298 = vmatpush2.msra.mxu1 %v10810_v39  ;;  %10815 = vst [vmem:[#allocation120_spill] sm:$0xff] %v7635_v51  ;;  %v7639_v33 = vld [vmem:[#allocation5 + $0x420] sm:$0xff] }
 0x4ff   :  { %2228 = vmatprep.subr.mxu0 %v7627_v18  ;;  %2299 = vmatprep.subr.mxu1 %v10812_v6  ;;  %10817 = vst [vmem:[#allocation122_spill] sm:$0xff] %v7639_v33  ;;  %v10818_v39 = vld [vmem:[#allocation38_spill] sm:$0xff]  ;;  %v7645_v6 = vld [vmem:[#allocation5 + $0x3c8] sm:$0xff] }
 0x500   :  { %2229 = vmatpush2.msra.mxu0 %v7631_v12  ;;  %2300 = vmatpush2.msra.mxu1 %v10814_v48  ;;  %10819 = vst [vmem:[#allocation125_spill] sm:$0xff] %v7645_v6  ;;  %v10820_v48 = vld [vmem:[#allocation39_spill] sm:$0xff]  ;;  %v7649_v12 = vld [vmem:[#allocation5 + $0x3c0] sm:$0xff] }
 0x501   :  { %2230 = vmatprep.subr.mxu0 %v7635_v51  ;;  %2301 = vmatprep.subr.mxu1 %v10816_v56  ;;  %10821 = vst [vmem:[#allocation128_spill] sm:$0xff] %v7649_v12  ;;  %v10822_v56 = vld [vmem:[#allocation40_spill] sm:$0xff]  ;;  %v7653_v51 = vld [vmem:[#allocation5 + $0x388] sm:$0xff] }
 0x502   :  { %2231 = vmatpush2.msra.mxu0 %v7639_v33  ;;  %2302 = vmatpush2.msra.mxu1 %v10818_v39  ;;  %10823 = vst [vmem:[#allocation129_spill] sm:$0xff] %v7653_v51  ;;  %v10824_v39 = vld [vmem:[#allocation41_spill] sm:$0xff]  ;;  %v7657_v33 = vld [vmem:[#allocation5 + $0x380] sm:$0xff] }
 0x503   :  { %2233 = vmatmul.mubr.f32.vlgmr.msra.gmra.mxu0 %v7383_v54  ;;  %2304 = vmatmul.mubr.f32.vlgmr.msra.gmra.mxu1 %v7383_v54  ;;  %10825 = vst [vmem:[#allocation130_spill] sm:$0xff] %v7657_v33  ;;  %v10826_v54 = vld [vmem:[#allocation42_spill] sm:$0xff] }
 0x504   :  { %2368 = vmatprep.subr.mxu0 %v7645_v6  ;;  %2439 = vmatprep.subr.mxu1 %v10820_v48  ;;  %v7661_v6 = vld [vmem:[#allocation5 + $0x348] sm:$0xff] }
 0x505   :  { %2369 = vmatpush1.msra.mxu0 %v7649_v12  ;;  %2440 = vmatpush1.msra.mxu1 %v10822_v56  ;;  %10827 = vst [vmem:[#allocation147_spill] sm:$0xff] %v7661_v6  ;;  %v10828_v48 = vld [vmem:[#allocation43_spill] sm:$0xff]  ;;  %v7665_v12 = vld [vmem:[#allocation5 + $0x340] sm:$0xff]  ;;  %v10830_v56 = vld [vmem:[#allocation44_spill] sm:$0xff] }
 0x506   :  { %2370 = vmatprep.subr.mxu0 %v7653_v51  ;;  %2441 = vmatprep.subr.mxu1 %v10824_v39  ;;  %10829 = vst [vmem:[#allocation148_spill] sm:$0xff] %v7665_v12  ;;  %v7669_v51 = vld [vmem:[#allocation5 + $0x308] sm:$0xff]  ;;  %v10832_v39 = vld [vmem:[#allocation45_spill] sm:$0xff] }
 0x507   :  { %2371 = vmatpush1.msra.mxu0 %v7657_v33  ;;  %2442 = vmatpush1.msra.mxu1 %v10826_v54  ;;  %10831 = vst [vmem:[#allocation149_spill] sm:$0xff] %v7669_v51  ;;  %v7673_v33 = vld [vmem:[#allocation5 + $0x300] sm:$0xff] }
 0x508   :  { %2372 = vmatprep.subr.mxu0 %v7661_v6  ;;  %2443 = vmatprep.subr.mxu1 %v10828_v48  ;;  %10833 = vst [vmem:[#allocation150_spill] sm:$0xff] %v7673_v33  ;;  %v10834_v54 = vld [vmem:[#allocation46_spill] sm:$0xff]  ;;  %v7677_v6 = vld [vmem:[#allocation5 + $0x2c8] sm:$0xff] }
 0x509   :  { %2373 = vmatpush1.msra.mxu0 %v7665_v12  ;;  %2444 = vmatpush1.msra.mxu1 %v10830_v56  ;;  %10835 = vst [vmem:[#allocation151_spill] sm:$0xff] %v7677_v6  ;;  %v10836_v48 = vld [vmem:[#allocation47_spill] sm:$0xff]  ;;  %v7681_v12 = vld [vmem:[#allocation5 + $0x2c0] sm:$0xff]  ;;  %v7684_v56 = vld [vmem:[#allocation5 + $0x2d0] sm:$0xff] }
 0x50a   :  { %2374 = vmatprep.subr.mxu0 %v7669_v51  ;;  %2445 = vmatprep.subr.mxu1 %v10832_v39  ;;  %10837 = vst [vmem:[#allocation152_spill] sm:$0xff] %v7681_v12  ;;  %10838 = vst [vmem:[#allocation153_spill] sm:$0xff] %v7684_v56  ;;  %v7687_v39 = vld [vmem:[#allocation5 + $0x288] sm:$0xff]  ;;  %v7942_v51 = vld [vmem:[#allocation5 + $0x550] sm:$0xff] }
 0x50b   :  { %2375 = vmatpush1.msra.mxu0 %v7673_v33  ;;  %2446 = vmatpush1.msra.mxu1 %v10834_v54  ;;  %10839 = vst [vmem:[#allocation154_spill] sm:$0xff] %v7687_v39  ;;  %v7690_v33 = vld [vmem:[#allocation5 + $0x298] sm:$0xff]  ;;  %v7693_v54 = vld [vmem:[#allocation5 + $0x280] sm:$0xff]  ;;  %10926 = vst [vmem:[#allocation40_spill] sm:$0xff] %v7942_v51 }
 0x50c   :  { %2376 = vmatprep.subr.mxu0 %v7677_v6  ;;  %2447 = vmatprep.subr.mxu1 %v10836_v48  ;;  %10840 = vst [vmem:[#allocation155_spill] sm:$0xff] %v7690_v33  ;;  %10841 = vst [vmem:[#allocation156_spill] sm:$0xff] %v7693_v54  ;;  %v7696_v48 = vld [vmem:[#allocation5 + $0x290] sm:$0xff] }
 0x50d   :  { %2377 = vmatpush1.msra.mxu0 %v7681_v12  ;;  %2448 = vmatpush1.msra.mxu1 %v7684_v56  ;;  %10842 = vst [vmem:[#allocation157_spill] sm:$0xff] %v7696_v48  ;;  %v7699_v12 = vld [vmem:[#allocation5 + $0x248] sm:$0xff]  ;;  %v7702_v56 = vld [vmem:[#allocation5 + $0x258] sm:$0xff]  ;;  %v7934_v6 = vld [vmem:[#allocation5 + $0x590] sm:$0xff] }
 0x50e   :  { %2378 = vmatprep.subr.mxu0 %v7687_v39  ;;  %2449 = vmatprep.subr.mxu1 %v7690_v33  ;;  %10843 = vst [vmem:[#allocation158_spill] sm:$0xff] %v7699_v12  ;;  %10844 = vst [vmem:[#allocation159_spill] sm:$0xff] %v7702_v56  ;;  %v7705_v39 = vld [vmem:[#allocation5 + $0x240] sm:$0xff]  ;;  %v7708_v33 = vld [vmem:[#allocation5 + $0x250] sm:$0xff] }
 0x50f   :  { %2379 = vmatpush1.msra.mxu0 %v7693_v54  ;;  %2450 = vmatpush1.msra.mxu1 %v7696_v48  ;;  %10845 = vst [vmem:[#allocation160_spill] sm:$0xff] %v7705_v39  ;;  %10846 = vst [vmem:[#allocation161_spill] sm:$0xff] %v7708_v33  ;;  %v7711_v54 = vld [vmem:[#allocation5 + $0x208] sm:$0xff]  ;;  %v7714_v48 = vld [vmem:[#allocation5 + $0x218] sm:$0xff] }
 0x510   :  { %2380 = vmatprep.subr.mxu0 %v7699_v12  ;;  %2451 = vmatprep.subr.mxu1 %v7702_v56  ;;  %10847 = vst [vmem:[#allocation162_spill] sm:$0xff] %v7711_v54  ;;  %10848 = vst [vmem:[#allocation163_spill] sm:$0xff] %v7714_v48  ;;  %v7717_v12 = vld [vmem:[#allocation5 + $0x200] sm:$0xff]  ;;  %v7720_v56 = vld [vmem:[#allocation5 + $0x210] sm:$0xff] }
 0x511   :  { %2381 = vmatpush1.msra.mxu0 %v7705_v39  ;;  %2452 = vmatpush1.msra.mxu1 %v7708_v33  ;;  %10849 = vst [vmem:[#allocation164_spill] sm:$0xff] %v7717_v12  ;;  %10850 = vst [vmem:[#allocation165_spill] sm:$0xff] %v7720_v56  ;;  %v7723_v39 = vld [vmem:[#allocation5 + $0x1c8] sm:$0xff]  ;;  %v7726_v33 = vld [vmem:[#allocation5 + $0x1d8] sm:$0xff] }
 0x512   :  { %2382 = vmatprep.subr.mxu0 %v7711_v54  ;;  %2453 = vmatprep.subr.mxu1 %v7714_v48  ;;  %10851 = vst [vmem:[#allocation166_spill] sm:$0xff] %v7723_v39  ;;  %10852 = vst [vmem:[#allocation167_spill] sm:$0xff] %v7726_v33  ;;  %v7729_v54 = vld [vmem:[#allocation5 + $0x1c0] sm:$0xff]  ;;  %v7732_v48 = vld [vmem:[#allocation5 + $0x1d0] sm:$0xff] }
 0x513   :  { %2383 = vmatpush1.msra.mxu0 %v7717_v12  ;;  %2454 = vmatpush1.msra.mxu1 %v7720_v56  ;;  %10853 = vst [vmem:[#allocation168_spill] sm:$0xff] %v7729_v54  ;;  %10854 = vst [vmem:[#allocation169_spill] sm:$0xff] %v7732_v48  ;;  %v7735_v12 = vld [vmem:[#allocation5 + $0x188] sm:$0xff]  ;;  %v7738_v56 = vld [vmem:[#allocation5 + $0x198] sm:$0xff] }
 0x514   :  { %2384 = vmatprep.subr.mxu0 %v7723_v39  ;;  %2455 = vmatprep.subr.mxu1 %v7726_v33  ;;  %10855 = vst [vmem:[#allocation170_spill] sm:$0xff] %v7735_v12  ;;  %10856 = vst [vmem:[#allocation171_spill] sm:$0xff] %v7738_v56  ;;  %v7741_v39 = vld [vmem:[#allocation5 + $0x180] sm:$0xff]  ;;  %v7744_v33 = vld [vmem:[#allocation5 + $0x190] sm:$0xff] }
 0x515   :  { %2385 = vmatpush1.msra.mxu0 %v7729_v54  ;;  %2456 = vmatpush1.msra.mxu1 %v7732_v48  ;;  %10857 = vst [vmem:[#allocation172_spill] sm:$0xff] %v7741_v39  ;;  %10858 = vst [vmem:[#allocation173_spill] sm:$0xff] %v7744_v33  ;;  %v7747_v54 = vld [vmem:[#allocation5 + $0x148] sm:$0xff]  ;;  %v7750_v48 = vld [vmem:[#allocation5 + $0x158] sm:$0xff] }
 0x516   :  { %2386 = vmatprep.subr.mxu0 %v7735_v12  ;;  %2457 = vmatprep.subr.mxu1 %v7738_v56  ;;  %10859 = vst [vmem:[#allocation174_spill] sm:$0xff] %v7747_v54  ;;  %10860 = vst [vmem:[#allocation175_spill] sm:$0xff] %v7750_v48  ;;  %v7753_v12 = vld [vmem:[#allocation5 + $0x140] sm:$0xff]  ;;  %v7756_v56 = vld [vmem:[#allocation5 + $0x150] sm:$0xff] }
 0x517   :  { %2387 = vmatpush1.msra.mxu0 %v7741_v39  ;;  %2458 = vmatpush1.msra.mxu1 %v7744_v33  ;;  %10861 = vst [vmem:[#allocation176_spill] sm:$0xff] %v7753_v12  ;;  %10862 = vst [vmem:[#allocation177_spill] sm:$0xff] %v7756_v56  ;;  %v7759_v39 = vld [vmem:[#allocation5 + $0x108] sm:$0xff]  ;;  %v7762_v33 = vld [vmem:[#allocation5 + $0x118] sm:$0xff] }
 0x518   :  { %2388 = vmatprep.subr.mxu0 %v7747_v54  ;;  %2459 = vmatprep.subr.mxu1 %v7750_v48  ;;  %10863 = vst [vmem:[#allocation178_spill] sm:$0xff] %v7759_v39  ;;  %10864 = vst [vmem:[#allocation179_spill] sm:$0xff] %v7762_v33  ;;  %v7765_v54 = vld [vmem:[#allocation5 + $0x100] sm:$0xff]  ;;  %v7768_v48 = vld [vmem:[#allocation5 + $0x110] sm:$0xff] }
 0x519   :  { %2389 = vmatpush1.msra.mxu0 %v7753_v12  ;;  %2460 = vmatpush1.msra.mxu1 %v7756_v56  ;;  %10865 = vst [vmem:[#allocation180_spill] sm:$0xff] %v7765_v54  ;;  %10866 = vst [vmem:[#allocation181_spill] sm:$0xff] %v7768_v48  ;;  %v7771_v12 = vld [vmem:[#allocation5 + $0xc8] sm:$0xff]  ;;  %v7774_v56 = vld [vmem:[#allocation5 + $0xd8] sm:$0xff] }
 0x51a   :  { %2390 = vmatprep.subr.mxu0 %v7759_v39  ;;  %2461 = vmatprep.subr.mxu1 %v7762_v33  ;;  %10867 = vst [vmem:[#allocation182_spill] sm:$0xff] %v7771_v12  ;;  %10868 = vst [vmem:[#allocation183_spill] sm:$0xff] %v7774_v56  ;;  %v7777_v39 = vld [vmem:[#allocation5 + $0xc0] sm:$0xff]  ;;  %v7780_v33 = vld [vmem:[#allocation5 + $0xd0] sm:$0xff] }
 0x51b   :  { %2391 = vmatpush1.msra.mxu0 %v7765_v54  ;;  %2462 = vmatpush1.msra.mxu1 %v7768_v48  ;;  %10869 = vst [vmem:[#allocation184_spill] sm:$0xff] %v7777_v39  ;;  %10870 = vst [vmem:[#allocation185_spill] sm:$0xff] %v7780_v33  ;;  %v7783_v54 = vld [vmem:[#allocation5 + $0x88] sm:$0xff]  ;;  %v7786_v48 = vld [vmem:[#allocation5 + $0x98] sm:$0xff] }
 0x51c   :  { %2392 = vmatprep.subr.mxu0 %v7771_v12  ;;  %2463 = vmatprep.subr.mxu1 %v7774_v56  ;;  %10871 = vst [vmem:[#allocation186_spill] sm:$0xff] %v7783_v54  ;;  %10872 = vst [vmem:[#allocation187_spill] sm:$0xff] %v7786_v48  ;;  %v7789_v12 = vld [vmem:[#allocation5 + $0x80] sm:$0xff]  ;;  %v7792_v56 = vld [vmem:[#allocation5 + $0x90] sm:$0xff] }
 0x51d   :  { %2393 = vmatpush1.msra.mxu0 %v7777_v39  ;;  %2464 = vmatpush1.msra.mxu1 %v7780_v33  ;;  %10873 = vst [vmem:[#allocation188_spill] sm:$0xff] %v7789_v12  ;;  %10874 = vst [vmem:[#allocation189_spill] sm:$0xff] %v7792_v56  ;;  %v7795_v39 = vld [vmem:[#allocation5 + $0x48] sm:$0xff]  ;;  %v7798_v33 = vld [vmem:[#allocation5 + $0x58] sm:$0xff] }
 0x51e   :  { %2394 = vmatprep.subr.mxu0 %v7783_v54  ;;  %2465 = vmatprep.subr.mxu1 %v7786_v48  ;;  %10875 = vst [vmem:[#allocation190_spill] sm:$0xff] %v7795_v39  ;;  %10876 = vst [vmem:[#allocation191_spill] sm:$0xff] %v7798_v33  ;;  %v7801_v54 = vld [vmem:[#allocation5 + $0x40] sm:$0xff]  ;;  %v7804_v48 = vld [vmem:[#allocation5 + $0x50] sm:$0xff] }
 0x51f   :  { %2395 = vmatpush1.msra.mxu0 %v7789_v12  ;;  %2466 = vmatpush1.msra.mxu1 %v7792_v56  ;;  %10877 = vst [vmem:[#allocation192_spill] sm:$0xff] %v7801_v54  ;;  %10878 = vst [vmem:[#allocation193_spill] sm:$0xff] %v7804_v48  ;;  %v7807_v12 = vld [vmem:[#allocation5 + $0x8] sm:$0xff]  ;;  %v7810_v56 = vld [vmem:[#allocation5 + $0x18] sm:$0xff] }
 0x520   :  { %2396 = vmatprep.subr.mxu0 %v7795_v39  ;;  %2467 = vmatprep.subr.mxu1 %v7798_v33  ;;  %10879 = vst [vmem:[#allocation92_spill] sm:$0xff] %v7807_v12  ;;  %10880 = vst [vmem:[#allocation93_spill] sm:$0xff] %v7810_v56  ;;  %v7813_v39 = vld [vmem:[#allocation5] sm:$0xff]  ;;  %v7816_v33 = vld [vmem:[#allocation5 + $0x10] sm:$0xff] }
 0x521   :  { %2397 = vmatpush1.msra.mxu0 %v7801_v54  ;;  %2468 = vmatpush1.msra.mxu1 %v7804_v48  ;;  %10881 = vst [vmem:[#allocation95_spill] sm:$0xff] %v7813_v39  ;;  %10882 = vst [vmem:[#allocation96_spill] sm:$0xff] %v7816_v33  ;;  %v7819_v54 = vld [vmem:[#allocation5 + $0x7c8] sm:$0xff]  ;;  %v7822_v48 = vld [vmem:[#allocation5 + $0x7d8] sm:$0xff] }
 0x522   :  { %2398 = vmatprep.subr.mxu0 %v7807_v12  ;;  %2469 = vmatprep.subr.mxu1 %v7810_v56  ;;  %10883 = vst [vmem:[#allocation100_spill] sm:$0xff] %v7819_v54  ;;  %10884 = vst [vmem:[#allocation102_spill] sm:$0xff] %v7822_v48  ;;  %v7825_v12 = vld [vmem:[#allocation5 + $0x7c0] sm:$0xff]  ;;  %v7828_v56 = vld [vmem:[#allocation5 + $0x7d0] sm:$0xff] }
 0x523   :  { %2399 = vmatpush1.msra.mxu0 %v7813_v39  ;;  %2470 = vmatpush1.msra.mxu1 %v7816_v33  ;;  %10885 = vst [vmem:[#allocation106_spill] sm:$0xff] %v7825_v12  ;;  %10886 = vst [vmem:[#allocation107_spill] sm:$0xff] %v7828_v56  ;;  %v7831_v39 = vld [vmem:[#allocation5 + $0x788] sm:$0xff]  ;;  %v7834_v33 = vld [vmem:[#allocation5 + $0x798] sm:$0xff] }
 0x524   :  { %2400 = vmatprep.subr.mxu0 %v7819_v54  ;;  %2471 = vmatprep.subr.mxu1 %v7822_v48  ;;  %10887 = vst [vmem:[#allocation109_spill] sm:$0xff] %v7831_v39  ;;  %10888 = vst [vmem:[#allocation110_spill] sm:$0xff] %v7834_v33  ;;  %v7837_v54 = vld [vmem:[#allocation5 + $0x780] sm:$0xff]  ;;  %v7840_v48 = vld [vmem:[#allocation5 + $0x790] sm:$0xff] }
 0x525   :  { %2401 = vmatpush2.msra.mxu0 %v7825_v12  ;;  %2472 = vmatpush2.msra.mxu1 %v7828_v56  ;;  %10889 = vst [vmem:[#allocation113_spill] sm:$0xff] %v7837_v54  ;;  %10890 = vst [vmem:[#allocation114_spill] sm:$0xff] %v7840_v48  ;;  %v7843_v12 = vld [vmem:[#allocation5 + $0x748] sm:$0xff]  ;;  %v7846_v56 = vld [vmem:[#allocation5 + $0x758] sm:$0xff] }
 0x526   :  { %2402 = vmatprep.subr.mxu0 %v7831_v39  ;;  %2473 = vmatprep.subr.mxu1 %v7834_v33  ;;  %10891 = vst [vmem:[#allocation119_spill] sm:$0xff] %v7843_v12  ;;  %10892 = vst [vmem:[#allocation121_spill] sm:$0xff] %v7846_v56  ;;  %v7849_v39 = vld [vmem:[#allocation5 + $0x740] sm:$0xff]  ;;  %v7852_v33 = vld [vmem:[#allocation5 + $0x750] sm:$0xff] }
 0x527   :  { %2403 = vmatpush2.msra.mxu0 %v7837_v54  ;;  %2474 = vmatpush2.msra.mxu1 %v7840_v48  ;;  %10893 = vst [vmem:[#allocation77_spill] sm:$0xff] %v7849_v39  ;;  %10894 = vst [vmem:[#allocation135_spill] sm:$0xff] %v7852_v33  ;;  %v7855_v54 = vld [vmem:[#allocation5 + $0x708] sm:$0xff]  ;;  %v7858_v48 = vld [vmem:[#allocation5 + $0x718] sm:$0xff] }
 0x528   :  { %2404 = vmatprep.subr.mxu0 %v7843_v12  ;;  %2475 = vmatprep.subr.mxu1 %v7846_v56  ;;  %10895 = vst [vmem:[#allocation81_spill] sm:$0xff] %v7855_v54  ;;  %10896 = vst [vmem:[#allocation136_spill] sm:$0xff] %v7858_v48  ;;  %v7861_v12 = vld [vmem:[#allocation5 + $0x700] sm:$0xff]  ;;  %v7864_v56 = vld [vmem:[#allocation5 + $0x710] sm:$0xff] }
 0x529   :  { %2405 = vmatpush2.msra.mxu0 %v7849_v39  ;;  %2476 = vmatpush2.msra.mxu1 %v7852_v33  ;;  %10897 = vst [vmem:[#allocation78_spill] sm:$0xff] %v7861_v12  ;;  %10898 = vst [vmem:[#allocation10_spill] sm:$0xff] %v7864_v56  ;;  %v7867_v39 = vld [vmem:[#allocation5 + $0x6c8] sm:$0xff]  ;;  %v7870_v33 = vld [vmem:[#allocation5 + $0x6d8] sm:$0xff] }
 0x52a   :  { %2406 = vmatprep.subr.mxu0 %v7855_v54  ;;  %2477 = vmatprep.subr.mxu1 %v7858_v48  ;;  %10899 = vst [vmem:[#allocation82_spill] sm:$0xff] %v7867_v39  ;;  %10900 = vst [vmem:[#allocation11_spill] sm:$0xff] %v7870_v33  ;;  %v7873_v54 = vld [vmem:[#allocation5 + $0x6c0] sm:$0xff]  ;;  %v7876_v48 = vld [vmem:[#allocation5 + $0x6d0] sm:$0xff] }
 0x52b   :  { %2407 = vmatpush2.msra.mxu0 %v7861_v12  ;;  %2478 = vmatpush2.msra.mxu1 %v7864_v56  ;;  %10901 = vst [vmem:[#allocation68_spill] sm:$0xff] %v7873_v54  ;;  %10902 = vst [vmem:[#allocation72_spill] sm:$0xff] %v7876_v48  ;;  %v7879_v12 = vld [vmem:[#allocation5 + $0x688] sm:$0xff]  ;;  %v7882_v56 = vld [vmem:[#allocation5 + $0x698] sm:$0xff] }
 0x52c   :  { %2408 = vmatprep.subr.mxu0 %v7867_v39  ;;  %2479 = vmatprep.subr.mxu1 %v7870_v33  ;;  %10903 = vst [vmem:[#allocation60_spill] sm:$0xff] %v7879_v12  ;;  %10904 = vst [vmem:[#allocation56_spill] sm:$0xff] %v7882_v56  ;;  %v7885_v39 = vld [vmem:[#allocation5 + $0x680] sm:$0xff]  ;;  %v7888_v33 = vld [vmem:[#allocation5 + $0x690] sm:$0xff] }
 0x52d   :  { %2409 = vmatpush2.msra.mxu0 %v7873_v54  ;;  %2480 = vmatpush2.msra.mxu1 %v7876_v48  ;;  %10905 = vst [vmem:[#allocation22_spill] sm:$0xff] %v7885_v39  ;;  %10906 = vst [vmem:[#allocation23_spill] sm:$0xff] %v7888_v33  ;;  %v7891_v54 = vld [vmem:[#allocation5 + $0x648] sm:$0xff]  ;;  %v7894_v48 = vld [vmem:[#allocation5 + $0x658] sm:$0xff] }
 0x52e   :  { %2410 = vmatprep.subr.mxu0 %v7879_v12  ;;  %2481 = vmatprep.subr.mxu1 %v7882_v56  ;;  %10907 = vst [vmem:[#allocation24_spill] sm:$0xff] %v7891_v54  ;;  %10908 = vst [vmem:[#allocation25_spill] sm:$0xff] %v7894_v48  ;;  %v7897_v12 = vld [vmem:[#allocation5 + $0x640] sm:$0xff]  ;;  %v7900_v56 = vld [vmem:[#allocation5 + $0x650] sm:$0xff] }
 0x52f   :  { %2411 = vmatpush2.msra.mxu0 %v7885_v39  ;;  %2482 = vmatpush2.msra.mxu1 %v7888_v33  ;;  %10909 = vst [vmem:[#allocation26_spill] sm:$0xff] %v7897_v12  ;;  %10910 = vst [vmem:[#allocation27_spill] sm:$0xff] %v7900_v56  ;;  %v7903_v39 = vld [vmem:[#allocation5 + $0x608] sm:$0xff]  ;;  %v7906_v33 = vld [vmem:[#allocation5 + $0x618] sm:$0xff] }
 0x530   :  { %2412 = vmatprep.subr.mxu0 %v7891_v54  ;;  %2483 = vmatprep.subr.mxu1 %v7894_v48  ;;  %10911 = vst [vmem:[#allocation28_spill] sm:$0xff] %v7903_v39  ;;  %10912 = vst [vmem:[#allocation29_spill] sm:$0xff] %v7906_v33  ;;  %v7909_v54 = vld [vmem:[#allocation5 + $0x600] sm:$0xff]  ;;  %v7912_v48 = vld [vmem:[#allocation5 + $0x610] sm:$0xff] }
 0x531   :  { %2413 = vmatpush2.msra.mxu0 %v7897_v12  ;;  %2484 = vmatpush2.msra.mxu1 %v7900_v56  ;;  %10913 = vst [vmem:[#allocation30_spill] sm:$0xff] %v7909_v54  ;;  %10914 = vst [vmem:[#allocation31_spill] sm:$0xff] %v7912_v48  ;;  %v7915_v12 = vld [vmem:[#allocation5 + $0x5c8] sm:$0xff]  ;;  %v7918_v56 = vld [vmem:[#allocation5 + $0x5d8] sm:$0xff] }
 0x532   :  { %2414 = vmatprep.subr.mxu0 %v7903_v39  ;;  %2485 = vmatprep.subr.mxu1 %v7906_v33  ;;  %10915 = vst [vmem:[#allocation32_spill] sm:$0xff] %v7915_v12  ;;  %10916 = vst [vmem:[#allocation33_spill] sm:$0xff] %v7918_v56  ;;  %v7921_v39 = vld [vmem:[#allocation5 + $0x5c0] sm:$0xff]  ;;  %v7924_v33 = vld [vmem:[#allocation5 + $0x5d0] sm:$0xff] }
 0x533   :  { %2415 = vmatpush2.msra.mxu0 %v7909_v54  ;;  %2486 = vmatpush2.msra.mxu1 %v7912_v48  ;;  %10917 = vst [vmem:[#allocation34_spill] sm:$0xff] %v7921_v39  ;;  %10918 = vst [vmem:[#allocation35_spill] sm:$0xff] %v7924_v33  ;;  %v7927_v54 = vld [vmem:[#allocation5 + $0x588] sm:$0xff]  ;;  %v7930_v48 = vld [vmem:[#allocation5 + $0x598] sm:$0xff] }
 0x534   :  { %2416 = vmatprep.subr.mxu0 %v7915_v12  ;;  %2487 = vmatprep.subr.mxu1 %v7918_v56  ;;  %10919 = vst [vmem:[#allocation36_spill] sm:$0xff] %v7927_v54  ;;  %10920 = vst [vmem:[#allocation37_spill] sm:$0xff] %v7930_v48  ;;  %v10921_v12 = vld [vmem:[#allocation48_spill] sm:$0xff]  ;;  %v10923_v56 = vld [vmem:[#allocation49_spill] sm:$0xff] }
 0x535   :  { %2417 = vmatpush2.msra.mxu0 %v7921_v39  ;;  %2488 = vmatpush2.msra.mxu1 %v7924_v33  ;;  %10922 = vst [vmem:[#allocation38_spill] sm:$0xff] %v7934_v6  ;;  %v7938_v39 = vld [vmem:[#allocation5 + $0x558] sm:$0xff]  ;;  %v10925_v33 = vld [vmem:[#allocation50_spill] sm:$0xff] }
 0x536   :  { %2418 = vmatprep.subr.mxu0 %v7927_v54  ;;  %2489 = vmatprep.subr.mxu1 %v7930_v48  ;;  %10924 = vst [vmem:[#allocation39_spill] sm:$0xff] %v7938_v39  ;;  %v10927_v54 = vld [vmem:[#allocation51_spill] sm:$0xff]  ;;  %v7946_v48 = vld [vmem:[#allocation5 + $0x518] sm:$0xff] }
 0x537   :  { %2419 = vmatpush2.msra.mxu0 %v10921_v12  ;;  %2490 = vmatpush2.msra.mxu1 %v7934_v6  ;;  %10928 = vst [vmem:[#allocation41_spill] sm:$0xff] %v7946_v48  ;;  %v10929_v12 = vld [vmem:[#allocation52_spill] sm:$0xff] }
 0x538   :  { %2420 = vmatprep.subr.mxu0 %v10923_v56  ;;  %2491 = vmatprep.subr.mxu1 %v7938_v39  ;;  %v7950_v6 = vld [vmem:[#allocation5 + $0x510] sm:$0xff]  ;;  %v10931_v56 = vld [vmem:[#allocation53_spill] sm:$0xff] }
 0x539   :  { %2421 = vmatpush2.msra.mxu0 %v10925_v33  ;;  %2492 = vmatpush2.msra.mxu1 %v7942_v51  ;;  %10930 = vst [vmem:[#allocation42_spill] sm:$0xff] %v7950_v6  ;;  %v7954_v39 = vld [vmem:[#allocation5 + $0x4d8] sm:$0xff]  ;;  %v10933_v33 = vld [vmem:[#allocation54_spill] sm:$0xff]  ;;  %v7958_v51 = vld [vmem:[#allocation5 + $0x4d0] sm:$0xff] }
 0x53a   :  { %2422 = vmatprep.subr.mxu0 %v10927_v54  ;;  %2493 = vmatprep.subr.mxu1 %v7946_v48  ;;  %10932 = vst [vmem:[#allocation43_spill] sm:$0xff] %v7954_v39  ;;  %10934 = vst [vmem:[#allocation44_spill] sm:$0xff] %v7958_v51  ;;  %v10935_v54 = vld [vmem:[#allocation55_spill] sm:$0xff]  ;;  %v7962_v48 = vld [vmem:[#allocation5 + $0x498] sm:$0xff] }
 0x53b   :  { %2423 = vmatpush2.msra.mxu0 %v10929_v12  ;;  %2494 = vmatpush2.msra.mxu1 %v7950_v6  ;;  %10936 = vst [vmem:[#allocation45_spill] sm:$0xff] %v7962_v48  ;;  %v10937_v12 = vld [vmem:[#allocation57_spill] sm:$0xff]  ;;  %v7966_v6 = vld [vmem:[#allocation5 + $0x490] sm:$0xff] }
 0x53c   :  { %2424 = vmatprep.subr.mxu0 %v10931_v56  ;;  %2495 = vmatprep.subr.mxu1 %v7954_v39  ;;  %10938 = vst [vmem:[#allocation46_spill] sm:$0xff] %v7966_v6  ;;  %v10939_v56 = vld [vmem:[#allocation59_spill] sm:$0xff]  ;;  %v7970_v39 = vld [vmem:[#allocation5 + $0x458] sm:$0xff] }
 0x53d   :  { %2425 = vmatpush2.msra.mxu0 %v10933_v33  ;;  %2496 = vmatpush2.msra.mxu1 %v7958_v51  ;;  %10940 = vst [vmem:[#allocation47_spill] sm:$0xff] %v7970_v39  ;;  %v10941_v33 = vld [vmem:[#allocation61_spill] sm:$0xff]  ;;  %v7974_v51 = vld [vmem:[#allocation5 + $0x450] sm:$0xff] }
 0x53e   :  { %2426 = vmatprep.subr.mxu0 %v10935_v54  ;;  %2497 = vmatprep.subr.mxu1 %v7962_v48  ;;  %10942 = vst [vmem:[#allocation48_spill] sm:$0xff] %v7974_v51  ;;  %v10943_v54 = vld [vmem:[#allocation63_spill] sm:$0xff]  ;;  %v7978_v48 = vld [vmem:[#allocation5 + $0x418] sm:$0xff] }
 0x53f   :  { %2427 = vmatpush2.msra.mxu0 %v10937_v12  ;;  %2498 = vmatpush2.msra.mxu1 %v7966_v6  ;;  %10944 = vst [vmem:[#allocation49_spill] sm:$0xff] %v7978_v48  ;;  %v10945_v12 = vld [vmem:[#allocation64_spill] sm:$0xff] }
 0x540   :  { %2428 = vmatprep.subr.mxu0 %v10939_v56  ;;  %2499 = vmatprep.subr.mxu1 %v7970_v39  ;;  %v7982_v6 = vld [vmem:[#allocation5 + $0x410] sm:$0xff]  ;;  %v10947_v56 = vld [vmem:[#allocation65_spill] sm:$0xff] }
 0x541   :  { %2429 = vmatpush2.msra.mxu0 %v10941_v33  ;;  %2500 = vmatpush2.msra.mxu1 %v7974_v51  ;;  %10946 = vst [vmem:[#allocation50_spill] sm:$0xff] %v7982_v6  ;;  %v7986_v39 = vld [vmem:[#allocation5 + $0x3f8] sm:$0xff] }
 0x542   :  { %2430 = vmatprep.subr.mxu0 %v10943_v54  ;;  %2501 = vmatprep.subr.mxu1 %v7978_v48  ;;  %10948 = vst [vmem:[#allocation51_spill] sm:$0xff] %v7986_v39  ;;  %v10949_v54 = vld [vmem:[#allocation86_spill] sm:$0xff] }
 0x543   :  { %2431 = vmatpush2.msra.mxu0 %v10945_v12  ;;  %2502 = vmatpush2.msra.mxu1 %v7982_v6 }
 0x544   :  { %2510 = vmatprep.subr.mxu0 %v10947_v56  ;;  %2581 = vmatprep.subr.mxu1 %v7986_v39 }
 0x582   :  { %v2092_v33 = vpop.f32.mrf.mxu0  ;;  %v2163_v51 = vpop.f32.mrf.mxu1 }
 0x583   :  { %v2310_v34 = vadd.f32 %v2092_v33, %v10949_v54  ;;  %v2312_v20 = vadd.f32 %v2163_v51, %v10950_v47 }
 0x584   :  { %v2094_v18 = vpop.f32.mrf.mxu0  ;;  %v2165_v48 = vpop.f32.mrf.mxu1 }
 0x585   :  { %v2311_v12 = vadd.f32 %v2094_v18, %v10951_v11  ;;  %v3968_v43 = vmul.f32 -1.442695, %v2310_v34  ;;  %v2313_v45 = vadd.f32 %v2165_v48, %v10952_v1  ;;  %v3970_v6 = vmul.f32 -1.442695, %v2312_v20  ;;  %v10953_v1 = vld [vmem:[#allocation87_spill] sm:$0xff]  ;;  %v10954_v18 = vld [vmem:[#allocation12_spill] sm:$0xff] }
 0x586   :  { %v10955_v48 = vld [vmem:[#allocation91_spill] sm:$0xff] }
 0x587   :  { %v3969_v44 = vmul.f32 -1.442695, %v2311_v12  ;;  %4163 = vpow2.f32 %v3968_v43  ;;  %v3971_v56 = vmul.f32 -1.442695, %v2313_v45 }
 0x588   :  { %4165 = vpow2.f32 %v3970_v6 }
 0x589   :  { %4167 = vpow2.f32 %v3969_v44 }
 0x58a   :  { %4169 = vpow2.f32 %v3971_v56 }
 0x594   :  { %v4164_v39 = vpop.eup %4163 }
 0x595   :  { %v4166_v52 = vpop.eup %4165  ;;  %v2336_v58 = vadd.f32 1.0, %v4164_v39  ;;  %v10956_v39 = vld [vmem:[#allocation13_spill] sm:$0xff] }
 0x596   :  { %v4168_v25 = vpop.eup %4167  ;;  %v2338_v54 = vadd.f32 1.0, %v4166_v52 }
 0x597   :  { %v4170_v33 = vpop.eup %4169  ;;  %v2337_v47 = vadd.f32 1.0, %v4168_v25  ;;  %4171 = vrcp.f32 %v2336_v58 }
 0x598   :  { %v2339_v51 = vadd.f32 1.0, %v4170_v33  ;;  %4173 = vrcp.f32 %v2338_v54 }
 0x599   :  { %4175 = vrcp.f32 %v2337_v47 }
 0x5a4   :  { %v4172_v25 = vpop.eup %4171 }
 0x5a5   :  { %v4174_v52 = vpop.eup %4173 }
 0x5a6   :  { %v4176_v33 = vpop.eup %4175  ;;  %v2356_v47 = vmul.f32 %v4174_v52, %v7374_v21  ;;  %v8019_v52 = vld [vmem:[#allocation5 + $0x3b8] sm:$0xff] }
 0x5c3   :  { %v2234_v11 = vpop.f32.mrf.mxu0  ;;  %v2305_v34 = vpop.f32.mrf.mxu1 }
 0x5c4   :  { %v2314_v20 = vadd.f32 %v2234_v11, %v10953_v1  ;;  %v2316_v43 = vadd.f32 %v2305_v34, %v10954_v18 }
 0x5c5   :  { %v2236_v45 = vpop.f32.mrf.mxu0  ;;  %v2307_v44 = vpop.f32.mrf.mxu1 }
 0x5c6   :  { %v3972_v6 = vmul.f32 -1.442695, %v2314_v20  ;;  %4177 = vtanh.f32 %v2316_v43  ;;  %v2315_v12 = vadd.f32 %v2236_v45, %v10955_v48  ;;  %v2317_v56 = vadd.f32 %v2307_v44, %v10956_v39 }
 0x5c7   :  { %4179 = vrcp.f32 %v2339_v51 }
 0x5c8   :  { %4181 = vpow2.f32 %v3972_v6  ;;  %v3973_v58 = vmul.f32 -1.442695, %v2315_v12 }
 0x5c9   :  { %4183 = vtanh.f32 %v2317_v56 }
 0x5ca   :  { %4185 = vpow2.f32 %v3973_v58 }
 0x5d3   :  { %v4178_v54 = vpop.eup %4177 }
 0x5d4   :  { %v4180_v11 = vpop.eup %4179  ;;  %v2358_v34 = vmul.f32 %v4178_v54, %v4172_v25  ;;  %v8036_v54 = vld [vmem:[#allocation5 + $0x338] sm:$0xff] }
 0x5d5   :  { %v4182_v1 = vpop.eup %4181  ;;  %v2357_v51 = vmul.f32 %v4180_v11, %v7378_v16  ;;  %v8014_v16 = vld [vmem:[#allocation5 + $0x3f0] sm:$0xff] }
 0x5d6   :  { %v4184_v20 = vpop.eup %4183  ;;  %v2340_v18 = vadd.f32 1.0, %v4182_v1  ;;  %v7998_v43 = vadd.f32 %v2358_v34, %v2356_v47  ;;  %v8184_v11 = vld [vmem:[#allocation5 + $0x6b0] sm:$0xff]  ;;  %v8188_v47 = vld [vmem:[#allocation5 + $0x678] sm:$0xff] }
 0x5d7   :  { %v4186_v45 = vpop.eup %4185  ;;  %v2359_v44 = vmul.f32 %v4184_v20, %v4176_v33  ;;  %v8024_v33 = vld [vmem:[#allocation5 + $0x3b0] sm:$0xff]  ;;  %10960 = vst [vmem:[#allocation54_spill] sm:$0xff] %v8184_v11  ;;  %10962 = vst [vmem:[#allocation55_spill] sm:$0xff] %v8188_v47  ;;  %v8196_v1 = vld [vmem:[#allocation5 + $0x638] sm:$0xff] }
 0x5d8   :  { %4187 = vrcp.f32 %v2340_v18  ;;  %v2341_v6 = vadd.f32 1.0, %v4186_v45  ;;  %v8192_v34 = vld [vmem:[#allocation5 + $0x670] sm:$0xff]  ;;  %10966 = vst [vmem:[#allocation59_spill] sm:$0xff] %v8196_v1  ;;  %v10969_v45 = vld [vmem:[#allocation79_spill] sm:$0xff] }
 0x5d9   :  { %4189 = vtanh.f32 %v7998_v43  ;;  %v8002_v48 = vadd.f32 %v2359_v44, %v2357_v51  ;;  %10964 = vst [vmem:[#allocation57_spill] sm:$0xff] %v8192_v34  ;;  %v10967_v20 = vld [vmem:[#allocation76_spill] sm:$0xff]  ;;  %v8204_v51 = vld [vmem:[#allocation5 + $0x5f8] sm:$0xff] }
 0x5da   :  { %4191 = vrcp.f32 %v2341_v6  ;;  %v8200_v18 = vld [vmem:[#allocation5 + $0x630] sm:$0xff]  ;;  %10970 = vst [vmem:[#allocation63_spill] sm:$0xff] %v8204_v51 }
 0x5db   :  { %4193 = vtanh.f32 %v8002_v48  ;;  %10968 = vst [vmem:[#allocation61_spill] sm:$0xff] %v8200_v18  ;;  %v10971_v44 = vld [vmem:[#allocation80_spill] sm:$0xff] }
 0x5dc   :  { %v8208_v6 = vld [vmem:[#allocation5 + $0x5f0] sm:$0xff] }
 0x5dd   :  { %10972 = vst [vmem:[#allocation64_spill] sm:$0xff] %v8208_v6 }
 0x5e5   :  { %v4188_v21 = vpop.eup %4187 }
 0x5e6   :  { %v4190_v12 = vpop.eup %4189 }
 0x5e7   :  { %v4192_v39 = vpop.eup %4191  ;;  %v8007_v25 = vmul.f32 %v4190_v12, %v4188_v21  ;;  %v10973_v21 = vld [vmem:[#allocation83_spill] sm:$0xff]  ;;  %v8212_v12 = vld [vmem:[#allocation5 + $0x5b8] sm:$0xff] }
 0x5e8   :  { %v4194_v56 = vpop.eup %4193  ;;  %10974 = vst [vmem:[#allocation65_spill] sm:$0xff] %v8212_v12 }
 0x5e9   :  { %v8005_v58 = vmul.f32 %v4194_v56, %v4192_v39  ;;  %10958 = vst [vmem:[#allocation53_spill] sm:$0xff] %v8007_v25  ;;  %v10975_v39 = vld [vmem:[#allocation84_spill] sm:$0xff] }
 0x5ea   :  { %v8216_v56 = vld [vmem:[#allocation5 + $0x5b0] sm:$0xff] }
 0x5eb   :  { %10957 = vst [vmem:[#allocation52_spill] sm:$0xff] %v8005_v58  ;;  %2432 = vmatprep.mubr.f32.mxu0 %v8005_v58  ;;  %2503 = vmatprep.mubr.f32.mxu1 %v8005_v58  ;;  %10976 = vst [vmem:[#allocation86_spill] sm:$0xff] %v8216_v56 }
 0x5ec   :  { %2433 = vmatmul.mubr.f32.vlgmr.msra.gmra.mxu0 %v8007_v25  ;;  %2504 = vmatmul.mubr.f32.vlgmr.msra.gmra.mxu1 %v8007_v25 }
 0x5ed   :  { %2511 = vmatpush1.msra.mxu0 %v7389_v23  ;;  %2582 = vmatpush1.msra.mxu1 %v8014_v16  ;;  %v8028_v23 = vld [vmem:[#allocation5 + $0x378] sm:$0xff] }
 0x5ee   :  { %2512 = vmatprep.subr.mxu0 %v7393_v38  ;;  %2574 = vmatprep.mubr.f32.mxu0 %v8005_v58  ;;  %v8032_v38 = vld [vmem:[#allocation5 + $0x370] sm:$0xff] }
 0x5ef   :  { %2583 = vmatprep.subr.mxu1 %v8019_v52  ;;  %2645 = vmatprep.mubr.f32.mxu1 %v8005_v58  ;;  %v8240_v58 = vld [vmem:[#allocation5 + $0x4f0] sm:$0xff] }
 0x5f0   :  { %2513 = vmatpush1.msra.mxu0 %v7399_v60  ;;  %2584 = vmatpush1.msra.mxu1 %v8024_v33  ;;  %v8040_v60 = vld [vmem:[#allocation5 + $0x330] sm:$0xff]  ;;  %10988 = vst [vmem:[#allocation91_spill] sm:$0xff] %v8240_v58 }
 0x5f1   :  { %2514 = vmatprep.subr.mxu0 %v7403_v8  ;;  %2585 = vmatprep.subr.mxu1 %v8028_v23  ;;  %v8044_v8 = vld [vmem:[#allocation5 + $0x2f8] sm:$0xff] }
 0x5f2   :  { %2515 = vmatpush1.msra.mxu0 %v7407_v9  ;;  %2586 = vmatpush1.msra.mxu1 %v8032_v38  ;;  %v8048_v9 = vld [vmem:[#allocation5 + $0x2f0] sm:$0xff] }
 0x5f3   :  { %2516 = vmatprep.subr.mxu0 %v7411_v31  ;;  %2587 = vmatprep.subr.mxu1 %v8036_v54  ;;  %v8052_v31 = vld [vmem:[#allocation5 + $0x2b8] sm:$0xff] }
 0x5f4   :  { %2517 = vmatpush1.msra.mxu0 %v7415_v4  ;;  %2588 = vmatpush1.msra.mxu1 %v8040_v60  ;;  %v8056_v4 = vld [vmem:[#allocation5 + $0x2b0] sm:$0xff] }
 0x5f5   :  { %2518 = vmatprep.subr.mxu0 %v7419_v29  ;;  %2589 = vmatprep.subr.mxu1 %v8044_v8  ;;  %v8060_v29 = vld [vmem:[#allocation5 + $0x278] sm:$0xff] }
 0x5f6   :  { %2519 = vmatpush1.msra.mxu0 %v7423_v55  ;;  %2590 = vmatpush1.msra.mxu1 %v8048_v9  ;;  %v8064_v55 = vld [vmem:[#allocation5 + $0x270] sm:$0xff] }
 0x5f7   :  { %2520 = vmatprep.subr.mxu0 %v7427_v28  ;;  %2591 = vmatprep.subr.mxu1 %v8052_v31  ;;  %v8068_v28 = vld [vmem:[#allocation5 + $0x238] sm:$0xff] }
 0x5f8   :  { %2521 = vmatpush1.msra.mxu0 %v7431_v37  ;;  %2592 = vmatpush1.msra.mxu1 %v8056_v4  ;;  %v8072_v37 = vld [vmem:[#allocation5 + $0x230] sm:$0xff] }
 0x5f9   :  { %2522 = vmatprep.subr.mxu0 %v7435_v27  ;;  %2593 = vmatprep.subr.mxu1 %v8060_v29  ;;  %v8076_v27 = vld [vmem:[#allocation5 + $0x1f8] sm:$0xff] }
 0x5fa   :  { %2523 = vmatpush1.msra.mxu0 %v7439_v50  ;;  %2594 = vmatpush1.msra.mxu1 %v8064_v55  ;;  %v8080_v50 = vld [vmem:[#allocation5 + $0x1f0] sm:$0xff] }
 0x5fb   :  { %2524 = vmatprep.subr.mxu0 %v7443_v32  ;;  %2595 = vmatprep.subr.mxu1 %v8068_v28  ;;  %v8084_v32 = vld [vmem:[#allocation5 + $0x1b8] sm:$0xff] }
 0x5fc   :  { %2525 = vmatpush1.msra.mxu0 %v7447_v46  ;;  %2596 = vmatpush1.msra.mxu1 %v8072_v37  ;;  %v8088_v46 = vld [vmem:[#allocation5 + $0x1b0] sm:$0xff] }
 0x5fd   :  { %2526 = vmatprep.subr.mxu0 %v7451_v3  ;;  %2597 = vmatprep.subr.mxu1 %v8076_v27  ;;  %v8092_v3 = vld [vmem:[#allocation5 + $0x178] sm:$0xff] }
 0x5fe   :  { %2527 = vmatpush1.msra.mxu0 %v7455_v63  ;;  %2598 = vmatpush1.msra.mxu1 %v8080_v50  ;;  %v8096_v63 = vld [vmem:[#allocation5 + $0x170] sm:$0xff] }
 0x5ff   :  { %2528 = vmatprep.subr.mxu0 %v7459_v35  ;;  %2599 = vmatprep.subr.mxu1 %v8084_v32  ;;  %v8100_v35 = vld [vmem:[#allocation5 + $0x138] sm:$0xff] }
 0x600   :  { %2529 = vmatpush1.msra.mxu0 %v7463_v0  ;;  %2600 = vmatpush1.msra.mxu1 %v8088_v46  ;;  %v8104_v0 = vld [vmem:[#allocation5 + $0x130] sm:$0xff] }
 0x601   :  { %2530 = vmatprep.subr.mxu0 %v7467_v26  ;;  %2601 = vmatprep.subr.mxu1 %v8092_v3  ;;  %v8108_v26 = vld [vmem:[#allocation5 + $0xf8] sm:$0xff] }
 0x602   :  { %2531 = vmatpush1.msra.mxu0 %v7471_v41  ;;  %2602 = vmatpush1.msra.mxu1 %v8096_v63  ;;  %v8112_v41 = vld [vmem:[#allocation5 + $0xf0] sm:$0xff] }
 0x603   :  { %2532 = vmatprep.subr.mxu0 %v7475_v10  ;;  %2603 = vmatprep.subr.mxu1 %v8100_v35  ;;  %v8116_v10 = vld [vmem:[#allocation5 + $0xb8] sm:$0xff] }
 0x604   :  { %2533 = vmatpush1.msra.mxu0 %v7479_v19  ;;  %2604 = vmatpush1.msra.mxu1 %v8104_v0  ;;  %v8120_v19 = vld [vmem:[#allocation5 + $0xb0] sm:$0xff] }
 0x605   :  { %2534 = vmatprep.subr.mxu0 %v7483_v57  ;;  %2605 = vmatprep.subr.mxu1 %v8108_v26  ;;  %v8124_v57 = vld [vmem:[#allocation5 + $0x78] sm:$0xff] }
 0x606   :  { %2535 = vmatpush1.msra.mxu0 %v7487_v5  ;;  %2606 = vmatpush1.msra.mxu1 %v8112_v41  ;;  %v8128_v5 = vld [vmem:[#allocation5 + $0x70] sm:$0xff] }
 0x607   :  { %2536 = vmatprep.subr.mxu0 %v7491_v24  ;;  %2607 = vmatprep.subr.mxu1 %v8116_v10  ;;  %v8132_v24 = vld [vmem:[#allocation5 + $0x38] sm:$0xff] }
 0x608   :  { %2537 = vmatpush1.msra.mxu0 %v7495_v2  ;;  %2608 = vmatpush1.msra.mxu1 %v8120_v19  ;;  %v8136_v2 = vld [vmem:[#allocation5 + $0x30] sm:$0xff] }
 0x609   :  { %2538 = vmatprep.subr.mxu0 %v7499_v17  ;;  %2609 = vmatprep.subr.mxu1 %v8124_v57  ;;  %v8140_v17 = vld [vmem:[#allocation5 + $0x7f8] sm:$0xff] }
 0x60a   :  { %2539 = vmatpush1.msra.mxu0 %v7503_v13  ;;  %2610 = vmatpush1.msra.mxu1 %v8128_v5  ;;  %v8144_v13 = vld [vmem:[#allocation5 + $0x7f0] sm:$0xff] }
 0x60b   :  { %2540 = vmatprep.subr.mxu0 %v7507_v61  ;;  %2611 = vmatprep.subr.mxu1 %v8132_v24  ;;  %v8148_v61 = vld [vmem:[#allocation5 + $0x7b8] sm:$0xff] }
 0x60c   :  { %2541 = vmatpush1.msra.mxu0 %v7511_v42  ;;  %2612 = vmatpush1.msra.mxu1 %v8136_v2  ;;  %v8152_v42 = vld [vmem:[#allocation5 + $0x7b0] sm:$0xff] }
 0x60d   :  { %2542 = vmatprep.subr.mxu0 %v7515_v59  ;;  %2613 = vmatprep.subr.mxu1 %v8140_v17  ;;  %v8156_v59 = vld [vmem:[#allocation5 + $0x778] sm:$0xff] }
 0x60e   :  { %2543 = vmatpush2.msra.mxu0 %v7519_v62  ;;  %2614 = vmatpush2.msra.mxu1 %v8144_v13  ;;  %v8160_v62 = vld [vmem:[#allocation5 + $0x770] sm:$0xff] }
 0x60f   :  { %2544 = vmatprep.subr.mxu0 %v7523_v40  ;;  %2615 = vmatprep.subr.mxu1 %v8148_v61  ;;  %v8164_v40 = vld [vmem:[#allocation5 + $0x738] sm:$0xff] }
 0x610   :  { %2545 = vmatpush2.msra.mxu0 %v7527_v15  ;;  %2616 = vmatpush2.msra.mxu1 %v8152_v42  ;;  %v8168_v15 = vld [vmem:[#allocation5 + $0x730] sm:$0xff] }
 0x611   :  { %2546 = vmatprep.subr.mxu0 %v7531_v36  ;;  %2617 = vmatprep.subr.mxu1 %v8156_v59  ;;  %v8172_v36 = vld [vmem:[#allocation5 + $0x6f8] sm:$0xff] }
 0x612   :  { %2547 = vmatpush2.msra.mxu0 %v7535_v49  ;;  %2618 = vmatpush2.msra.mxu1 %v8160_v62  ;;  %v8176_v49 = vld [vmem:[#allocation5 + $0x6f0] sm:$0xff] }
 0x613   :  { %2548 = vmatprep.subr.mxu0 %v7539_v30  ;;  %2619 = vmatprep.subr.mxu1 %v8164_v40  ;;  %v8180_v30 = vld [vmem:[#allocation5 + $0x6b8] sm:$0xff] }
 0x614   :  { %2549 = vmatpush2.msra.mxu0 %v7543_v22  ;;  %2620 = vmatpush2.msra.mxu1 %v8168_v15  ;;  %v10959_v22 = vld [vmem:[#allocation70_spill] sm:$0xff] }
 0x615   :  { %2550 = vmatprep.subr.mxu0 %v7547_v53  ;;  %2621 = vmatprep.subr.mxu1 %v8172_v36  ;;  %v10961_v53 = vld [vmem:[#allocation73_spill] sm:$0xff] }
 0x616   :  { %2551 = vmatpush2.msra.mxu0 %v7551_v14  ;;  %2622 = vmatpush2.msra.mxu1 %v8176_v49  ;;  %v10963_v14 = vld [vmem:[#allocation74_spill] sm:$0xff] }
 0x617   :  { %2552 = vmatprep.subr.mxu0 %v7555_v7  ;;  %2623 = vmatprep.subr.mxu1 %v8180_v30  ;;  %v10965_v7 = vld [vmem:[#allocation75_spill] sm:$0xff] }
 0x618   :  { %2553 = vmatpush2.msra.mxu0 %v10959_v22  ;;  %2624 = vmatpush2.msra.mxu1 %v8184_v11  ;;  %v10977_v22 = vld [vmem:[#allocation85_spill] sm:$0xff] }
 0x619   :  { %2554 = vmatprep.subr.mxu0 %v10961_v53  ;;  %2625 = vmatprep.subr.mxu1 %v8188_v47  ;;  %v8220_v53 = vld [vmem:[#allocation5 + $0x578] sm:$0xff] }
 0x61a   :  { %2555 = vmatpush2.msra.mxu0 %v10963_v14  ;;  %2626 = vmatpush2.msra.mxu1 %v8192_v34  ;;  %10978 = vst [vmem:[#allocation137_spill] sm:$0xff] %v8220_v53  ;;  %v10979_v14 = vld [vmem:[#allocation88_spill] sm:$0xff] }
 0x61b   :  { %2556 = vmatprep.subr.mxu0 %v10965_v7  ;;  %2627 = vmatprep.subr.mxu1 %v8196_v1  ;;  %v8224_v7 = vld [vmem:[#allocation5 + $0x570] sm:$0xff] }
 0x61c   :  { %2557 = vmatpush2.msra.mxu0 %v10967_v20  ;;  %2628 = vmatpush2.msra.mxu1 %v8200_v18  ;;  %10980 = vst [vmem:[#allocation90_spill] sm:$0xff] %v8224_v7  ;;  %v10981_v20 = vld [vmem:[#allocation89_spill] sm:$0xff] }
 0x61d   :  { %2558 = vmatprep.subr.mxu0 %v10969_v45  ;;  %2629 = vmatprep.subr.mxu1 %v8204_v51  ;;  %v8228_v45 = vld [vmem:[#allocation5 + $0x538] sm:$0xff] }
 0x61e   :  { %2559 = vmatpush2.msra.mxu0 %v10971_v44  ;;  %2630 = vmatpush2.msra.mxu1 %v8208_v6  ;;  %10982 = vst [vmem:[#allocation138_spill] sm:$0xff] %v8228_v45  ;;  %v10983_v44 = vld [vmem:[#allocation94_spill] sm:$0xff] }
 0x61f   :  { %2560 = vmatprep.subr.mxu0 %v10973_v21  ;;  %2631 = vmatprep.subr.mxu1 %v8212_v12  ;;  %v8232_v21 = vld [vmem:[#allocation5 + $0x530] sm:$0xff] }
 0x620   :  { %2561 = vmatpush2.msra.mxu0 %v10975_v39  ;;  %2632 = vmatpush2.msra.mxu1 %v8216_v56  ;;  %10984 = vst [vmem:[#allocation87_spill] sm:$0xff] %v8232_v21  ;;  %v10985_v39 = vld [vmem:[#allocation97_spill] sm:$0xff]  ;;  %v11133_v12 = vld [vmem:[#allocation104_spill] sm:$0xff] }
 0x621   :  { %2562 = vmatprep.subr.mxu0 %v10977_v22  ;;  %2633 = vmatprep.subr.mxu1 %v8220_v53  ;;  %v8236_v22 = vld [vmem:[#allocation5 + $0x4f8] sm:$0xff] }
 0x622   :  { %2563 = vmatpush2.msra.mxu0 %v10979_v14  ;;  %2634 = vmatpush2.msra.mxu1 %v8224_v7  ;;  %10986 = vst [vmem:[#allocation12_spill] sm:$0xff] %v8236_v22  ;;  %v10987_v14 = vld [vmem:[#allocation101_spill] sm:$0xff]  ;;  %v11025_v7 = vld [vmem:[#allocation158_spill] sm:$0xff] }
 0x623   :  { %2564 = vmatprep.subr.mxu0 %v10981_v20  ;;  %2635 = vmatprep.subr.mxu1 %v8228_v45  ;;  %v10989_v20 = vld [vmem:[#allocation103_spill] sm:$0xff]  ;;  %v8244_v45 = vld [vmem:[#allocation5 + $0x4b8] sm:$0xff] }
 0x624   :  { %2565 = vmatpush2.msra.mxu0 %v10983_v44  ;;  %2636 = vmatpush2.msra.mxu1 %v8232_v21  ;;  %10990 = vst [vmem:[#allocation13_spill] sm:$0xff] %v8244_v45  ;;  %v10991_v44 = vld [vmem:[#allocation108_spill] sm:$0xff]  ;;  %v11028_v53 = vld [vmem:[#allocation161_spill] sm:$0xff] }
 0x625   :  { %2566 = vmatprep.subr.mxu0 %v10985_v39  ;;  %2637 = vmatprep.subr.mxu1 %v8236_v22  ;;  %v8248_v21 = vld [vmem:[#allocation5 + $0x4b0] sm:$0xff]  ;;  %v10993_v39 = vld [vmem:[#allocation117_spill] sm:$0xff] }
 0x626   :  { %2567 = vmatpush2.msra.mxu0 %v10987_v14  ;;  %2638 = vmatpush2.msra.mxu1 %v8240_v58  ;;  %10992 = vst [vmem:[#allocation70_spill] sm:$0xff] %v8248_v21  ;;  %v8252_v22 = vld [vmem:[#allocation5 + $0x478] sm:$0xff]  ;;  %v10995_v14 = vld [vmem:[#allocation118_spill] sm:$0xff]  ;;  %v8256_v58 = vld [vmem:[#allocation5 + $0x470] sm:$0xff] }
 0x627   :  { %2568 = vmatprep.subr.mxu0 %v10989_v20  ;;  %2639 = vmatprep.subr.mxu1 %v8244_v45  ;;  %10994 = vst [vmem:[#allocation73_spill] sm:$0xff] %v8252_v22  ;;  %10996 = vst [vmem:[#allocation74_spill] sm:$0xff] %v8256_v58  ;;  %v10997_v20 = vld [vmem:[#allocation120_spill] sm:$0xff]  ;;  %v8260_v45 = vld [vmem:[#allocation5 + $0x438] sm:$0xff] }
 0x628   :  { %2569 = vmatpush2.msra.mxu0 %v10991_v44  ;;  %2640 = vmatpush2.msra.mxu1 %v8248_v21  ;;  %10998 = vst [vmem:[#allocation75_spill] sm:$0xff] %v8260_v45  ;;  %v10999_v44 = vld [vmem:[#allocation122_spill] sm:$0xff]  ;;  %v8264_v21 = vld [vmem:[#allocation5 + $0x430] sm:$0xff] }
 0x629   :  { %2570 = vmatprep.subr.mxu0 %v10993_v39  ;;  %2641 = vmatprep.subr.mxu1 %v8252_v22  ;;  %11000 = vst [vmem:[#allocation76_spill] sm:$0xff] %v8264_v21  ;;  %v11001_v39 = vld [vmem:[#allocation125_spill] sm:$0xff]  ;;  %v11022_v22 = vld [vmem:[#allocation155_spill] sm:$0xff] }
 0x62a   :  { %2571 = vmatpush2.msra.mxu0 %v10995_v14  ;;  %2642 = vmatpush2.msra.mxu1 %v8256_v58  ;;  %v8270_v14 = vld [vmem:[#allocation5 + $0x3d8] sm:$0xff]  ;;  %v8274_v58 = vld [vmem:[#allocation5 + $0x3d0] sm:$0xff] }
 0x62b   :  { %2572 = vmatprep.subr.mxu0 %v10997_v20  ;;  %2643 = vmatprep.subr.mxu1 %v8260_v45  ;;  %11002 = vst [vmem:[#allocation79_spill] sm:$0xff] %v8270_v14  ;;  %v11003_v20 = vld [vmem:[#allocation128_spill] sm:$0xff]  ;;  %11004 = vst [vmem:[#allocation80_spill] sm:$0xff] %v8274_v58  ;;  %v8278_v45 = vld [vmem:[#allocation5 + $0x398] sm:$0xff] }
 0x62c   :  { %2573 = vmatpush2.msra.mxu0 %v10999_v44  ;;  %2644 = vmatpush2.msra.mxu1 %v8264_v21  ;;  %v11005_v44 = vld [vmem:[#allocation129_spill] sm:$0xff]  ;;  %11006 = vst [vmem:[#allocation83_spill] sm:$0xff] %v8278_v45  ;;  %v11007_v21 = vld [vmem:[#allocation130_spill] sm:$0xff] }
 0x62d   :  { %2575 = vmatmul.mubr.f32.vlgmr.msra.gmra.mxu0 %v8007_v25  ;;  %2646 = vmatmul.mubr.f32.vlgmr.msra.gmra.mxu1 %v8007_v25  ;;  %v8282_v25 = vld [vmem:[#allocation5 + $0x390] sm:$0xff] }
 0x62e   :  { %2710 = vmatprep.subr.mxu0 %v11001_v39  ;;  %2781 = vmatprep.subr.mxu1 %v8270_v14  ;;  %11008 = vst [vmem:[#allocation84_spill] sm:$0xff] %v8282_v25  ;;  %v11009_v39 = vld [vmem:[#allocation147_spill] sm:$0xff]  ;;  %v8286_v14 = vld [vmem:[#allocation5 + $0x358] sm:$0xff] }
 0x62f   :  { %2711 = vmatpush1.msra.mxu0 %v11003_v20  ;;  %2782 = vmatpush1.msra.mxu1 %v8274_v58  ;;  %11010 = vst [vmem:[#allocation85_spill] sm:$0xff] %v8286_v14  ;;  %v11011_v20 = vld [vmem:[#allocation148_spill] sm:$0xff] }
 0x630   :  { %2712 = vmatprep.subr.mxu0 %v11005_v44  ;;  %2783 = vmatprep.subr.mxu1 %v8278_v45  ;;  %v8290_v58 = vld [vmem:[#allocation5 + $0x350] sm:$0xff]  ;;  %v11013_v44 = vld [vmem:[#allocation149_spill] sm:$0xff] }
 0x631   :  { %2713 = vmatpush1.msra.mxu0 %v11007_v21  ;;  %2784 = vmatpush1.msra.mxu1 %v8282_v25  ;;  %11012 = vst [vmem:[#allocation88_spill] sm:$0xff] %v8290_v58  ;;  %v8294_v45 = vld [vmem:[#allocation5 + $0x318] sm:$0xff]  ;;  %v11015_v21 = vld [vmem:[#allocation150_spill] sm:$0xff]  ;;  %v8298_v25 = vld [vmem:[#allocation5 + $0x310] sm:$0xff] }
 0x632   :  { %2714 = vmatprep.subr.mxu0 %v11009_v39  ;;  %2785 = vmatprep.subr.mxu1 %v8286_v14  ;;  %11014 = vst [vmem:[#allocation89_spill] sm:$0xff] %v8294_v45  ;;  %11016 = vst [vmem:[#allocation94_spill] sm:$0xff] %v8298_v25  ;;  %v11017_v39 = vld [vmem:[#allocation151_spill] sm:$0xff]  ;;  %v8302_v14 = vld [vmem:[#allocation5 + $0x2d8] sm:$0xff] }
 0x633   :  { %2715 = vmatpush1.msra.mxu0 %v11011_v20  ;;  %2786 = vmatpush1.msra.mxu1 %v8290_v58  ;;  %11018 = vst [vmem:[#allocation97_spill] sm:$0xff] %v8302_v14  ;;  %v11019_v20 = vld [vmem:[#allocation152_spill] sm:$0xff]  ;;  %v11020_v58 = vld [vmem:[#allocation153_spill] sm:$0xff] }
 0x634   :  { %2716 = vmatprep.subr.mxu0 %v11013_v44  ;;  %2787 = vmatprep.subr.mxu1 %v8294_v45  ;;  %v11021_v44 = vld [vmem:[#allocation154_spill] sm:$0xff]  ;;  %v11023_v45 = vld [vmem:[#allocation156_spill] sm:$0xff] }
 0x635   :  { %2717 = vmatpush1.msra.mxu0 %v11015_v21  ;;  %2788 = vmatpush1.msra.mxu1 %v8298_v25  ;;  %v11024_v21 = vld [vmem:[#allocation157_spill] sm:$0xff]  ;;  %v11026_v25 = vld [vmem:[#allocation159_spill] sm:$0xff] }
 0x636   :  { %2718 = vmatprep.subr.mxu0 %v11017_v39  ;;  %2789 = vmatprep.subr.mxu1 %v8302_v14  ;;  %v11027_v39 = vld [vmem:[#allocation160_spill] sm:$0xff]  ;;  %v11029_v14 = vld [vmem:[#allocation162_spill] sm:$0xff] }
 0x637   :  { %2719 = vmatpush1.msra.mxu0 %v11019_v20  ;;  %2790 = vmatpush1.msra.mxu1 %v11020_v58  ;;  %v11030_v20 = vld [vmem:[#allocation163_spill] sm:$0xff]  ;;  %v11031_v58 = vld [vmem:[#allocation164_spill] sm:$0xff] }
 0x638   :  { %2720 = vmatprep.subr.mxu0 %v11021_v44  ;;  %2791 = vmatprep.subr.mxu1 %v11022_v22  ;;  %v11032_v44 = vld [vmem:[#allocation165_spill] sm:$0xff]  ;;  %v11033_v22 = vld [vmem:[#allocation166_spill] sm:$0xff] }
 0x639   :  { %2721 = vmatpush1.msra.mxu0 %v11023_v45  ;;  %2792 = vmatpush1.msra.mxu1 %v11024_v21  ;;  %v11034_v45 = vld [vmem:[#allocation167_spill] sm:$0xff]  ;;  %v11035_v21 = vld [vmem:[#allocation168_spill] sm:$0xff] }
 0x63a   :  { %2722 = vmatprep.subr.mxu0 %v11025_v7  ;;  %2793 = vmatprep.subr.mxu1 %v11026_v25  ;;  %v11036_v7 = vld [vmem:[#allocation169_spill] sm:$0xff]  ;;  %v11037_v25 = vld [vmem:[#allocation170_spill] sm:$0xff] }
 0x63b   :  { %2723 = vmatpush1.msra.mxu0 %v11027_v39  ;;  %2794 = vmatpush1.msra.mxu1 %v11028_v53  ;;  %v11038_v39 = vld [vmem:[#allocation171_spill] sm:$0xff]  ;;  %v11039_v53 = vld [vmem:[#allocation172_spill] sm:$0xff] }
 0x63c   :  { %2724 = vmatprep.subr.mxu0 %v11029_v14  ;;  %2795 = vmatprep.subr.mxu1 %v11030_v20  ;;  %v11040_v14 = vld [vmem:[#allocation173_spill] sm:$0xff]  ;;  %v11041_v20 = vld [vmem:[#allocation174_spill] sm:$0xff] }
 0x63d   :  { %2725 = vmatpush1.msra.mxu0 %v11031_v58  ;;  %2796 = vmatpush1.msra.mxu1 %v11032_v44  ;;  %v11042_v58 = vld [vmem:[#allocation175_spill] sm:$0xff]  ;;  %v11043_v44 = vld [vmem:[#allocation176_spill] sm:$0xff] }
 0x63e   :  { %2726 = vmatprep.subr.mxu0 %v11033_v22  ;;  %2797 = vmatprep.subr.mxu1 %v11034_v45  ;;  %v11044_v22 = vld [vmem:[#allocation177_spill] sm:$0xff]  ;;  %v11045_v45 = vld [vmem:[#allocation178_spill] sm:$0xff] }
 0x63f   :  { %2727 = vmatpush1.msra.mxu0 %v11035_v21  ;;  %2798 = vmatpush1.msra.mxu1 %v11036_v7  ;;  %v11046_v21 = vld [vmem:[#allocation179_spill] sm:$0xff]  ;;  %v11047_v7 = vld [vmem:[#allocation180_spill] sm:$0xff] }
 0x640   :  { %2728 = vmatprep.subr.mxu0 %v11037_v25  ;;  %2799 = vmatprep.subr.mxu1 %v11038_v39  ;;  %v11048_v25 = vld [vmem:[#allocation181_spill] sm:$0xff]  ;;  %v11049_v39 = vld [vmem:[#allocation182_spill] sm:$0xff] }
 0x641   :  { %2729 = vmatpush1.msra.mxu0 %v11039_v53  ;;  %2800 = vmatpush1.msra.mxu1 %v11040_v14  ;;  %v11050_v53 = vld [vmem:[#allocation183_spill] sm:$0xff]  ;;  %v11051_v14 = vld [vmem:[#allocation184_spill] sm:$0xff] }
 0x642   :  { %2730 = vmatprep.subr.mxu0 %v11041_v20  ;;  %2801 = vmatprep.subr.mxu1 %v11042_v58  ;;  %v11052_v20 = vld [vmem:[#allocation185_spill] sm:$0xff]  ;;  %v11053_v58 = vld [vmem:[#allocation186_spill] sm:$0xff] }
 0x643   :  { %2731 = vmatpush1.msra.mxu0 %v11043_v44  ;;  %2802 = vmatpush1.msra.mxu1 %v11044_v22  ;;  %v11054_v44 = vld [vmem:[#allocation187_spill] sm:$0xff]  ;;  %v11055_v22 = vld [vmem:[#allocation188_spill] sm:$0xff] }
 0x644   :  { %2732 = vmatprep.subr.mxu0 %v11045_v45  ;;  %2803 = vmatprep.subr.mxu1 %v11046_v21  ;;  %v11056_v45 = vld [vmem:[#allocation189_spill] sm:$0xff]  ;;  %v11057_v21 = vld [vmem:[#allocation190_spill] sm:$0xff] }
 0x645   :  { %2733 = vmatpush1.msra.mxu0 %v11047_v7  ;;  %2804 = vmatpush1.msra.mxu1 %v11048_v25  ;;  %v11058_v7 = vld [vmem:[#allocation191_spill] sm:$0xff]  ;;  %v11059_v25 = vld [vmem:[#allocation192_spill] sm:$0xff] }
 0x646   :  { %2734 = vmatprep.subr.mxu0 %v11049_v39  ;;  %2805 = vmatprep.subr.mxu1 %v11050_v53  ;;  %v11060_v39 = vld [vmem:[#allocation193_spill] sm:$0xff]  ;;  %v11061_v53 = vld [vmem:[#allocation92_spill] sm:$0xff] }
 0x647   :  { %2735 = vmatpush1.msra.mxu0 %v11051_v14  ;;  %2806 = vmatpush1.msra.mxu1 %v11052_v20  ;;  %v11062_v14 = vld [vmem:[#allocation93_spill] sm:$0xff]  ;;  %v11063_v20 = vld [vmem:[#allocation95_spill] sm:$0xff] }
 0x648   :  { %2736 = vmatprep.subr.mxu0 %v11053_v58  ;;  %2807 = vmatprep.subr.mxu1 %v11054_v44  ;;  %v11064_v58 = vld [vmem:[#allocation96_spill] sm:$0xff] }
 0x649   :  { %2737 = vmatpush1.msra.mxu0 %v11055_v22  ;;  %2808 = vmatpush1.msra.mxu1 %v11056_v45  ;;  %v11065_v44 = vld [vmem:[#allocation100_spill] sm:$0xff]  ;;  %v11066_v22 = vld [vmem:[#allocation102_spill] sm:$0xff] }
 0x64a   :  { %2738 = vmatprep.subr.mxu0 %v11057_v21  ;;  %2809 = vmatprep.subr.mxu1 %v11058_v7  ;;  %v11067_v45 = vld [vmem:[#allocation106_spill] sm:$0xff]  ;;  %v11068_v21 = vld [vmem:[#allocation107_spill] sm:$0xff]  ;;  %v11069_v7 = vld [vmem:[#allocation109_spill] sm:$0xff] }
 0x64b   :  { %2739 = vmatpush1.msra.mxu0 %v11059_v25  ;;  %2810 = vmatpush1.msra.mxu1 %v11060_v39  ;;  %v11070_v25 = vld [vmem:[#allocation110_spill] sm:$0xff]  ;;  %v11071_v39 = vld [vmem:[#allocation113_spill] sm:$0xff] }
 0x64c   :  { %2740 = vmatprep.subr.mxu0 %v11061_v53  ;;  %2811 = vmatprep.subr.mxu1 %v11062_v14  ;;  %v11072_v53 = vld [vmem:[#allocation114_spill] sm:$0xff]  ;;  %v11073_v14 = vld [vmem:[#allocation119_spill] sm:$0xff] }
 0x64d   :  { %2741 = vmatpush1.msra.mxu0 %v11063_v20  ;;  %2812 = vmatpush1.msra.mxu1 %v11064_v58  ;;  %v11074_v20 = vld [vmem:[#allocation121_spill] sm:$0xff] }
 0x64e   :  { %2742 = vmatprep.subr.mxu0 %v11065_v44  ;;  %2813 = vmatprep.subr.mxu1 %v11066_v22  ;;  %v11075_v58 = vld [vmem:[#allocation77_spill] sm:$0xff]  ;;  %v11076_v44 = vld [vmem:[#allocation135_spill] sm:$0xff] }
 0x64f   :  { %2743 = vmatpush2.msra.mxu0 %v11067_v45  ;;  %2814 = vmatpush2.msra.mxu1 %v11068_v21  ;;  %v11077_v22 = vld [vmem:[#allocation81_spill] sm:$0xff]  ;;  %v11078_v45 = vld [vmem:[#allocation136_spill] sm:$0xff]  ;;  %v11079_v21 = vld [vmem:[#allocation78_spill] sm:$0xff] }
 0x650   :  { %2744 = vmatprep.subr.mxu0 %v11069_v7  ;;  %2815 = vmatprep.subr.mxu1 %v11070_v25  ;;  %v11080_v7 = vld [vmem:[#allocation10_spill] sm:$0xff] }
 0x651   :  { %2745 = vmatpush2.msra.mxu0 %v11071_v39  ;;  %2816 = vmatpush2.msra.mxu1 %v11072_v53  ;;  %v11081_v25 = vld [vmem:[#allocation82_spill] sm:$0xff]  ;;  %v11082_v39 = vld [vmem:[#allocation11_spill] sm:$0xff]  ;;  %v11083_v53 = vld [vmem:[#allocation68_spill] sm:$0xff] }
 0x652   :  { %2746 = vmatprep.subr.mxu0 %v11073_v14  ;;  %2817 = vmatprep.subr.mxu1 %v11074_v20  ;;  %v11084_v14 = vld [vmem:[#allocation72_spill] sm:$0xff] }
 0x653   :  { %2747 = vmatpush2.msra.mxu0 %v11075_v58  ;;  %2818 = vmatpush2.msra.mxu1 %v11076_v44  ;;  %v11085_v20 = vld [vmem:[#allocation60_spill] sm:$0xff]  ;;  %v11087_v44 = vld [vmem:[#allocation22_spill] sm:$0xff] }
 0x654   :  { %2748 = vmatprep.subr.mxu0 %v11077_v22  ;;  %2819 = vmatprep.subr.mxu1 %v11078_v45  ;;  %v11086_v58 = vld [vmem:[#allocation56_spill] sm:$0xff]  ;;  %v11088_v22 = vld [vmem:[#allocation23_spill] sm:$0xff] }
 0x655   :  { %2749 = vmatpush2.msra.mxu0 %v11079_v21  ;;  %2820 = vmatpush2.msra.mxu1 %v11080_v7  ;;  %v11089_v45 = vld [vmem:[#allocation24_spill] sm:$0xff]  ;;  %v11090_v21 = vld [vmem:[#allocation25_spill] sm:$0xff]  ;;  %v11091_v7 = vld [vmem:[#allocation26_spill] sm:$0xff] }
 0x656   :  { %2750 = vmatprep.subr.mxu0 %v11081_v25  ;;  %2821 = vmatprep.subr.mxu1 %v11082_v39  ;;  %v11092_v25 = vld [vmem:[#allocation27_spill] sm:$0xff]  ;;  %v11093_v39 = vld [vmem:[#allocation28_spill] sm:$0xff] }
 0x657   :  { %2751 = vmatpush2.msra.mxu0 %v11083_v53  ;;  %2822 = vmatpush2.msra.mxu1 %v11084_v14  ;;  %v11094_v53 = vld [vmem:[#allocation29_spill] sm:$0xff]  ;;  %v11095_v14 = vld [vmem:[#allocation30_spill] sm:$0xff] }
 0x658   :  { %2752 = vmatprep.subr.mxu0 %v11085_v20  ;;  %2823 = vmatprep.subr.mxu1 %v11086_v58  ;;  %v11096_v20 = vld [vmem:[#allocation31_spill] sm:$0xff]  ;;  %v11097_v58 = vld [vmem:[#allocation32_spill] sm:$0xff] }
 0x659   :  { %2753 = vmatpush2.msra.mxu0 %v11087_v44  ;;  %2824 = vmatpush2.msra.mxu1 %v11088_v22  ;;  %v11098_v44 = vld [vmem:[#allocation33_spill] sm:$0xff]  ;;  %v11099_v22 = vld [vmem:[#allocation34_spill] sm:$0xff] }
 0x65a   :  { %2754 = vmatprep.subr.mxu0 %v11089_v45  ;;  %2825 = vmatprep.subr.mxu1 %v11090_v21  ;;  %v11100_v45 = vld [vmem:[#allocation35_spill] sm:$0xff]  ;;  %v11101_v21 = vld [vmem:[#allocation36_spill] sm:$0xff] }
 0x65b   :  { %2755 = vmatpush2.msra.mxu0 %v11091_v7  ;;  %2826 = vmatpush2.msra.mxu1 %v11092_v25  ;;  %v11102_v7 = vld [vmem:[#allocation37_spill] sm:$0xff]  ;;  %v8389_v25 = vld [vmem:[#allocation5 + $0x580] sm:$0xff] }
 0x65c   :  { %2756 = vmatprep.subr.mxu0 %v11093_v39  ;;  %2827 = vmatprep.subr.mxu1 %v11094_v53  ;;  %11103 = vst [vmem:[#allocation101_spill] sm:$0xff] %v8389_v25  ;;  %v11104_v39 = vld [vmem:[#allocation38_spill] sm:$0xff]  ;;  %v8393_v53 = vld [vmem:[#allocation5 + $0x548] sm:$0xff] }
 0x65d   :  { %2757 = vmatpush2.msra.mxu0 %v11095_v14  ;;  %2828 = vmatpush2.msra.mxu1 %v11096_v20  ;;  %11105 = vst [vmem:[#allocation103_spill] sm:$0xff] %v8393_v53  ;;  %v11106_v14 = vld [vmem:[#allocation39_spill] sm:$0xff]  ;;  %v8397_v20 = vld [vmem:[#allocation5 + $0x540] sm:$0xff] }
 0x65e   :  { %2758 = vmatprep.subr.mxu0 %v11097_v58  ;;  %2829 = vmatprep.subr.mxu1 %v11098_v44  ;;  %11107 = vst [vmem:[#allocation108_spill] sm:$0xff] %v8397_v20  ;;  %v11108_v58 = vld [vmem:[#allocation40_spill] sm:$0xff]  ;;  %v8401_v44 = vld [vmem:[#allocation5 + $0x508] sm:$0xff] }
 0x65f   :  { %2759 = vmatpush2.msra.mxu0 %v11099_v22  ;;  %2830 = vmatpush2.msra.mxu1 %v11100_v45  ;;  %11109 = vst [vmem:[#allocation117_spill] sm:$0xff] %v8401_v44  ;;  %v11110_v22 = vld [vmem:[#allocation41_spill] sm:$0xff]  ;;  %v8405_v45 = vld [vmem:[#allocation5 + $0x500] sm:$0xff] }
 0x660   :  { %2760 = vmatprep.subr.mxu0 %v11101_v21  ;;  %2831 = vmatprep.subr.mxu1 %v11102_v7  ;;  %11111 = vst [vmem:[#allocation118_spill] sm:$0xff] %v8405_v45  ;;  %v11112_v21 = vld [vmem:[#allocation42_spill] sm:$0xff]  ;;  %v8409_v7 = vld [vmem:[#allocation5 + $0x4c8] sm:$0xff] }
 0x661   :  { %2761 = vmatpush2.msra.mxu0 %v8389_v25  ;;  %2832 = vmatpush2.msra.mxu1 %v11104_v39  ;;  %11113 = vst [vmem:[#allocation120_spill] sm:$0xff] %v8409_v7  ;;  %v11114_v39 = vld [vmem:[#allocation43_spill] sm:$0xff] }
 0x662   :  { %2762 = vmatprep.subr.mxu0 %v8393_v53  ;;  %2833 = vmatprep.subr.mxu1 %v11106_v14  ;;  %v8413_v14 = vld [vmem:[#allocation5 + $0x4c0] sm:$0xff] }
 0x663   :  { %2763 = vmatpush2.msra.mxu0 %v8397_v20  ;;  %2834 = vmatpush2.msra.mxu1 %v11108_v58  ;;  %11115 = vst [vmem:[#allocation122_spill] sm:$0xff] %v8413_v14  ;;  %v11116_v58 = vld [vmem:[#allocation44_spill] sm:$0xff]  ;;  %v11131_v53 = vld [vmem:[#allocation98_spill] sm:$0xff] }
 0x664   :  { %2764 = vmatprep.subr.mxu0 %v8401_v44  ;;  %2835 = vmatprep.subr.mxu1 %v11110_v22  ;;  %v8417_v44 = vld [vmem:[#allocation5 + $0x488] sm:$0xff]  ;;  %v11118_v22 = vld [vmem:[#allocation45_spill] sm:$0xff] }
 0x665   :  { %2765 = vmatpush2.msra.mxu0 %v8405_v45  ;;  %2836 = vmatpush2.msra.mxu1 %v11112_v21  ;;  %11117 = vst [vmem:[#allocation125_spill] sm:$0xff] %v8417_v44  ;;  %v8421_v45 = vld [vmem:[#allocation5 + $0x480] sm:$0xff] }
 0x666   :  { %2766 = vmatprep.subr.mxu0 %v8409_v7  ;;  %2837 = vmatprep.subr.mxu1 %v11114_v39  ;;  %11119 = vst [vmem:[#allocation128_spill] sm:$0xff] %v8421_v45  ;;  %v11120_v21 = vld [vmem:[#allocation46_spill] sm:$0xff]  ;;  %v8425_v7 = vld [vmem:[#allocation5 + $0x448] sm:$0xff] }
 0x667   :  { %2767 = vmatpush2.msra.mxu0 %v8413_v14  ;;  %2838 = vmatpush2.msra.mxu1 %v11116_v58  ;;  %11121 = vst [vmem:[#allocation129_spill] sm:$0xff] %v8425_v7  ;;  %v11122_v39 = vld [vmem:[#allocation47_spill] sm:$0xff]  ;;  %v8429_v14 = vld [vmem:[#allocation5 + $0x440] sm:$0xff]  ;;  %v11124_v58 = vld [vmem:[#allocation48_spill] sm:$0xff] }
 0x668   :  { %2768 = vmatprep.subr.mxu0 %v8417_v44  ;;  %2839 = vmatprep.subr.mxu1 %v11118_v22  ;;  %11123 = vst [vmem:[#allocation130_spill] sm:$0xff] %v8429_v14  ;;  %v8433_v44 = vld [vmem:[#allocation5 + $0x408] sm:$0xff]  ;;  %v11126_v22 = vld [vmem:[#allocation49_spill] sm:$0xff] }
 0x669   :  { %2769 = vmatpush2.msra.mxu0 %v8421_v45  ;;  %2840 = vmatpush2.msra.mxu1 %v11120_v21  ;;  %11125 = vst [vmem:[#allocation147_spill] sm:$0xff] %v8433_v44  ;;  %v8437_v45 = vld [vmem:[#allocation5 + $0x400] sm:$0xff] }
 0x66a   :  { %2770 = vmatprep.subr.mxu0 %v8425_v7  ;;  %2841 = vmatprep.subr.mxu1 %v11122_v39  ;;  %11127 = vst [vmem:[#allocation148_spill] sm:$0xff] %v8437_v45  ;;  %v11128_v21 = vld [vmem:[#allocation50_spill] sm:$0xff]  ;;  %v8441_v7 = vld [vmem:[#allocation5 + $0x3e8] sm:$0xff] }
 0x66b   :  { %2771 = vmatpush2.msra.mxu0 %v8429_v14  ;;  %2842 = vmatpush2.msra.mxu1 %v11124_v58  ;;  %11129 = vst [vmem:[#allocation149_spill] sm:$0xff] %v8441_v7  ;;  %v11130_v39 = vld [vmem:[#allocation51_spill] sm:$0xff] }
 0x66c   :  { %2772 = vmatprep.subr.mxu0 %v8433_v44  ;;  %2843 = vmatprep.subr.mxu1 %v11126_v22  ;;  %v11132_v44 = vld [vmem:[#allocation139_spill] sm:$0xff] }
 0x66d   :  { %2773 = vmatpush2.msra.mxu0 %v8437_v45  ;;  %2844 = vmatpush2.msra.mxu1 %v11128_v21  ;;  %v11134_v45 = vld [vmem:[#allocation140_spill] sm:$0xff] }
 0x66e   :  { %2852 = vmatprep.subr.mxu0 %v8441_v7  ;;  %2923 = vmatprep.subr.mxu1 %v11130_v39 }
 0x6ac   :  { %v2434_v14 = vpop.f32.mrf.mxu0  ;;  %v2505_v58 = vpop.f32.mrf.mxu1 }
 0x6ad   :  { %v2652_v25 = vadd.f32 %v2434_v14, %v11131_v53  ;;  %v2654_v56 = vadd.f32 %v2505_v58, %v11132_v44 }
 0x6ae   :  { %v2436_v20 = vpop.f32.mrf.mxu0  ;;  %v2507_v22 = vpop.f32.mrf.mxu1 }
 0x6af   :  { %v2653_v6 = vadd.f32 %v2436_v20, %v11133_v12  ;;  %v3974_v51 = vmul.f32 -1.442695, %v2652_v25  ;;  %v2655_v18 = vadd.f32 %v2507_v22, %v11134_v45  ;;  %v3976_v21 = vmul.f32 -1.442695, %v2654_v56  ;;  %v11135_v20 = vld [vmem:[#allocation99_spill] sm:$0xff]  ;;  %v11137_v45 = vld [vmem:[#allocation105_spill] sm:$0xff] }
 0x6b1   :  { %v3975_v1 = vmul.f32 -1.442695, %v2653_v6  ;;  %4195 = vpow2.f32 %v3974_v51  ;;  %v3977_v34 = vmul.f32 -1.442695, %v2655_v18  ;;  %v11136_v6 = vld [vmem:[#allocation14_spill] sm:$0xff] }
 0x6b2   :  { %4197 = vpow2.f32 %v3976_v21  ;;  %v11138_v21 = vld [vmem:[#allocation15_spill] sm:$0xff] }
 0x6b3   :  { %4199 = vpow2.f32 %v3975_v1 }
 0x6b4   :  { %4201 = vpow2.f32 %v3977_v34 }
 0x6be   :  { %v4196_v39 = vpop.eup %4195 }
 0x6bf   :  { %v4198_v7 = vpop.eup %4197  ;;  %v2678_v11 = vadd.f32 1.0, %v4196_v39 }
 0x6c0   :  { %v4200_v47 = vpop.eup %4199  ;;  %v2680_v14 = vadd.f32 1.0, %v4198_v7 }
 0x6c1   :  { %v4202_v53 = vpop.eup %4201  ;;  %v2679_v44 = vadd.f32 1.0, %v4200_v47  ;;  %4203 = vrcp.f32 %v2678_v11 }
 0x6c2   :  { %v2681_v58 = vadd.f32 1.0, %v4202_v53  ;;  %4205 = vrcp.f32 %v2680_v14 }
 0x6c3   :  { %4207 = vrcp.f32 %v2679_v44 }
 0x6ce   :  { %v4204_v47 = vpop.eup %4203 }
 0x6cf   :  { %v4206_v7 = vpop.eup %4205 }
 0x6d0   :  { %v4208_v53 = vpop.eup %4207  ;;  %v2698_v44 = vmul.f32 %v4206_v7, %v7998_v43  ;;  %v8473_v7 = vld [vmem:[#allocation5 + $0x3a8] sm:$0xff] }
 0x6ed   :  { %v2576_v12 = vpop.f32.mrf.mxu0  ;;  %v2647_v25 = vpop.f32.mrf.mxu1 }
 0x6ee   :  { %v2656_v56 = vadd.f32 %v2576_v12, %v11135_v20  ;;  %v2658_v51 = vadd.f32 %v2647_v25, %v11136_v6 }
 0x6ef   :  { %v2578_v18 = vpop.f32.mrf.mxu0  ;;  %v2649_v1 = vpop.f32.mrf.mxu1 }
 0x6f0   :  { %v3978_v34 = vmul.f32 -1.442695, %v2656_v56  ;;  %4209 = vtanh.f32 %v2658_v51  ;;  %v2657_v22 = vadd.f32 %v2578_v18, %v11137_v45  ;;  %v2659_v39 = vadd.f32 %v2649_v1, %v11138_v21 }
 0x6f1   :  { %4211 = vrcp.f32 %v2681_v58 }
 0x6f2   :  { %4213 = vpow2.f32 %v3978_v34  ;;  %v3979_v11 = vmul.f32 -1.442695, %v2657_v22 }
 0x6f3   :  { %4215 = vtanh.f32 %v2659_v39 }
 0x6f4   :  { %4217 = vpow2.f32 %v3979_v11 }
 0x6fd   :  { %v4210_v14 = vpop.eup %4209 }
 0x6fe   :  { %v4212_v12 = vpop.eup %4211  ;;  %v2700_v25 = vmul.f32 %v4210_v14, %v4204_v47  ;;  %v8483_v14 = vld [vmem:[#allocation5 + $0x368] sm:$0xff] }
 0x6ff   :  { %v4214_v20 = vpop.eup %4213  ;;  %v2699_v58 = vmul.f32 %v4212_v12, %v8002_v48  ;;  %v8469_v48 = vld [vmem:[#allocation5 + $0x3e0] sm:$0xff] }
 0x700   :  { %v4216_v56 = vpop.eup %4215  ;;  %v2682_v6 = vadd.f32 1.0, %v4214_v20  ;;  %v8454_v51 = vadd.f32 %v2700_v25, %v2698_v44  ;;  %v8495_v12 = vld [vmem:[#allocation5 + $0x320] sm:$0xff]  ;;  %v8643_v44 = vld [vmem:[#allocation5 + $0x668] sm:$0xff] }
 0x701   :  { %v4218_v18 = vpop.eup %4217  ;;  %v2701_v1 = vmul.f32 %v4216_v56, %v4208_v53  ;;  %v8479_v53 = vld [vmem:[#allocation5 + $0x3a0] sm:$0xff]  ;;  %11143 = vst [vmem:[#allocation153_spill] sm:$0xff] %v8643_v44  ;;  %v8651_v20 = vld [vmem:[#allocation5 + $0x628] sm:$0xff] }
 0x702   :  { %4219 = vrcp.f32 %v2682_v6  ;;  %v2683_v34 = vadd.f32 1.0, %v4218_v18  ;;  %v8647_v25 = vld [vmem:[#allocation5 + $0x660] sm:$0xff]  ;;  %11147 = vst [vmem:[#allocation155_spill] sm:$0xff] %v8651_v20  ;;  %v11150_v6 = vld [vmem:[#allocation61_spill] sm:$0xff]  ;;  %v8659_v18 = vld [vmem:[#allocation5 + $0x5e8] sm:$0xff] }
 0x703   :  { %4221 = vtanh.f32 %v8454_v51  ;;  %v8458_v45 = vadd.f32 %v2701_v1, %v2699_v58  ;;  %11145 = vst [vmem:[#allocation154_spill] sm:$0xff] %v8647_v25  ;;  %v8655_v56 = vld [vmem:[#allocation5 + $0x620] sm:$0xff]  ;;  %11151 = vst [vmem:[#allocation157_spill] sm:$0xff] %v8659_v18  ;;  %v11152_v58 = vld [vmem:[#allocation63_spill] sm:$0xff] }
 0x704   :  { %4223 = vrcp.f32 %v2683_v34  ;;  %11149 = vst [vmem:[#allocation156_spill] sm:$0xff] %v8655_v56  ;;  %v8663_v1 = vld [vmem:[#allocation5 + $0x5e0] sm:$0xff]  ;;  %v11154_v34 = vld [vmem:[#allocation64_spill] sm:$0xff] }
 0x705   :  { %4225 = vtanh.f32 %v8458_v45  ;;  %11153 = vst [vmem:[#allocation158_spill] sm:$0xff] %v8663_v1 }
 0x70f   :  { %v4220_v43 = vpop.eup %4219 }
 0x710   :  { %v4222_v22 = vpop.eup %4221 }
 0x711   :  { %v4224_v21 = vpop.eup %4223  ;;  %v8463_v47 = vmul.f32 %v4222_v22, %v4220_v43  ;;  %v8667_v43 = vld [vmem:[#allocation5 + $0x5a8] sm:$0xff]  ;;  %v11156_v22 = vld [vmem:[#allocation65_spill] sm:$0xff] }
 0x712   :  { %v4226_v39 = vpop.eup %4225  ;;  %11155 = vst [vmem:[#allocation159_spill] sm:$0xff] %v8667_v43 }
 0x713   :  { %v8461_v11 = vmul.f32 %v4226_v39, %v4224_v21  ;;  %11140 = vst [vmem:[#allocation151_spill] sm:$0xff] %v8463_v47  ;;  %v8671_v21 = vld [vmem:[#allocation5 + $0x5a0] sm:$0xff] }
 0x714   :  { %11157 = vst [vmem:[#allocation160_spill] sm:$0xff] %v8671_v21  ;;  %v11158_v39 = vld [vmem:[#allocation86_spill] sm:$0xff] }
 0x715   :  { %11139 = vst [vmem:[#allocation150_spill] sm:$0xff] %v8461_v11  ;;  %2774 = vmatprep.mubr.f32.mxu0 %v8461_v11  ;;  %2845 = vmatprep.mubr.f32.mxu1 %v8461_v11 }
 0x716   :  { %2775 = vmatmul.mubr.f32.vlgmr.msra.gmra.mxu0 %v8463_v47  ;;  %2846 = vmatmul.mubr.f32.vlgmr.msra.gmra.mxu1 %v8463_v47 }
 0x717   :  { %2853 = vmatpush1.msra.mxu0 %v8469_v48  ;;  %2924 = vmatpush1.msra.mxu1 %v8014_v16  ;;  %v8487_v16 = vld [vmem:[#allocation5 + $0x360] sm:$0xff] }
 0x718   :  { %2854 = vmatprep.subr.mxu0 %v8473_v7  ;;  %2916 = vmatprep.mubr.f32.mxu0 %v8461_v11 }
 0x719   :  { %2925 = vmatprep.subr.mxu1 %v8019_v52  ;;  %2987 = vmatprep.mubr.f32.mxu1 %v8461_v11  ;;  %v8491_v52 = vld [vmem:[#allocation5 + $0x328] sm:$0xff]  ;;  %v8695_v11 = vld [vmem:[#allocation5 + $0x4e0] sm:$0xff] }
 0x71a   :  { %2855 = vmatpush1.msra.mxu0 %v8479_v53  ;;  %2926 = vmatpush1.msra.mxu1 %v8024_v33  ;;  %v8499_v33 = vld [vmem:[#allocation5 + $0x2e8] sm:$0xff]  ;;  %11169 = vst [vmem:[#allocation166_spill] sm:$0xff] %v8695_v11 }
 0x71b   :  { %2856 = vmatprep.subr.mxu0 %v8483_v14  ;;  %2927 = vmatprep.subr.mxu1 %v8028_v23  ;;  %v8503_v23 = vld [vmem:[#allocation5 + $0x2e0] sm:$0xff] }
 0x71c   :  { %2857 = vmatpush1.msra.mxu0 %v8487_v16  ;;  %2928 = vmatpush1.msra.mxu1 %v8032_v38  ;;  %v8507_v38 = vld [vmem:[#allocation5 + $0x2a8] sm:$0xff] }
 0x71d   :  { %2858 = vmatprep.subr.mxu0 %v8491_v52  ;;  %2929 = vmatprep.subr.mxu1 %v8036_v54  ;;  %v8511_v54 = vld [vmem:[#allocation5 + $0x2a0] sm:$0xff] }
 0x71e   :  { %2859 = vmatpush1.msra.mxu0 %v8495_v12  ;;  %2930 = vmatpush1.msra.mxu1 %v8040_v60  ;;  %v8515_v60 = vld [vmem:[#allocation5 + $0x268] sm:$0xff] }
 0x71f   :  { %2860 = vmatprep.subr.mxu0 %v8499_v33  ;;  %2931 = vmatprep.subr.mxu1 %v8044_v8  ;;  %v8519_v8 = vld [vmem:[#allocation5 + $0x260] sm:$0xff] }
 0x720   :  { %2861 = vmatpush1.msra.mxu0 %v8503_v23  ;;  %2932 = vmatpush1.msra.mxu1 %v8048_v9  ;;  %v8523_v9 = vld [vmem:[#allocation5 + $0x228] sm:$0xff] }
 0x721   :  { %2862 = vmatprep.subr.mxu0 %v8507_v38  ;;  %2933 = vmatprep.subr.mxu1 %v8052_v31  ;;  %v8527_v31 = vld [vmem:[#allocation5 + $0x220] sm:$0xff] }
 0x722   :  { %2863 = vmatpush1.msra.mxu0 %v8511_v54  ;;  %2934 = vmatpush1.msra.mxu1 %v8056_v4  ;;  %v8531_v4 = vld [vmem:[#allocation5 + $0x1e8] sm:$0xff] }
 0x723   :  { %2864 = vmatprep.subr.mxu0 %v8515_v60  ;;  %2935 = vmatprep.subr.mxu1 %v8060_v29  ;;  %v8535_v29 = vld [vmem:[#allocation5 + $0x1e0] sm:$0xff] }
 0x724   :  { %2865 = vmatpush1.msra.mxu0 %v8519_v8  ;;  %2936 = vmatpush1.msra.mxu1 %v8064_v55  ;;  %v8539_v55 = vld [vmem:[#allocation5 + $0x1a8] sm:$0xff] }
 0x725   :  { %2866 = vmatprep.subr.mxu0 %v8523_v9  ;;  %2937 = vmatprep.subr.mxu1 %v8068_v28  ;;  %v8543_v28 = vld [vmem:[#allocation5 + $0x1a0] sm:$0xff] }
 0x726   :  { %2867 = vmatpush1.msra.mxu0 %v8527_v31  ;;  %2938 = vmatpush1.msra.mxu1 %v8072_v37  ;;  %v8547_v37 = vld [vmem:[#allocation5 + $0x168] sm:$0xff] }
 0x727   :  { %2868 = vmatprep.subr.mxu0 %v8531_v4  ;;  %2939 = vmatprep.subr.mxu1 %v8076_v27  ;;  %v8551_v27 = vld [vmem:[#allocation5 + $0x160] sm:$0xff] }
 0x728   :  { %2869 = vmatpush1.msra.mxu0 %v8535_v29  ;;  %2940 = vmatpush1.msra.mxu1 %v8080_v50  ;;  %v8555_v50 = vld [vmem:[#allocation5 + $0x128] sm:$0xff] }
 0x729   :  { %2870 = vmatprep.subr.mxu0 %v8539_v55  ;;  %2941 = vmatprep.subr.mxu1 %v8084_v32  ;;  %v8559_v32 = vld [vmem:[#allocation5 + $0x120] sm:$0xff] }
 0x72a   :  { %2871 = vmatpush1.msra.mxu0 %v8543_v28  ;;  %2942 = vmatpush1.msra.mxu1 %v8088_v46  ;;  %v8563_v46 = vld [vmem:[#allocation5 + $0xe8] sm:$0xff] }
 0x72b   :  { %2872 = vmatprep.subr.mxu0 %v8547_v37  ;;  %2943 = vmatprep.subr.mxu1 %v8092_v3  ;;  %v8567_v3 = vld [vmem:[#allocation5 + $0xe0] sm:$0xff] }
 0x72c   :  { %2873 = vmatpush1.msra.mxu0 %v8551_v27  ;;  %2944 = vmatpush1.msra.mxu1 %v8096_v63  ;;  %v8571_v63 = vld [vmem:[#allocation5 + $0xa8] sm:$0xff] }
 0x72d   :  { %2874 = vmatprep.subr.mxu0 %v8555_v50  ;;  %2945 = vmatprep.subr.mxu1 %v8100_v35  ;;  %v8575_v35 = vld [vmem:[#allocation5 + $0xa0] sm:$0xff] }
 0x72e   :  { %2875 = vmatpush1.msra.mxu0 %v8559_v32  ;;  %2946 = vmatpush1.msra.mxu1 %v8104_v0  ;;  %v8579_v0 = vld [vmem:[#allocation5 + $0x68] sm:$0xff] }
 0x72f   :  { %2876 = vmatprep.subr.mxu0 %v8563_v46  ;;  %2947 = vmatprep.subr.mxu1 %v8108_v26  ;;  %v8583_v26 = vld [vmem:[#allocation5 + $0x60] sm:$0xff] }
 0x730   :  { %2877 = vmatpush1.msra.mxu0 %v8567_v3  ;;  %2948 = vmatpush1.msra.mxu1 %v8112_v41  ;;  %v8587_v41 = vld [vmem:[#allocation5 + $0x28] sm:$0xff] }
 0x731   :  { %2878 = vmatprep.subr.mxu0 %v8571_v63  ;;  %2949 = vmatprep.subr.mxu1 %v8116_v10  ;;  %v8591_v10 = vld [vmem:[#allocation5 + $0x20] sm:$0xff] }
 0x732   :  { %2879 = vmatpush1.msra.mxu0 %v8575_v35  ;;  %2950 = vmatpush1.msra.mxu1 %v8120_v19  ;;  %v8595_v19 = vld [vmem:[#allocation5 + $0x7e8] sm:$0xff] }
 0x733   :  { %2880 = vmatprep.subr.mxu0 %v8579_v0  ;;  %2951 = vmatprep.subr.mxu1 %v8124_v57  ;;  %v8599_v57 = vld [vmem:[#allocation5 + $0x7e0] sm:$0xff] }
 0x734   :  { %2881 = vmatpush1.msra.mxu0 %v8583_v26  ;;  %2952 = vmatpush1.msra.mxu1 %v8128_v5  ;;  %v8603_v5 = vld [vmem:[#allocation5 + $0x7a8] sm:$0xff] }
 0x735   :  { %2882 = vmatprep.subr.mxu0 %v8587_v41  ;;  %2953 = vmatprep.subr.mxu1 %v8132_v24  ;;  %v8607_v24 = vld [vmem:[#allocation5 + $0x7a0] sm:$0xff] }
 0x736   :  { %2883 = vmatpush1.msra.mxu0 %v8591_v10  ;;  %2954 = vmatpush1.msra.mxu1 %v8136_v2  ;;  %v8611_v2 = vld [vmem:[#allocation5 + $0x768] sm:$0xff] }
 0x737   :  { %2884 = vmatprep.subr.mxu0 %v8595_v19  ;;  %2955 = vmatprep.subr.mxu1 %v8140_v17  ;;  %v8615_v17 = vld [vmem:[#allocation5 + $0x760] sm:$0xff] }
 0x738   :  { %2885 = vmatpush2.msra.mxu0 %v8599_v57  ;;  %2956 = vmatpush2.msra.mxu1 %v8144_v13  ;;  %v8619_v13 = vld [vmem:[#allocation5 + $0x728] sm:$0xff] }
 0x739   :  { %2886 = vmatprep.subr.mxu0 %v8603_v5  ;;  %2957 = vmatprep.subr.mxu1 %v8148_v61  ;;  %v8623_v61 = vld [vmem:[#allocation5 + $0x720] sm:$0xff] }
 0x73a   :  { %2887 = vmatpush2.msra.mxu0 %v8607_v24  ;;  %2958 = vmatpush2.msra.mxu1 %v8152_v42  ;;  %v8627_v42 = vld [vmem:[#allocation5 + $0x6e8] sm:$0xff] }
 0x73b   :  { %2888 = vmatprep.subr.mxu0 %v8611_v2  ;;  %2959 = vmatprep.subr.mxu1 %v8156_v59  ;;  %v8631_v59 = vld [vmem:[#allocation5 + $0x6e0] sm:$0xff] }
 0x73c   :  { %2889 = vmatpush2.msra.mxu0 %v8615_v17  ;;  %2960 = vmatpush2.msra.mxu1 %v8160_v62  ;;  %v8635_v62 = vld [vmem:[#allocation5 + $0x6a8] sm:$0xff] }
 0x73d   :  { %2890 = vmatprep.subr.mxu0 %v8619_v13  ;;  %2961 = vmatprep.subr.mxu1 %v8164_v40  ;;  %v8639_v40 = vld [vmem:[#allocation5 + $0x6a0] sm:$0xff] }
 0x73e   :  { %2891 = vmatpush2.msra.mxu0 %v8623_v61  ;;  %2962 = vmatpush2.msra.mxu1 %v8168_v15  ;;  %11141 = vst [vmem:[#allocation152_spill] sm:$0xff] %v8639_v40  ;;  %v11142_v15 = vld [vmem:[#allocation54_spill] sm:$0xff] }
 0x73f   :  { %2892 = vmatprep.subr.mxu0 %v8627_v42  ;;  %2963 = vmatprep.subr.mxu1 %v8172_v36  ;;  %v11144_v36 = vld [vmem:[#allocation55_spill] sm:$0xff] }
 0x740   :  { %2893 = vmatpush2.msra.mxu0 %v8631_v59  ;;  %2964 = vmatpush2.msra.mxu1 %v8176_v49  ;;  %v11146_v49 = vld [vmem:[#allocation57_spill] sm:$0xff] }
 0x741   :  { %2894 = vmatprep.subr.mxu0 %v8635_v62  ;;  %2965 = vmatprep.subr.mxu1 %v8180_v30  ;;  %v11148_v30 = vld [vmem:[#allocation59_spill] sm:$0xff] }
 0x742   :  { %2895 = vmatpush2.msra.mxu0 %v8639_v40  ;;  %2966 = vmatpush2.msra.mxu1 %v11142_v15  ;;  %v8675_v15 = vld [vmem:[#allocation5 + $0x568] sm:$0xff] }
 0x743   :  { %2896 = vmatprep.subr.mxu0 %v8643_v44  ;;  %2967 = vmatprep.subr.mxu1 %v11144_v36  ;;  %11159 = vst [vmem:[#allocation161_spill] sm:$0xff] %v8675_v15  ;;  %v11160_v36 = vld [vmem:[#allocation137_spill] sm:$0xff] }
 0x744   :  { %2897 = vmatpush2.msra.mxu0 %v8647_v25  ;;  %2968 = vmatpush2.msra.mxu1 %v11146_v49  ;;  %v8679_v49 = vld [vmem:[#allocation5 + $0x560] sm:$0xff] }
 0x745   :  { %2898 = vmatprep.subr.mxu0 %v8651_v20  ;;  %2969 = vmatprep.subr.mxu1 %v11148_v30  ;;  %11161 = vst [vmem:[#allocation162_spill] sm:$0xff] %v8679_v49  ;;  %v11162_v30 = vld [vmem:[#allocation90_spill] sm:$0xff] }
 0x746   :  { %2899 = vmatpush2.msra.mxu0 %v8655_v56  ;;  %2970 = vmatpush2.msra.mxu1 %v11150_v6  ;;  %v8683_v6 = vld [vmem:[#allocation5 + $0x528] sm:$0xff] }
 0x747   :  { %2900 = vmatprep.subr.mxu0 %v8659_v18  ;;  %2971 = vmatprep.subr.mxu1 %v11152_v58  ;;  %11163 = vst [vmem:[#allocation163_spill] sm:$0xff] %v8683_v6  ;;  %v11164_v58 = vld [vmem:[#allocation138_spill] sm:$0xff] }
 0x748   :  { %2901 = vmatpush2.msra.mxu0 %v8663_v1  ;;  %2972 = vmatpush2.msra.mxu1 %v11154_v34  ;;  %v8687_v34 = vld [vmem:[#allocation5 + $0x520] sm:$0xff] }
 0x749   :  { %2902 = vmatprep.subr.mxu0 %v8667_v43  ;;  %2973 = vmatprep.subr.mxu1 %v11156_v22  ;;  %11165 = vst [vmem:[#allocation164_spill] sm:$0xff] %v8687_v34  ;;  %v11166_v22 = vld [vmem:[#allocation87_spill] sm:$0xff]  ;;  %v11316_v18 = vld [vmem:[#allocation142_spill] sm:$0xff] }
 0x74a   :  { %2903 = vmatpush2.msra.mxu0 %v8671_v21  ;;  %2974 = vmatpush2.msra.mxu1 %v11158_v39  ;;  %v8691_v39 = vld [vmem:[#allocation5 + $0x4e8] sm:$0xff] }
 0x74b   :  { %2904 = vmatprep.subr.mxu0 %v8675_v15  ;;  %2975 = vmatprep.subr.mxu1 %v11160_v36  ;;  %11167 = vst [vmem:[#allocation165_spill] sm:$0xff] %v8691_v39  ;;  %v11168_v36 = vld [vmem:[#allocation12_spill] sm:$0xff]  ;;  %v11314_v15 = vld [vmem:[#allocation141_spill] sm:$0xff]  ;;  %v11315_v43 = vld [vmem:[#allocation115_spill] sm:$0xff] }
 0x74c   :  { %2905 = vmatpush2.msra.mxu0 %v8679_v49  ;;  %2976 = vmatpush2.msra.mxu1 %v11162_v30  ;;  %v11170_v30 = vld [vmem:[#allocation91_spill] sm:$0xff] }
 0x74d   :  { %2906 = vmatprep.subr.mxu0 %v8683_v6  ;;  %2977 = vmatprep.subr.mxu1 %v11164_v58  ;;  %v8699_v6 = vld [vmem:[#allocation5 + $0x4a8] sm:$0xff]  ;;  %v11172_v58 = vld [vmem:[#allocation13_spill] sm:$0xff] }
 0x74e   :  { %2907 = vmatpush2.msra.mxu0 %v8687_v34  ;;  %2978 = vmatpush2.msra.mxu1 %v11166_v22  ;;  %11171 = vst [vmem:[#allocation167_spill] sm:$0xff] %v8699_v6  ;;  %v8703_v34 = vld [vmem:[#allocation5 + $0x4a0] sm:$0xff] }
 0x74f   :  { %2908 = vmatprep.subr.mxu0 %v8691_v39  ;;  %2979 = vmatprep.subr.mxu1 %v11168_v36  ;;  %11173 = vst [vmem:[#allocation168_spill] sm:$0xff] %v8703_v34  ;;  %v11174_v22 = vld [vmem:[#allocation70_spill] sm:$0xff]  ;;  %v8707_v39 = vld [vmem:[#allocation5 + $0x468] sm:$0xff]  ;;  %v11176_v36 = vld [vmem:[#allocation73_spill] sm:$0xff] }
 0x750   :  { %2909 = vmatpush2.msra.mxu0 %v8695_v11  ;;  %2980 = vmatpush2.msra.mxu1 %v11170_v30  ;;  %11175 = vst [vmem:[#allocation169_spill] sm:$0xff] %v8707_v39  ;;  %v8711_v11 = vld [vmem:[#allocation5 + $0x460] sm:$0xff] }
 0x751   :  { %2910 = vmatprep.subr.mxu0 %v8699_v6  ;;  %2981 = vmatprep.subr.mxu1 %v11172_v58  ;;  %11177 = vst [vmem:[#allocation170_spill] sm:$0xff] %v8711_v11  ;;  %v11178_v30 = vld [vmem:[#allocation74_spill] sm:$0xff]  ;;  %v8715_v6 = vld [vmem:[#allocation5 + $0x428] sm:$0xff] }
 0x752   :  { %2911 = vmatpush2.msra.mxu0 %v8703_v34  ;;  %2982 = vmatpush2.msra.mxu1 %v11174_v22  ;;  %11179 = vst [vmem:[#allocation171_spill] sm:$0xff] %v8715_v6  ;;  %v11180_v58 = vld [vmem:[#allocation75_spill] sm:$0xff]  ;;  %v8719_v34 = vld [vmem:[#allocation5 + $0x420] sm:$0xff]  ;;  %v11182_v22 = vld [vmem:[#allocation76_spill] sm:$0xff] }
 0x753   :  { %2912 = vmatprep.subr.mxu0 %v8707_v39  ;;  %2983 = vmatprep.subr.mxu1 %v11176_v36  ;;  %11181 = vst [vmem:[#allocation172_spill] sm:$0xff] %v8719_v34  ;;  %v8725_v36 = vld [vmem:[#allocation5 + $0x3c8] sm:$0xff] }
 0x754   :  { %2913 = vmatpush2.msra.mxu0 %v8711_v11  ;;  %2984 = vmatpush2.msra.mxu1 %v11178_v30  ;;  %11183 = vst [vmem:[#allocation173_spill] sm:$0xff] %v8725_v36  ;;  %v11184_v30 = vld [vmem:[#allocation79_spill] sm:$0xff]  ;;  %v8729_v11 = vld [vmem:[#allocation5 + $0x3c0] sm:$0xff] }
 0x755   :  { %2914 = vmatprep.subr.mxu0 %v8715_v6  ;;  %2985 = vmatprep.subr.mxu1 %v11180_v58  ;;  %11185 = vst [vmem:[#allocation174_spill] sm:$0xff] %v8729_v11  ;;  %v11186_v58 = vld [vmem:[#allocation80_spill] sm:$0xff]  ;;  %v8733_v6 = vld [vmem:[#allocation5 + $0x388] sm:$0xff] }
 0x756   :  { %2915 = vmatpush2.msra.mxu0 %v8719_v34  ;;  %2986 = vmatpush2.msra.mxu1 %v11182_v22  ;;  %11187 = vst [vmem:[#allocation175_spill] sm:$0xff] %v8733_v6  ;;  %v11188_v22 = vld [vmem:[#allocation83_spill] sm:$0xff]  ;;  %v8737_v34 = vld [vmem:[#allocation5 + $0x380] sm:$0xff] }
 0x757   :  { %2917 = vmatmul.mubr.f32.vlgmr.msra.gmra.mxu0 %v8463_v47  ;;  %2988 = vmatmul.mubr.f32.vlgmr.msra.gmra.mxu1 %v8463_v47  ;;  %11189 = vst [vmem:[#allocation176_spill] sm:$0xff] %v8737_v34  ;;  %v11190_v47 = vld [vmem:[#allocation84_spill] sm:$0xff] }
 0x758   :  { %3052 = vmatprep.subr.mxu0 %v8725_v36  ;;  %3123 = vmatprep.subr.mxu1 %v11184_v30  ;;  %v8741_v36 = vld [vmem:[#allocation5 + $0x348] sm:$0xff]  ;;  %v11192_v30 = vld [vmem:[#allocation85_spill] sm:$0xff] }
 0x759   :  { %3053 = vmatpush1.msra.mxu0 %v8729_v11  ;;  %3124 = vmatpush1.msra.mxu1 %v11186_v58  ;;  %11191 = vst [vmem:[#allocation177_spill] sm:$0xff] %v8741_v36  ;;  %v8745_v11 = vld [vmem:[#allocation5 + $0x340] sm:$0xff]  ;;  %v11194_v58 = vld [vmem:[#allocation88_spill] sm:$0xff] }
 0x75a   :  { %3054 = vmatprep.subr.mxu0 %v8733_v6  ;;  %3125 = vmatprep.subr.mxu1 %v11188_v22  ;;  %11193 = vst [vmem:[#allocation178_spill] sm:$0xff] %v8745_v11  ;;  %v8749_v6 = vld [vmem:[#allocation5 + $0x308] sm:$0xff]  ;;  %v11196_v22 = vld [vmem:[#allocation89_spill] sm:$0xff] }
 0x75b   :  { %3055 = vmatpush1.msra.mxu0 %v8737_v34  ;;  %3126 = vmatpush1.msra.mxu1 %v11190_v47  ;;  %11195 = vst [vmem:[#allocation179_spill] sm:$0xff] %v8749_v6  ;;  %v8753_v34 = vld [vmem:[#allocation5 + $0x300] sm:$0xff] }
 0x75c   :  { %3056 = vmatprep.subr.mxu0 %v8741_v36  ;;  %3127 = vmatprep.subr.mxu1 %v11192_v30  ;;  %11197 = vst [vmem:[#allocation180_spill] sm:$0xff] %v8753_v34  ;;  %v11198_v47 = vld [vmem:[#allocation94_spill] sm:$0xff]  ;;  %v8757_v36 = vld [vmem:[#allocation5 + $0x2c8] sm:$0xff]  ;;  %v11200_v30 = vld [vmem:[#allocation97_spill] sm:$0xff] }
 0x75d   :  { %3057 = vmatpush1.msra.mxu0 %v8745_v11  ;;  %3128 = vmatpush1.msra.mxu1 %v11194_v58  ;;  %11199 = vst [vmem:[#allocation181_spill] sm:$0xff] %v8757_v36  ;;  %v8761_v11 = vld [vmem:[#allocation5 + $0x2c0] sm:$0xff]  ;;  %v8764_v58 = vld [vmem:[#allocation5 + $0x2d0] sm:$0xff] }
 0x75e   :  { %3058 = vmatprep.subr.mxu0 %v8749_v6  ;;  %3129 = vmatprep.subr.mxu1 %v11196_v22  ;;  %11201 = vst [vmem:[#allocation182_spill] sm:$0xff] %v8761_v11  ;;  %11202 = vst [vmem:[#allocation183_spill] sm:$0xff] %v8764_v58  ;;  %v8767_v22 = vld [vmem:[#allocation5 + $0x288] sm:$0xff]  ;;  %v9022_v6 = vld [vmem:[#allocation5 + $0x550] sm:$0xff] }
 0x75f   :  { %3059 = vmatpush1.msra.mxu0 %v8753_v34  ;;  %3130 = vmatpush1.msra.mxu1 %v11198_v47  ;;  %11203 = vst [vmem:[#allocation184_spill] sm:$0xff] %v8767_v22  ;;  %v8770_v34 = vld [vmem:[#allocation5 + $0x298] sm:$0xff]  ;;  %v8773_v47 = vld [vmem:[#allocation5 + $0x280] sm:$0xff]  ;;  %11290 = vst [vmem:[#allocation90_spill] sm:$0xff] %v9022_v6 }
 0x760   :  { %3060 = vmatprep.subr.mxu0 %v8757_v36  ;;  %3131 = vmatprep.subr.mxu1 %v11200_v30  ;;  %11204 = vst [vmem:[#allocation185_spill] sm:$0xff] %v8770_v34  ;;  %11205 = vst [vmem:[#allocation186_spill] sm:$0xff] %v8773_v47  ;;  %v8776_v30 = vld [vmem:[#allocation5 + $0x290] sm:$0xff] }
 0x761   :  { %3061 = vmatpush1.msra.mxu0 %v8761_v11  ;;  %3132 = vmatpush1.msra.mxu1 %v8764_v58  ;;  %11206 = vst [vmem:[#allocation187_spill] sm:$0xff] %v8776_v30  ;;  %v8779_v11 = vld [vmem:[#allocation5 + $0x248] sm:$0xff]  ;;  %v8782_v58 = vld [vmem:[#allocation5 + $0x258] sm:$0xff]  ;;  %v9014_v36 = vld [vmem:[#allocation5 + $0x590] sm:$0xff] }
 0x762   :  { %3062 = vmatprep.subr.mxu0 %v8767_v22  ;;  %3133 = vmatprep.subr.mxu1 %v8770_v34  ;;  %11207 = vst [vmem:[#allocation188_spill] sm:$0xff] %v8779_v11  ;;  %11208 = vst [vmem:[#allocation189_spill] sm:$0xff] %v8782_v58  ;;  %v8785_v22 = vld [vmem:[#allocation5 + $0x240] sm:$0xff]  ;;  %v8788_v34 = vld [vmem:[#allocation5 + $0x250] sm:$0xff] }
 0x763   :  { %3063 = vmatpush1.msra.mxu0 %v8773_v47  ;;  %3134 = vmatpush1.msra.mxu1 %v8776_v30  ;;  %11209 = vst [vmem:[#allocation190_spill] sm:$0xff] %v8785_v22  ;;  %11210 = vst [vmem:[#allocation191_spill] sm:$0xff] %v8788_v34  ;;  %v8791_v47 = vld [vmem:[#allocation5 + $0x208] sm:$0xff]  ;;  %v8794_v30 = vld [vmem:[#allocation5 + $0x218] sm:$0xff] }
 0x764   :  { %3064 = vmatprep.subr.mxu0 %v8779_v11  ;;  %3135 = vmatprep.subr.mxu1 %v8782_v58  ;;  %11211 = vst [vmem:[#allocation192_spill] sm:$0xff] %v8791_v47  ;;  %11212 = vst [vmem:[#allocation193_spill] sm:$0xff] %v8794_v30  ;;  %v8797_v11 = vld [vmem:[#allocation5 + $0x200] sm:$0xff]  ;;  %v8800_v58 = vld [vmem:[#allocation5 + $0x210] sm:$0xff] }
 0x765   :  { %3065 = vmatpush1.msra.mxu0 %v8785_v22  ;;  %3136 = vmatpush1.msra.mxu1 %v8788_v34  ;;  %11213 = vst [vmem:[#allocation92_spill] sm:$0xff] %v8797_v11  ;;  %11214 = vst [vmem:[#allocation93_spill] sm:$0xff] %v8800_v58  ;;  %v8803_v22 = vld [vmem:[#allocation5 + $0x1c8] sm:$0xff]  ;;  %v8806_v34 = vld [vmem:[#allocation5 + $0x1d8] sm:$0xff] }
 0x766   :  { %3066 = vmatprep.subr.mxu0 %v8791_v47  ;;  %3137 = vmatprep.subr.mxu1 %v8794_v30  ;;  %11215 = vst [vmem:[#allocation95_spill] sm:$0xff] %v8803_v22  ;;  %11216 = vst [vmem:[#allocation96_spill] sm:$0xff] %v8806_v34  ;;  %v8809_v47 = vld [vmem:[#allocation5 + $0x1c0] sm:$0xff]  ;;  %v8812_v30 = vld [vmem:[#allocation5 + $0x1d0] sm:$0xff] }
 0x767   :  { %3067 = vmatpush1.msra.mxu0 %v8797_v11  ;;  %3138 = vmatpush1.msra.mxu1 %v8800_v58  ;;  %11217 = vst [vmem:[#allocation100_spill] sm:$0xff] %v8809_v47  ;;  %11218 = vst [vmem:[#allocation102_spill] sm:$0xff] %v8812_v30  ;;  %v8815_v11 = vld [vmem:[#allocation5 + $0x188] sm:$0xff]  ;;  %v8818_v58 = vld [vmem:[#allocation5 + $0x198] sm:$0xff] }
 0x768   :  { %3068 = vmatprep.subr.mxu0 %v8803_v22  ;;  %3139 = vmatprep.subr.mxu1 %v8806_v34  ;;  %11219 = vst [vmem:[#allocation106_spill] sm:$0xff] %v8815_v11  ;;  %11220 = vst [vmem:[#allocation107_spill] sm:$0xff] %v8818_v58  ;;  %v8821_v22 = vld [vmem:[#allocation5 + $0x180] sm:$0xff]  ;;  %v8824_v34 = vld [vmem:[#allocation5 + $0x190] sm:$0xff] }
 0x769   :  { %3069 = vmatpush1.msra.mxu0 %v8809_v47  ;;  %3140 = vmatpush1.msra.mxu1 %v8812_v30  ;;  %11221 = vst [vmem:[#allocation109_spill] sm:$0xff] %v8821_v22  ;;  %11222 = vst [vmem:[#allocation110_spill] sm:$0xff] %v8824_v34  ;;  %v8827_v47 = vld [vmem:[#allocation5 + $0x148] sm:$0xff]  ;;  %v8830_v30 = vld [vmem:[#allocation5 + $0x158] sm:$0xff] }
 0x76a   :  { %3070 = vmatprep.subr.mxu0 %v8815_v11  ;;  %3141 = vmatprep.subr.mxu1 %v8818_v58  ;;  %11223 = vst [vmem:[#allocation113_spill] sm:$0xff] %v8827_v47  ;;  %11224 = vst [vmem:[#allocation114_spill] sm:$0xff] %v8830_v30  ;;  %v8833_v11 = vld [vmem:[#allocation5 + $0x140] sm:$0xff]  ;;  %v8836_v58 = vld [vmem:[#allocation5 + $0x150] sm:$0xff] }
 0x76b   :  { %3071 = vmatpush1.msra.mxu0 %v8821_v22  ;;  %3142 = vmatpush1.msra.mxu1 %v8824_v34  ;;  %11225 = vst [vmem:[#allocation119_spill] sm:$0xff] %v8833_v11  ;;  %11226 = vst [vmem:[#allocation121_spill] sm:$0xff] %v8836_v58  ;;  %v8839_v22 = vld [vmem:[#allocation5 + $0x108] sm:$0xff]  ;;  %v8842_v34 = vld [vmem:[#allocation5 + $0x118] sm:$0xff] }
 0x76c   :  { %3072 = vmatprep.subr.mxu0 %v8827_v47  ;;  %3143 = vmatprep.subr.mxu1 %v8830_v30  ;;  %11227 = vst [vmem:[#allocation77_spill] sm:$0xff] %v8839_v22  ;;  %11228 = vst [vmem:[#allocation135_spill] sm:$0xff] %v8842_v34  ;;  %v8845_v47 = vld [vmem:[#allocation5 + $0x100] sm:$0xff]  ;;  %v8848_v30 = vld [vmem:[#allocation5 + $0x110] sm:$0xff] }
 0x76d   :  { %3073 = vmatpush1.msra.mxu0 %v8833_v11  ;;  %3144 = vmatpush1.msra.mxu1 %v8836_v58  ;;  %11229 = vst [vmem:[#allocation81_spill] sm:$0xff] %v8845_v47  ;;  %11230 = vst [vmem:[#allocation136_spill] sm:$0xff] %v8848_v30  ;;  %v8851_v11 = vld [vmem:[#allocation5 + $0xc8] sm:$0xff]  ;;  %v8854_v58 = vld [vmem:[#allocation5 + $0xd8] sm:$0xff] }
 0x76e   :  { %3074 = vmatprep.subr.mxu0 %v8839_v22  ;;  %3145 = vmatprep.subr.mxu1 %v8842_v34  ;;  %11231 = vst [vmem:[#allocation78_spill] sm:$0xff] %v8851_v11  ;;  %11232 = vst [vmem:[#allocation10_spill] sm:$0xff] %v8854_v58  ;;  %v8857_v22 = vld [vmem:[#allocation5 + $0xc0] sm:$0xff]  ;;  %v8860_v34 = vld [vmem:[#allocation5 + $0xd0] sm:$0xff] }
 0x76f   :  { %3075 = vmatpush1.msra.mxu0 %v8845_v47  ;;  %3146 = vmatpush1.msra.mxu1 %v8848_v30  ;;  %11233 = vst [vmem:[#allocation82_spill] sm:$0xff] %v8857_v22  ;;  %11234 = vst [vmem:[#allocation11_spill] sm:$0xff] %v8860_v34  ;;  %v8863_v47 = vld [vmem:[#allocation5 + $0x88] sm:$0xff]  ;;  %v8866_v30 = vld [vmem:[#allocation5 + $0x98] sm:$0xff] }
 0x770   :  { %3076 = vmatprep.subr.mxu0 %v8851_v11  ;;  %3147 = vmatprep.subr.mxu1 %v8854_v58  ;;  %11235 = vst [vmem:[#allocation68_spill] sm:$0xff] %v8863_v47  ;;  %11236 = vst [vmem:[#allocation72_spill] sm:$0xff] %v8866_v30  ;;  %v8869_v11 = vld [vmem:[#allocation5 + $0x80] sm:$0xff]  ;;  %v8872_v58 = vld [vmem:[#allocation5 + $0x90] sm:$0xff] }
 0x771   :  { %3077 = vmatpush1.msra.mxu0 %v8857_v22  ;;  %3148 = vmatpush1.msra.mxu1 %v8860_v34  ;;  %11237 = vst [vmem:[#allocation60_spill] sm:$0xff] %v8869_v11  ;;  %11238 = vst [vmem:[#allocation56_spill] sm:$0xff] %v8872_v58  ;;  %v8875_v22 = vld [vmem:[#allocation5 + $0x48] sm:$0xff]  ;;  %v8878_v34 = vld [vmem:[#allocation5 + $0x58] sm:$0xff] }
 0x772   :  { %3078 = vmatprep.subr.mxu0 %v8863_v47  ;;  %3149 = vmatprep.subr.mxu1 %v8866_v30  ;;  %11239 = vst [vmem:[#allocation22_spill] sm:$0xff] %v8875_v22  ;;  %11240 = vst [vmem:[#allocation23_spill] sm:$0xff] %v8878_v34  ;;  %v8881_v47 = vld [vmem:[#allocation5 + $0x40] sm:$0xff]  ;;  %v8884_v30 = vld [vmem:[#allocation5 + $0x50] sm:$0xff] }
 0x773   :  { %3079 = vmatpush1.msra.mxu0 %v8869_v11  ;;  %3150 = vmatpush1.msra.mxu1 %v8872_v58  ;;  %11241 = vst [vmem:[#allocation24_spill] sm:$0xff] %v8881_v47  ;;  %11242 = vst [vmem:[#allocation25_spill] sm:$0xff] %v8884_v30  ;;  %v8887_v11 = vld [vmem:[#allocation5 + $0x8] sm:$0xff]  ;;  %v8890_v58 = vld [vmem:[#allocation5 + $0x18] sm:$0xff] }
 0x774   :  { %3080 = vmatprep.subr.mxu0 %v8875_v22  ;;  %3151 = vmatprep.subr.mxu1 %v8878_v34  ;;  %11243 = vst [vmem:[#allocation26_spill] sm:$0xff] %v8887_v11  ;;  %11244 = vst [vmem:[#allocation27_spill] sm:$0xff] %v8890_v58  ;;  %v8893_v22 = vld [vmem:[#allocation5] sm:$0xff]  ;;  %v8896_v34 = vld [vmem:[#allocation5 + $0x10] sm:$0xff] }
 0x775   :  { %3081 = vmatpush1.msra.mxu0 %v8881_v47  ;;  %3152 = vmatpush1.msra.mxu1 %v8884_v30  ;;  %11245 = vst [vmem:[#allocation28_spill] sm:$0xff] %v8893_v22  ;;  %11246 = vst [vmem:[#allocation29_spill] sm:$0xff] %v8896_v34  ;;  %v8899_v47 = vld [vmem:[#allocation5 + $0x7c8] sm:$0xff]  ;;  %v8902_v30 = vld [vmem:[#allocation5 + $0x7d8] sm:$0xff] }
 0x776   :  { %3082 = vmatprep.subr.mxu0 %v8887_v11  ;;  %3153 = vmatprep.subr.mxu1 %v8890_v58  ;;  %11247 = vst [vmem:[#allocation30_spill] sm:$0xff] %v8899_v47  ;;  %11248 = vst [vmem:[#allocation31_spill] sm:$0xff] %v8902_v30  ;;  %v8905_v11 = vld [vmem:[#allocation5 + $0x7c0] sm:$0xff]  ;;  %v8908_v58 = vld [vmem:[#allocation5 + $0x7d0] sm:$0xff] }
 0x777   :  { %3083 = vmatpush1.msra.mxu0 %v8893_v22  ;;  %3154 = vmatpush1.msra.mxu1 %v8896_v34  ;;  %11249 = vst [vmem:[#allocation32_spill] sm:$0xff] %v8905_v11  ;;  %11250 = vst [vmem:[#allocation33_spill] sm:$0xff] %v8908_v58  ;;  %v8911_v22 = vld [vmem:[#allocation5 + $0x788] sm:$0xff]  ;;  %v8914_v34 = vld [vmem:[#allocation5 + $0x798] sm:$0xff] }
 0x778   :  { %3084 = vmatprep.subr.mxu0 %v8899_v47  ;;  %3155 = vmatprep.subr.mxu1 %v8902_v30  ;;  %11251 = vst [vmem:[#allocation34_spill] sm:$0xff] %v8911_v22  ;;  %11252 = vst [vmem:[#allocation35_spill] sm:$0xff] %v8914_v34  ;;  %v8917_v47 = vld [vmem:[#allocation5 + $0x780] sm:$0xff]  ;;  %v8920_v30 = vld [vmem:[#allocation5 + $0x790] sm:$0xff] }
 0x779   :  { %3085 = vmatpush2.msra.mxu0 %v8905_v11  ;;  %3156 = vmatpush2.msra.mxu1 %v8908_v58  ;;  %11253 = vst [vmem:[#allocation36_spill] sm:$0xff] %v8917_v47  ;;  %11254 = vst [vmem:[#allocation37_spill] sm:$0xff] %v8920_v30  ;;  %v8923_v11 = vld [vmem:[#allocation5 + $0x748] sm:$0xff]  ;;  %v8926_v58 = vld [vmem:[#allocation5 + $0x758] sm:$0xff] }
 0x77a   :  { %3086 = vmatprep.subr.mxu0 %v8911_v22  ;;  %3157 = vmatprep.subr.mxu1 %v8914_v34  ;;  %11255 = vst [vmem:[#allocation38_spill] sm:$0xff] %v8923_v11  ;;  %11256 = vst [vmem:[#allocation39_spill] sm:$0xff] %v8926_v58  ;;  %v8929_v22 = vld [vmem:[#allocation5 + $0x740] sm:$0xff]  ;;  %v8932_v34 = vld [vmem:[#allocation5 + $0x750] sm:$0xff] }
 0x77b   :  { %3087 = vmatpush2.msra.mxu0 %v8917_v47  ;;  %3158 = vmatpush2.msra.mxu1 %v8920_v30  ;;  %11257 = vst [vmem:[#allocation40_spill] sm:$0xff] %v8929_v22  ;;  %11258 = vst [vmem:[#allocation41_spill] sm:$0xff] %v8932_v34  ;;  %v8935_v47 = vld [vmem:[#allocation5 + $0x708] sm:$0xff]  ;;  %v8938_v30 = vld [vmem:[#allocation5 + $0x718] sm:$0xff] }
 0x77c   :  { %3088 = vmatprep.subr.mxu0 %v8923_v11  ;;  %3159 = vmatprep.subr.mxu1 %v8926_v58  ;;  %11259 = vst [vmem:[#allocation42_spill] sm:$0xff] %v8935_v47  ;;  %11260 = vst [vmem:[#allocation43_spill] sm:$0xff] %v8938_v30  ;;  %v8941_v11 = vld [vmem:[#allocation5 + $0x700] sm:$0xff]  ;;  %v8944_v58 = vld [vmem:[#allocation5 + $0x710] sm:$0xff] }
 0x77d   :  { %3089 = vmatpush2.msra.mxu0 %v8929_v22  ;;  %3160 = vmatpush2.msra.mxu1 %v8932_v34  ;;  %11261 = vst [vmem:[#allocation44_spill] sm:$0xff] %v8941_v11  ;;  %11262 = vst [vmem:[#allocation45_spill] sm:$0xff] %v8944_v58  ;;  %v8947_v22 = vld [vmem:[#allocation5 + $0x6c8] sm:$0xff]  ;;  %v8950_v34 = vld [vmem:[#allocation5 + $0x6d8] sm:$0xff] }
 0x77e   :  { %3090 = vmatprep.subr.mxu0 %v8935_v47  ;;  %3161 = vmatprep.subr.mxu1 %v8938_v30  ;;  %11263 = vst [vmem:[#allocation46_spill] sm:$0xff] %v8947_v22  ;;  %11264 = vst [vmem:[#allocation47_spill] sm:$0xff] %v8950_v34  ;;  %v8953_v47 = vld [vmem:[#allocation5 + $0x6c0] sm:$0xff]  ;;  %v8956_v30 = vld [vmem:[#allocation5 + $0x6d0] sm:$0xff] }
 0x77f   :  { %3091 = vmatpush2.msra.mxu0 %v8941_v11  ;;  %3162 = vmatpush2.msra.mxu1 %v8944_v58  ;;  %11265 = vst [vmem:[#allocation48_spill] sm:$0xff] %v8953_v47  ;;  %11266 = vst [vmem:[#allocation49_spill] sm:$0xff] %v8956_v30  ;;  %v8959_v11 = vld [vmem:[#allocation5 + $0x688] sm:$0xff]  ;;  %v8962_v58 = vld [vmem:[#allocation5 + $0x698] sm:$0xff] }
 0x780   :  { %3092 = vmatprep.subr.mxu0 %v8947_v22  ;;  %3163 = vmatprep.subr.mxu1 %v8950_v34  ;;  %11267 = vst [vmem:[#allocation50_spill] sm:$0xff] %v8959_v11  ;;  %11268 = vst [vmem:[#allocation51_spill] sm:$0xff] %v8962_v58  ;;  %v8965_v22 = vld [vmem:[#allocation5 + $0x680] sm:$0xff]  ;;  %v8968_v34 = vld [vmem:[#allocation5 + $0x690] sm:$0xff] }
 0x781   :  { %3093 = vmatpush2.msra.mxu0 %v8953_v47  ;;  %3164 = vmatpush2.msra.mxu1 %v8956_v30  ;;  %11269 = vst [vmem:[#allocation98_spill] sm:$0xff] %v8965_v22  ;;  %11270 = vst [vmem:[#allocation139_spill] sm:$0xff] %v8968_v34  ;;  %v8971_v47 = vld [vmem:[#allocation5 + $0x648] sm:$0xff]  ;;  %v8974_v30 = vld [vmem:[#allocation5 + $0x658] sm:$0xff] }
 0x782   :  { %3094 = vmatprep.subr.mxu0 %v8959_v11  ;;  %3165 = vmatprep.subr.mxu1 %v8962_v58  ;;  %11271 = vst [vmem:[#allocation104_spill] sm:$0xff] %v8971_v47  ;;  %11272 = vst [vmem:[#allocation140_spill] sm:$0xff] %v8974_v30  ;;  %v8977_v11 = vld [vmem:[#allocation5 + $0x640] sm:$0xff]  ;;  %v8980_v58 = vld [vmem:[#allocation5 + $0x650] sm:$0xff] }
 0x783   :  { %3095 = vmatpush2.msra.mxu0 %v8965_v22  ;;  %3166 = vmatpush2.msra.mxu1 %v8968_v34  ;;  %11273 = vst [vmem:[#allocation99_spill] sm:$0xff] %v8977_v11  ;;  %11274 = vst [vmem:[#allocation14_spill] sm:$0xff] %v8980_v58  ;;  %v8983_v22 = vld [vmem:[#allocation5 + $0x608] sm:$0xff]  ;;  %v8986_v34 = vld [vmem:[#allocation5 + $0x618] sm:$0xff] }
 0x784   :  { %3096 = vmatprep.subr.mxu0 %v8971_v47  ;;  %3167 = vmatprep.subr.mxu1 %v8974_v30  ;;  %11275 = vst [vmem:[#allocation105_spill] sm:$0xff] %v8983_v22  ;;  %11276 = vst [vmem:[#allocation15_spill] sm:$0xff] %v8986_v34  ;;  %v8989_v47 = vld [vmem:[#allocation5 + $0x600] sm:$0xff]  ;;  %v8992_v30 = vld [vmem:[#allocation5 + $0x610] sm:$0xff] }
 0x785   :  { %3097 = vmatpush2.msra.mxu0 %v8977_v11  ;;  %3168 = vmatpush2.msra.mxu1 %v8980_v58  ;;  %11277 = vst [vmem:[#allocation54_spill] sm:$0xff] %v8989_v47  ;;  %11278 = vst [vmem:[#allocation55_spill] sm:$0xff] %v8992_v30  ;;  %v8995_v11 = vld [vmem:[#allocation5 + $0x5c8] sm:$0xff]  ;;  %v8998_v58 = vld [vmem:[#allocation5 + $0x5d8] sm:$0xff] }
 0x786   :  { %3098 = vmatprep.subr.mxu0 %v8983_v22  ;;  %3169 = vmatprep.subr.mxu1 %v8986_v34  ;;  %11279 = vst [vmem:[#allocation57_spill] sm:$0xff] %v8995_v11  ;;  %11280 = vst [vmem:[#allocation59_spill] sm:$0xff] %v8998_v58  ;;  %v9001_v22 = vld [vmem:[#allocation5 + $0x5c0] sm:$0xff]  ;;  %v9004_v34 = vld [vmem:[#allocation5 + $0x5d0] sm:$0xff] }
 0x787   :  { %3099 = vmatpush2.msra.mxu0 %v8989_v47  ;;  %3170 = vmatpush2.msra.mxu1 %v8992_v30  ;;  %11281 = vst [vmem:[#allocation61_spill] sm:$0xff] %v9001_v22  ;;  %11282 = vst [vmem:[#allocation63_spill] sm:$0xff] %v9004_v34  ;;  %v9007_v47 = vld [vmem:[#allocation5 + $0x588] sm:$0xff]  ;;  %v9010_v30 = vld [vmem:[#allocation5 + $0x598] sm:$0xff] }
 0x788   :  { %3100 = vmatprep.subr.mxu0 %v8995_v11  ;;  %3171 = vmatprep.subr.mxu1 %v8998_v58  ;;  %11283 = vst [vmem:[#allocation64_spill] sm:$0xff] %v9007_v47  ;;  %11284 = vst [vmem:[#allocation65_spill] sm:$0xff] %v9010_v30  ;;  %v11285_v11 = vld [vmem:[#allocation101_spill] sm:$0xff]  ;;  %v11287_v58 = vld [vmem:[#allocation103_spill] sm:$0xff] }
 0x789   :  { %3101 = vmatpush2.msra.mxu0 %v9001_v22  ;;  %3172 = vmatpush2.msra.mxu1 %v9004_v34  ;;  %11286 = vst [vmem:[#allocation86_spill] sm:$0xff] %v9014_v36  ;;  %v9018_v22 = vld [vmem:[#allocation5 + $0x558] sm:$0xff]  ;;  %v11289_v34 = vld [vmem:[#allocation108_spill] sm:$0xff] }
 0x78a   :  { %3102 = vmatprep.subr.mxu0 %v9007_v47  ;;  %3173 = vmatprep.subr.mxu1 %v9010_v30  ;;  %11288 = vst [vmem:[#allocation137_spill] sm:$0xff] %v9018_v22  ;;  %v11291_v47 = vld [vmem:[#allocation117_spill] sm:$0xff] }
 0x78b   :  { %3103 = vmatpush2.msra.mxu0 %v11285_v11  ;;  %3174 = vmatpush2.msra.mxu1 %v9014_v36  ;;  %v9026_v30 = vld [vmem:[#allocation5 + $0x518] sm:$0xff]  ;;  %v11293_v11 = vld [vmem:[#allocation118_spill] sm:$0xff]  ;;  %v9030_v36 = vld [vmem:[#allocation5 + $0x510] sm:$0xff] }
 0x78c   :  { %3104 = vmatprep.subr.mxu0 %v11287_v58  ;;  %3175 = vmatprep.subr.mxu1 %v9018_v22  ;;  %11292 = vst [vmem:[#allocation138_spill] sm:$0xff] %v9026_v30  ;;  %11294 = vst [vmem:[#allocation87_spill] sm:$0xff] %v9030_v36  ;;  %v11295_v58 = vld [vmem:[#allocation120_spill] sm:$0xff]  ;;  %v9034_v22 = vld [vmem:[#allocation5 + $0x4d8] sm:$0xff] }
 0x78d   :  { %3105 = vmatpush2.msra.mxu0 %v11289_v34  ;;  %3176 = vmatpush2.msra.mxu1 %v9022_v6  ;;  %11296 = vst [vmem:[#allocation12_spill] sm:$0xff] %v9034_v22  ;;  %v11297_v34 = vld [vmem:[#allocation122_spill] sm:$0xff]  ;;  %v9038_v6 = vld [vmem:[#allocation5 + $0x4d0] sm:$0xff] }
 0x78e   :  { %3106 = vmatprep.subr.mxu0 %v11291_v47  ;;  %3177 = vmatprep.subr.mxu1 %v9026_v30  ;;  %11298 = vst [vmem:[#allocation91_spill] sm:$0xff] %v9038_v6  ;;  %v11299_v47 = vld [vmem:[#allocation125_spill] sm:$0xff] }
 0x78f   :  { %3107 = vmatpush2.msra.mxu0 %v11293_v11  ;;  %3178 = vmatpush2.msra.mxu1 %v9030_v36  ;;  %v9042_v30 = vld [vmem:[#allocation5 + $0x498] sm:$0xff]  ;;  %v11301_v11 = vld [vmem:[#allocation128_spill] sm:$0xff] }
 0x790   :  { %3108 = vmatprep.subr.mxu0 %v11295_v58  ;;  %3179 = vmatprep.subr.mxu1 %v9034_v22  ;;  %11300 = vst [vmem:[#allocation13_spill] sm:$0xff] %v9042_v30  ;;  %v9046_v36 = vld [vmem:[#allocation5 + $0x490] sm:$0xff]  ;;  %v11303_v58 = vld [vmem:[#allocation129_spill] sm:$0xff] }
 0x791   :  { %3109 = vmatpush2.msra.mxu0 %v11297_v34  ;;  %3180 = vmatpush2.msra.mxu1 %v9038_v6  ;;  %11302 = vst [vmem:[#allocation70_spill] sm:$0xff] %v9046_v36  ;;  %v9050_v22 = vld [vmem:[#allocation5 + $0x458] sm:$0xff]  ;;  %v11305_v34 = vld [vmem:[#allocation130_spill] sm:$0xff]  ;;  %v9054_v6 = vld [vmem:[#allocation5 + $0x450] sm:$0xff] }
 0x792   :  { %3110 = vmatprep.subr.mxu0 %v11299_v47  ;;  %3181 = vmatprep.subr.mxu1 %v9042_v30  ;;  %11304 = vst [vmem:[#allocation73_spill] sm:$0xff] %v9050_v22  ;;  %11306 = vst [vmem:[#allocation74_spill] sm:$0xff] %v9054_v6  ;;  %v11307_v47 = vld [vmem:[#allocation147_spill] sm:$0xff]  ;;  %v9058_v30 = vld [vmem:[#allocation5 + $0x418] sm:$0xff] }
 0x793   :  { %3111 = vmatpush2.msra.mxu0 %v11301_v11  ;;  %3182 = vmatpush2.msra.mxu1 %v9046_v36  ;;  %11308 = vst [vmem:[#allocation75_spill] sm:$0xff] %v9058_v30  ;;  %v11309_v11 = vld [vmem:[#allocation148_spill] sm:$0xff] }
 0x794   :  { %3112 = vmatprep.subr.mxu0 %v11303_v58  ;;  %3183 = vmatprep.subr.mxu1 %v9050_v22  ;;  %v9062_v36 = vld [vmem:[#allocation5 + $0x410] sm:$0xff]  ;;  %v11311_v58 = vld [vmem:[#allocation149_spill] sm:$0xff] }
 0x795   :  { %3113 = vmatpush2.msra.mxu0 %v11305_v34  ;;  %3184 = vmatpush2.msra.mxu1 %v9054_v6  ;;  %11310 = vst [vmem:[#allocation76_spill] sm:$0xff] %v9062_v36  ;;  %v9066_v22 = vld [vmem:[#allocation5 + $0x3f8] sm:$0xff] }
 0x796   :  { %3114 = vmatprep.subr.mxu0 %v11307_v47  ;;  %3185 = vmatprep.subr.mxu1 %v9058_v30  ;;  %11312 = vst [vmem:[#allocation79_spill] sm:$0xff] %v9066_v22  ;;  %v11313_v47 = vld [vmem:[#allocation111_spill] sm:$0xff] }
 0x797   :  { %3115 = vmatpush2.msra.mxu0 %v11309_v11  ;;  %3186 = vmatpush2.msra.mxu1 %v9062_v36 }
 0x798   :  { %3194 = vmatprep.subr.mxu0 %v11311_v58  ;;  %3265 = vmatprep.subr.mxu1 %v9066_v22 }
 0x7d6   :  { %v2776_v34 = vpop.f32.mrf.mxu0  ;;  %v2847_v6 = vpop.f32.mrf.mxu1 }
 0x7d7   :  { %v2994_v49 = vadd.f32 %v2776_v34, %v11313_v47  ;;  %v2996_v21 = vadd.f32 %v2847_v6, %v11314_v15 }
 0x7d8   :  { %v2778_v39 = vpop.f32.mrf.mxu0  ;;  %v2849_v30 = vpop.f32.mrf.mxu1 }
 0x7d9   :  { %v2995_v11 = vadd.f32 %v2778_v39, %v11315_v43  ;;  %v3980_v1 = vmul.f32 -1.442695, %v2994_v49  ;;  %v2997_v56 = vadd.f32 %v2849_v30, %v11316_v18  ;;  %v3982_v36 = vmul.f32 -1.442695, %v2996_v21  ;;  %v11317_v18 = vld [vmem:[#allocation112_spill] sm:$0xff] }
 0x7da   :  { %v11318_v39 = vld [vmem:[#allocation16_spill] sm:$0xff] }
 0x7db   :  { %v3981_v20 = vmul.f32 -1.442695, %v2995_v11  ;;  %4227 = vpow2.f32 %v3980_v1  ;;  %v3983_v58 = vmul.f32 -1.442695, %v2997_v56  ;;  %v11319_v30 = vld [vmem:[#allocation116_spill] sm:$0xff] }
 0x7dc   :  { %4229 = vpow2.f32 %v3982_v36 }
 0x7dd   :  { %4231 = vpow2.f32 %v3981_v20 }
 0x7de   :  { %4233 = vpow2.f32 %v3983_v58 }
 0x7e8   :  { %v4228_v22 = vpop.eup %4227 }
 0x7e9   :  { %v4230_v25 = vpop.eup %4229  ;;  %v3020_v40 = vadd.f32 1.0, %v4228_v22  ;;  %v11320_v22 = vld [vmem:[#allocation17_spill] sm:$0xff] }
 0x7ea   :  { %v4232_v44 = vpop.eup %4231  ;;  %v3022_v47 = vadd.f32 1.0, %v4230_v25 }
 0x7eb   :  { %v4234_v34 = vpop.eup %4233  ;;  %v3021_v15 = vadd.f32 1.0, %v4232_v44  ;;  %4235 = vrcp.f32 %v3020_v40 }
 0x7ec   :  { %v3023_v6 = vadd.f32 1.0, %v4234_v34  ;;  %4237 = vrcp.f32 %v3022_v47 }
 0x7ed   :  { %4239 = vrcp.f32 %v3021_v15 }
 0x7f8   :  { %v4236_v44 = vpop.eup %4235 }
 0x7f9   :  { %v4238_v25 = vpop.eup %4237 }
 0x7fa   :  { %v4240_v34 = vpop.eup %4239  ;;  %v3040_v15 = vmul.f32 %v4238_v25, %v8454_v51  ;;  %v9099_v25 = vld [vmem:[#allocation5 + $0x3b8] sm:$0xff] }
 0x817   :  { %v2918_v43 = vpop.f32.mrf.mxu0  ;;  %v2989_v49 = vpop.f32.mrf.mxu1 }
 0x818   :  { %v2998_v21 = vadd.f32 %v2918_v43, %v11317_v18  ;;  %v3000_v1 = vadd.f32 %v2989_v49, %v11318_v39 }
 0x819   :  { %v2920_v56 = vpop.f32.mrf.mxu0  ;;  %v2991_v20 = vpop.f32.mrf.mxu1 }
 0x81a   :  { %v3984_v36 = vmul.f32 -1.442695, %v2998_v21  ;;  %4241 = vtanh.f32 %v3000_v1  ;;  %v2999_v11 = vadd.f32 %v2920_v56, %v11319_v30  ;;  %v3001_v58 = vadd.f32 %v2991_v20, %v11320_v22 }
 0x81b   :  { %4243 = vrcp.f32 %v3023_v6 }
 0x81c   :  { %4245 = vpow2.f32 %v3984_v36  ;;  %v3985_v40 = vmul.f32 -1.442695, %v2999_v11 }
 0x81d   :  { %4247 = vtanh.f32 %v3001_v58 }
 0x81e   :  { %4249 = vpow2.f32 %v3985_v40 }
 0x827   :  { %v4242_v47 = vpop.eup %4241 }
 0x828   :  { %v4244_v43 = vpop.eup %4243  ;;  %v3042_v49 = vmul.f32 %v4242_v47, %v4236_v44  ;;  %v9116_v47 = vld [vmem:[#allocation5 + $0x338] sm:$0xff] }
 0x829   :  { %v4246_v18 = vpop.eup %4245  ;;  %v3041_v6 = vmul.f32 %v4244_v43, %v8458_v45  ;;  %v9094_v45 = vld [vmem:[#allocation5 + $0x3f0] sm:$0xff] }
 0x82a   :  { %v4248_v21 = vpop.eup %4247  ;;  %v3024_v39 = vadd.f32 1.0, %v4246_v18  ;;  %v9078_v1 = vadd.f32 %v3042_v49, %v3040_v15  ;;  %v9264_v43 = vld [vmem:[#allocation5 + $0x6b0] sm:$0xff]  ;;  %v9268_v15 = vld [vmem:[#allocation5 + $0x678] sm:$0xff] }
 0x82b   :  { %v4250_v56 = vpop.eup %4249  ;;  %v3043_v20 = vmul.f32 %v4248_v21, %v4240_v34  ;;  %v9104_v34 = vld [vmem:[#allocation5 + $0x3b0] sm:$0xff]  ;;  %11324 = vst [vmem:[#allocation84_spill] sm:$0xff] %v9264_v43  ;;  %11326 = vst [vmem:[#allocation85_spill] sm:$0xff] %v9268_v15  ;;  %v9276_v18 = vld [vmem:[#allocation5 + $0x638] sm:$0xff] }
 0x82c   :  { %4251 = vrcp.f32 %v3024_v39  ;;  %v3025_v36 = vadd.f32 1.0, %v4250_v56  ;;  %v9272_v49 = vld [vmem:[#allocation5 + $0x670] sm:$0xff]  ;;  %11330 = vst [vmem:[#allocation89_spill] sm:$0xff] %v9276_v18  ;;  %v11333_v56 = vld [vmem:[#allocation157_spill] sm:$0xff] }
 0x82d   :  { %4253 = vtanh.f32 %v9078_v1  ;;  %v9082_v30 = vadd.f32 %v3043_v20, %v3041_v6  ;;  %11328 = vst [vmem:[#allocation88_spill] sm:$0xff] %v9272_v49  ;;  %v11331_v21 = vld [vmem:[#allocation156_spill] sm:$0xff]  ;;  %v9284_v6 = vld [vmem:[#allocation5 + $0x5f8] sm:$0xff]  ;;  %v11335_v20 = vld [vmem:[#allocation158_spill] sm:$0xff] }
 0x82e   :  { %4255 = vrcp.f32 %v3025_v36  ;;  %v9280_v39 = vld [vmem:[#allocation5 + $0x630] sm:$0xff]  ;;  %11334 = vst [vmem:[#allocation97_spill] sm:$0xff] %v9284_v6 }
 0x82f   :  { %4257 = vtanh.f32 %v9082_v30  ;;  %11332 = vst [vmem:[#allocation94_spill] sm:$0xff] %v9280_v39  ;;  %v9288_v36 = vld [vmem:[#allocation5 + $0x5f0] sm:$0xff] }
 0x830   :  { %11336 = vst [vmem:[#allocation101_spill] sm:$0xff] %v9288_v36 }
 0x839   :  { %v4252_v51 = vpop.eup %4251 }
 0x83a   :  { %v4254_v11 = vpop.eup %4253 }
 0x83b   :  { %v4256_v22 = vpop.eup %4255  ;;  %v9087_v44 = vmul.f32 %v4254_v11, %v4252_v51  ;;  %v11337_v51 = vld [vmem:[#allocation159_spill] sm:$0xff]  ;;  %v9292_v11 = vld [vmem:[#allocation5 + $0x5b8] sm:$0xff] }
 0x83c   :  { %v4258_v58 = vpop.eup %4257  ;;  %11338 = vst [vmem:[#allocation103_spill] sm:$0xff] %v9292_v11 }
 0x83d   :  { %v9085_v40 = vmul.f32 %v4258_v58, %v4256_v22  ;;  %11322 = vst [vmem:[#allocation83_spill] sm:$0xff] %v9087_v44  ;;  %v11339_v22 = vld [vmem:[#allocation160_spill] sm:$0xff] }
 0x83e   :  { %v9296_v58 = vld [vmem:[#allocation5 + $0x5b0] sm:$0xff] }
 0x83f   :  { %11321 = vst [vmem:[#allocation80_spill] sm:$0xff] %v9085_v40  ;;  %3116 = vmatprep.mubr.f32.mxu0 %v9085_v40  ;;  %3187 = vmatprep.mubr.f32.mxu1 %v9085_v40  ;;  %11340 = vst [vmem:[#allocation108_spill] sm:$0xff] %v9296_v58 }
 0x840   :  { %3117 = vmatmul.mubr.f32.vlgmr.msra.gmra.mxu0 %v9087_v44  ;;  %3188 = vmatmul.mubr.f32.vlgmr.msra.gmra.mxu1 %v9087_v44 }
 0x841   :  { %3195 = vmatpush1.msra.mxu0 %v8469_v48  ;;  %3266 = vmatpush1.msra.mxu1 %v9094_v45  ;;  %v9108_v48 = vld [vmem:[#allocation5 + $0x378] sm:$0xff] }
 0x842   :  { %3196 = vmatprep.subr.mxu0 %v8473_v7  ;;  %3258 = vmatprep.mubr.f32.mxu0 %v9085_v40  ;;  %v9112_v7 = vld [vmem:[#allocation5 + $0x370] sm:$0xff] }
 0x843   :  { %3267 = vmatprep.subr.mxu1 %v9099_v25  ;;  %3329 = vmatprep.mubr.f32.mxu1 %v9085_v40  ;;  %v9320_v40 = vld [vmem:[#allocation5 + $0x4f0] sm:$0xff] }
 0x844   :  { %3197 = vmatpush1.msra.mxu0 %v8479_v53  ;;  %3268 = vmatpush1.msra.mxu1 %v9104_v34  ;;  %v9120_v53 = vld [vmem:[#allocation5 + $0x330] sm:$0xff]  ;;  %11352 = vst [vmem:[#allocation128_spill] sm:$0xff] %v9320_v40 }
 0x845   :  { %3198 = vmatprep.subr.mxu0 %v8483_v14  ;;  %3269 = vmatprep.subr.mxu1 %v9108_v48  ;;  %v9124_v14 = vld [vmem:[#allocation5 + $0x2f8] sm:$0xff] }
 0x846   :  { %3199 = vmatpush1.msra.mxu0 %v8487_v16  ;;  %3270 = vmatpush1.msra.mxu1 %v9112_v7  ;;  %v9128_v16 = vld [vmem:[#allocation5 + $0x2f0] sm:$0xff] }
 0x847   :  { %3200 = vmatprep.subr.mxu0 %v8491_v52  ;;  %3271 = vmatprep.subr.mxu1 %v9116_v47  ;;  %v9132_v52 = vld [vmem:[#allocation5 + $0x2b8] sm:$0xff] }
 0x848   :  { %3201 = vmatpush1.msra.mxu0 %v8495_v12  ;;  %3272 = vmatpush1.msra.mxu1 %v9120_v53  ;;  %v9136_v12 = vld [vmem:[#allocation5 + $0x2b0] sm:$0xff] }
 0x849   :  { %3202 = vmatprep.subr.mxu0 %v8499_v33  ;;  %3273 = vmatprep.subr.mxu1 %v9124_v14  ;;  %v9140_v33 = vld [vmem:[#allocation5 + $0x278] sm:$0xff] }
 0x84a   :  { %3203 = vmatpush1.msra.mxu0 %v8503_v23  ;;  %3274 = vmatpush1.msra.mxu1 %v9128_v16  ;;  %v9144_v23 = vld [vmem:[#allocation5 + $0x270] sm:$0xff] }
 0x84b   :  { %3204 = vmatprep.subr.mxu0 %v8507_v38  ;;  %3275 = vmatprep.subr.mxu1 %v9132_v52  ;;  %v9148_v38 = vld [vmem:[#allocation5 + $0x238] sm:$0xff] }
 0x84c   :  { %3205 = vmatpush1.msra.mxu0 %v8511_v54  ;;  %3276 = vmatpush1.msra.mxu1 %v9136_v12  ;;  %v9152_v54 = vld [vmem:[#allocation5 + $0x230] sm:$0xff] }
 0x84d   :  { %3206 = vmatprep.subr.mxu0 %v8515_v60  ;;  %3277 = vmatprep.subr.mxu1 %v9140_v33  ;;  %v9156_v60 = vld [vmem:[#allocation5 + $0x1f8] sm:$0xff] }
 0x84e   :  { %3207 = vmatpush1.msra.mxu0 %v8519_v8  ;;  %3278 = vmatpush1.msra.mxu1 %v9144_v23  ;;  %v9160_v8 = vld [vmem:[#allocation5 + $0x1f0] sm:$0xff] }
 0x84f   :  { %3208 = vmatprep.subr.mxu0 %v8523_v9  ;;  %3279 = vmatprep.subr.mxu1 %v9148_v38  ;;  %v9164_v9 = vld [vmem:[#allocation5 + $0x1b8] sm:$0xff] }
 0x850   :  { %3209 = vmatpush1.msra.mxu0 %v8527_v31  ;;  %3280 = vmatpush1.msra.mxu1 %v9152_v54  ;;  %v9168_v31 = vld [vmem:[#allocation5 + $0x1b0] sm:$0xff] }
 0x851   :  { %3210 = vmatprep.subr.mxu0 %v8531_v4  ;;  %3281 = vmatprep.subr.mxu1 %v9156_v60  ;;  %v9172_v4 = vld [vmem:[#allocation5 + $0x178] sm:$0xff] }
 0x852   :  { %3211 = vmatpush1.msra.mxu0 %v8535_v29  ;;  %3282 = vmatpush1.msra.mxu1 %v9160_v8  ;;  %v9176_v29 = vld [vmem:[#allocation5 + $0x170] sm:$0xff] }
 0x853   :  { %3212 = vmatprep.subr.mxu0 %v8539_v55  ;;  %3283 = vmatprep.subr.mxu1 %v9164_v9  ;;  %v9180_v55 = vld [vmem:[#allocation5 + $0x138] sm:$0xff] }
 0x854   :  { %3213 = vmatpush1.msra.mxu0 %v8543_v28  ;;  %3284 = vmatpush1.msra.mxu1 %v9168_v31  ;;  %v9184_v28 = vld [vmem:[#allocation5 + $0x130] sm:$0xff] }
 0x855   :  { %3214 = vmatprep.subr.mxu0 %v8547_v37  ;;  %3285 = vmatprep.subr.mxu1 %v9172_v4  ;;  %v9188_v37 = vld [vmem:[#allocation5 + $0xf8] sm:$0xff] }
 0x856   :  { %3215 = vmatpush1.msra.mxu0 %v8551_v27  ;;  %3286 = vmatpush1.msra.mxu1 %v9176_v29  ;;  %v9192_v27 = vld [vmem:[#allocation5 + $0xf0] sm:$0xff] }
 0x857   :  { %3216 = vmatprep.subr.mxu0 %v8555_v50  ;;  %3287 = vmatprep.subr.mxu1 %v9180_v55  ;;  %v9196_v50 = vld [vmem:[#allocation5 + $0xb8] sm:$0xff] }
 0x858   :  { %3217 = vmatpush1.msra.mxu0 %v8559_v32  ;;  %3288 = vmatpush1.msra.mxu1 %v9184_v28  ;;  %v9200_v32 = vld [vmem:[#allocation5 + $0xb0] sm:$0xff] }
 0x859   :  { %3218 = vmatprep.subr.mxu0 %v8563_v46  ;;  %3289 = vmatprep.subr.mxu1 %v9188_v37  ;;  %v9204_v46 = vld [vmem:[#allocation5 + $0x78] sm:$0xff] }
 0x85a   :  { %3219 = vmatpush1.msra.mxu0 %v8567_v3  ;;  %3290 = vmatpush1.msra.mxu1 %v9192_v27  ;;  %v9208_v3 = vld [vmem:[#allocation5 + $0x70] sm:$0xff] }
 0x85b   :  { %3220 = vmatprep.subr.mxu0 %v8571_v63  ;;  %3291 = vmatprep.subr.mxu1 %v9196_v50  ;;  %v9212_v63 = vld [vmem:[#allocation5 + $0x38] sm:$0xff] }
 0x85c   :  { %3221 = vmatpush1.msra.mxu0 %v8575_v35  ;;  %3292 = vmatpush1.msra.mxu1 %v9200_v32  ;;  %v9216_v35 = vld [vmem:[#allocation5 + $0x30] sm:$0xff] }
 0x85d   :  { %3222 = vmatprep.subr.mxu0 %v8579_v0  ;;  %3293 = vmatprep.subr.mxu1 %v9204_v46  ;;  %v9220_v0 = vld [vmem:[#allocation5 + $0x7f8] sm:$0xff] }
 0x85e   :  { %3223 = vmatpush1.msra.mxu0 %v8583_v26  ;;  %3294 = vmatpush1.msra.mxu1 %v9208_v3  ;;  %v9224_v26 = vld [vmem:[#allocation5 + $0x7f0] sm:$0xff] }
 0x85f   :  { %3224 = vmatprep.subr.mxu0 %v8587_v41  ;;  %3295 = vmatprep.subr.mxu1 %v9212_v63  ;;  %v9228_v41 = vld [vmem:[#allocation5 + $0x7b8] sm:$0xff] }
 0x860   :  { %3225 = vmatpush1.msra.mxu0 %v8591_v10  ;;  %3296 = vmatpush1.msra.mxu1 %v9216_v35  ;;  %v9232_v10 = vld [vmem:[#allocation5 + $0x7b0] sm:$0xff] }
 0x861   :  { %3226 = vmatprep.subr.mxu0 %v8595_v19  ;;  %3297 = vmatprep.subr.mxu1 %v9220_v0  ;;  %v9236_v19 = vld [vmem:[#allocation5 + $0x778] sm:$0xff] }
 0x862   :  { %3227 = vmatpush2.msra.mxu0 %v8599_v57  ;;  %3298 = vmatpush2.msra.mxu1 %v9224_v26  ;;  %v9240_v57 = vld [vmem:[#allocation5 + $0x770] sm:$0xff] }
 0x863   :  { %3228 = vmatprep.subr.mxu0 %v8603_v5  ;;  %3299 = vmatprep.subr.mxu1 %v9228_v41  ;;  %v9244_v5 = vld [vmem:[#allocation5 + $0x738] sm:$0xff] }
 0x864   :  { %3229 = vmatpush2.msra.mxu0 %v8607_v24  ;;  %3300 = vmatpush2.msra.mxu1 %v9232_v10  ;;  %v9248_v24 = vld [vmem:[#allocation5 + $0x730] sm:$0xff] }
 0x865   :  { %3230 = vmatprep.subr.mxu0 %v8611_v2  ;;  %3301 = vmatprep.subr.mxu1 %v9236_v19  ;;  %v9252_v2 = vld [vmem:[#allocation5 + $0x6f8] sm:$0xff] }
 0x866   :  { %3231 = vmatpush2.msra.mxu0 %v8615_v17  ;;  %3302 = vmatpush2.msra.mxu1 %v9240_v57  ;;  %v9256_v17 = vld [vmem:[#allocation5 + $0x6f0] sm:$0xff] }
 0x867   :  { %3232 = vmatprep.subr.mxu0 %v8619_v13  ;;  %3303 = vmatprep.subr.mxu1 %v9244_v5  ;;  %v9260_v13 = vld [vmem:[#allocation5 + $0x6b8] sm:$0xff] }
 0x868   :  { %3233 = vmatpush2.msra.mxu0 %v8623_v61  ;;  %3304 = vmatpush2.msra.mxu1 %v9248_v24  ;;  %v11323_v61 = vld [vmem:[#allocation152_spill] sm:$0xff] }
 0x869   :  { %3234 = vmatprep.subr.mxu0 %v8627_v42  ;;  %3305 = vmatprep.subr.mxu1 %v9252_v2  ;;  %v11325_v42 = vld [vmem:[#allocation153_spill] sm:$0xff] }
 0x86a   :  { %3235 = vmatpush2.msra.mxu0 %v8631_v59  ;;  %3306 = vmatpush2.msra.mxu1 %v9256_v17  ;;  %v11327_v59 = vld [vmem:[#allocation154_spill] sm:$0xff] }
 0x86b   :  { %3236 = vmatprep.subr.mxu0 %v8635_v62  ;;  %3307 = vmatprep.subr.mxu1 %v9260_v13  ;;  %v11329_v62 = vld [vmem:[#allocation155_spill] sm:$0xff] }
 0x86c   :  { %3237 = vmatpush2.msra.mxu0 %v11323_v61  ;;  %3308 = vmatpush2.msra.mxu1 %v9264_v43  ;;  %v11341_v61 = vld [vmem:[#allocation161_spill] sm:$0xff] }
 0x86d   :  { %3238 = vmatprep.subr.mxu0 %v11325_v42  ;;  %3309 = vmatprep.subr.mxu1 %v9268_v15  ;;  %v9300_v42 = vld [vmem:[#allocation5 + $0x578] sm:$0xff] }
 0x86e   :  { %3239 = vmatpush2.msra.mxu0 %v11327_v59  ;;  %3310 = vmatpush2.msra.mxu1 %v9272_v49  ;;  %11342 = vst [vmem:[#allocation117_spill] sm:$0xff] %v9300_v42  ;;  %v11343_v59 = vld [vmem:[#allocation162_spill] sm:$0xff] }
 0x86f   :  { %3240 = vmatprep.subr.mxu0 %v11329_v62  ;;  %3311 = vmatprep.subr.mxu1 %v9276_v18  ;;  %v9304_v62 = vld [vmem:[#allocation5 + $0x570] sm:$0xff] }
 0x870   :  { %3241 = vmatpush2.msra.mxu0 %v11331_v21  ;;  %3312 = vmatpush2.msra.mxu1 %v9280_v39  ;;  %11344 = vst [vmem:[#allocation118_spill] sm:$0xff] %v9304_v62  ;;  %v11345_v21 = vld [vmem:[#allocation163_spill] sm:$0xff] }
 0x871   :  { %3242 = vmatprep.subr.mxu0 %v11333_v56  ;;  %3313 = vmatprep.subr.mxu1 %v9284_v6  ;;  %v9308_v56 = vld [vmem:[#allocation5 + $0x538] sm:$0xff]  ;;  %v11474_v6 = vld [vmem:[#allocation126_spill] sm:$0xff] }
 0x872   :  { %3243 = vmatpush2.msra.mxu0 %v11335_v20  ;;  %3314 = vmatpush2.msra.mxu1 %v9288_v36  ;;  %11346 = vst [vmem:[#allocation120_spill] sm:$0xff] %v9308_v56  ;;  %v11347_v20 = vld [vmem:[#allocation164_spill] sm:$0xff] }
 0x873   :  { %3244 = vmatprep.subr.mxu0 %v11337_v51  ;;  %3315 = vmatprep.subr.mxu1 %v9292_v11  ;;  %v9312_v51 = vld [vmem:[#allocation5 + $0x530] sm:$0xff] }
 0x874   :  { %3245 = vmatpush2.msra.mxu0 %v11339_v22  ;;  %3316 = vmatpush2.msra.mxu1 %v9296_v58  ;;  %11348 = vst [vmem:[#allocation122_spill] sm:$0xff] %v9312_v51  ;;  %v11349_v22 = vld [vmem:[#allocation165_spill] sm:$0xff] }
 0x875   :  { %3246 = vmatprep.subr.mxu0 %v11341_v61  ;;  %3317 = vmatprep.subr.mxu1 %v9300_v42  ;;  %v9316_v61 = vld [vmem:[#allocation5 + $0x4f8] sm:$0xff] }
 0x876   :  { %3247 = vmatpush2.msra.mxu0 %v11343_v59  ;;  %3318 = vmatpush2.msra.mxu1 %v9304_v62  ;;  %11350 = vst [vmem:[#allocation125_spill] sm:$0xff] %v9316_v61  ;;  %v11351_v59 = vld [vmem:[#allocation166_spill] sm:$0xff]  ;;  %v5145_v62 = vld [vmem:[#allocation5 + $0x390] sm:$0xff]  ;;  %v5146_v42 = vld [vmem:[#allocation5 + $0x358] sm:$0xff] }
 0x877   :  { %3248 = vmatprep.subr.mxu0 %v11345_v21  ;;  %3319 = vmatprep.subr.mxu1 %v9308_v56  ;;  %v11353_v21 = vld [vmem:[#allocation167_spill] sm:$0xff]  ;;  %v9324_v56 = vld [vmem:[#allocation5 + $0x4b8] sm:$0xff] }
 0x878   :  { %3249 = vmatpush2.msra.mxu0 %v11347_v20  ;;  %3320 = vmatpush2.msra.mxu1 %v9312_v51  ;;  %11354 = vst [vmem:[#allocation129_spill] sm:$0xff] %v9324_v56  ;;  %v11355_v20 = vld [vmem:[#allocation168_spill] sm:$0xff] }
 0x879   :  { %3250 = vmatprep.subr.mxu0 %v11349_v22  ;;  %3321 = vmatprep.subr.mxu1 %v9316_v61  ;;  %v9328_v51 = vld [vmem:[#allocation5 + $0x4b0] sm:$0xff]  ;;  %v11357_v22 = vld [vmem:[#allocation169_spill] sm:$0xff] }
 0x87a   :  { %3251 = vmatpush2.msra.mxu0 %v11351_v59  ;;  %3322 = vmatpush2.msra.mxu1 %v9320_v40  ;;  %11356 = vst [vmem:[#allocation130_spill] sm:$0xff] %v9328_v51  ;;  %v9332_v61 = vld [vmem:[#allocation5 + $0x478] sm:$0xff]  ;;  %v11359_v59 = vld [vmem:[#allocation170_spill] sm:$0xff]  ;;  %v9336_v40 = vld [vmem:[#allocation5 + $0x470] sm:$0xff] }
 0x87b   :  { %3252 = vmatprep.subr.mxu0 %v11353_v21  ;;  %3323 = vmatprep.subr.mxu1 %v9324_v56  ;;  %11358 = vst [vmem:[#allocation147_spill] sm:$0xff] %v9332_v61  ;;  %11360 = vst [vmem:[#allocation148_spill] sm:$0xff] %v9336_v40  ;;  %v11361_v21 = vld [vmem:[#allocation171_spill] sm:$0xff]  ;;  %v9340_v56 = vld [vmem:[#allocation5 + $0x438] sm:$0xff] }
 0x87c   :  { %3253 = vmatpush2.msra.mxu0 %v11355_v20  ;;  %3324 = vmatpush2.msra.mxu1 %v9328_v51  ;;  %11362 = vst [vmem:[#allocation149_spill] sm:$0xff] %v9340_v56  ;;  %v11363_v20 = vld [vmem:[#allocation172_spill] sm:$0xff] }
 0x87d   :  { %3254 = vmatprep.subr.mxu0 %v11357_v22  ;;  %3325 = vmatprep.subr.mxu1 %v9332_v61  ;;  %v9344_v51 = vld [vmem:[#allocation5 + $0x430] sm:$0xff]  ;;  %v11365_v22 = vld [vmem:[#allocation173_spill] sm:$0xff]  ;;  %v11367_v61 = vld [vmem:[#allocation175_spill] sm:$0xff] }
 0x87e   :  { %3255 = vmatpush2.msra.mxu0 %v11359_v59  ;;  %3326 = vmatpush2.msra.mxu1 %v9336_v40  ;;  %11364 = vst [vmem:[#allocation111_spill] sm:$0xff] %v9344_v51  ;;  %v5142_v59 = vld [vmem:[#allocation5 + $0x3d8] sm:$0xff]  ;;  %v11366_v40 = vld [vmem:[#allocation174_spill] sm:$0xff] }
 0x87f   :  { %3256 = vmatprep.subr.mxu0 %v11361_v21  ;;  %3327 = vmatprep.subr.mxu1 %v9340_v56  ;;  %v5143_v21 = vld [vmem:[#allocation5 + $0x3d0] sm:$0xff]  ;;  %v5144_v56 = vld [vmem:[#allocation5 + $0x398] sm:$0xff] }
 0x880   :  { %3257 = vmatpush2.msra.mxu0 %v11363_v20  ;;  %3328 = vmatpush2.msra.mxu1 %v9344_v51  ;;  %v11368_v20 = vld [vmem:[#allocation176_spill] sm:$0xff]  ;;  %v11369_v51 = vld [vmem:[#allocation177_spill] sm:$0xff] }
 0x881   :  { %3259 = vmatmul.mubr.f32.vlgmr.msra.gmra.mxu0 %v9087_v44  ;;  %3330 = vmatmul.mubr.f32.vlgmr.msra.gmra.mxu1 %v9087_v44  ;;  %v11370_v44 = vld [vmem:[#allocation178_spill] sm:$0xff] }
 0x882   :  { %3394 = vmatprep.subr.mxu0 %v11365_v22  ;;  %3465 = vmatprep.subr.mxu1 %v5142_v59  ;;  %v5147_v22 = vld [vmem:[#allocation5 + $0x350] sm:$0xff]  ;;  %v11371_v59 = vld [vmem:[#allocation179_spill] sm:$0xff] }
 0x883   :  { %3395 = vmatpush1.msra.mxu0 %v11366_v40  ;;  %3466 = vmatpush1.msra.mxu1 %v5143_v21  ;;  %v5148_v40 = vld [vmem:[#allocation5 + $0x318] sm:$0xff]  ;;  %v11372_v21 = vld [vmem:[#allocation180_spill] sm:$0xff] }
 0x884   :  { %3396 = vmatprep.subr.mxu0 %v11367_v61  ;;  %3467 = vmatprep.subr.mxu1 %v5144_v56  ;;  %v5149_v61 = vld [vmem:[#allocation5 + $0x310] sm:$0xff]  ;;  %v11373_v56 = vld [vmem:[#allocation181_spill] sm:$0xff] }
 0x885   :  { %3397 = vmatpush1.msra.mxu0 %v11368_v20  ;;  %3468 = vmatpush1.msra.mxu1 %v5145_v62  ;;  %v5150_v20 = vld [vmem:[#allocation5 + $0x2d8] sm:$0xff]  ;;  %v11374_v62 = vld [vmem:[#allocation182_spill] sm:$0xff] }
 0x886   :  { %3398 = vmatprep.subr.mxu0 %v11369_v51  ;;  %3469 = vmatprep.subr.mxu1 %v5146_v42  ;;  %v11375_v51 = vld [vmem:[#allocation183_spill] sm:$0xff]  ;;  %v11376_v42 = vld [vmem:[#allocation184_spill] sm:$0xff] }
 0x887   :  { %3399 = vmatpush1.msra.mxu0 %v11370_v44  ;;  %3470 = vmatpush1.msra.mxu1 %v5147_v22  ;;  %v11377_v44 = vld [vmem:[#allocation185_spill] sm:$0xff]  ;;  %v11378_v22 = vld [vmem:[#allocation186_spill] sm:$0xff] }
 0x888   :  { %3400 = vmatprep.subr.mxu0 %v11371_v59  ;;  %3471 = vmatprep.subr.mxu1 %v5148_v40  ;;  %v11379_v59 = vld [vmem:[#allocation187_spill] sm:$0xff]  ;;  %v11380_v40 = vld [vmem:[#allocation188_spill] sm:$0xff] }
 0x889   :  { %3401 = vmatpush1.msra.mxu0 %v11372_v21  ;;  %3472 = vmatpush1.msra.mxu1 %v5149_v61  ;;  %v11381_v21 = vld [vmem:[#allocation189_spill] sm:$0xff]  ;;  %v11382_v61 = vld [vmem:[#allocation190_spill] sm:$0xff] }
 0x88a   :  { %3402 = vmatprep.subr.mxu0 %v11373_v56  ;;  %3473 = vmatprep.subr.mxu1 %v5150_v20  ;;  %v11383_v56 = vld [vmem:[#allocation191_spill] sm:$0xff]  ;;  %v11384_v20 = vld [vmem:[#allocation192_spill] sm:$0xff] }
 0x88b   :  { %3403 = vmatpush1.msra.mxu0 %v11374_v62  ;;  %3474 = vmatpush1.msra.mxu1 %v11375_v51  ;;  %v11385_v62 = vld [vmem:[#allocation193_spill] sm:$0xff]  ;;  %v11386_v51 = vld [vmem:[#allocation92_spill] sm:$0xff] }
 0x88c   :  { %3404 = vmatprep.subr.mxu0 %v11376_v42  ;;  %3475 = vmatprep.subr.mxu1 %v11377_v44  ;;  %v11387_v42 = vld [vmem:[#allocation93_spill] sm:$0xff]  ;;  %v11388_v44 = vld [vmem:[#allocation95_spill] sm:$0xff] }
 0x88d   :  { %3405 = vmatpush1.msra.mxu0 %v11378_v22  ;;  %3476 = vmatpush1.msra.mxu1 %v11379_v59  ;;  %v11389_v22 = vld [vmem:[#allocation96_spill] sm:$0xff] }
 0x88e   :  { %3406 = vmatprep.subr.mxu0 %v11380_v40  ;;  %3477 = vmatprep.subr.mxu1 %v11381_v21  ;;  %v11390_v59 = vld [vmem:[#allocation100_spill] sm:$0xff]  ;;  %v11391_v40 = vld [vmem:[#allocation102_spill] sm:$0xff] }
 0x88f   :  { %3407 = vmatpush1.msra.mxu0 %v11382_v61  ;;  %3478 = vmatpush1.msra.mxu1 %v11383_v56  ;;  %v11392_v21 = vld [vmem:[#allocation106_spill] sm:$0xff]  ;;  %v11393_v61 = vld [vmem:[#allocation107_spill] sm:$0xff]  ;;  %v11394_v56 = vld [vmem:[#allocation109_spill] sm:$0xff] }
 0x890   :  { %3408 = vmatprep.subr.mxu0 %v11384_v20  ;;  %3479 = vmatprep.subr.mxu1 %v11385_v62  ;;  %v11395_v20 = vld [vmem:[#allocation110_spill] sm:$0xff]  ;;  %v11396_v62 = vld [vmem:[#allocation113_spill] sm:$0xff] }
 0x891   :  { %3409 = vmatpush1.msra.mxu0 %v11386_v51  ;;  %3480 = vmatpush1.msra.mxu1 %v11387_v42  ;;  %v11397_v51 = vld [vmem:[#allocation114_spill] sm:$0xff]  ;;  %v11398_v42 = vld [vmem:[#allocation119_spill] sm:$0xff] }
 0x892   :  { %3410 = vmatprep.subr.mxu0 %v11388_v44  ;;  %3481 = vmatprep.subr.mxu1 %v11389_v22  ;;  %v11399_v44 = vld [vmem:[#allocation121_spill] sm:$0xff] }
 0x893   :  { %3411 = vmatpush1.msra.mxu0 %v11390_v59  ;;  %3482 = vmatpush1.msra.mxu1 %v11391_v40  ;;  %v11400_v22 = vld [vmem:[#allocation77_spill] sm:$0xff]  ;;  %v11401_v59 = vld [vmem:[#allocation135_spill] sm:$0xff] }
 0x894   :  { %3412 = vmatprep.subr.mxu0 %v11392_v21  ;;  %3483 = vmatprep.subr.mxu1 %v11393_v61  ;;  %v11402_v40 = vld [vmem:[#allocation81_spill] sm:$0xff]  ;;  %v11403_v21 = vld [vmem:[#allocation136_spill] sm:$0xff]  ;;  %v11404_v61 = vld [vmem:[#allocation78_spill] sm:$0xff] }
 0x895   :  { %3413 = vmatpush1.msra.mxu0 %v11394_v56  ;;  %3484 = vmatpush1.msra.mxu1 %v11395_v20  ;;  %v11405_v56 = vld [vmem:[#allocation10_spill] sm:$0xff] }
 0x896   :  { %3414 = vmatprep.subr.mxu0 %v11396_v62  ;;  %3485 = vmatprep.subr.mxu1 %v11397_v51  ;;  %v11406_v20 = vld [vmem:[#allocation82_spill] sm:$0xff]  ;;  %v11407_v62 = vld [vmem:[#allocation11_spill] sm:$0xff]  ;;  %v11408_v51 = vld [vmem:[#allocation68_spill] sm:$0xff] }
 0x897   :  { %3415 = vmatpush1.msra.mxu0 %v11398_v42  ;;  %3486 = vmatpush1.msra.mxu1 %v11399_v44  ;;  %v11409_v42 = vld [vmem:[#allocation72_spill] sm:$0xff] }
 0x898   :  { %3416 = vmatprep.subr.mxu0 %v11400_v22  ;;  %3487 = vmatprep.subr.mxu1 %v11401_v59  ;;  %v11410_v44 = vld [vmem:[#allocation60_spill] sm:$0xff]  ;;  %v11412_v59 = vld [vmem:[#allocation22_spill] sm:$0xff] }
 0x899   :  { %3417 = vmatpush1.msra.mxu0 %v11402_v40  ;;  %3488 = vmatpush1.msra.mxu1 %v11403_v21  ;;  %v11411_v22 = vld [vmem:[#allocation56_spill] sm:$0xff]  ;;  %v11413_v40 = vld [vmem:[#allocation23_spill] sm:$0xff] }
 0x89a   :  { %3418 = vmatprep.subr.mxu0 %v11404_v61  ;;  %3489 = vmatprep.subr.mxu1 %v11405_v56  ;;  %v11414_v21 = vld [vmem:[#allocation24_spill] sm:$0xff]  ;;  %v11415_v61 = vld [vmem:[#allocation25_spill] sm:$0xff]  ;;  %v11416_v56 = vld [vmem:[#allocation26_spill] sm:$0xff] }
 0x89b   :  { %3419 = vmatpush1.msra.mxu0 %v11406_v20  ;;  %3490 = vmatpush1.msra.mxu1 %v11407_v62  ;;  %v11417_v20 = vld [vmem:[#allocation27_spill] sm:$0xff]  ;;  %v11418_v62 = vld [vmem:[#allocation28_spill] sm:$0xff] }
 0x89c   :  { %3420 = vmatprep.subr.mxu0 %v11408_v51  ;;  %3491 = vmatprep.subr.mxu1 %v11409_v42  ;;  %v11419_v51 = vld [vmem:[#allocation29_spill] sm:$0xff]  ;;  %v11420_v42 = vld [vmem:[#allocation30_spill] sm:$0xff] }
 0x89d   :  { %3421 = vmatpush1.msra.mxu0 %v11410_v44  ;;  %3492 = vmatpush1.msra.mxu1 %v11411_v22  ;;  %v11421_v44 = vld [vmem:[#allocation31_spill] sm:$0xff]  ;;  %v11422_v22 = vld [vmem:[#allocation32_spill] sm:$0xff] }
 0x89e   :  { %3422 = vmatprep.subr.mxu0 %v11412_v59  ;;  %3493 = vmatprep.subr.mxu1 %v11413_v40  ;;  %v11423_v59 = vld [vmem:[#allocation33_spill] sm:$0xff]  ;;  %v11424_v40 = vld [vmem:[#allocation34_spill] sm:$0xff] }
 0x89f   :  { %3423 = vmatpush1.msra.mxu0 %v11414_v21  ;;  %3494 = vmatpush1.msra.mxu1 %v11415_v61  ;;  %v11425_v21 = vld [vmem:[#allocation35_spill] sm:$0xff]  ;;  %v11426_v61 = vld [vmem:[#allocation36_spill] sm:$0xff] }
 0x8a0   :  { %3424 = vmatprep.subr.mxu0 %v11416_v56  ;;  %3495 = vmatprep.subr.mxu1 %v11417_v20  ;;  %v11427_v56 = vld [vmem:[#allocation37_spill] sm:$0xff]  ;;  %v11428_v20 = vld [vmem:[#allocation38_spill] sm:$0xff] }
 0x8a1   :  { %3425 = vmatpush1.msra.mxu0 %v11418_v62  ;;  %3496 = vmatpush1.msra.mxu1 %v11419_v51  ;;  %v11429_v62 = vld [vmem:[#allocation39_spill] sm:$0xff]  ;;  %v11430_v51 = vld [vmem:[#allocation40_spill] sm:$0xff] }
 0x8a2   :  { %3426 = vmatprep.subr.mxu0 %v11420_v42  ;;  %3497 = vmatprep.subr.mxu1 %v11421_v44  ;;  %v11431_v42 = vld [vmem:[#allocation41_spill] sm:$0xff]  ;;  %v11432_v44 = vld [vmem:[#allocation42_spill] sm:$0xff] }
 0x8a3   :  { %3427 = vmatpush2.msra.mxu0 %v11422_v22  ;;  %3498 = vmatpush2.msra.mxu1 %v11423_v59  ;;  %v11433_v22 = vld [vmem:[#allocation43_spill] sm:$0xff]  ;;  %v11434_v59 = vld [vmem:[#allocation44_spill] sm:$0xff] }
 0x8a4   :  { %3428 = vmatprep.subr.mxu0 %v11424_v40  ;;  %3499 = vmatprep.subr.mxu1 %v11425_v21  ;;  %v11435_v40 = vld [vmem:[#allocation45_spill] sm:$0xff]  ;;  %v11436_v21 = vld [vmem:[#allocation46_spill] sm:$0xff] }
 0x8a5   :  { %3429 = vmatpush2.msra.mxu0 %v11426_v61  ;;  %3500 = vmatpush2.msra.mxu1 %v11427_v56  ;;  %v11437_v61 = vld [vmem:[#allocation47_spill] sm:$0xff]  ;;  %v11438_v56 = vld [vmem:[#allocation48_spill] sm:$0xff] }
 0x8a6   :  { %3430 = vmatprep.subr.mxu0 %v11428_v20  ;;  %3501 = vmatprep.subr.mxu1 %v11429_v62  ;;  %v11439_v20 = vld [vmem:[#allocation49_spill] sm:$0xff]  ;;  %v11440_v62 = vld [vmem:[#allocation50_spill] sm:$0xff] }
 0x8a7   :  { %3431 = vmatpush2.msra.mxu0 %v11430_v51  ;;  %3502 = vmatpush2.msra.mxu1 %v11431_v42  ;;  %v11441_v51 = vld [vmem:[#allocation51_spill] sm:$0xff]  ;;  %v11442_v42 = vld [vmem:[#allocation98_spill] sm:$0xff] }
 0x8a8   :  { %3432 = vmatprep.subr.mxu0 %v11432_v44  ;;  %3503 = vmatprep.subr.mxu1 %v11433_v22  ;;  %v11443_v44 = vld [vmem:[#allocation139_spill] sm:$0xff]  ;;  %v11444_v22 = vld [vmem:[#allocation104_spill] sm:$0xff] }
 0x8a9   :  { %3433 = vmatpush2.msra.mxu0 %v11434_v59  ;;  %3504 = vmatpush2.msra.mxu1 %v11435_v40  ;;  %v11445_v59 = vld [vmem:[#allocation140_spill] sm:$0xff]  ;;  %v11446_v40 = vld [vmem:[#allocation99_spill] sm:$0xff] }
 0x8aa   :  { %3434 = vmatprep.subr.mxu0 %v11436_v21  ;;  %3505 = vmatprep.subr.mxu1 %v11437_v61  ;;  %v11447_v21 = vld [vmem:[#allocation14_spill] sm:$0xff]  ;;  %v11448_v61 = vld [vmem:[#allocation105_spill] sm:$0xff] }
 0x8ab   :  { %3435 = vmatpush2.msra.mxu0 %v11438_v56  ;;  %3506 = vmatpush2.msra.mxu1 %v11439_v20  ;;  %v11449_v56 = vld [vmem:[#allocation15_spill] sm:$0xff]  ;;  %v11450_v20 = vld [vmem:[#allocation54_spill] sm:$0xff] }
 0x8ac   :  { %3436 = vmatprep.subr.mxu0 %v11440_v62  ;;  %3507 = vmatprep.subr.mxu1 %v11441_v51  ;;  %v11451_v62 = vld [vmem:[#allocation55_spill] sm:$0xff]  ;;  %v11452_v51 = vld [vmem:[#allocation57_spill] sm:$0xff] }
 0x8ad   :  { %3437 = vmatpush2.msra.mxu0 %v11442_v42  ;;  %3508 = vmatpush2.msra.mxu1 %v11443_v44  ;;  %v11453_v42 = vld [vmem:[#allocation59_spill] sm:$0xff]  ;;  %v11454_v44 = vld [vmem:[#allocation61_spill] sm:$0xff] }
 0x8ae   :  { %3438 = vmatprep.subr.mxu0 %v11444_v22  ;;  %3509 = vmatprep.subr.mxu1 %v11445_v59  ;;  %v11455_v22 = vld [vmem:[#allocation63_spill] sm:$0xff]  ;;  %v11456_v59 = vld [vmem:[#allocation64_spill] sm:$0xff] }
 0x8af   :  { %3439 = vmatpush2.msra.mxu0 %v11446_v40  ;;  %3510 = vmatpush2.msra.mxu1 %v11447_v21  ;;  %v11457_v40 = vld [vmem:[#allocation65_spill] sm:$0xff]  ;;  %v5151_v21 = vld [vmem:[#allocation5 + $0x580] sm:$0xff] }
 0x8b0   :  { %3440 = vmatprep.subr.mxu0 %v11448_v61  ;;  %3511 = vmatprep.subr.mxu1 %v11449_v56  ;;  %v11458_v61 = vld [vmem:[#allocation86_spill] sm:$0xff]  ;;  %v5152_v56 = vld [vmem:[#allocation5 + $0x548] sm:$0xff] }
 0x8b1   :  { %3441 = vmatpush2.msra.mxu0 %v11450_v20  ;;  %3512 = vmatpush2.msra.mxu1 %v11451_v62  ;;  %v11459_v20 = vld [vmem:[#allocation137_spill] sm:$0xff]  ;;  %v5153_v62 = vld [vmem:[#allocation5 + $0x540] sm:$0xff] }
 0x8b2   :  { %3442 = vmatprep.subr.mxu0 %v11452_v51  ;;  %3513 = vmatprep.subr.mxu1 %v11453_v42  ;;  %v11460_v51 = vld [vmem:[#allocation90_spill] sm:$0xff]  ;;  %v5154_v42 = vld [vmem:[#allocation5 + $0x508] sm:$0xff] }
 0x8b3   :  { %3443 = vmatpush2.msra.mxu0 %v11454_v44  ;;  %3514 = vmatpush2.msra.mxu1 %v11455_v22  ;;  %v11461_v44 = vld [vmem:[#allocation138_spill] sm:$0xff] }
 0x8b4   :  { %3444 = vmatprep.subr.mxu0 %v11456_v59  ;;  %3515 = vmatprep.subr.mxu1 %v11457_v40  ;;  %v5155_v22 = vld [vmem:[#allocation5 + $0x500] sm:$0xff]  ;;  %v11462_v59 = vld [vmem:[#allocation87_spill] sm:$0xff] }
 0x8b5   :  { %3445 = vmatpush2.msra.mxu0 %v5151_v21  ;;  %3516 = vmatpush2.msra.mxu1 %v11458_v61  ;;  %v5156_v40 = vld [vmem:[#allocation5 + $0x4c8] sm:$0xff]  ;;  %v11463_v21 = vld [vmem:[#allocation12_spill] sm:$0xff]  ;;  %v5157_v61 = vld [vmem:[#allocation5 + $0x4c0] sm:$0xff] }
 0x8b6   :  { %3446 = vmatprep.subr.mxu0 %v5152_v56  ;;  %3517 = vmatprep.subr.mxu1 %v11459_v20  ;;  %v11464_v56 = vld [vmem:[#allocation91_spill] sm:$0xff] }
 0x8b7   :  { %3447 = vmatpush2.msra.mxu0 %v5153_v62  ;;  %3518 = vmatpush2.msra.mxu1 %v11460_v51  ;;  %v5158_v20 = vld [vmem:[#allocation5 + $0x488] sm:$0xff]  ;;  %v11465_v62 = vld [vmem:[#allocation13_spill] sm:$0xff]  ;;  %v5159_v51 = vld [vmem:[#allocation5 + $0x480] sm:$0xff] }
 0x8b8   :  { %3448 = vmatprep.subr.mxu0 %v5154_v42  ;;  %3519 = vmatprep.subr.mxu1 %v11461_v44  ;;  %v11466_v42 = vld [vmem:[#allocation70_spill] sm:$0xff]  ;;  %v5160_v44 = vld [vmem:[#allocation5 + $0x448] sm:$0xff] }
 0x8b9   :  { %3449 = vmatpush2.msra.mxu0 %v5155_v22  ;;  %3520 = vmatpush2.msra.mxu1 %v11462_v59  ;;  %v11467_v22 = vld [vmem:[#allocation73_spill] sm:$0xff]  ;;  %v5161_v59 = vld [vmem:[#allocation5 + $0x440] sm:$0xff] }
 0x8ba   :  { %3450 = vmatprep.subr.mxu0 %v5156_v40  ;;  %3521 = vmatprep.subr.mxu1 %v11463_v21  ;;  %v11468_v40 = vld [vmem:[#allocation74_spill] sm:$0xff]  ;;  %v5162_v21 = vld [vmem:[#allocation5 + $0x408] sm:$0xff] }
 0x8bb   :  { %3451 = vmatpush2.msra.mxu0 %v5157_v61  ;;  %3522 = vmatpush2.msra.mxu1 %v11464_v56  ;;  %v11469_v61 = vld [vmem:[#allocation75_spill] sm:$0xff]  ;;  %v5163_v56 = vld [vmem:[#allocation5 + $0x400] sm:$0xff] }
 0x8bc   :  { %3452 = vmatprep.subr.mxu0 %v5158_v20  ;;  %3523 = vmatprep.subr.mxu1 %v11465_v62  ;;  %v11470_v20 = vld [vmem:[#allocation76_spill] sm:$0xff]  ;;  %v5164_v62 = vld [vmem:[#allocation5 + $0x3e8] sm:$0xff] }
 0x8bd   :  { %3453 = vmatpush2.msra.mxu0 %v5159_v51  ;;  %3524 = vmatpush2.msra.mxu1 %v11466_v42  ;;  %v11471_v51 = vld [vmem:[#allocation79_spill] sm:$0xff] }
 0x8be   :  { %3454 = vmatprep.subr.mxu0 %v5160_v44  ;;  %3525 = vmatprep.subr.mxu1 %v11467_v22  ;;  %v11472_v22 = vld [vmem:[#allocation123_spill] sm:$0xff] }
 0x8bf   :  { %3455 = vmatpush2.msra.mxu0 %v5161_v59  ;;  %3526 = vmatpush2.msra.mxu1 %v11468_v40  ;;  %v11473_v59 = vld [vmem:[#allocation143_spill] sm:$0xff] }
 0x8c0   :  { %3456 = vmatprep.subr.mxu0 %v5162_v21  ;;  %3527 = vmatprep.subr.mxu1 %v11469_v61  ;;  %v11475_v61 = vld [vmem:[#allocation144_spill] sm:$0xff] }
 0x8c1   :  { %3457 = vmatpush2.msra.mxu0 %v5163_v56  ;;  %3528 = vmatpush2.msra.mxu1 %v11470_v20 }
 0x8c2   :  { %3536 = vmatprep.subr.mxu0 %v5164_v62  ;;  %3607 = vmatprep.subr.mxu1 %v11471_v51 }
 0x900   :  { %v3118_v42 = vpop.f32.mrf.mxu0  ;;  %v3189_v44 = vpop.f32.mrf.mxu1 }
 0x901   :  { %v3336_v11 = vadd.f32 %v3118_v42, %v11472_v22  ;;  %v3338_v36 = vadd.f32 %v3189_v44, %v11473_v59 }
 0x902   :  { %v3120_v58 = vpop.f32.mrf.mxu0  ;;  %v3191_v40 = vpop.f32.mrf.mxu1 }
 0x903   :  { %v3337_v21 = vadd.f32 %v3120_v58, %v11474_v6  ;;  %v3986_v39 = vmul.f32 -1.442695, %v3336_v11  ;;  %v3339_v18 = vadd.f32 %v3191_v40, %v11475_v61  ;;  %v3988_v56 = vmul.f32 -1.442695, %v3338_v36  ;;  %v11476_v58 = vld [vmem:[#allocation124_spill] sm:$0xff]  ;;  %v11477_v40 = vld [vmem:[#allocation18_spill] sm:$0xff] }
 0x904   :  { %v11478_v61 = vld [vmem:[#allocation127_spill] sm:$0xff] }
 0x905   :  { %v3987_v49 = vmul.f32 -1.442695, %v3337_v21  ;;  %4259 = vpow2.f32 %v3986_v39  ;;  %v3989_v20 = vmul.f32 -1.442695, %v3339_v18 }
 0x906   :  { %4261 = vpow2.f32 %v3988_v56 }
 0x907   :  { %4263 = vpow2.f32 %v3987_v49 }
 0x908   :  { %4265 = vpow2.f32 %v3989_v20  ;;  %v11479_v20 = vld [vmem:[#allocation19_spill] sm:$0xff] }
 0x912   :  { %v4260_v62 = vpop.eup %4259 }
 0x913   :  { %v4262_v51 = vpop.eup %4261  ;;  %v3362_v43 = vadd.f32 1.0, %v4260_v62 }
 0x914   :  { %v4264_v15 = vpop.eup %4263  ;;  %v3364_v22 = vadd.f32 1.0, %v4262_v51 }
 0x915   :  { %v4266_v42 = vpop.eup %4265  ;;  %v3363_v44 = vadd.f32 1.0, %v4264_v15  ;;  %4267 = vrcp.f32 %v3362_v43 }
 0x916   :  { %v3365_v59 = vadd.f32 1.0, %v4266_v42  ;;  %4269 = vrcp.f32 %v3364_v22 }
 0x917   :  { %4271 = vrcp.f32 %v3363_v44 }
 0x922   :  { %v4268_v15 = vpop.eup %4267 }
 0x923   :  { %v4270_v51 = vpop.eup %4269 }
 0x924   :  { %v4272_v42 = vpop.eup %4271  ;;  %v3382_v44 = vmul.f32 %v4270_v51, %v9078_v1  ;;  %v5166_v51 = vld [vmem:[#allocation5 + $0x3a8] sm:$0xff] }
 0x941   :  { %v3260_v6 = vpop.f32.mrf.mxu0  ;;  %v3331_v11 = vpop.f32.mrf.mxu1 }
 0x942   :  { %v3340_v36 = vadd.f32 %v3260_v6, %v11476_v58  ;;  %v3342_v39 = vadd.f32 %v3331_v11, %v11477_v40 }
 0x943   :  { %v3262_v18 = vpop.f32.mrf.mxu0  ;;  %v3333_v49 = vpop.f32.mrf.mxu1 }
 0x944   :  { %v3990_v21 = vmul.f32 -1.442695, %v3340_v36  ;;  %4273 = vtanh.f32 %v3342_v39  ;;  %v3341_v56 = vadd.f32 %v3262_v18, %v11478_v61  ;;  %v3343_v62 = vadd.f32 %v3333_v49, %v11479_v20 }
 0x945   :  { %4275 = vrcp.f32 %v3365_v59 }
 0x946   :  { %4277 = vpow2.f32 %v3990_v21  ;;  %v3991_v43 = vmul.f32 -1.442695, %v3341_v56 }
 0x947   :  { %4279 = vtanh.f32 %v3343_v62 }
 0x948   :  { %4281 = vpow2.f32 %v3991_v43 }
 0x951   :  { %v4274_v22 = vpop.eup %4273 }
 0x952   :  { %v4276_v6 = vpop.eup %4275  ;;  %v3384_v11 = vmul.f32 %v4274_v22, %v4268_v15  ;;  %v5168_v22 = vld [vmem:[#allocation5 + $0x368] sm:$0xff] }
 0x953   :  { %v4278_v58 = vpop.eup %4277  ;;  %v3383_v59 = vmul.f32 %v4276_v6, %v9082_v30  ;;  %v5165_v30 = vld [vmem:[#allocation5 + $0x3e0] sm:$0xff] }
 0x954   :  { %v4280_v36 = vpop.eup %4279  ;;  %v3366_v40 = vadd.f32 1.0, %v4278_v58  ;;  %v9465_v39 = vadd.f32 %v3384_v11, %v3382_v44  ;;  %v5169_v6 = vld [vmem:[#allocation5 + $0x360] sm:$0xff]  ;;  %v11480_v11 = vld [vmem:[#allocation84_spill] sm:$0xff]  ;;  %v11481_v58 = vld [vmem:[#allocation85_spill] sm:$0xff] }
 0x955   :  { %v4282_v18 = vpop.eup %4281  ;;  %v3385_v49 = vmul.f32 %v4280_v36, %v4272_v42  ;;  %v5167_v42 = vld [vmem:[#allocation5 + $0x3a0] sm:$0xff]  ;;  %v11482_v36 = vld [vmem:[#allocation88_spill] sm:$0xff] }
 0x956   :  { %4283 = vrcp.f32 %v3366_v40  ;;  %v3367_v21 = vadd.f32 1.0, %v4282_v18  ;;  %v5171_v44 = vld [vmem:[#allocation5 + $0x320] sm:$0xff]  ;;  %v11483_v40 = vld [vmem:[#allocation89_spill] sm:$0xff] }
 0x957   :  { %4285 = vtanh.f32 %v9465_v39  ;;  %v9469_v61 = vadd.f32 %v3385_v49, %v3383_v59  ;;  %v11484_v18 = vld [vmem:[#allocation94_spill] sm:$0xff]  ;;  %v11485_v59 = vld [vmem:[#allocation97_spill] sm:$0xff] }
 0x958   :  { %4287 = vrcp.f32 %v3367_v21  ;;  %v5213_v49 = vld [vmem:[#allocation5 + $0x5e0] sm:$0xff]  ;;  %v11486_v21 = vld [vmem:[#allocation101_spill] sm:$0xff] }
 0x959   :  { %4289 = vtanh.f32 %v9469_v61 }
 0x963   :  { %v4284_v1 = vpop.eup %4283 }
 0x964   :  { %v4286_v56 = vpop.eup %4285 }
 0x965   :  { %v4288_v20 = vpop.eup %4287  ;;  %v9474_v15 = vmul.f32 %v4286_v56, %v4284_v1  ;;  %v5214_v1 = vld [vmem:[#allocation5 + $0x5a8] sm:$0xff] }
 0x966   :  { %v4290_v62 = vpop.eup %4289  ;;  %v11487_v56 = vld [vmem:[#allocation103_spill] sm:$0xff] }
 0x967   :  { %v9472_v43 = vmul.f32 %v4290_v62, %v4288_v20  ;;  %v5215_v20 = vld [vmem:[#allocation5 + $0x5a0] sm:$0xff]  ;;  %v11488_v62 = vld [vmem:[#allocation108_spill] sm:$0xff] }
 0x969   :  { %3458 = vmatprep.mubr.f32.mxu0 %v9472_v43  ;;  %3529 = vmatprep.mubr.f32.mxu1 %v9472_v43 }
 0x96a   :  { %3459 = vmatmul.mubr.f32.vlgmr.msra.gmra.mxu0 %v9474_v15  ;;  %3530 = vmatmul.mubr.f32.vlgmr.msra.gmra.mxu1 %v9474_v15 }
 0x96b   :  { %3537 = vmatpush1.msra.mxu0 %v5165_v30  ;;  %3608 = vmatpush1.msra.mxu1 %v9094_v45  ;;  %v5170_v45 = vld [vmem:[#allocation5 + $0x328] sm:$0xff] }
 0x96c   :  { %3538 = vmatprep.subr.mxu0 %v5166_v51  ;;  %3600 = vmatprep.mubr.f32.mxu0 %v9472_v43  ;;  %v5216_v30 = vld [vmem:[#allocation5 + $0x568] sm:$0xff]  ;;  %v11489_v51 = vld [vmem:[#allocation117_spill] sm:$0xff] }
 0x96d   :  { %3609 = vmatprep.subr.mxu1 %v9099_v25  ;;  %3671 = vmatprep.mubr.f32.mxu1 %v9472_v43  ;;  %v5172_v25 = vld [vmem:[#allocation5 + $0x2e8] sm:$0xff] }
 0x96e   :  { %3539 = vmatpush1.msra.mxu0 %v5167_v42  ;;  %3610 = vmatpush1.msra.mxu1 %v9104_v34  ;;  %v5173_v34 = vld [vmem:[#allocation5 + $0x2e0] sm:$0xff] }
 0x96f   :  { %3540 = vmatprep.subr.mxu0 %v5168_v22  ;;  %3611 = vmatprep.subr.mxu1 %v9108_v48  ;;  %v5174_v48 = vld [vmem:[#allocation5 + $0x2a8] sm:$0xff]  ;;  %v5217_v42 = vld [vmem:[#allocation5 + $0x560] sm:$0xff] }
 0x970   :  { %3541 = vmatpush1.msra.mxu0 %v5169_v6  ;;  %3612 = vmatpush1.msra.mxu1 %v9112_v7  ;;  %v5175_v7 = vld [vmem:[#allocation5 + $0x2a0] sm:$0xff]  ;;  %v5218_v6 = vld [vmem:[#allocation5 + $0x528] sm:$0xff] }
 0x971   :  { %3542 = vmatprep.subr.mxu0 %v5170_v45  ;;  %3613 = vmatprep.subr.mxu1 %v9116_v47  ;;  %v5176_v47 = vld [vmem:[#allocation5 + $0x268] sm:$0xff]  ;;  %v11490_v22 = vld [vmem:[#allocation118_spill] sm:$0xff]  ;;  %v11491_v45 = vld [vmem:[#allocation120_spill] sm:$0xff] }
 0x972   :  { %3543 = vmatpush1.msra.mxu0 %v5171_v44  ;;  %3614 = vmatpush1.msra.mxu1 %v9120_v53  ;;  %v5177_v53 = vld [vmem:[#allocation5 + $0x260] sm:$0xff] }
 0x973   :  { %3544 = vmatprep.subr.mxu0 %v5172_v25  ;;  %3615 = vmatprep.subr.mxu1 %v9124_v14  ;;  %v5178_v14 = vld [vmem:[#allocation5 + $0x228] sm:$0xff]  ;;  %v5219_v44 = vld [vmem:[#allocation5 + $0x520] sm:$0xff] }
 0x974   :  { %3545 = vmatpush1.msra.mxu0 %v5173_v34  ;;  %3616 = vmatpush1.msra.mxu1 %v9128_v16  ;;  %v5179_v16 = vld [vmem:[#allocation5 + $0x220] sm:$0xff]  ;;  %v5220_v34 = vld [vmem:[#allocation5 + $0x4e8] sm:$0xff] }
 0x975   :  { %3546 = vmatprep.subr.mxu0 %v5174_v48  ;;  %3617 = vmatprep.subr.mxu1 %v9132_v52  ;;  %v5180_v52 = vld [vmem:[#allocation5 + $0x1e8] sm:$0xff]  ;;  %v11492_v25 = vld [vmem:[#allocation122_spill] sm:$0xff]  ;;  %v11493_v48 = vld [vmem:[#allocation125_spill] sm:$0xff] }
 0x976   :  { %3547 = vmatpush1.msra.mxu0 %v5175_v7  ;;  %3618 = vmatpush1.msra.mxu1 %v9136_v12  ;;  %v5181_v12 = vld [vmem:[#allocation5 + $0x1e0] sm:$0xff] }
 0x977   :  { %3548 = vmatprep.subr.mxu0 %v5176_v47  ;;  %3619 = vmatprep.subr.mxu1 %v9140_v33  ;;  %v5182_v33 = vld [vmem:[#allocation5 + $0x1a8] sm:$0xff]  ;;  %v5221_v7 = vld [vmem:[#allocation5 + $0x4e0] sm:$0xff]  ;;  %v11494_v47 = vld [vmem:[#allocation128_spill] sm:$0xff] }
 0x978   :  { %3549 = vmatpush1.msra.mxu0 %v5177_v53  ;;  %3620 = vmatpush1.msra.mxu1 %v9144_v23  ;;  %v5183_v23 = vld [vmem:[#allocation5 + $0x1a0] sm:$0xff]  ;;  %v5222_v53 = vld [vmem:[#allocation5 + $0x4a8] sm:$0xff] }
 0x979   :  { %3550 = vmatprep.subr.mxu0 %v5178_v14  ;;  %3621 = vmatprep.subr.mxu1 %v9148_v38  ;;  %v5184_v38 = vld [vmem:[#allocation5 + $0x168] sm:$0xff]  ;;  %v11495_v14 = vld [vmem:[#allocation129_spill] sm:$0xff] }
 0x97a   :  { %3551 = vmatpush1.msra.mxu0 %v5179_v16  ;;  %3622 = vmatpush1.msra.mxu1 %v9152_v54  ;;  %v5185_v54 = vld [vmem:[#allocation5 + $0x160] sm:$0xff] }
 0x97b   :  { %3552 = vmatprep.subr.mxu0 %v5180_v52  ;;  %3623 = vmatprep.subr.mxu1 %v9156_v60  ;;  %v5186_v60 = vld [vmem:[#allocation5 + $0x128] sm:$0xff]  ;;  %v5223_v16 = vld [vmem:[#allocation5 + $0x4a0] sm:$0xff] }
 0x97c   :  { %3553 = vmatpush1.msra.mxu0 %v5181_v12  ;;  %3624 = vmatpush1.msra.mxu1 %v9160_v8  ;;  %v5187_v8 = vld [vmem:[#allocation5 + $0x120] sm:$0xff]  ;;  %v5224_v12 = vld [vmem:[#allocation5 + $0x468] sm:$0xff] }
 0x97d   :  { %3554 = vmatprep.subr.mxu0 %v5182_v33  ;;  %3625 = vmatprep.subr.mxu1 %v9164_v9  ;;  %v5188_v9 = vld [vmem:[#allocation5 + $0xe8] sm:$0xff]  ;;  %v11496_v52 = vld [vmem:[#allocation130_spill] sm:$0xff] }
 0x97e   :  { %3555 = vmatpush1.msra.mxu0 %v5183_v23  ;;  %3626 = vmatpush1.msra.mxu1 %v9168_v31  ;;  %v5189_v31 = vld [vmem:[#allocation5 + $0xe0] sm:$0xff]  ;;  %v11497_v33 = vld [vmem:[#allocation147_spill] sm:$0xff] }
 0x97f   :  { %3556 = vmatprep.subr.mxu0 %v5184_v38  ;;  %3627 = vmatprep.subr.mxu1 %v9172_v4  ;;  %v5190_v4 = vld [vmem:[#allocation5 + $0xa8] sm:$0xff]  ;;  %v5225_v23 = vld [vmem:[#allocation5 + $0x460] sm:$0xff]  ;;  %v11498_v38 = vld [vmem:[#allocation148_spill] sm:$0xff] }
 0x980   :  { %3557 = vmatpush1.msra.mxu0 %v5185_v54  ;;  %3628 = vmatpush1.msra.mxu1 %v9176_v29  ;;  %v5191_v29 = vld [vmem:[#allocation5 + $0xa0] sm:$0xff]  ;;  %v5226_v54 = vld [vmem:[#allocation5 + $0x428] sm:$0xff] }
 0x981   :  { %3558 = vmatprep.subr.mxu0 %v5186_v60  ;;  %3629 = vmatprep.subr.mxu1 %v9180_v55  ;;  %v5192_v55 = vld [vmem:[#allocation5 + $0x68] sm:$0xff]  ;;  %v11499_v60 = vld [vmem:[#allocation149_spill] sm:$0xff] }
 0x982   :  { %3559 = vmatpush1.msra.mxu0 %v5187_v8  ;;  %3630 = vmatpush1.msra.mxu1 %v9184_v28  ;;  %v5193_v28 = vld [vmem:[#allocation5 + $0x60] sm:$0xff]  ;;  %v3783_v8 = vld [vmem:[#allocation7 + $0xf8] sm:$0xff] }
 0x983   :  { %3560 = vmatprep.subr.mxu0 %v5188_v9  ;;  %3631 = vmatprep.subr.mxu1 %v9188_v37  ;;  %v5194_v37 = vld [vmem:[#allocation5 + $0x28] sm:$0xff]  ;;  %v5227_v9 = vld [vmem:[#allocation5 + $0x420] sm:$0xff] }
 0x984   :  { %3561 = vmatpush1.msra.mxu0 %v5189_v31  ;;  %3632 = vmatpush1.msra.mxu1 %v9192_v27  ;;  %v5195_v27 = vld [vmem:[#allocation5 + $0x20] sm:$0xff]  ;;  %v11500_v31 = vld [vmem:[#allocation111_spill] sm:$0xff] }
 0x985   :  { %3562 = vmatprep.subr.mxu0 %v5190_v4  ;;  %3633 = vmatprep.subr.mxu1 %v9196_v50  ;;  %v5196_v50 = vld [vmem:[#allocation5 + $0x7e8] sm:$0xff]  ;;  %v3767_v4 = vld [vmem:[#allocation7 + $0x78] sm:$0xff] }
 0x986   :  { %3563 = vmatpush1.msra.mxu0 %v5191_v29  ;;  %3634 = vmatpush1.msra.mxu1 %v9200_v32  ;;  %v5197_v32 = vld [vmem:[#allocation5 + $0x7e0] sm:$0xff]  ;;  %v3782_v29 = vld [vmem:[#allocation7 + $0xf0] sm:$0xff] }
 0x987   :  { %3564 = vmatprep.subr.mxu0 %v5192_v55  ;;  %3635 = vmatprep.subr.mxu1 %v9204_v46  ;;  %v5198_v46 = vld [vmem:[#allocation5 + $0x7a8] sm:$0xff]  ;;  %v11501_v55 = vld [vmem:[#allocation58_spill] sm:$0xff] }
 0x988   :  { %3565 = vmatpush1.msra.mxu0 %v5193_v28  ;;  %3636 = vmatpush1.msra.mxu1 %v9208_v3  ;;  %v5199_v3 = vld [vmem:[#allocation5 + $0x7a0] sm:$0xff]  ;;  %v3766_v28 = vld [vmem:[#allocation7 + $0x70] sm:$0xff] }
 0x989   :  { %3566 = vmatprep.subr.mxu0 %v5194_v37  ;;  %3637 = vmatprep.subr.mxu1 %v9212_v63  ;;  %v5200_v63 = vld [vmem:[#allocation5 + $0x768] sm:$0xff] }
 0x98a   :  { %3567 = vmatpush1.msra.mxu0 %v5195_v27  ;;  %3638 = vmatpush1.msra.mxu1 %v9216_v35  ;;  %v5201_v35 = vld [vmem:[#allocation5 + $0x760] sm:$0xff]  ;;  %v3781_v37 = vld [vmem:[#allocation7 + $0xe8] sm:$0xff] }
 0x98b   :  { %3568 = vmatprep.subr.mxu0 %v5196_v50  ;;  %3639 = vmatprep.subr.mxu1 %v9220_v0  ;;  %v5202_v0 = vld [vmem:[#allocation5 + $0x728] sm:$0xff]  ;;  %v3780_v50 = vld [vmem:[#allocation7 + $0xe0] sm:$0xff] }
 0x98c   :  { %3569 = vmatpush2.msra.mxu0 %v5197_v32  ;;  %3640 = vmatpush2.msra.mxu1 %v9224_v26  ;;  %v5203_v26 = vld [vmem:[#allocation5 + $0x720] sm:$0xff]  ;;  %v3765_v27 = vld [vmem:[#allocation7 + $0x68] sm:$0xff] }
 0x98d   :  { %3570 = vmatprep.subr.mxu0 %v5198_v46  ;;  %3641 = vmatprep.subr.mxu1 %v9228_v41  ;;  %v5204_v41 = vld [vmem:[#allocation5 + $0x6e8] sm:$0xff]  ;;  %v3764_v32 = vld [vmem:[#allocation7 + $0x60] sm:$0xff]  ;;  %v3779_v46 = vld [vmem:[#allocation7 + $0xd8] sm:$0xff] }
 0x98e   :  { %3571 = vmatpush2.msra.mxu0 %v5199_v3  ;;  %3642 = vmatpush2.msra.mxu1 %v9232_v10  ;;  %v5205_v10 = vld [vmem:[#allocation5 + $0x6e0] sm:$0xff]  ;;  %v3763_v3 = vld [vmem:[#allocation7 + $0x58] sm:$0xff] }
 0x98f   :  { %3572 = vmatprep.subr.mxu0 %v5200_v63  ;;  %3643 = vmatprep.subr.mxu1 %v9236_v19  ;;  %v5206_v19 = vld [vmem:[#allocation5 + $0x6a8] sm:$0xff]  ;;  %v3778_v63 = vld [vmem:[#allocation7 + $0xd0] sm:$0xff] }
 0x990   :  { %3573 = vmatpush2.msra.mxu0 %v5201_v35  ;;  %3644 = vmatpush2.msra.mxu1 %v9240_v57  ;;  %v5207_v57 = vld [vmem:[#allocation5 + $0x6a0] sm:$0xff]  ;;  %v3762_v35 = vld [vmem:[#allocation7 + $0x50] sm:$0xff] }
 0x991   :  { %3574 = vmatprep.subr.mxu0 %v5202_v0  ;;  %3645 = vmatprep.subr.mxu1 %v9244_v5  ;;  %v5208_v5 = vld [vmem:[#allocation5 + $0x668] sm:$0xff] }
 0x992   :  { %3575 = vmatpush2.msra.mxu0 %v5203_v26  ;;  %3646 = vmatpush2.msra.mxu1 %v9248_v24  ;;  %v5209_v24 = vld [vmem:[#allocation5 + $0x660] sm:$0xff]  ;;  %v3777_v0 = vld [vmem:[#allocation7 + $0xc8] sm:$0xff] }
 0x993   :  { %3576 = vmatprep.subr.mxu0 %v5204_v41  ;;  %3647 = vmatprep.subr.mxu1 %v9252_v2  ;;  %v5210_v2 = vld [vmem:[#allocation5 + $0x628] sm:$0xff]  ;;  %v3776_v41 = vld [vmem:[#allocation7 + $0xc0] sm:$0xff] }
 0x994   :  { %3577 = vmatpush2.msra.mxu0 %v5205_v10  ;;  %3648 = vmatpush2.msra.mxu1 %v9256_v17  ;;  %v5211_v17 = vld [vmem:[#allocation5 + $0x620] sm:$0xff]  ;;  %v3761_v26 = vld [vmem:[#allocation7 + $0x48] sm:$0xff] }
 0x995   :  { %3578 = vmatprep.subr.mxu0 %v5206_v19  ;;  %3649 = vmatprep.subr.mxu1 %v9260_v13  ;;  %v5212_v13 = vld [vmem:[#allocation5 + $0x5e8] sm:$0xff]  ;;  %v3760_v10 = vld [vmem:[#allocation7 + $0x40] sm:$0xff]  ;;  %v3775_v19 = vld [vmem:[#allocation7 + $0xb8] sm:$0xff] }
 0x996   :  { %3579 = vmatpush2.msra.mxu0 %v5207_v57  ;;  %3650 = vmatpush2.msra.mxu1 %v11480_v11  ;;  %v3759_v57 = vld [vmem:[#allocation7 + $0x38] sm:$0xff]  ;;  %v3774_v11 = vld [vmem:[#allocation7 + $0xb0] sm:$0xff] }
 0x997   :  { %3580 = vmatprep.subr.mxu0 %v5208_v5  ;;  %3651 = vmatprep.subr.mxu1 %v11481_v58  ;;  %v3758_v5 = vld [vmem:[#allocation7 + $0x30] sm:$0xff]  ;;  %v3773_v58 = vld [vmem:[#allocation7 + $0xa8] sm:$0xff] }
 0x998   :  { %3581 = vmatpush2.msra.mxu0 %v5209_v24  ;;  %3652 = vmatpush2.msra.mxu1 %v11482_v36  ;;  %v3757_v24 = vld [vmem:[#allocation7 + $0x28] sm:$0xff]  ;;  %v3772_v36 = vld [vmem:[#allocation7 + $0xa0] sm:$0xff] }
 0x999   :  { %3582 = vmatprep.subr.mxu0 %v5210_v2  ;;  %3653 = vmatprep.subr.mxu1 %v11483_v40  ;;  %v3756_v2 = vld [vmem:[#allocation7 + $0x20] sm:$0xff]  ;;  %v3771_v40 = vld [vmem:[#allocation7 + $0x98] sm:$0xff] }
 0x99a   :  { %3583 = vmatpush2.msra.mxu0 %v5211_v17  ;;  %3654 = vmatpush2.msra.mxu1 %v11484_v18  ;;  %v3755_v17 = vld [vmem:[#allocation7 + $0x18] sm:$0xff]  ;;  %v3770_v18 = vld [vmem:[#allocation7 + $0x90] sm:$0xff] }
 0x99b   :  { %3584 = vmatprep.subr.mxu0 %v5212_v13  ;;  %3655 = vmatprep.subr.mxu1 %v11485_v59  ;;  %v3754_v13 = vld [vmem:[#allocation7 + $0x10] sm:$0xff]  ;;  %v3769_v59 = vld [vmem:[#allocation7 + $0x88] sm:$0xff] }
 0x99c   :  { %3585 = vmatpush2.msra.mxu0 %v5213_v49  ;;  %3656 = vmatpush2.msra.mxu1 %v11486_v21  ;;  %v3753_v49 = vld [vmem:[#allocation7 + $0x8] sm:$0xff]  ;;  %v3768_v21 = vld [vmem:[#allocation7 + $0x80] sm:$0xff] }
 0x99d   :  { %3586 = vmatprep.subr.mxu0 %v5214_v1  ;;  %3657 = vmatprep.subr.mxu1 %v11487_v56  ;;  %v3752_v1 = vld [vmem:[#allocation7] sm:$0xff] }
 0x99e   :  { %3587 = vmatpush2.msra.mxu0 %v5215_v20  ;;  %3658 = vmatpush2.msra.mxu1 %v11488_v62  ;;  %v11502_v56 = vld [vmem:[#allocation62_spill] sm:$0xff]  ;;  %v11503_v20 = vld [vmem:[#allocation67_spill] sm:$0xff] }
 0x99f   :  { %3588 = vmatprep.subr.mxu0 %v5216_v30  ;;  %3659 = vmatprep.subr.mxu1 %v11489_v51  ;;  %v11504_v62 = vld [vmem:[#allocation71_spill] sm:$0xff]  ;;  %v11505_v30 = vld [vmem:[#allocation66_spill] sm:$0xff]  ;;  %v11506_v51 = vld [vmem:[#allocation69_spill] sm:$0xff] }
 0x9a0   :  { %3589 = vmatpush2.msra.mxu0 %v5217_v42  ;;  %3660 = vmatpush2.msra.mxu1 %v11490_v22  ;;  %v11507_v42 = vld [vmem:[#allocation52_spill] sm:$0xff]  ;;  %v11508_v22 = vld [vmem:[#allocation53_spill] sm:$0xff] }
 0x9a1   :  { %3590 = vmatprep.subr.mxu0 %v5218_v6  ;;  %3661 = vmatprep.subr.mxu1 %v11491_v45  ;;  %v11509_v6 = vld [vmem:[#allocation150_spill] sm:$0xff]  ;;  %v11510_v45 = vld [vmem:[#allocation151_spill] sm:$0xff] }
 0x9a2   :  { %3591 = vmatpush2.msra.mxu0 %v5219_v44  ;;  %3662 = vmatpush2.msra.mxu1 %v11492_v25  ;;  %v11511_v44 = vld [vmem:[#allocation80_spill] sm:$0xff]  ;;  %v11512_v25 = vld [vmem:[#allocation83_spill] sm:$0xff] }
 0x9a3   :  { %3592 = vmatprep.subr.mxu0 %v5220_v34  ;;  %3663 = vmatprep.subr.mxu1 %v11493_v48 }
 0x9a4   :  { %3593 = vmatpush2.msra.mxu0 %v5221_v7  ;;  %3664 = vmatpush2.msra.mxu1 %v11494_v47  ;;  %v11513_v47 = vld [vmem:[#allocation131_spill] sm:$0xff] }
 0x9a5   :  { %3594 = vmatprep.subr.mxu0 %v5222_v53  ;;  %3665 = vmatprep.subr.mxu1 %v11495_v14  ;;  %v11514_v14 = vld [vmem:[#allocation145_spill] sm:$0xff] }
 0x9a6   :  { %3595 = vmatpush2.msra.mxu0 %v5223_v16  ;;  %3666 = vmatpush2.msra.mxu1 %v11496_v52 }
 0x9a7   :  { %3596 = vmatprep.subr.mxu0 %v5224_v12  ;;  %3667 = vmatprep.subr.mxu1 %v11497_v33  ;;  %v11515_v12 = vld [vmem:[#allocation133_spill] sm:$0xff] }
 0x9a8   :  { %3597 = vmatpush2.msra.mxu0 %v5225_v23  ;;  %3668 = vmatpush2.msra.mxu1 %v11498_v38  ;;  %v11516_v38 = vld [vmem:[#allocation146_spill] sm:$0xff] }
 0x9a9   :  { %3598 = vmatprep.subr.mxu0 %v5226_v54  ;;  %3669 = vmatprep.subr.mxu1 %v11499_v60 }
 0x9aa   :  { %3599 = vmatpush2.msra.mxu0 %v5227_v9  ;;  %3670 = vmatpush2.msra.mxu1 %v11500_v31 }
 0x9ab   :  { %3601 = vmatmul.mubr.f32.vlgmr.msra.gmra.mxu0 %v9474_v15  ;;  %3672 = vmatmul.mubr.f32.vlgmr.msra.gmra.mxu1 %v9474_v15 }
 0x9ac   :  { %3999 = vmatprep.subr.mxu0 %v3783_v8  ;;  %3855 = vmatprep.mubr.f32.mxu0 %v11501_v55 }
 0x9ad   :  { %4000 = vmatpush3.msra.mxu0 %v3767_v4 }
 0x9ae   :  { %4001 = vmatprep.subr.mxu0 %v3782_v29 }
 0x9af   :  { %4002 = vmatpush3.msra.mxu0 %v3766_v28 }
 0x9b0   :  { %4003 = vmatprep.subr.mxu0 %v3781_v37 }
 0x9b1   :  { %4004 = vmatpush3.msra.mxu0 %v3765_v27 }
 0x9b2   :  { %4005 = vmatprep.subr.mxu0 %v3780_v50 }
 0x9b3   :  { %4006 = vmatpush3.msra.mxu0 %v3764_v32  ;;  %v11517_v32 = vld [vmem:[#allocation132_spill] sm:$0xff] }
 0x9b4   :  { %4007 = vmatprep.subr.mxu0 %v3779_v46 }
 0x9b5   :  { %4008 = vmatpush3.msra.mxu0 %v3763_v3  ;;  %v11518_v3 = vld [vmem:[#allocation20_spill] sm:$0xff] }
 0x9b6   :  { %4009 = vmatprep.subr.mxu0 %v3778_v63 }
 0x9b7   :  { %4010 = vmatpush3.msra.mxu0 %v3762_v35 }
 0x9b8   :  { %4011 = vmatprep.subr.mxu0 %v3777_v0 }
 0x9b9   :  { %4012 = vmatpush3.msra.mxu0 %v3761_v26 }
 0x9ba   :  { %4013 = vmatprep.subr.mxu0 %v3776_v41  ;;  %v11519_v41 = vld [vmem:[#allocation134_spill] sm:$0xff] }
 0x9bb   :  { %4014 = vmatpush3.msra.mxu0 %v3760_v10 }
 0x9bc   :  { %4015 = vmatprep.subr.mxu0 %v3775_v19  ;;  %v11520_v19 = vld [vmem:[#allocation21_spill] sm:$0xff] }
 0x9bd   :  { %4016 = vmatpush3.msra.mxu0 %v3759_v57 }
 0x9be   :  { %4017 = vmatprep.subr.mxu0 %v3774_v11 }
 0x9bf   :  { %4018 = vmatpush3.msra.mxu0 %v3758_v5 }
 0x9c0   :  { %4019 = vmatprep.subr.mxu0 %v3773_v58 }
 0x9c1   :  { %4020 = vmatpush3.msra.mxu0 %v3757_v24 }
 0x9c2   :  { %4021 = vmatprep.subr.mxu0 %v3772_v36 }
 0x9c3   :  { %4022 = vmatpush3.msra.mxu0 %v3756_v2 }
 0x9c4   :  { %4023 = vmatprep.subr.mxu0 %v3771_v40 }
 0x9c5   :  { %4024 = vmatpush3.msra.mxu0 %v3755_v17 }
 0x9c6   :  { %4025 = vmatprep.subr.mxu0 %v3770_v18 }
 0x9c7   :  { %4026 = vmatpush3.msra.mxu0 %v3754_v13 }
 0x9c8   :  { %4027 = vmatprep.subr.mxu0 %v3769_v59 }
 0x9c9   :  { %4028 = vmatpush3.msra.mxu0 %v3753_v49 }
 0x9ca   :  { %4029 = vmatprep.subr.mxu0 %v3768_v21 }
 0x9cb   :  { %4030 = vmatpush3.msra.mxu0 %v3752_v1 }
 0x9cc   :  { %3856 = vmatmul.mubr.f32.vlgmr.msra.gmra.mxu0 %v11502_v56 }
 0x9cd   :  { %3860 = vmatprep.mubr.f32.mxu0 %v11503_v20 }
 0x9d0   :  { %3861 = vmatmul.mubr.f32.gmra.mxu0 %v11504_v62 }
 0x9d1   :  { %3865 = vmatprep.mubr.f32.mxu0 %v11505_v30 }
 0x9d4   :  { %3866 = vmatmul.mubr.f32.gmra.mxu0 %v11506_v51 }
 0x9d5   :  { %3870 = vmatprep.mubr.f32.mxu0 %v11507_v42 }
 0x9d8   :  { %3871 = vmatmul.mubr.f32.gmra.mxu0 %v11508_v22 }
 0x9d9   :  { %3875 = vmatprep.mubr.f32.mxu0 %v11509_v6 }
 0x9dc   :  { %3876 = vmatmul.mubr.f32.gmra.mxu0 %v11510_v45 }
 0x9dd   :  { %3880 = vmatprep.mubr.f32.mxu0 %v11511_v44 }
 0x9e0   :  { %3881 = vmatmul.mubr.f32.gmra.mxu0 %v11512_v25 }
 0x9e1   :  { %3885 = vmatprep.mubr.f32.mxu0 %v9472_v43 }
 0x9e4   :  { %3886 = vmatmul.mubr.f32.gmra.mxu0 %v9474_v15 }
 0xa2a   :  { %v3460_v34 = vpop.f32.mrf.mxu0  ;;  %v3531_v48 = vpop.f32.mrf.mxu1 }
 0xa2b   :  { %v3678_v53 = vadd.f32 %v3460_v34, %v11513_v47  ;;  %v3680_v16 = vadd.f32 %v3531_v48, %v11514_v14 }
 0xa2c   :  { %v3462_v7 = vpop.f32.mrf.mxu0  ;;  %v3533_v52 = vpop.f32.mrf.mxu1 }
 0xa2d   :  { %v3679_v33 = vadd.f32 %v3462_v7, %v11515_v12  ;;  %v3992_v23 = vmul.f32 -1.442695, %v3678_v53  ;;  %v3681_v54 = vadd.f32 %v3533_v52, %v11516_v38  ;;  %v3994_v60 = vmul.f32 -1.442695, %v3680_v16 }
 0xa2f   :  { %v3993_v8 = vmul.f32 -1.442695, %v3679_v33  ;;  %4291 = vpow2.f32 %v3992_v23  ;;  %v3995_v9 = vmul.f32 -1.442695, %v3681_v54 }
 0xa30   :  { %4293 = vpow2.f32 %v3994_v60 }
 0xa31   :  { %4295 = vpow2.f32 %v3993_v8 }
 0xa32   :  { %4297 = vpow2.f32 %v3995_v9 }
 0xa3c   :  { %v4292_v43 = vpop.eup %4291 }
 0xa3d   :  { %v4294_v15 = vpop.eup %4293  ;;  %v3704_v4 = vadd.f32 1.0, %v4292_v43 }
 0xa3e   :  { %v4296_v31 = vpop.eup %4295  ;;  %v3706_v55 = vadd.f32 1.0, %v4294_v15 }
 0xa3f   :  { %v4298_v29 = vpop.eup %4297  ;;  %v3705_v28 = vadd.f32 1.0, %v4296_v31  ;;  %4299 = vrcp.f32 %v3704_v4 }
 0xa40   :  { %v3707_v37 = vadd.f32 1.0, %v4298_v29  ;;  %4301 = vrcp.f32 %v3706_v55 }
 0xa41   :  { %4303 = vrcp.f32 %v3705_v28 }
 0xa4c   :  { %v4300_v5 = vpop.eup %4299 }
 0xa4d   :  { %v4302_v58 = vpop.eup %4301 }
 0xa4e   :  { %v4304_v24 = vpop.eup %4303  ;;  %v3724_v40 = vmul.f32 %v4302_v58, %v9465_v39  ;;  %v3998_v39 = vld [vmem:[%s9603_s5] ss:$0 sm:$0xff] }
 0xa6b   :  { %v3602_v27 = vpop.f32.mrf.mxu0  ;;  %v3673_v50 = vpop.f32.mrf.mxu1 }
 0xa6c   :  { %v3682_v46 = vadd.f32 %v3602_v27, %v11517_v32  ;;  %v3684_v63 = vadd.f32 %v3673_v50, %v11518_v3 }
 0xa6d   :  { %v3604_v35 = vpop.f32.mrf.mxu0  ;;  %v3675_v0 = vpop.f32.mrf.mxu1 }
 0xa6e   :  { %v3996_v26 = vmul.f32 -1.442695, %v3682_v46  ;;  %4305 = vtanh.f32 %v3684_v63  ;;  %v3683_v10 = vadd.f32 %v3604_v35, %v11519_v41  ;;  %v3685_v57 = vadd.f32 %v3675_v0, %v11520_v19 }
 0xa6f   :  { %4307 = vrcp.f32 %v3707_v37 }
 0xa70   :  { %4309 = vpow2.f32 %v3996_v26  ;;  %v3997_v11 = vmul.f32 -1.442695, %v3683_v10 }
 0xa71   :  { %4311 = vtanh.f32 %v3685_v57 }
 0xa72   :  { %4313 = vpow2.f32 %v3997_v11 }
 0xa7b   :  { %v4306_v36 = vpop.eup %4305 }
 0xa7c   :  { %v4308_v2 = vpop.eup %4307  ;;  %v3726_v17 = vmul.f32 %v4306_v36, %v4300_v5 }
 0xa7d   :  { %v4310_v18 = vpop.eup %4309  ;;  %v3725_v1 = vmul.f32 %v4308_v2, %v9469_v61 }
 0xa7e   :  { %v4312_v13 = vpop.eup %4311  ;;  %v3708_v59 = vadd.f32 1.0, %v4310_v18  ;;  %v3728_v49 = vadd.f32 %v3726_v17, %v3724_v40 }
 0xa7f   :  { %v4314_v21 = vpop.eup %4313  ;;  %v3727_v56 = vmul.f32 %v4312_v13, %v4304_v24 }
 0xa80   :  { %4315 = vrcp.f32 %v3708_v59  ;;  %v3709_v20 = vadd.f32 1.0, %v4314_v21 }
 0xa81   :  { %4317 = vtanh.f32 %v3728_v49  ;;  %v3729_v62 = vadd.f32 %v3727_v56, %v3725_v1 }
 0xa82   :  { %4319 = vrcp.f32 %v3709_v20 }
 0xa83   :  { %4321 = vtanh.f32 %v3729_v62 }
 0xa8c   :  { %v4031_v30 = vpop.f32.mrf.mxu0 }
 0xa8d   :  { %v4316_v51 = vpop.eup %4315 }
 0xa8e   :  { %v4318_v42 = vpop.eup %4317  ;;  %v4032_v22 = vpop.f32.mrf.mxu0 }
 0xa8f   :  { %v4320_v6 = vpop.eup %4319  ;;  %v4033_v45 = vadd.f32 %v4032_v22, %v4031_v30  ;;  %v3732_v44 = vmul.f32 %v4318_v42, %v4316_v51 }
 0xa90   :  { %v4322_v25 = vpop.eup %4321  ;;  %v4034_v61 = vpop.f32.mrf.mxu0 }
 0xa91   :  { %v3858_v34 = vadd.f32 %v4033_v45, %v3998_v39  ;;  %v3733_v48 = vmul.f32 %v4322_v25, %v4320_v6 }
 0xa92   :  { %v4035_v7 = vpop.f32.mrf.mxu0 }
 0xa93   :  { %3896 = vst [vmem:[%s9604_s6] sm:$0xff] %v3858_v34  ;;  %v4036_v47 = vadd.f32 %v4035_v7, %v4034_v61  ;;  %3890 = vmatprep.mubr.f32.mxu0 %v3733_v48 }
 0xa94   :  { %v4037_v53 = vpop.f32.mrf.mxu0  ;;  %3891 = vmatmul.mubr.f32.gmra.mxu0 %v3732_v44 }
 0xa95   :  { %v3863_v14 = vadd.f32 %v4036_v47, %v3998_v39 }
 0xa96   :  { %v4038_v16 = vpop.f32.mrf.mxu0 }
 0xa97   :  { %3897 = vst [vmem:[%s9604_s6 + $0x8] sm:$0xff] %v3863_v14  ;;  %v4039_v52 = vadd.f32 %v4038_v16, %v4037_v53 }
 0xa98   :  { %v4040_v12 = vpop.f32.mrf.mxu0 }
 0xa99   :  { %v3868_v33 = vadd.f32 %v4039_v52, %v3998_v39 }
 0xa9a   :  { %v4041_v23 = vpop.f32.mrf.mxu0 }
 0xa9b   :  { %3898 = vst [vmem:[%s9604_s6 + $0x10] sm:$0xff] %v3868_v33  ;;  %v4042_v38 = vadd.f32 %v4041_v23, %v4040_v12 }
 0xa9c   :  { %v4043_v54 = vpop.f32.mrf.mxu0 }
 0xa9d   :  { %v3873_v60 = vadd.f32 %v4042_v38, %v3998_v39 }
 0xa9e   :  { %v4044_v8 = vpop.f32.mrf.mxu0 }
 0xa9f   :  { %3899 = vst [vmem:[%s9604_s6 + $0x18] sm:$0xff] %v3873_v60  ;;  %v4045_v9 = vadd.f32 %v4044_v8, %v4043_v54 }
 0xaa0   :  { %v4046_v43 = vpop.f32.mrf.mxu0 }
 0xaa1   :  { %v3878_v15 = vadd.f32 %v4045_v9, %v3998_v39 }
 0xaa2   :  { %v4047_v31 = vpop.f32.mrf.mxu0 }
 0xaa3   :  { %3900 = vst [vmem:[%s9604_s6 + $0x20] sm:$0xff] %v3878_v15  ;;  %v4048_v4 = vadd.f32 %v4047_v31, %v4046_v43 }
 0xaa4   :  { %v4049_v29 = vpop.f32.mrf.mxu0 }
 0xaa5   :  { %v3883_v55 = vadd.f32 %v4048_v4, %v3998_v39 }
 0xaa6   :  { %v4050_v28 = vpop.f32.mrf.mxu0 }
 0xaa7   :  { %3901 = vst [vmem:[%s9604_s6 + $0x28] sm:$0xff] %v3883_v55  ;;  %v4051_v37 = vadd.f32 %v4050_v28, %v4049_v29 }
 0xaa9   :  { %v3888_v27 = vadd.f32 %v4051_v37, %v3998_v39 }
 0xaab   :  { %3902 = vst [vmem:[%s9604_s6 + $0x30] sm:$0xff] %v3888_v27 }
 0xb54   :  { %v4052_v50 = vpop.f32.mrf.mxu0 }
 0xb56   :  { %v4053_v32 = vpop.f32.mrf.mxu0 }
 0xb57   :  { %v4054_v46 = vadd.f32 %v4053_v32, %v4052_v50 }
 0xb59   :  { %v3893_v3 = vadd.f32 %v4054_v46, %v3998_v39 }
 0xb5b   :  { %3903 = vst [vmem:[%s9604_s6 + $0x38] sm:$0xff] %v3893_v3 }
 0xb5c   :  { %3908 = vsyncpa [#allocation4], 1 }
 0xb5d   :  { %3909 = vsyncpa [#allocation6], 1 }

</bundles_post_ra>
